<compile_context>
chip_gen: v7x
topology: tpu7x:2x2x1
jax: 0.10.0
libtpu: 0.0.40
codegen_flags: <defaults>
</compile_context>

<pallas_src>
import functools

import numpy as np
import jax
import jax.numpy as jnp
from jax import lax
from jax.experimental import pallas as pl
from jax.experimental.pallas import tpu as pltpu

N_MELS = 80
HIDDEN = 32
NUM_LAYERS = 2          # kernel below is written for exactly 2 layers (module default)
LINEAR = 64
MORPH = 7
BN_EPS = 1e-5
LEAKY_SLOPE = 0.01      # PyTorch LeakyReLU default


# ---------------------------------------------------------------------------
# Fused Pallas kernel: whole forward pass
# ---------------------------------------------------------------------------
def speech_to_lip_kernel(
    # inputs -------------------------------------------------------------
    x_ref,                                              # (T, B, N_MELS) time-major
    wif0, bif0, whf0, bhf0, wib0, bib0, whb0, bhb0,     # GRU layer 0 fwd / bwd
    wif1, bif1, whf1, bhf1, wib1, bib1, whb1, bhb1,     # GRU layer 1 fwd / bwd
    w1_ref, b1_ref, sc_ref, sh_ref, w2_ref, b2_ref,     # morph_blending MLP
    # output -------------------------------------------------------------
    y_ref,                                              # (T, B, MORPH)
    # scratch ------------------------------------------------------------
    l0f, l0b, l1f, l1b,                                 # (T, B, HIDDEN) each
    *, T, B, H, unroll,
):
    def run_bigru(in_refs, wif, bif, whf, bhf, wib, bib, whb, bhb, of_ref, ob_ref):
        # in_refs: tuple of (T, B, F_k) refs whose features concatenate to this
        # layer's input.  W_ih is split row-wise so per-step inputs never need
        # a lane concatenation inside the serial loop.
        sizes = [r.shape[2] for r in in_refs]
        offs = np.concatenate([[0], np.cumsum(sizes)]).tolist()

        def split_rows(w):
            return [w[offs[k]:offs[k + 1], :] for k in range(len(in_refs))]

        Wif_p, Wib_p = split_rows(wif[...]), split_rows(wib[...])
        Bif, Bib = bif[...], bib[...]
        Whf, Whb = whf[...], whb[...]
        Bhf, Bhb = bhf[...], bhb[...]

        def gx_at(t, w_parts, bias):
            acc = bias                                   # (1, 3H) -> broadcast over B
            for r, wp in zip(in_refs, w_parts):
                acc = acc + jnp.dot(r[t], wp, preferred_element_type=jnp.float32)
            return acc                                   # (B, 3H)

        def cell(gx, h, wh, bh):
            # PyTorch GRU gate order: r, z, n ;  n uses r * (W_hn h + b_hn)
            gh = jnp.dot(h, wh, preferred_element_type=jnp.float32) + bh
            rz = jax.nn.sigmoid(gx[:, :2 * H] + gh[:, :2 * H])
            r, z = rz[:, :H], rz[:, H:]
            n = jnp.tanh(gx[:, 2 * H:] + r * gh[:, 2 * H:])
            return (1.0 - z) * n + z * h

        def step(i, carry):
            hf, hb = carry
            j = T - 1 - i
            hf = cell(gx_at(i, Wif_p, Bif), hf, Whf, Bhf)   # forward direction
            hb = cell(gx_at(j, Wib_p, Bib), hb, Whb, Bhb)   # backward direction
            of_ref[i] = hf
            ob_ref[j] = hb
            return hf, hb

        h0 = jnp.zeros((B, H), jnp.float32)
        lax.fori_loop(0, T, step, (h0, h0), unroll=unroll)

    # ---- GRU layer 0 (input: mel features) -------------------------------
    run_bigru((x_ref,), wif0, bif0, whf0, bhf0, wib0, bib0, whb0, bhb0, l0f, l0b)

    # ---- GRU layer 1 (input: [fwd | bwd] of layer 0, kept in VMEM) --------
    # TODO(synk): inter-layer GRU dropout (p=0.1) only applies in training mode.
    run_bigru((l0f, l0b), wif1, bif1, whf1, bhf1, wib1, bib1, whb1, bhb1, l1f, l1b)

    # ---- morph_blending: Linear -> BatchNorm(eval, folded) -> LeakyReLU ->
    #      (Dropout = identity) -> Linear, fused on the GRU output in VMEM.
    W1 = w1_ref[...]
    W1f, W1b = W1[:H, :], W1[H:, :]
    B1, SC, SH = b1_ref[...], sc_ref[...], sh_ref[...]
    W2, B2 = w2_ref[...], b2_ref[...]

    def mlp_step(t, carry):
        m = (jnp.dot(l1f[t], W1f, preferred_element_type=jnp.float32)
             + jnp.dot(l1b[t], W1b, preferred_element_type=jnp.float32) + B1)
        m = m * SC + SH
        m = jnp.where(m > 0, m, LEAKY_SLOPE * m)
        y_ref[t] = (jnp.dot(m, W2, preferred_element_type=jnp.float32)
                    + B2).astype(y_ref.dtype)
        return carry

    lax.fori_loop(0, T, mlp_step, 0, unroll=unroll)


# ---------------------------------------------------------------------------
# Wrapper
# ---------------------------------------------------------------------------
def _full_spec(shape):
    nd = len(shape)
    return pl.BlockSpec(tuple(shape), lambda i, _nd=nd: (0,) * _nd)


def speech_to_lip_forward(x, params):
    """x: (B, T, n_mels) batch-first. Returns (B*T, MORPH) like the PyTorch forward."""
    assert len(params["gru"]) == NUM_LAYERS == 2
    B, T, _ = x.shape

    # One transpose to time-major so the recurrence indexes only the leading axis.
    # TODO(synk): could be removed with per-timestep manual DMA from batch-first HBM.
    x_tm = jnp.transpose(x, (1, 0, 2)).astype(jnp.float32)

    def prep_dir(p):
        return [p["w_ih"].T, p["b_ih"].reshape(1, -1),
                p["w_hh"].T, p["b_hh"].reshape(1, -1)]

    gru_args = []
    for layer in params["gru"]:
        gru_args += prep_dir(layer["fwd"]) + prep_dir(layer["bwd"])

    m = params["mlp"]
    scale = m["bn_gamma"] / jnp.sqrt(m["bn_var"] + BN_EPS)
    shift = m["bn_beta"] - m["bn_mean"] * scale
    mlp_args = [m["w1"].T, m["b1"].reshape(1, -1), scale.reshape(1, -1),
                shift.reshape(1, -1), m["w2"].T, m["b2"].reshape(1, -1)]

    inputs = [x_tm] + gru_args + mlp_args
    unroll = max(1, min(8, T))

    kernel = functools.partial(
        speech_to_lip_kernel, T=T, B=B, H=HIDDEN, unroll=unroll)

    y_tm = pl.pallas_call(
        kernel,
        out_shape=jax.ShapeDtypeStruct((T, B, MORPH), jnp.float32),
        grid=(1,),
        in_specs=[_full_spec(a.shape) for a in inputs],
        out_specs=_full_spec((T, B, MORPH)),
        scratch_shapes=[pltpu.VMEM((T, B, HIDDEN), jnp.float32) for _ in range(4)],
        compiler_params=pltpu.CompilerParams(
            dimension_semantics=("arbitrary",),
            vmem_limit_bytes=64 * 1024 * 1024,
        ),
    )(*inputs)

    # PyTorch returns the (B*T, morph_target_count) tensor (batch-major rows);
    # the reshape back to (B, T, MORPH) in the original forward is not assigned.
    return jnp.transpose(y_tm, (1, 0, 2)).reshape(B * T, MORPH)


# ---------------------------------------------------------------------------
# Deterministic parameter init (PyTorch parameter shapes)
# ---------------------------------------------------------------------------
def init_params(key):
    keys = iter(jax.random.split(key, 64))

    def rnd(shape, scale=0.1):
        return scale * jax.random.normal(next(keys), shape, jnp.float32)

    params = {"gru": []}
    in_size = N_MELS
    for _ in range(NUM_LAYERS):
        layer = {}
        for d in ("fwd", "bwd"):
            layer[d] = dict(
                w_ih=rnd((3 * HIDDEN, in_size)),
                w_hh=rnd((3 * HIDDEN, HIDDEN)),
                b_ih=rnd((3 * HIDDEN,)),
                b_hh=rnd((3 * HIDDEN,)),
            )
        params["gru"].append(layer)
        in_size = 2 * HIDDEN
    params["mlp"] = dict(
        w1=rnd((LINEAR, 2 * HIDDEN)),
        b1=rnd((LINEAR,)),
        bn_gamma=1.0 + rnd((LINEAR,)),
        bn_beta=rnd((LINEAR,)),
        bn_mean=rnd((LINEAR,)),
        bn_var=1.0 + jnp.abs(rnd((LINEAR,))),
        w2=rnd((MORPH, LINEAR)),
        b2=rnd((MORPH,)),
    )
    params["morph_mapping_w"] = rnd((25, MORPH))  # defined in module but unused in forward
    return params


# ---------------------------------------------------------------------------
# Pure-JAX reference (for correctness check)
# ---------------------------------------------------------------------------
def ref_forward(x, params):
    def gru_dir_ref(x_tm, p, reverse):
        T, B, _ = x_tm.shape
        gx = jnp.einsum("tbi,gi->tbg", x_tm, p["w_ih"]) + p["b_ih"]
        if reverse:
            gx = gx[::-1]

        def step(h, g):
            gh = h @ p["w_hh"].T + p["b_hh"]
            H = HIDDEN
            r = jax.nn.sigmoid(g[:, :H] + gh[:, :H])
            z = jax.nn.sigmoid(g[:, H:2 * H] + gh[:, H:2 * H])
            n = jnp.tanh(g[:, 2 * H:] + r * gh[:, 2 * H:])
            hn = (1.0 - z) * n + z * h
            return hn, hn

        h0 = jnp.zeros((B, HIDDEN), jnp.float32)
        _, hs = lax.scan(step, h0, gx)
        if reverse:
            hs = hs[::-1]
        return hs

    h = jnp.transpose(x, (1, 0, 2))
    for layer in params["gru"]:
        hf = gru_dir_ref(h, layer["fwd"], False)
        hb = gru_dir_ref(h, layer["bwd"], True)
        h = jnp.concatenate([hf, hb], axis=-1)
    g = jnp.transpose(h, (1, 0, 2)).reshape(-1, 2 * HIDDEN)
    m = params["mlp"]
    scale = m["bn_gamma"] / jnp.sqrt(m["bn_var"] + BN_EPS)
    shift = m["bn_beta"] - m["bn_mean"] * scale
    y = g @ m["w1"].T + m["b1"]
    y = y * scale + shift
    y = jnp.where(y > 0, y, LEAKY_SLOPE * y)
    return y @ m["w2"].T + m["b2"]


if __name__ == "__main__":
    key = jax.random.PRNGKey(0)
    k_param, k_x = jax.random.split(key)
    params = init_params(k_param)

    B, T = 2, 8
    x = jax.random.normal(k_x, (B, T, N_MELS), jnp.float32)

    fwd = jax.jit(speech_to_lip_forward)
    out = jax.block_until_ready(fwd(x, params))
    assert out.shape == (B * T, MORPH), out.shape

    ref = jax.block_until_ready(ref_forward(x, params))
    np.testing.assert_allclose(np.asarray(out), np.asarray(ref), rtol=2e-2, atol=2e-2)

    print("KERNEL_OK")
</pallas_src>

<mosaic_0001>
module attributes {stable_mosaic.version = 11 : i64} {
  func.func @speech_to_lip_kernel(%arg0: i32, %arg1: memref<8x2x80xf32, #tpu.memory_space<vmem>>, %arg2: memref<80x96xf32, #tpu.memory_space<vmem>>, %arg3: memref<1x96xf32, #tpu.memory_space<vmem>>, %arg4: memref<32x96xf32, #tpu.memory_space<vmem>>, %arg5: memref<1x96xf32, #tpu.memory_space<vmem>>, %arg6: memref<80x96xf32, #tpu.memory_space<vmem>>, %arg7: memref<1x96xf32, #tpu.memory_space<vmem>>, %arg8: memref<32x96xf32, #tpu.memory_space<vmem>>, %arg9: memref<1x96xf32, #tpu.memory_space<vmem>>, %arg10: memref<64x96xf32, #tpu.memory_space<vmem>>, %arg11: memref<1x96xf32, #tpu.memory_space<vmem>>, %arg12: memref<32x96xf32, #tpu.memory_space<vmem>>, %arg13: memref<1x96xf32, #tpu.memory_space<vmem>>, %arg14: memref<64x96xf32, #tpu.memory_space<vmem>>, %arg15: memref<1x96xf32, #tpu.memory_space<vmem>>, %arg16: memref<32x96xf32, #tpu.memory_space<vmem>>, %arg17: memref<1x96xf32, #tpu.memory_space<vmem>>, %arg18: memref<64x64xf32, #tpu.memory_space<vmem>>, %arg19: memref<1x64xf32, #tpu.memory_space<vmem>>, %arg20: memref<1x64xf32, #tpu.memory_space<vmem>>, %arg21: memref<1x64xf32, #tpu.memory_space<vmem>>, %arg22: memref<64x7xf32, #tpu.memory_space<vmem>>, %arg23: memref<1x7xf32, #tpu.memory_space<vmem>>, %arg24: memref<8x2x7xf32, #tpu.memory_space<vmem>>, %arg25: memref<8x2x32xf32, #tpu.memory_space<vmem>>, %arg26: memref<8x2x32xf32, #tpu.memory_space<vmem>>, %arg27: memref<8x2x32xf32, #tpu.memory_space<vmem>>, %arg28: memref<8x2x32xf32, #tpu.memory_space<vmem>>) attributes {dimension_semantics = [#tpu.dimension_semantics<arbitrary>], iteration_bounds = array<i64: 1>, scalar_prefetch = 0 : i64, scratch_operands = 4 : i64, tpu.core_type = #tpu.core_type<tc>, window_params = [{pipeline_mode = #tpu.pipeline_mode<synchronous>, transform_indices = @transform_0, window_bounds = array<i64: 8, 2, 80>}, {pipeline_mode = #tpu.pipeline_mode<synchronous>, transform_indices = @transform_1, window_bounds = array<i64: 80, 96>}, {pipeline_mode = #tpu.pipeline_mode<synchronous>, transform_indices = @transform_2, window_bounds = array<i64: 1, 96>}, {pipeline_mode = #tpu.pipeline_mode<synchronous>, transform_indices = @transform_3, window_bounds = array<i64: 32, 96>}, {pipeline_mode = #tpu.pipeline_mode<synchronous>, transform_indices = @transform_4, window_bounds = array<i64: 1, 96>}, {pipeline_mode = #tpu.pipeline_mode<synchronous>, transform_indices = @transform_5, window_bounds = array<i64: 80, 96>}, {pipeline_mode = #tpu.pipeline_mode<synchronous>, transform_indices = @transform_6, window_bounds = array<i64: 1, 96>}, {pipeline_mode = #tpu.pipeline_mode<synchronous>, transform_indices = @transform_7, window_bounds = array<i64: 32, 96>}, {pipeline_mode = #tpu.pipeline_mode<synchronous>, transform_indices = @transform_8, window_bounds = array<i64: 1, 96>}, {pipeline_mode = #tpu.pipeline_mode<synchronous>, transform_indices = @transform_9, window_bounds = array<i64: 64, 96>}, {pipeline_mode = #tpu.pipeline_mode<synchronous>, transform_indices = @transform_10, window_bounds = array<i64: 1, 96>}, {pipeline_mode = #tpu.pipeline_mode<synchronous>, transform_indices = @transform_11, window_bounds = array<i64: 32, 96>}, {pipeline_mode = #tpu.pipeline_mode<synchronous>, transform_indices = @transform_12, window_bounds = array<i64: 1, 96>}, {pipeline_mode = #tpu.pipeline_mode<synchronous>, transform_indices = @transform_13, window_bounds = array<i64: 64, 96>}, {pipeline_mode = #tpu.pipeline_mode<synchronous>, transform_indices = @transform_14, window_bounds = array<i64: 1, 96>}, {pipeline_mode = #tpu.pipeline_mode<synchronous>, transform_indices = @transform_15, window_bounds = array<i64: 32, 96>}, {pipeline_mode = #tpu.pipeline_mode<synchronous>, transform_indices = @transform_16, window_bounds = array<i64: 1, 96>}, {pipeline_mode = #tpu.pipeline_mode<synchronous>, transform_indices = @transform_17, window_bounds = array<i64: 64, 64>}, {pipeline_mode = #tpu.pipeline_mode<synchronous>, transform_indices = @transform_18, window_bounds = array<i64: 1, 64>}, {pipeline_mode = #tpu.pipeline_mode<synchronous>, transform_indices = @transform_19, window_bounds = array<i64: 1, 64>}, {pipeline_mode = #tpu.pipeline_mode<synchronous>, transform_indices = @transform_20, window_bounds = array<i64: 1, 64>}, {pipeline_mode = #tpu.pipeline_mode<synchronous>, transform_indices = @transform_21, window_bounds = array<i64: 64, 7>}, {pipeline_mode = #tpu.pipeline_mode<synchronous>, transform_indices = @transform_22, window_bounds = array<i64: 1, 7>}, {pipeline_mode = #tpu.pipeline_mode<synchronous>, transform_indices = @transform_23, window_bounds = array<i64: 8, 2, 7>}]} {
    %c0 = arith.constant 0 : index
    %c0_0 = arith.constant 0 : index
    %0 = vector.load %arg2[%c0, %c0_0] : memref<80x96xf32, #tpu.memory_space<vmem>>, vector<80x96xf32>
    %c0_1 = arith.constant 0 : index
    %c0_2 = arith.constant 0 : index
    %1 = vector.load %arg6[%c0_1, %c0_2] : memref<80x96xf32, #tpu.memory_space<vmem>>, vector<80x96xf32>
    %c0_3 = arith.constant 0 : index
    %c0_4 = arith.constant 0 : index
    %2 = vector.load %arg3[%c0_3, %c0_4] : memref<1x96xf32, #tpu.memory_space<vmem>>, vector<1x96xf32>
    %c0_5 = arith.constant 0 : index
    %c0_6 = arith.constant 0 : index
    %3 = vector.load %arg7[%c0_5, %c0_6] : memref<1x96xf32, #tpu.memory_space<vmem>>, vector<1x96xf32>
    %c0_7 = arith.constant 0 : index
    %c0_8 = arith.constant 0 : index
    %4 = vector.load %arg4[%c0_7, %c0_8] : memref<32x96xf32, #tpu.memory_space<vmem>>, vector<32x96xf32>
    %c0_9 = arith.constant 0 : index
    %c0_10 = arith.constant 0 : index
    %5 = vector.load %arg8[%c0_9, %c0_10] : memref<32x96xf32, #tpu.memory_space<vmem>>, vector<32x96xf32>
    %c0_11 = arith.constant 0 : index
    %c0_12 = arith.constant 0 : index
    %6 = vector.load %arg5[%c0_11, %c0_12] : memref<1x96xf32, #tpu.memory_space<vmem>>, vector<1x96xf32>
    %c0_13 = arith.constant 0 : index
    %c0_14 = arith.constant 0 : index
    %7 = vector.load %arg9[%c0_13, %c0_14] : memref<1x96xf32, #tpu.memory_space<vmem>>, vector<1x96xf32>
    %cst = arith.constant 0.000000e+00 : f32
    %8 = vector.broadcast %cst : f32 to vector<2x32xf32>
    %c0_i32 = arith.constant 0 : i32
    %c7_i32 = arith.constant 7 : i32
    %9 = arith.subi %c7_i32, %c0_i32 : i32
    %10 = arith.index_cast %c0_i32 : i32 to index
    %c0_15 = arith.constant 0 : index
    %c0_16 = arith.constant 0 : index
    %11 = vector.load %arg1[%10, %c0_15, %c0_16] : memref<8x2x80xf32, #tpu.memory_space<vmem>>, vector<1x2x80xf32>
    %12 = vector.shape_cast %11 : vector<1x2x80xf32> to vector<2x80xf32>
    %cst_17 = arith.constant dense<0.000000e+00> : vector<2x96xf32>
    %13 = tpu.matmul %12, %0, %cst_17 {dimension_numbers = #tpu.dot_dimension_numbers<[1], [0], [0], [1], [0, 0, 1, 1], [], []>} : vector<2x80xf32>, vector<80x96xf32>, vector<2x96xf32> -> vector<2x96xf32>
    %14 = vector.broadcast %2 : vector<1x96xf32> to vector<2x96xf32>
    %15 = arith.addf %14, %13 : vector<2x96xf32>
    %cst_18 = arith.constant dense<0.000000e+00> : vector<2x96xf32>
    %16 = tpu.matmul %8, %4, %cst_18 {dimension_numbers = #tpu.dot_dimension_numbers<[1], [0], [0], [1], [0, 0, 1, 1], [], []>} : vector<2x32xf32>, vector<32x96xf32>, vector<2x96xf32> -> vector<2x96xf32>
    %17 = vector.broadcast %6 : vector<1x96xf32> to vector<2x96xf32>
    %18 = arith.addf %16, %17 : vector<2x96xf32>
    %19 = vector.extract_strided_slice %15 {offsets = [0, 0], sizes = [2, 64], strides = [1, 1]} : vector<2x96xf32> to vector<2x64xf32>
    %20 = vector.extract_strided_slice %18 {offsets = [0, 0], sizes = [2, 64], strides = [1, 1]} : vector<2x96xf32> to vector<2x64xf32>
    %21 = arith.addf %19, %20 : vector<2x64xf32>
    %22 = arith.negf %21 : vector<2x64xf32>
    %23 = math.exp %22 : vector<2x64xf32>
    %cst_19 = arith.constant 1.000000e+00 : f32
    %24 = vector.broadcast %cst_19 : f32 to vector<2x64xf32>
    %25 = arith.addf %24, %23 : vector<2x64xf32>
    %26 = arith.divf %24, %25 : vector<2x64xf32>
    %27 = vector.extract_strided_slice %26 {offsets = [0, 0], sizes = [2, 32], strides = [1, 1]} : vector<2x64xf32> to vector<2x32xf32>
    %28 = vector.extract_strided_slice %26 {offsets = [0, 32], sizes = [2, 32], strides = [1, 1]} : vector<2x64xf32> to vector<2x32xf32>
    %29 = vector.extract_strided_slice %15 {offsets = [0, 64], sizes = [2, 32], strides = [1, 1]} : vector<2x96xf32> to vector<2x32xf32>
    %30 = vector.extract_strided_slice %18 {offsets = [0, 64], sizes = [2, 32], strides = [1, 1]} : vector<2x96xf32> to vector<2x32xf32>
    %31 = arith.mulf %27, %30 : vector<2x32xf32>
    %32 = arith.addf %29, %31 : vector<2x32xf32>
    %33 = math.tanh %32 : vector<2x32xf32>
    %cst_20 = arith.constant 1.000000e+00 : f32
    %34 = vector.broadcast %cst_20 : f32 to vector<2x32xf32>
    %35 = arith.subf %34, %28 : vector<2x32xf32>
    %36 = arith.mulf %35, %33 : vector<2x32xf32>
    %37 = arith.mulf %28, %8 : vector<2x32xf32>
    %38 = arith.addf %36, %37 : vector<2x32xf32>
    %39 = arith.index_cast %9 : i32 to index
    %c0_21 = arith.constant 0 : index
    %c0_22 = arith.constant 0 : index
    %40 = vector.load %arg1[%39, %c0_21, %c0_22] : memref<8x2x80xf32, #tpu.memory_space<vmem>>, vector<1x2x80xf32>
    %41 = vector.shape_cast %40 : vector<1x2x80xf32> to vector<2x80xf32>
    %cst_23 = arith.constant dense<0.000000e+00> : vector<2x96xf32>
    %42 = tpu.matmul %41, %1, %cst_23 {dimension_numbers = #tpu.dot_dimension_numbers<[1], [0], [0], [1], [0, 0, 1, 1], [], []>} : vector<2x80xf32>, vector<80x96xf32>, vector<2x96xf32> -> vector<2x96xf32>
    %43 = vector.broadcast %3 : vector<1x96xf32> to vector<2x96xf32>
    %44 = arith.addf %43, %42 : vector<2x96xf32>
    %cst_24 = arith.constant dense<0.000000e+00> : vector<2x96xf32>
    %45 = tpu.matmul %8, %5, %cst_24 {dimension_numbers = #tpu.dot_dimension_numbers<[1], [0], [0], [1], [0, 0, 1, 1], [], []>} : vector<2x32xf32>, vector<32x96xf32>, vector<2x96xf32> -> vector<2x96xf32>
    %46 = vector.broadcast %7 : vector<1x96xf32> to vector<2x96xf32>
    %47 = arith.addf %45, %46 : vector<2x96xf32>
    %48 = vector.extract_strided_slice %44 {offsets = [0, 0], sizes = [2, 64], strides = [1, 1]} : vector<2x96xf32> to vector<2x64xf32>
    %49 = vector.extract_strided_slice %47 {offsets = [0, 0], sizes = [2, 64], strides = [1, 1]} : vector<2x96xf32> to vector<2x64xf32>
    %50 = arith.addf %48, %49 : vector<2x64xf32>
    %51 = arith.negf %50 : vector<2x64xf32>
    %52 = math.exp %51 : vector<2x64xf32>
    %cst_25 = arith.constant 1.000000e+00 : f32
    %53 = vector.broadcast %cst_25 : f32 to vector<2x64xf32>
    %54 = arith.addf %53, %52 : vector<2x64xf32>
    %55 = arith.divf %53, %54 : vector<2x64xf32>
    %56 = vector.extract_strided_slice %55 {offsets = [0, 0], sizes = [2, 32], strides = [1, 1]} : vector<2x64xf32> to vector<2x32xf32>
    %57 = vector.extract_strided_slice %55 {offsets = [0, 32], sizes = [2, 32], strides = [1, 1]} : vector<2x64xf32> to vector<2x32xf32>
    %58 = vector.extract_strided_slice %44 {offsets = [0, 64], sizes = [2, 32], strides = [1, 1]} : vector<2x96xf32> to vector<2x32xf32>
    %59 = vector.extract_strided_slice %47 {offsets = [0, 64], sizes = [2, 32], strides = [1, 1]} : vector<2x96xf32> to vector<2x32xf32>
    %60 = arith.mulf %56, %59 : vector<2x32xf32>
    %61 = arith.addf %58, %60 : vector<2x32xf32>
    %62 = math.tanh %61 : vector<2x32xf32>
    %cst_26 = arith.constant 1.000000e+00 : f32
    %63 = vector.broadcast %cst_26 : f32 to vector<2x32xf32>
    %64 = arith.subf %63, %57 : vector<2x32xf32>
    %65 = arith.mulf %64, %62 : vector<2x32xf32>
    %66 = arith.mulf %57, %8 : vector<2x32xf32>
    %67 = arith.addf %65, %66 : vector<2x32xf32>
    %68 = arith.index_cast %c0_i32 : i32 to index
    %c0_27 = arith.constant 0 : index
    %c0_28 = arith.constant 0 : index
    %69 = vector.load %arg25[%68, %c0_27, %c0_28] : memref<8x2x32xf32, #tpu.memory_space<vmem>>, vector<1x2x32xf32>
    %70 = vector.shape_cast %69 : vector<1x2x32xf32> to vector<2x32xf32>
    %71 = vector.shape_cast %38 : vector<2x32xf32> to vector<1x2x32xf32>
    tpu.vector_store %arg25[%68, %c0_27, %c0_28], %71 {strides = array<i32>} : memref<8x2x32xf32, #tpu.memory_space<vmem>>, vector<1x2x32xf32>,
    %72 = arith.index_cast %9 : i32 to index
    %c0_29 = arith.constant 0 : index
    %c0_30 = arith.constant 0 : index
    %73 = vector.load %arg26[%72, %c0_29, %c0_30] : memref<8x2x32xf32, #tpu.memory_space<vmem>>, vector<1x2x32xf32>
    %74 = vector.shape_cast %73 : vector<1x2x32xf32> to vector<2x32xf32>
    %75 = vector.shape_cast %67 : vector<2x32xf32> to vector<1x2x32xf32>
    tpu.vector_store %arg26[%72, %c0_29, %c0_30], %75 {strides = array<i32>} : memref<8x2x32xf32, #tpu.memory_space<vmem>>, vector<1x2x32xf32>,
    %c1_i32 = arith.constant 1 : i32
    %c7_i32_31 = arith.constant 7 : i32
    %76 = arith.subi %c7_i32_31, %c1_i32 : i32
    %77 = arith.index_cast %c1_i32 : i32 to index
    %c0_32 = arith.constant 0 : index
    %c0_33 = arith.constant 0 : index
    %78 = vector.load %arg1[%77, %c0_32, %c0_33] : memref<8x2x80xf32, #tpu.memory_space<vmem>>, vector<1x2x80xf32>
    %79 = vector.shape_cast %78 : vector<1x2x80xf32> to vector<2x80xf32>
    %cst_34 = arith.constant dense<0.000000e+00> : vector<2x96xf32>
    %80 = tpu.matmul %79, %0, %cst_34 {dimension_numbers = #tpu.dot_dimension_numbers<[1], [0], [0], [1], [0, 0, 1, 1], [], []>} : vector<2x80xf32>, vector<80x96xf32>, vector<2x96xf32> -> vector<2x96xf32>
    %81 = vector.broadcast %2 : vector<1x96xf32> to vector<2x96xf32>
    %82 = arith.addf %81, %80 : vector<2x96xf32>
    %cst_35 = arith.constant dense<0.000000e+00> : vector<2x96xf32>
    %83 = tpu.matmul %38, %4, %cst_35 {dimension_numbers = #tpu.dot_dimension_numbers<[1], [0], [0], [1], [0, 0, 1, 1], [], []>} : vector<2x32xf32>, vector<32x96xf32>, vector<2x96xf32> -> vector<2x96xf32>
    %84 = vector.broadcast %6 : vector<1x96xf32> to vector<2x96xf32>
    %85 = arith.addf %83, %84 : vector<2x96xf32>
    %86 = vector.extract_strided_slice %82 {offsets = [0, 0], sizes = [2, 64], strides = [1, 1]} : vector<2x96xf32> to vector<2x64xf32>
    %87 = vector.extract_strided_slice %85 {offsets = [0, 0], sizes = [2, 64], strides = [1, 1]} : vector<2x96xf32> to vector<2x64xf32>
    %88 = arith.addf %86, %87 : vector<2x64xf32>
    %89 = arith.negf %88 : vector<2x64xf32>
    %90 = math.exp %89 : vector<2x64xf32>
    %cst_36 = arith.constant 1.000000e+00 : f32
    %91 = vector.broadcast %cst_36 : f32 to vector<2x64xf32>
    %92 = arith.addf %91, %90 : vector<2x64xf32>
    %93 = arith.divf %91, %92 : vector<2x64xf32>
    %94 = vector.extract_strided_slice %93 {offsets = [0, 0], sizes = [2, 32], strides = [1, 1]} : vector<2x64xf32> to vector<2x32xf32>
    %95 = vector.extract_strided_slice %93 {offsets = [0, 32], sizes = [2, 32], strides = [1, 1]} : vector<2x64xf32> to vector<2x32xf32>
    %96 = vector.extract_strided_slice %82 {offsets = [0, 64], sizes = [2, 32], strides = [1, 1]} : vector<2x96xf32> to vector<2x32xf32>
    %97 = vector.extract_strided_slice %85 {offsets = [0, 64], sizes = [2, 32], strides = [1, 1]} : vector<2x96xf32> to vector<2x32xf32>
    %98 = arith.mulf %94, %97 : vector<2x32xf32>
    %99 = arith.addf %96, %98 : vector<2x32xf32>
    %100 = math.tanh %99 : vector<2x32xf32>
    %cst_37 = arith.constant 1.000000e+00 : f32
    %101 = vector.broadcast %cst_37 : f32 to vector<2x32xf32>
    %102 = arith.subf %101, %95 : vector<2x32xf32>
    %103 = arith.mulf %102, %100 : vector<2x32xf32>
    %104 = arith.mulf %95, %38 : vector<2x32xf32>
    %105 = arith.addf %103, %104 : vector<2x32xf32>
    %106 = arith.index_cast %76 : i32 to index
    %c0_38 = arith.constant 0 : index
    %c0_39 = arith.constant 0 : index
    %107 = vector.load %arg1[%106, %c0_38, %c0_39] : memref<8x2x80xf32, #tpu.memory_space<vmem>>, vector<1x2x80xf32>
    %108 = vector.shape_cast %107 : vector<1x2x80xf32> to vector<2x80xf32>
    %cst_40 = arith.constant dense<0.000000e+00> : vector<2x96xf32>
    %109 = tpu.matmul %108, %1, %cst_40 {dimension_numbers = #tpu.dot_dimension_numbers<[1], [0], [0], [1], [0, 0, 1, 1], [], []>} : vector<2x80xf32>, vector<80x96xf32>, vector<2x96xf32> -> vector<2x96xf32>
    %110 = vector.broadcast %3 : vector<1x96xf32> to vector<2x96xf32>
    %111 = arith.addf %110, %109 : vector<2x96xf32>
    %cst_41 = arith.constant dense<0.000000e+00> : vector<2x96xf32>
    %112 = tpu.matmul %67, %5, %cst_41 {dimension_numbers = #tpu.dot_dimension_numbers<[1], [0], [0], [1], [0, 0, 1, 1], [], []>} : vector<2x32xf32>, vector<32x96xf32>, vector<2x96xf32> -> vector<2x96xf32>
    %113 = vector.broadcast %7 : vector<1x96xf32> to vector<2x96xf32>
    %114 = arith.addf %112, %113 : vector<2x96xf32>
    %115 = vector.extract_strided_slice %111 {offsets = [0, 0], sizes = [2, 64], strides = [1, 1]} : vector<2x96xf32> to vector<2x64xf32>
    %116 = vector.extract_strided_slice %114 {offsets = [0, 0], sizes = [2, 64], strides = [1, 1]} : vector<2x96xf32> to vector<2x64xf32>
    %117 = arith.addf %115, %116 : vector<2x64xf32>
    %118 = arith.negf %117 : vector<2x64xf32>
    %119 = math.exp %118 : vector<2x64xf32>
    %cst_42 = arith.constant 1.000000e+00 : f32
    %120 = vector.broadcast %cst_42 : f32 to vector<2x64xf32>
    %121 = arith.addf %120, %119 : vector<2x64xf32>
    %122 = arith.divf %120, %121 : vector<2x64xf32>
    %123 = vector.extract_strided_slice %122 {offsets = [0, 0], sizes = [2, 32], strides = [1, 1]} : vector<2x64xf32> to vector<2x32xf32>
    %124 = vector.extract_strided_slice %122 {offsets = [0, 32], sizes = [2, 32], strides = [1, 1]} : vector<2x64xf32> to vector<2x32xf32>
    %125 = vector.extract_strided_slice %111 {offsets = [0, 64], sizes = [2, 32], strides = [1, 1]} : vector<2x96xf32> to vector<2x32xf32>
    %126 = vector.extract_strided_slice %114 {offsets = [0, 64], sizes = [2, 32], strides = [1, 1]} : vector<2x96xf32> to vector<2x32xf32>
    %127 = arith.mulf %123, %126 : vector<2x32xf32>
    %128 = arith.addf %125, %127 : vector<2x32xf32>
    %129 = math.tanh %128 : vector<2x32xf32>
    %cst_43 = arith.constant 1.000000e+00 : f32
    %130 = vector.broadcast %cst_43 : f32 to vector<2x32xf32>
    %131 = arith.subf %130, %124 : vector<2x32xf32>
    %132 = arith.mulf %131, %129 : vector<2x32xf32>
    %133 = arith.mulf %124, %67 : vector<2x32xf32>
    %134 = arith.addf %132, %133 : vector<2x32xf32>
    %135 = arith.index_cast %c1_i32 : i32 to index
    %c0_44 = arith.constant 0 : index
    %c0_45 = arith.constant 0 : index
    %136 = vector.load %arg25[%135, %c0_44, %c0_45] : memref<8x2x32xf32, #tpu.memory_space<vmem>>, vector<1x2x32xf32>
    %137 = vector.shape_cast %136 : vector<1x2x32xf32> to vector<2x32xf32>
    %138 = vector.shape_cast %105 : vector<2x32xf32> to vector<1x2x32xf32>
    tpu.vector_store %arg25[%135, %c0_44, %c0_45], %138 {strides = array<i32>} : memref<8x2x32xf32, #tpu.memory_space<vmem>>, vector<1x2x32xf32>,
    %139 = arith.index_cast %76 : i32 to index
    %c0_46 = arith.constant 0 : index
    %c0_47 = arith.constant 0 : index
    %140 = vector.load %arg26[%139, %c0_46, %c0_47] : memref<8x2x32xf32, #tpu.memory_space<vmem>>, vector<1x2x32xf32>
    %141 = vector.shape_cast %140 : vector<1x2x32xf32> to vector<2x32xf32>
    %142 = vector.shape_cast %134 : vector<2x32xf32> to vector<1x2x32xf32>
    tpu.vector_store %arg26[%139, %c0_46, %c0_47], %142 {strides = array<i32>} : memref<8x2x32xf32, #tpu.memory_space<vmem>>, vector<1x2x32xf32>,
    %c2_i32 = arith.constant 2 : i32
    %c7_i32_48 = arith.constant 7 : i32
    %143 = arith.subi %c7_i32_48, %c2_i32 : i32
    %144 = arith.index_cast %c2_i32 : i32 to index
    %c0_49 = arith.constant 0 : index
    %c0_50 = arith.constant 0 : index
    %145 = vector.load %arg1[%144, %c0_49, %c0_50] : memref<8x2x80xf32, #tpu.memory_space<vmem>>, vector<1x2x80xf32>
    %146 = vector.shape_cast %145 : vector<1x2x80xf32> to vector<2x80xf32>
    %cst_51 = arith.constant dense<0.000000e+00> : vector<2x96xf32>
    %147 = tpu.matmul %146, %0, %cst_51 {dimension_numbers = #tpu.dot_dimension_numbers<[1], [0], [0], [1], [0, 0, 1, 1], [], []>} : vector<2x80xf32>, vector<80x96xf32>, vector<2x96xf32> -> vector<2x96xf32>
    %148 = vector.broadcast %2 : vector<1x96xf32> to vector<2x96xf32>
    %149 = arith.addf %148, %147 : vector<2x96xf32>
    %cst_52 = arith.constant dense<0.000000e+00> : vector<2x96xf32>
    %150 = tpu.matmul %105, %4, %cst_52 {dimension_numbers = #tpu.dot_dimension_numbers<[1], [0], [0], [1], [0, 0, 1, 1], [], []>} : vector<2x32xf32>, vector<32x96xf32>, vector<2x96xf32> -> vector<2x96xf32>
    %151 = vector.broadcast %6 : vector<1x96xf32> to vector<2x96xf32>
    %152 = arith.addf %150, %151 : vector<2x96xf32>
    %153 = vector.extract_strided_slice %149 {offsets = [0, 0], sizes = [2, 64], strides = [1, 1]} : vector<2x96xf32> to vector<2x64xf32>
    %154 = vector.extract_strided_slice %152 {offsets = [0, 0], sizes = [2, 64], strides = [1, 1]} : vector<2x96xf32> to vector<2x64xf32>
    %155 = arith.addf %153, %154 : vector<2x64xf32>
    %156 = arith.negf %155 : vector<2x64xf32>
    %157 = math.exp %156 : vector<2x64xf32>
    %cst_53 = arith.constant 1.000000e+00 : f32
    %158 = vector.broadcast %cst_53 : f32 to vector<2x64xf32>
    %159 = arith.addf %158, %157 : vector<2x64xf32>
    %160 = arith.divf %158, %159 : vector<2x64xf32>
    %161 = vector.extract_strided_slice %160 {offsets = [0, 0], sizes = [2, 32], strides = [1, 1]} : vector<2x64xf32> to vector<2x32xf32>
    %162 = vector.extract_strided_slice %160 {offsets = [0, 32], sizes = [2, 32], strides = [1, 1]} : vector<2x64xf32> to vector<2x32xf32>
    %163 = vector.extract_strided_slice %149 {offsets = [0, 64], sizes = [2, 32], strides = [1, 1]} : vector<2x96xf32> to vector<2x32xf32>
    %164 = vector.extract_strided_slice %152 {offsets = [0, 64], sizes = [2, 32], strides = [1, 1]} : vector<2x96xf32> to vector<2x32xf32>
    %165 = arith.mulf %161, %164 : vector<2x32xf32>
    %166 = arith.addf %163, %165 : vector<2x32xf32>
    %167 = math.tanh %166 : vector<2x32xf32>
    %cst_54 = arith.constant 1.000000e+00 : f32
    %168 = vector.broadcast %cst_54 : f32 to vector<2x32xf32>
    %169 = arith.subf %168, %162 : vector<2x32xf32>
    %170 = arith.mulf %169, %167 : vector<2x32xf32>
    %171 = arith.mulf %162, %105 : vector<2x32xf32>
    %172 = arith.addf %170, %171 : vector<2x32xf32>
    %173 = arith.index_cast %143 : i32 to index
    %c0_55 = arith.constant 0 : index
    %c0_56 = arith.constant 0 : index
    %174 = vector.load %arg1[%173, %c0_55, %c0_56] : memref<8x2x80xf32, #tpu.memory_space<vmem>>, vector<1x2x80xf32>
    %175 = vector.shape_cast %174 : vector<1x2x80xf32> to vector<2x80xf32>
    %cst_57 = arith.constant dense<0.000000e+00> : vector<2x96xf32>
    %176 = tpu.matmul %175, %1, %cst_57 {dimension_numbers = #tpu.dot_dimension_numbers<[1], [0], [0], [1], [0, 0, 1, 1], [], []>} : vector<2x80xf32>, vector<80x96xf32>, vector<2x96xf32> -> vector<2x96xf32>
    %177 = vector.broadcast %3 : vector<1x96xf32> to vector<2x96xf32>
    %178 = arith.addf %177, %176 : vector<2x96xf32>
    %cst_58 = arith.constant dense<0.000000e+00> : vector<2x96xf32>
    %179 = tpu.matmul %134, %5, %cst_58 {dimension_numbers = #tpu.dot_dimension_numbers<[1], [0], [0], [1], [0, 0, 1, 1], [], []>} : vector<2x32xf32>, vector<32x96xf32>, vector<2x96xf32> -> vector<2x96xf32>
    %180 = vector.broadcast %7 : vector<1x96xf32> to vector<2x96xf32>
    %181 = arith.addf %179, %180 : vector<2x96xf32>
    %182 = vector.extract_strided_slice %178 {offsets = [0, 0], sizes = [2, 64], strides = [1, 1]} : vector<2x96xf32> to vector<2x64xf32>
    %183 = vector.extract_strided_slice %181 {offsets = [0, 0], sizes = [2, 64], strides = [1, 1]} : vector<2x96xf32> to vector<2x64xf32>
    %184 = arith.addf %182, %183 : vector<2x64xf32>
    %185 = arith.negf %184 : vector<2x64xf32>
    %186 = math.exp %185 : vector<2x64xf32>
    %cst_59 = arith.constant 1.000000e+00 : f32
    %187 = vector.broadcast %cst_59 : f32 to vector<2x64xf32>
    %188 = arith.addf %187, %186 : vector<2x64xf32>
    %189 = arith.divf %187, %188 : vector<2x64xf32>
    %190 = vector.extract_strided_slice %189 {offsets = [0, 0], sizes = [2, 32], strides = [1, 1]} : vector<2x64xf32> to vector<2x32xf32>
    %191 = vector.extract_strided_slice %189 {offsets = [0, 32], sizes = [2, 32], strides = [1, 1]} : vector<2x64xf32> to vector<2x32xf32>
    %192 = vector.extract_strided_slice %178 {offsets = [0, 64], sizes = [2, 32], strides = [1, 1]} : vector<2x96xf32> to vector<2x32xf32>
    %193 = vector.extract_strided_slice %181 {offsets = [0, 64], sizes = [2, 32], strides = [1, 1]} : vector<2x96xf32> to vector<2x32xf32>
    %194 = arith.mulf %190, %193 : vector<2x32xf32>
    %195 = arith.addf %192, %194 : vector<2x32xf32>
    %196 = math.tanh %195 : vector<2x32xf32>
    %cst_60 = arith.constant 1.000000e+00 : f32
    %197 = vector.broadcast %cst_60 : f32 to vector<2x32xf32>
    %198 = arith.subf %197, %191 : vector<2x32xf32>
    %199 = arith.mulf %198, %196 : vector<2x32xf32>
    %200 = arith.mulf %191, %134 : vector<2x32xf32>
    %201 = arith.addf %199, %200 : vector<2x32xf32>
    %202 = arith.index_cast %c2_i32 : i32 to index
    %c0_61 = arith.constant 0 : index
    %c0_62 = arith.constant 0 : index
    %203 = vector.load %arg25[%202, %c0_61, %c0_62] : memref<8x2x32xf32, #tpu.memory_space<vmem>>, vector<1x2x32xf32>
    %204 = vector.shape_cast %203 : vector<1x2x32xf32> to vector<2x32xf32>
    %205 = vector.shape_cast %172 : vector<2x32xf32> to vector<1x2x32xf32>
    tpu.vector_store %arg25[%202, %c0_61, %c0_62], %205 {strides = array<i32>} : memref<8x2x32xf32, #tpu.memory_space<vmem>>, vector<1x2x32xf32>,
    %206 = arith.index_cast %143 : i32 to index
    %c0_63 = arith.constant 0 : index
    %c0_64 = arith.constant 0 : index
    %207 = vector.load %arg26[%206, %c0_63, %c0_64] : memref<8x2x32xf32, #tpu.memory_space<vmem>>, vector<1x2x32xf32>
    %208 = vector.shape_cast %207 : vector<1x2x32xf32> to vector<2x32xf32>
    %209 = vector.shape_cast %201 : vector<2x32xf32> to vector<1x2x32xf32>
    tpu.vector_store %arg26[%206, %c0_63, %c0_64], %209 {strides = array<i32>} : memref<8x2x32xf32, #tpu.memory_space<vmem>>, vector<1x2x32xf32>,
    %c3_i32 = arith.constant 3 : i32
    %c7_i32_65 = arith.constant 7 : i32
    %210 = arith.subi %c7_i32_65, %c3_i32 : i32
    %211 = arith.index_cast %c3_i32 : i32 to index
    %c0_66 = arith.constant 0 : index
    %c0_67 = arith.constant 0 : index
    %212 = vector.load %arg1[%211, %c0_66, %c0_67] : memref<8x2x80xf32, #tpu.memory_space<vmem>>, vector<1x2x80xf32>
    %213 = vector.shape_cast %212 : vector<1x2x80xf32> to vector<2x80xf32>
    %cst_68 = arith.constant dense<0.000000e+00> : vector<2x96xf32>
    %214 = tpu.matmul %213, %0, %cst_68 {dimension_numbers = #tpu.dot_dimension_numbers<[1], [0], [0], [1], [0, 0, 1, 1], [], []>} : vector<2x80xf32>, vector<80x96xf32>, vector<2x96xf32> -> vector<2x96xf32>
    %215 = vector.broadcast %2 : vector<1x96xf32> to vector<2x96xf32>
    %216 = arith.addf %215, %214 : vector<2x96xf32>
    %cst_69 = arith.constant dense<0.000000e+00> : vector<2x96xf32>
    %217 = tpu.matmul %172, %4, %cst_69 {dimension_numbers = #tpu.dot_dimension_numbers<[1], [0], [0], [1], [0, 0, 1, 1], [], []>} : vector<2x32xf32>, vector<32x96xf32>, vector<2x96xf32> -> vector<2x96xf32>
    %218 = vector.broadcast %6 : vector<1x96xf32> to vector<2x96xf32>
    %219 = arith.addf %217, %218 : vector<2x96xf32>
    %220 = vector.extract_strided_slice %216 {offsets = [0, 0], sizes = [2, 64], strides = [1, 1]} : vector<2x96xf32> to vector<2x64xf32>
    %221 = vector.extract_strided_slice %219 {offsets = [0, 0], sizes = [2, 64], strides = [1, 1]} : vector<2x96xf32> to vector<2x64xf32>
    %222 = arith.addf %220, %221 : vector<2x64xf32>
    %223 = arith.negf %222 : vector<2x64xf32>
    %224 = math.exp %223 : vector<2x64xf32>
    %cst_70 = arith.constant 1.000000e+00 : f32
    %225 = vector.broadcast %cst_70 : f32 to vector<2x64xf32>
    %226 = arith.addf %225, %224 : vector<2x64xf32>
    %227 = arith.divf %225, %226 : vector<2x64xf32>
    %228 = vector.extract_strided_slice %227 {offsets = [0, 0], sizes = [2, 32], strides = [1, 1]} : vector<2x64xf32> to vector<2x32xf32>
    %229 = vector.extract_strided_slice %227 {offsets = [0, 32], sizes = [2, 32], strides = [1, 1]} : vector<2x64xf32> to vector<2x32xf32>
    %230 = vector.extract_strided_slice %216 {offsets = [0, 64], sizes = [2, 32], strides = [1, 1]} : vector<2x96xf32> to vector<2x32xf32>
    %231 = vector.extract_strided_slice %219 {offsets = [0, 64], sizes = [2, 32], strides = [1, 1]} : vector<2x96xf32> to vector<2x32xf32>
    %232 = arith.mulf %228, %231 : vector<2x32xf32>
    %233 = arith.addf %230, %232 : vector<2x32xf32>
    %234 = math.tanh %233 : vector<2x32xf32>
    %cst_71 = arith.constant 1.000000e+00 : f32
    %235 = vector.broadcast %cst_71 : f32 to vector<2x32xf32>
    %236 = arith.subf %235, %229 : vector<2x32xf32>
    %237 = arith.mulf %236, %234 : vector<2x32xf32>
    %238 = arith.mulf %229, %172 : vector<2x32xf32>
    %239 = arith.addf %237, %238 : vector<2x32xf32>
    %240 = arith.index_cast %210 : i32 to index
    %c0_72 = arith.constant 0 : index
    %c0_73 = arith.constant 0 : index
    %241 = vector.load %arg1[%240, %c0_72, %c0_73] : memref<8x2x80xf32, #tpu.memory_space<vmem>>, vector<1x2x80xf32>
    %242 = vector.shape_cast %241 : vector<1x2x80xf32> to vector<2x80xf32>
    %cst_74 = arith.constant dense<0.000000e+00> : vector<2x96xf32>
    %243 = tpu.matmul %242, %1, %cst_74 {dimension_numbers = #tpu.dot_dimension_numbers<[1], [0], [0], [1], [0, 0, 1, 1], [], []>} : vector<2x80xf32>, vector<80x96xf32>, vector<2x96xf32> -> vector<2x96xf32>
    %244 = vector.broadcast %3 : vector<1x96xf32> to vector<2x96xf32>
    %245 = arith.addf %244, %243 : vector<2x96xf32>
    %cst_75 = arith.constant dense<0.000000e+00> : vector<2x96xf32>
    %246 = tpu.matmul %201, %5, %cst_75 {dimension_numbers = #tpu.dot_dimension_numbers<[1], [0], [0], [1], [0, 0, 1, 1], [], []>} : vector<2x32xf32>, vector<32x96xf32>, vector<2x96xf32> -> vector<2x96xf32>
    %247 = vector.broadcast %7 : vector<1x96xf32> to vector<2x96xf32>
    %248 = arith.addf %246, %247 : vector<2x96xf32>
    %249 = vector.extract_strided_slice %245 {offsets = [0, 0], sizes = [2, 64], strides = [1, 1]} : vector<2x96xf32> to vector<2x64xf32>
    %250 = vector.extract_strided_slice %248 {offsets = [0, 0], sizes = [2, 64], strides = [1, 1]} : vector<2x96xf32> to vector<2x64xf32>
    %251 = arith.addf %249, %250 : vector<2x64xf32>
    %252 = arith.negf %251 : vector<2x64xf32>
    %253 = math.exp %252 : vector<2x64xf32>
    %cst_76 = arith.constant 1.000000e+00 : f32
    %254 = vector.broadcast %cst_76 : f32 to vector<2x64xf32>
    %255 = arith.addf %254, %253 : vector<2x64xf32>
    %256 = arith.divf %254, %255 : vector<2x64xf32>
    %257 = vector.extract_strided_slice %256 {offsets = [0, 0], sizes = [2, 32], strides = [1, 1]} : vector<2x64xf32> to vector<2x32xf32>
    %258 = vector.extract_strided_slice %256 {offsets = [0, 32], sizes = [2, 32], strides = [1, 1]} : vector<2x64xf32> to vector<2x32xf32>
    %259 = vector.extract_strided_slice %245 {offsets = [0, 64], sizes = [2, 32], strides = [1, 1]} : vector<2x96xf32> to vector<2x32xf32>
    %260 = vector.extract_strided_slice %248 {offsets = [0, 64], sizes = [2, 32], strides = [1, 1]} : vector<2x96xf32> to vector<2x32xf32>
    %261 = arith.mulf %257, %260 : vector<2x32xf32>
    %262 = arith.addf %259, %261 : vector<2x32xf32>
    %263 = math.tanh %262 : vector<2x32xf32>
    %cst_77 = arith.constant 1.000000e+00 : f32
    %264 = vector.broadcast %cst_77 : f32 to vector<2x32xf32>
    %265 = arith.subf %264, %258 : vector<2x32xf32>
    %266 = arith.mulf %265, %263 : vector<2x32xf32>
    %267 = arith.mulf %258, %201 : vector<2x32xf32>
    %268 = arith.addf %266, %267 : vector<2x32xf32>
    %269 = arith.index_cast %c3_i32 : i32 to index
    %c0_78 = arith.constant 0 : index
    %c0_79 = arith.constant 0 : index
    %270 = vector.load %arg25[%269, %c0_78, %c0_79] : memref<8x2x32xf32, #tpu.memory_space<vmem>>, vector<1x2x32xf32>
    %271 = vector.shape_cast %270 : vector<1x2x32xf32> to vector<2x32xf32>
    %272 = vector.shape_cast %239 : vector<2x32xf32> to vector<1x2x32xf32>
    tpu.vector_store %arg25[%269, %c0_78, %c0_79], %272 {strides = array<i32>} : memref<8x2x32xf32, #tpu.memory_space<vmem>>, vector<1x2x32xf32>,
    %273 = arith.index_cast %210 : i32 to index
    %c0_80 = arith.constant 0 : index
    %c0_81 = arith.constant 0 : index
    %274 = vector.load %arg26[%273, %c0_80, %c0_81] : memref<8x2x32xf32, #tpu.memory_space<vmem>>, vector<1x2x32xf32>
    %275 = vector.shape_cast %274 : vector<1x2x32xf32> to vector<2x32xf32>
    %276 = vector.shape_cast %268 : vector<2x32xf32> to vector<1x2x32xf32>
    tpu.vector_store %arg26[%273, %c0_80, %c0_81], %276 {strides = array<i32>} : memref<8x2x32xf32, #tpu.memory_space<vmem>>, vector<1x2x32xf32>,
    %c4_i32 = arith.constant 4 : i32
    %c7_i32_82 = arith.constant 7 : i32
    %277 = arith.subi %c7_i32_82, %c4_i32 : i32
    %278 = arith.index_cast %c4_i32 : i32 to index
    %c0_83 = arith.constant 0 : index
    %c0_84 = arith.constant 0 : index
    %279 = vector.load %arg1[%278, %c0_83, %c0_84] : memref<8x2x80xf32, #tpu.memory_space<vmem>>, vector<1x2x80xf32>
    %280 = vector.shape_cast %279 : vector<1x2x80xf32> to vector<2x80xf32>
    %cst_85 = arith.constant dense<0.000000e+00> : vector<2x96xf32>
    %281 = tpu.matmul %280, %0, %cst_85 {dimension_numbers = #tpu.dot_dimension_numbers<[1], [0], [0], [1], [0, 0, 1, 1], [], []>} : vector<2x80xf32>, vector<80x96xf32>, vector<2x96xf32> -> vector<2x96xf32>
    %282 = vector.broadcast %2 : vector<1x96xf32> to vector<2x96xf32>
    %283 = arith.addf %282, %281 : vector<2x96xf32>
    %cst_86 = arith.constant dense<0.000000e+00> : vector<2x96xf32>
    %284 = tpu.matmul %239, %4, %cst_86 {dimension_numbers = #tpu.dot_dimension_numbers<[1], [0], [0], [1], [0, 0, 1, 1], [], []>} : vector<2x32xf32>, vector<32x96xf32>, vector<2x96xf32> -> vector<2x96xf32>
    %285 = vector.broadcast %6 : vector<1x96xf32> to vector<2x96xf32>
    %286 = arith.addf %284, %285 : vector<2x96xf32>
    %287 = vector.extract_strided_slice %283 {offsets = [0, 0], sizes = [2, 64], strides = [1, 1]} : vector<2x96xf32> to vector<2x64xf32>
    %288 = vector.extract_strided_slice %286 {offsets = [0, 0], sizes = [2, 64], strides = [1, 1]} : vector<2x96xf32> to vector<2x64xf32>
    %289 = arith.addf %287, %288 : vector<2x64xf32>
    %290 = arith.negf %289 : vector<2x64xf32>
    %291 = math.exp %290 : vector<2x64xf32>
    %cst_87 = arith.constant 1.000000e+00 : f32
    %292 = vector.broadcast %cst_87 : f32 to vector<2x64xf32>
    %293 = arith.addf %292, %291 : vector<2x64xf32>
    %294 = arith.divf %292, %293 : vector<2x64xf32>
    %295 = vector.extract_strided_slice %294 {offsets = [0, 0], sizes = [2, 32], strides = [1, 1]} : vector<2x64xf32> to vector<2x32xf32>
    %296 = vector.extract_strided_slice %294 {offsets = [0, 32], sizes = [2, 32], strides = [1, 1]} : vector<2x64xf32> to vector<2x32xf32>
    %297 = vector.extract_strided_slice %283 {offsets = [0, 64], sizes = [2, 32], strides = [1, 1]} : vector<2x96xf32> to vector<2x32xf32>
    %298 = vector.extract_strided_slice %286 {offsets = [0, 64], sizes = [2, 32], strides = [1, 1]} : vector<2x96xf32> to vector<2x32xf32>
    %299 = arith.mulf %295, %298 : vector<2x32xf32>
    %300 = arith.addf %297, %299 : vector<2x32xf32>
    %301 = math.tanh %300 : vector<2x32xf32>
    %cst_88 = arith.constant 1.000000e+00 : f32
    %302 = vector.broadcast %cst_88 : f32 to vector<2x32xf32>
    %303 = arith.subf %302, %296 : vector<2x32xf32>
    %304 = arith.mulf %303, %301 : vector<2x32xf32>
    %305 = arith.mulf %296, %239 : vector<2x32xf32>
    %306 = arith.addf %304, %305 : vector<2x32xf32>
    %307 = arith.index_cast %277 : i32 to index
    %c0_89 = arith.constant 0 : index
    %c0_90 = arith.constant 0 : index
    %308 = vector.load %arg1[%307, %c0_89, %c0_90] : memref<8x2x80xf32, #tpu.memory_space<vmem>>, vector<1x2x80xf32>
    %309 = vector.shape_cast %308 : vector<1x2x80xf32> to vector<2x80xf32>
    %cst_91 = arith.constant dense<0.000000e+00> : vector<2x96xf32>
    %310 = tpu.matmul %309, %1, %cst_91 {dimension_numbers = #tpu.dot_dimension_numbers<[1], [0], [0], [1], [0, 0, 1, 1], [], []>} : vector<2x80xf32>, vector<80x96xf32>, vector<2x96xf32> -> vector<2x96xf32>
    %311 = vector.broadcast %3 : vector<1x96xf32> to vector<2x96xf32>
    %312 = arith.addf %311, %310 : vector<2x96xf32>
    %cst_92 = arith.constant dense<0.000000e+00> : vector<2x96xf32>
    %313 = tpu.matmul %268, %5, %cst_92 {dimension_numbers = #tpu.dot_dimension_numbers<[1], [0], [0], [1], [0, 0, 1, 1], [], []>} : vector<2x32xf32>, vector<32x96xf32>, vector<2x96xf32> -> vector<2x96xf32>
    %314 = vector.broadcast %7 : vector<1x96xf32> to vector<2x96xf32>
    %315 = arith.addf %313, %314 : vector<2x96xf32>
    %316 = vector.extract_strided_slice %312 {offsets = [0, 0], sizes = [2, 64], strides = [1, 1]} : vector<2x96xf32> to vector<2x64xf32>
    %317 = vector.extract_strided_slice %315 {offsets = [0, 0], sizes = [2, 64], strides = [1, 1]} : vector<2x96xf32> to vector<2x64xf32>
    %318 = arith.addf %316, %317 : vector<2x64xf32>
    %319 = arith.negf %318 : vector<2x64xf32>
    %320 = math.exp %319 : vector<2x64xf32>
    %cst_93 = arith.constant 1.000000e+00 : f32
    %321 = vector.broadcast %cst_93 : f32 to vector<2x64xf32>
    %322 = arith.addf %321, %320 : vector<2x64xf32>
    %323 = arith.divf %321, %322 : vector<2x64xf32>
    %324 = vector.extract_strided_slice %323 {offsets = [0, 0], sizes = [2, 32], strides = [1, 1]} : vector<2x64xf32> to vector<2x32xf32>
    %325 = vector.extract_strided_slice %323 {offsets = [0, 32], sizes = [2, 32], strides = [1, 1]} : vector<2x64xf32> to vector<2x32xf32>
    %326 = vector.extract_strided_slice %312 {offsets = [0, 64], sizes = [2, 32], strides = [1, 1]} : vector<2x96xf32> to vector<2x32xf32>
    %327 = vector.extract_strided_slice %315 {offsets = [0, 64], sizes = [2, 32], strides = [1, 1]} : vector<2x96xf32> to vector<2x32xf32>
    %328 = arith.mulf %324, %327 : vector<2x32xf32>
    %329 = arith.addf %326, %328 : vector<2x32xf32>
    %330 = math.tanh %329 : vector<2x32xf32>
    %cst_94 = arith.constant 1.000000e+00 : f32
    %331 = vector.broadcast %cst_94 : f32 to vector<2x32xf32>
    %332 = arith.subf %331, %325 : vector<2x32xf32>
    %333 = arith.mulf %332, %330 : vector<2x32xf32>
    %334 = arith.mulf %325, %268 : vector<2x32xf32>
    %335 = arith.addf %333, %334 : vector<2x32xf32>
    %336 = arith.index_cast %c4_i32 : i32 to index
    %c0_95 = arith.constant 0 : index
    %c0_96 = arith.constant 0 : index
    %337 = vector.load %arg25[%336, %c0_95, %c0_96] : memref<8x2x32xf32, #tpu.memory_space<vmem>>, vector<1x2x32xf32>
    %338 = vector.shape_cast %337 : vector<1x2x32xf32> to vector<2x32xf32>
    %339 = vector.shape_cast %306 : vector<2x32xf32> to vector<1x2x32xf32>
    tpu.vector_store %arg25[%336, %c0_95, %c0_96], %339 {strides = array<i32>} : memref<8x2x32xf32, #tpu.memory_space<vmem>>, vector<1x2x32xf32>,
    %340 = arith.index_cast %277 : i32 to index
    %c0_97 = arith.constant 0 : index
    %c0_98 = arith.constant 0 : index
    %341 = vector.load %arg26[%340, %c0_97, %c0_98] : memref<8x2x32xf32, #tpu.memory_space<vmem>>, vector<1x2x32xf32>
    %342 = vector.shape_cast %341 : vector<1x2x32xf32> to vector<2x32xf32>
    %343 = vector.shape_cast %335 : vector<2x32xf32> to vector<1x2x32xf32>
    tpu.vector_store %arg26[%340, %c0_97, %c0_98], %343 {strides = array<i32>} : memref<8x2x32xf32, #tpu.memory_space<vmem>>, vector<1x2x32xf32>,
    %c5_i32 = arith.constant 5 : i32
    %c7_i32_99 = arith.constant 7 : i32
    %344 = arith.subi %c7_i32_99, %c5_i32 : i32
    %345 = arith.index_cast %c5_i32 : i32 to index
    %c0_100 = arith.constant 0 : index
    %c0_101 = arith.constant 0 : index
    %346 = vector.load %arg1[%345, %c0_100, %c0_101] : memref<8x2x80xf32, #tpu.memory_space<vmem>>, vector<1x2x80xf32>
    %347 = vector.shape_cast %346 : vector<1x2x80xf32> to vector<2x80xf32>
    %cst_102 = arith.constant dense<0.000000e+00> : vector<2x96xf32>
    %348 = tpu.matmul %347, %0, %cst_102 {dimension_numbers = #tpu.dot_dimension_numbers<[1], [0], [0], [1], [0, 0, 1, 1], [], []>} : vector<2x80xf32>, vector<80x96xf32>, vector<2x96xf32> -> vector<2x96xf32>
    %349 = vector.broadcast %2 : vector<1x96xf32> to vector<2x96xf32>
    %350 = arith.addf %349, %348 : vector<2x96xf32>
    %cst_103 = arith.constant dense<0.000000e+00> : vector<2x96xf32>
    %351 = tpu.matmul %306, %4, %cst_103 {dimension_numbers = #tpu.dot_dimension_numbers<[1], [0], [0], [1], [0, 0, 1, 1], [], []>} : vector<2x32xf32>, vector<32x96xf32>, vector<2x96xf32> -> vector<2x96xf32>
    %352 = vector.broadcast %6 : vector<1x96xf32> to vector<2x96xf32>
    %353 = arith.addf %351, %352 : vector<2x96xf32>
    %354 = vector.extract_strided_slice %350 {offsets = [0, 0], sizes = [2, 64], strides = [1, 1]} : vector<2x96xf32> to vector<2x64xf32>
    %355 = vector.extract_strided_slice %353 {offsets = [0, 0], sizes = [2, 64], strides = [1, 1]} : vector<2x96xf32> to vector<2x64xf32>
    %356 = arith.addf %354, %355 : vector<2x64xf32>
    %357 = arith.negf %356 : vector<2x64xf32>
    %358 = math.exp %357 : vector<2x64xf32>
    %cst_104 = arith.constant 1.000000e+00 : f32
    %359 = vector.broadcast %cst_104 : f32 to vector<2x64xf32>
    %360 = arith.addf %359, %358 : vector<2x64xf32>
    %361 = arith.divf %359, %360 : vector<2x64xf32>
    %362 = vector.extract_strided_slice %361 {offsets = [0, 0], sizes = [2, 32], strides = [1, 1]} : vector<2x64xf32> to vector<2x32xf32>
    %363 = vector.extract_strided_slice %361 {offsets = [0, 32], sizes = [2, 32], strides = [1, 1]} : vector<2x64xf32> to vector<2x32xf32>
    %364 = vector.extract_strided_slice %350 {offsets = [0, 64], sizes = [2, 32], strides = [1, 1]} : vector<2x96xf32> to vector<2x32xf32>
    %365 = vector.extract_strided_slice %353 {offsets = [0, 64], sizes = [2, 32], strides = [1, 1]} : vector<2x96xf32> to vector<2x32xf32>
    %366 = arith.mulf %362, %365 : vector<2x32xf32>
    %367 = arith.addf %364, %366 : vector<2x32xf32>
    %368 = math.tanh %367 : vector<2x32xf32>
    %cst_105 = arith.constant 1.000000e+00 : f32
    %369 = vector.broadcast %cst_105 : f32 to vector<2x32xf32>
    %370 = arith.subf %369, %363 : vector<2x32xf32>
    %371 = arith.mulf %370, %368 : vector<2x32xf32>
    %372 = arith.mulf %363, %306 : vector<2x32xf32>
    %373 = arith.addf %371, %372 : vector<2x32xf32>
    %374 = arith.index_cast %344 : i32 to index
    %c0_106 = arith.constant 0 : index
    %c0_107 = arith.constant 0 : index
    %375 = vector.load %arg1[%374, %c0_106, %c0_107] : memref<8x2x80xf32, #tpu.memory_space<vmem>>, vector<1x2x80xf32>
    %376 = vector.shape_cast %375 : vector<1x2x80xf32> to vector<2x80xf32>
    %cst_108 = arith.constant dense<0.000000e+00> : vector<2x96xf32>
    %377 = tpu.matmul %376, %1, %cst_108 {dimension_numbers = #tpu.dot_dimension_numbers<[1], [0], [0], [1], [0, 0, 1, 1], [], []>} : vector<2x80xf32>, vector<80x96xf32>, vector<2x96xf32> -> vector<2x96xf32>
    %378 = vector.broadcast %3 : vector<1x96xf32> to vector<2x96xf32>
    %379 = arith.addf %378, %377 : vector<2x96xf32>
    %cst_109 = arith.constant dense<0.000000e+00> : vector<2x96xf32>
    %380 = tpu.matmul %335, %5, %cst_109 {dimension_numbers = #tpu.dot_dimension_numbers<[1], [0], [0], [1], [0, 0, 1, 1], [], []>} : vector<2x32xf32>, vector<32x96xf32>, vector<2x96xf32> -> vector<2x96xf32>
    %381 = vector.broadcast %7 : vector<1x96xf32> to vector<2x96xf32>
    %382 = arith.addf %380, %381 : vector<2x96xf32>
    %383 = vector.extract_strided_slice %379 {offsets = [0, 0], sizes = [2, 64], strides = [1, 1]} : vector<2x96xf32> to vector<2x64xf32>
    %384 = vector.extract_strided_slice %382 {offsets = [0, 0], sizes = [2, 64], strides = [1, 1]} : vector<2x96xf32> to vector<2x64xf32>
    %385 = arith.addf %383, %384 : vector<2x64xf32>
    %386 = arith.negf %385 : vector<2x64xf32>
    %387 = math.exp %386 : vector<2x64xf32>
    %cst_110 = arith.constant 1.000000e+00 : f32
    %388 = vector.broadcast %cst_110 : f32 to vector<2x64xf32>
    %389 = arith.addf %388, %387 : vector<2x64xf32>
    %390 = arith.divf %388, %389 : vector<2x64xf32>
    %391 = vector.extract_strided_slice %390 {offsets = [0, 0], sizes = [2, 32], strides = [1, 1]} : vector<2x64xf32> to vector<2x32xf32>
    %392 = vector.extract_strided_slice %390 {offsets = [0, 32], sizes = [2, 32], strides = [1, 1]} : vector<2x64xf32> to vector<2x32xf32>
    %393 = vector.extract_strided_slice %379 {offsets = [0, 64], sizes = [2, 32], strides = [1, 1]} : vector<2x96xf32> to vector<2x32xf32>
    %394 = vector.extract_strided_slice %382 {offsets = [0, 64], sizes = [2, 32], strides = [1, 1]} : vector<2x96xf32> to vector<2x32xf32>
    %395 = arith.mulf %391, %394 : vector<2x32xf32>
    %396 = arith.addf %393, %395 : vector<2x32xf32>
    %397 = math.tanh %396 : vector<2x32xf32>
    %cst_111 = arith.constant 1.000000e+00 : f32
    %398 = vector.broadcast %cst_111 : f32 to vector<2x32xf32>
    %399 = arith.subf %398, %392 : vector<2x32xf32>
    %400 = arith.mulf %399, %397 : vector<2x32xf32>
    %401 = arith.mulf %392, %335 : vector<2x32xf32>
    %402 = arith.addf %400, %401 : vector<2x32xf32>
    %403 = arith.index_cast %c5_i32 : i32 to index
    %c0_112 = arith.constant 0 : index
    %c0_113 = arith.constant 0 : index
    %404 = vector.load %arg25[%403, %c0_112, %c0_113] : memref<8x2x32xf32, #tpu.memory_space<vmem>>, vector<1x2x32xf32>
    %405 = vector.shape_cast %404 : vector<1x2x32xf32> to vector<2x32xf32>
    %406 = vector.shape_cast %373 : vector<2x32xf32> to vector<1x2x32xf32>
    tpu.vector_store %arg25[%403, %c0_112, %c0_113], %406 {strides = array<i32>} : memref<8x2x32xf32, #tpu.memory_space<vmem>>, vector<1x2x32xf32>,
    %407 = arith.index_cast %344 : i32 to index
    %c0_114 = arith.constant 0 : index
    %c0_115 = arith.constant 0 : index
    %408 = vector.load %arg26[%407, %c0_114, %c0_115] : memref<8x2x32xf32, #tpu.memory_space<vmem>>, vector<1x2x32xf32>
    %409 = vector.shape_cast %408 : vector<1x2x32xf32> to vector<2x32xf32>
    %410 = vector.shape_cast %402 : vector<2x32xf32> to vector<1x2x32xf32>
    tpu.vector_store %arg26[%407, %c0_114, %c0_115], %410 {strides = array<i32>} : memref<8x2x32xf32, #tpu.memory_space<vmem>>, vector<1x2x32xf32>,
    %c6_i32 = arith.constant 6 : i32
    %c7_i32_116 = arith.constant 7 : i32
    %411 = arith.subi %c7_i32_116, %c6_i32 : i32
    %412 = arith.index_cast %c6_i32 : i32 to index
    %c0_117 = arith.constant 0 : index
    %c0_118 = arith.constant 0 : index
    %413 = vector.load %arg1[%412, %c0_117, %c0_118] : memref<8x2x80xf32, #tpu.memory_space<vmem>>, vector<1x2x80xf32>
    %414 = vector.shape_cast %413 : vector<1x2x80xf32> to vector<2x80xf32>
    %cst_119 = arith.constant dense<0.000000e+00> : vector<2x96xf32>
    %415 = tpu.matmul %414, %0, %cst_119 {dimension_numbers = #tpu.dot_dimension_numbers<[1], [0], [0], [1], [0, 0, 1, 1], [], []>} : vector<2x80xf32>, vector<80x96xf32>, vector<2x96xf32> -> vector<2x96xf32>
    %416 = vector.broadcast %2 : vector<1x96xf32> to vector<2x96xf32>
    %417 = arith.addf %416, %415 : vector<2x96xf32>
    %cst_120 = arith.constant dense<0.000000e+00> : vector<2x96xf32>
    %418 = tpu.matmul %373, %4, %cst_120 {dimension_numbers = #tpu.dot_dimension_numbers<[1], [0], [0], [1], [0, 0, 1, 1], [], []>} : vector<2x32xf32>, vector<32x96xf32>, vector<2x96xf32> -> vector<2x96xf32>
    %419 = vector.broadcast %6 : vector<1x96xf32> to vector<2x96xf32>
    %420 = arith.addf %418, %419 : vector<2x96xf32>
    %421 = vector.extract_strided_slice %417 {offsets = [0, 0], sizes = [2, 64], strides = [1, 1]} : vector<2x96xf32> to vector<2x64xf32>
    %422 = vector.extract_strided_slice %420 {offsets = [0, 0], sizes = [2, 64], strides = [1, 1]} : vector<2x96xf32> to vector<2x64xf32>
    %423 = arith.addf %421, %422 : vector<2x64xf32>
    %424 = arith.negf %423 : vector<2x64xf32>
    %425 = math.exp %424 : vector<2x64xf32>
    %cst_121 = arith.constant 1.000000e+00 : f32
    %426 = vector.broadcast %cst_121 : f32 to vector<2x64xf32>
    %427 = arith.addf %426, %425 : vector<2x64xf32>
    %428 = arith.divf %426, %427 : vector<2x64xf32>
    %429 = vector.extract_strided_slice %428 {offsets = [0, 0], sizes = [2, 32], strides = [1, 1]} : vector<2x64xf32> to vector<2x32xf32>
    %430 = vector.extract_strided_slice %428 {offsets = [0, 32], sizes = [2, 32], strides = [1, 1]} : vector<2x64xf32> to vector<2x32xf32>
    %431 = vector.extract_strided_slice %417 {offsets = [0, 64], sizes = [2, 32], strides = [1, 1]} : vector<2x96xf32> to vector<2x32xf32>
    %432 = vector.extract_strided_slice %420 {offsets = [0, 64], sizes = [2, 32], strides = [1, 1]} : vector<2x96xf32> to vector<2x32xf32>
    %433 = arith.mulf %429, %432 : vector<2x32xf32>
    %434 = arith.addf %431, %433 : vector<2x32xf32>
    %435 = math.tanh %434 : vector<2x32xf32>
    %cst_122 = arith.constant 1.000000e+00 : f32
    %436 = vector.broadcast %cst_122 : f32 to vector<2x32xf32>
    %437 = arith.subf %436, %430 : vector<2x32xf32>
    %438 = arith.mulf %437, %435 : vector<2x32xf32>
    %439 = arith.mulf %430, %373 : vector<2x32xf32>
    %440 = arith.addf %438, %439 : vector<2x32xf32>
    %441 = arith.index_cast %411 : i32 to index
    %c0_123 = arith.constant 0 : index
    %c0_124 = arith.constant 0 : index
    %442 = vector.load %arg1[%441, %c0_123, %c0_124] : memref<8x2x80xf32, #tpu.memory_space<vmem>>, vector<1x2x80xf32>
    %443 = vector.shape_cast %442 : vector<1x2x80xf32> to vector<2x80xf32>
    %cst_125 = arith.constant dense<0.000000e+00> : vector<2x96xf32>
    %444 = tpu.matmul %443, %1, %cst_125 {dimension_numbers = #tpu.dot_dimension_numbers<[1], [0], [0], [1], [0, 0, 1, 1], [], []>} : vector<2x80xf32>, vector<80x96xf32>, vector<2x96xf32> -> vector<2x96xf32>
    %445 = vector.broadcast %3 : vector<1x96xf32> to vector<2x96xf32>
    %446 = arith.addf %445, %444 : vector<2x96xf32>
    %cst_126 = arith.constant dense<0.000000e+00> : vector<2x96xf32>
    %447 = tpu.matmul %402, %5, %cst_126 {dimension_numbers = #tpu.dot_dimension_numbers<[1], [0], [0], [1], [0, 0, 1, 1], [], []>} : vector<2x32xf32>, vector<32x96xf32>, vector<2x96xf32> -> vector<2x96xf32>
    %448 = vector.broadcast %7 : vector<1x96xf32> to vector<2x96xf32>
    %449 = arith.addf %447, %448 : vector<2x96xf32>
    %450 = vector.extract_strided_slice %446 {offsets = [0, 0], sizes = [2, 64], strides = [1, 1]} : vector<2x96xf32> to vector<2x64xf32>
    %451 = vector.extract_strided_slice %449 {offsets = [0, 0], sizes = [2, 64], strides = [1, 1]} : vector<2x96xf32> to vector<2x64xf32>
    %452 = arith.addf %450, %451 : vector<2x64xf32>
    %453 = arith.negf %452 : vector<2x64xf32>
    %454 = math.exp %453 : vector<2x64xf32>
    %cst_127 = arith.constant 1.000000e+00 : f32
    %455 = vector.broadcast %cst_127 : f32 to vector<2x64xf32>
    %456 = arith.addf %455, %454 : vector<2x64xf32>
    %457 = arith.divf %455, %456 : vector<2x64xf32>
    %458 = vector.extract_strided_slice %457 {offsets = [0, 0], sizes = [2, 32], strides = [1, 1]} : vector<2x64xf32> to vector<2x32xf32>
    %459 = vector.extract_strided_slice %457 {offsets = [0, 32], sizes = [2, 32], strides = [1, 1]} : vector<2x64xf32> to vector<2x32xf32>
    %460 = vector.extract_strided_slice %446 {offsets = [0, 64], sizes = [2, 32], strides = [1, 1]} : vector<2x96xf32> to vector<2x32xf32>
    %461 = vector.extract_strided_slice %449 {offsets = [0, 64], sizes = [2, 32], strides = [1, 1]} : vector<2x96xf32> to vector<2x32xf32>
    %462 = arith.mulf %458, %461 : vector<2x32xf32>
    %463 = arith.addf %460, %462 : vector<2x32xf32>
    %464 = math.tanh %463 : vector<2x32xf32>
    %cst_128 = arith.constant 1.000000e+00 : f32
    %465 = vector.broadcast %cst_128 : f32 to vector<2x32xf32>
    %466 = arith.subf %465, %459 : vector<2x32xf32>
    %467 = arith.mulf %466, %464 : vector<2x32xf32>
    %468 = arith.mulf %459, %402 : vector<2x32xf32>
    %469 = arith.addf %467, %468 : vector<2x32xf32>
    %470 = arith.index_cast %c6_i32 : i32 to index
    %c0_129 = arith.constant 0 : index
    %c0_130 = arith.constant 0 : index
    %471 = vector.load %arg25[%470, %c0_129, %c0_130] : memref<8x2x32xf32, #tpu.memory_space<vmem>>, vector<1x2x32xf32>
    %472 = vector.shape_cast %471 : vector<1x2x32xf32> to vector<2x32xf32>
    %473 = vector.shape_cast %440 : vector<2x32xf32> to vector<1x2x32xf32>
    tpu.vector_store %arg25[%470, %c0_129, %c0_130], %473 {strides = array<i32>} : memref<8x2x32xf32, #tpu.memory_space<vmem>>, vector<1x2x32xf32>,
    %474 = arith.index_cast %411 : i32 to index
    %c0_131 = arith.constant 0 : index
    %c0_132 = arith.constant 0 : index
    %475 = vector.load %arg26[%474, %c0_131, %c0_132] : memref<8x2x32xf32, #tpu.memory_space<vmem>>, vector<1x2x32xf32>
    %476 = vector.shape_cast %475 : vector<1x2x32xf32> to vector<2x32xf32>
    %477 = vector.shape_cast %469 : vector<2x32xf32> to vector<1x2x32xf32>
    tpu.vector_store %arg26[%474, %c0_131, %c0_132], %477 {strides = array<i32>} : memref<8x2x32xf32, #tpu.memory_space<vmem>>, vector<1x2x32xf32>,
    %c7_i32_133 = arith.constant 7 : i32
    %c7_i32_134 = arith.constant 7 : i32
    %478 = arith.subi %c7_i32_134, %c7_i32_133 : i32
    %479 = arith.index_cast %c7_i32_133 : i32 to index
    %c0_135 = arith.constant 0 : index
    %c0_136 = arith.constant 0 : index
    %480 = vector.load %arg1[%479, %c0_135, %c0_136] : memref<8x2x80xf32, #tpu.memory_space<vmem>>, vector<1x2x80xf32>
    %481 = vector.shape_cast %480 : vector<1x2x80xf32> to vector<2x80xf32>
    %cst_137 = arith.constant dense<0.000000e+00> : vector<2x96xf32>
    %482 = tpu.matmul %481, %0, %cst_137 {dimension_numbers = #tpu.dot_dimension_numbers<[1], [0], [0], [1], [0, 0, 1, 1], [], []>} : vector<2x80xf32>, vector<80x96xf32>, vector<2x96xf32> -> vector<2x96xf32>
    %483 = vector.broadcast %2 : vector<1x96xf32> to vector<2x96xf32>
    %484 = arith.addf %483, %482 : vector<2x96xf32>
    %cst_138 = arith.constant dense<0.000000e+00> : vector<2x96xf32>
    %485 = tpu.matmul %440, %4, %cst_138 {dimension_numbers = #tpu.dot_dimension_numbers<[1], [0], [0], [1], [0, 0, 1, 1], [], []>} : vector<2x32xf32>, vector<32x96xf32>, vector<2x96xf32> -> vector<2x96xf32>
    %486 = vector.broadcast %6 : vector<1x96xf32> to vector<2x96xf32>
    %487 = arith.addf %485, %486 : vector<2x96xf32>
    %488 = vector.extract_strided_slice %484 {offsets = [0, 0], sizes = [2, 64], strides = [1, 1]} : vector<2x96xf32> to vector<2x64xf32>
    %489 = vector.extract_strided_slice %487 {offsets = [0, 0], sizes = [2, 64], strides = [1, 1]} : vector<2x96xf32> to vector<2x64xf32>
    %490 = arith.addf %488, %489 : vector<2x64xf32>
    %491 = arith.negf %490 : vector<2x64xf32>
    %492 = math.exp %491 : vector<2x64xf32>
    %cst_139 = arith.constant 1.000000e+00 : f32
    %493 = vector.broadcast %cst_139 : f32 to vector<2x64xf32>
    %494 = arith.addf %493, %492 : vector<2x64xf32>
    %495 = arith.divf %493, %494 : vector<2x64xf32>
    %496 = vector.extract_strided_slice %495 {offsets = [0, 0], sizes = [2, 32], strides = [1, 1]} : vector<2x64xf32> to vector<2x32xf32>
    %497 = vector.extract_strided_slice %495 {offsets = [0, 32], sizes = [2, 32], strides = [1, 1]} : vector<2x64xf32> to vector<2x32xf32>
    %498 = vector.extract_strided_slice %484 {offsets = [0, 64], sizes = [2, 32], strides = [1, 1]} : vector<2x96xf32> to vector<2x32xf32>
    %499 = vector.extract_strided_slice %487 {offsets = [0, 64], sizes = [2, 32], strides = [1, 1]} : vector<2x96xf32> to vector<2x32xf32>
    %500 = arith.mulf %496, %499 : vector<2x32xf32>
    %501 = arith.addf %498, %500 : vector<2x32xf32>
    %502 = math.tanh %501 : vector<2x32xf32>
    %cst_140 = arith.constant 1.000000e+00 : f32
    %503 = vector.broadcast %cst_140 : f32 to vector<2x32xf32>
    %504 = arith.subf %503, %497 : vector<2x32xf32>
    %505 = arith.mulf %504, %502 : vector<2x32xf32>
    %506 = arith.mulf %497, %440 : vector<2x32xf32>
    %507 = arith.addf %505, %506 : vector<2x32xf32>
    %508 = arith.index_cast %478 : i32 to index
    %c0_141 = arith.constant 0 : index
    %c0_142 = arith.constant 0 : index
    %509 = vector.load %arg1[%508, %c0_141, %c0_142] : memref<8x2x80xf32, #tpu.memory_space<vmem>>, vector<1x2x80xf32>
    %510 = vector.shape_cast %509 : vector<1x2x80xf32> to vector<2x80xf32>
    %cst_143 = arith.constant dense<0.000000e+00> : vector<2x96xf32>
    %511 = tpu.matmul %510, %1, %cst_143 {dimension_numbers = #tpu.dot_dimension_numbers<[1], [0], [0], [1], [0, 0, 1, 1], [], []>} : vector<2x80xf32>, vector<80x96xf32>, vector<2x96xf32> -> vector<2x96xf32>
    %512 = vector.broadcast %3 : vector<1x96xf32> to vector<2x96xf32>
    %513 = arith.addf %512, %511 : vector<2x96xf32>
    %cst_144 = arith.constant dense<0.000000e+00> : vector<2x96xf32>
    %514 = tpu.matmul %469, %5, %cst_144 {dimension_numbers = #tpu.dot_dimension_numbers<[1], [0], [0], [1], [0, 0, 1, 1], [], []>} : vector<2x32xf32>, vector<32x96xf32>, vector<2x96xf32> -> vector<2x96xf32>
    %515 = vector.broadcast %7 : vector<1x96xf32> to vector<2x96xf32>
    %516 = arith.addf %514, %515 : vector<2x96xf32>
    %517 = vector.extract_strided_slice %513 {offsets = [0, 0], sizes = [2, 64], strides = [1, 1]} : vector<2x96xf32> to vector<2x64xf32>
    %518 = vector.extract_strided_slice %516 {offsets = [0, 0], sizes = [2, 64], strides = [1, 1]} : vector<2x96xf32> to vector<2x64xf32>
    %519 = arith.addf %517, %518 : vector<2x64xf32>
    %520 = arith.negf %519 : vector<2x64xf32>
    %521 = math.exp %520 : vector<2x64xf32>
    %cst_145 = arith.constant 1.000000e+00 : f32
    %522 = vector.broadcast %cst_145 : f32 to vector<2x64xf32>
    %523 = arith.addf %522, %521 : vector<2x64xf32>
    %524 = arith.divf %522, %523 : vector<2x64xf32>
    %525 = vector.extract_strided_slice %524 {offsets = [0, 0], sizes = [2, 32], strides = [1, 1]} : vector<2x64xf32> to vector<2x32xf32>
    %526 = vector.extract_strided_slice %524 {offsets = [0, 32], sizes = [2, 32], strides = [1, 1]} : vector<2x64xf32> to vector<2x32xf32>
    %527 = vector.extract_strided_slice %513 {offsets = [0, 64], sizes = [2, 32], strides = [1, 1]} : vector<2x96xf32> to vector<2x32xf32>
    %528 = vector.extract_strided_slice %516 {offsets = [0, 64], sizes = [2, 32], strides = [1, 1]} : vector<2x96xf32> to vector<2x32xf32>
    %529 = arith.mulf %525, %528 : vector<2x32xf32>
    %530 = arith.addf %527, %529 : vector<2x32xf32>
    %531 = math.tanh %530 : vector<2x32xf32>
    %cst_146 = arith.constant 1.000000e+00 : f32
    %532 = vector.broadcast %cst_146 : f32 to vector<2x32xf32>
    %533 = arith.subf %532, %526 : vector<2x32xf32>
    %534 = arith.mulf %533, %531 : vector<2x32xf32>
    %535 = arith.mulf %526, %469 : vector<2x32xf32>
    %536 = arith.addf %534, %535 : vector<2x32xf32>
    %537 = arith.index_cast %c7_i32_133 : i32 to index
    %c0_147 = arith.constant 0 : index
    %c0_148 = arith.constant 0 : index
    %538 = vector.load %arg25[%537, %c0_147, %c0_148] : memref<8x2x32xf32, #tpu.memory_space<vmem>>, vector<1x2x32xf32>
    %539 = vector.shape_cast %538 : vector<1x2x32xf32> to vector<2x32xf32>
    %540 = vector.shape_cast %507 : vector<2x32xf32> to vector<1x2x32xf32>
    tpu.vector_store %arg25[%537, %c0_147, %c0_148], %540 {strides = array<i32>} : memref<8x2x32xf32, #tpu.memory_space<vmem>>, vector<1x2x32xf32>,
    %541 = arith.index_cast %478 : i32 to index
    %c0_149 = arith.constant 0 : index
    %c0_150 = arith.constant 0 : index
    %542 = vector.load %arg26[%541, %c0_149, %c0_150] : memref<8x2x32xf32, #tpu.memory_space<vmem>>, vector<1x2x32xf32>
    %543 = vector.shape_cast %542 : vector<1x2x32xf32> to vector<2x32xf32>
    %544 = vector.shape_cast %536 : vector<2x32xf32> to vector<1x2x32xf32>
    tpu.vector_store %arg26[%541, %c0_149, %c0_150], %544 {strides = array<i32>} : memref<8x2x32xf32, #tpu.memory_space<vmem>>, vector<1x2x32xf32>,
    %c8_i32 = arith.constant 8 : i32
    %c0_151 = arith.constant 0 : index
    %c0_152 = arith.constant 0 : index
    %545 = vector.load %arg10[%c0_151, %c0_152] : memref<64x96xf32, #tpu.memory_space<vmem>>, vector<64x96xf32>
    %546 = vector.extract_strided_slice %545 {offsets = [0, 0], sizes = [32, 96], strides = [1, 1]} : vector<64x96xf32> to vector<32x96xf32>
    %547 = vector.extract_strided_slice %545 {offsets = [32, 0], sizes = [32, 96], strides = [1, 1]} : vector<64x96xf32> to vector<32x96xf32>
    %c0_153 = arith.constant 0 : index
    %c0_154 = arith.constant 0 : index
    %548 = vector.load %arg14[%c0_153, %c0_154] : memref<64x96xf32, #tpu.memory_space<vmem>>, vector<64x96xf32>
    %549 = vector.extract_strided_slice %548 {offsets = [0, 0], sizes = [32, 96], strides = [1, 1]} : vector<64x96xf32> to vector<32x96xf32>
    %550 = vector.extract_strided_slice %548 {offsets = [32, 0], sizes = [32, 96], strides = [1, 1]} : vector<64x96xf32> to vector<32x96xf32>
    %c0_155 = arith.constant 0 : index
    %c0_156 = arith.constant 0 : index
    %551 = vector.load %arg11[%c0_155, %c0_156] : memref<1x96xf32, #tpu.memory_space<vmem>>, vector<1x96xf32>
    %c0_157 = arith.constant 0 : index
    %c0_158 = arith.constant 0 : index
    %552 = vector.load %arg15[%c0_157, %c0_158] : memref<1x96xf32, #tpu.memory_space<vmem>>, vector<1x96xf32>
    %c0_159 = arith.constant 0 : index
    %c0_160 = arith.constant 0 : index
    %553 = vector.load %arg12[%c0_159, %c0_160] : memref<32x96xf32, #tpu.memory_space<vmem>>, vector<32x96xf32>
    %c0_161 = arith.constant 0 : index
    %c0_162 = arith.constant 0 : index
    %554 = vector.load %arg16[%c0_161, %c0_162] : memref<32x96xf32, #tpu.memory_space<vmem>>, vector<32x96xf32>
    %c0_163 = arith.constant 0 : index
    %c0_164 = arith.constant 0 : index
    %555 = vector.load %arg13[%c0_163, %c0_164] : memref<1x96xf32, #tpu.memory_space<vmem>>, vector<1x96xf32>
    %c0_165 = arith.constant 0 : index
    %c0_166 = arith.constant 0 : index
    %556 = vector.load %arg17[%c0_165, %c0_166] : memref<1x96xf32, #tpu.memory_space<vmem>>, vector<1x96xf32>
    %cst_167 = arith.constant 0.000000e+00 : f32
    %557 = vector.broadcast %cst_167 : f32 to vector<2x32xf32>
    %c0_i32_168 = arith.constant 0 : i32
    %c7_i32_169 = arith.constant 7 : i32
    %558 = arith.subi %c7_i32_169, %c0_i32_168 : i32
    %559 = arith.index_cast %c0_i32_168 : i32 to index
    %c0_170 = arith.constant 0 : index
    %c0_171 = arith.constant 0 : index
    %560 = vector.load %arg25[%559, %c0_170, %c0_171] : memref<8x2x32xf32, #tpu.memory_space<vmem>>, vector<1x2x32xf32>
    %561 = vector.shape_cast %560 : vector<1x2x32xf32> to vector<2x32xf32>
    %cst_172 = arith.constant dense<0.000000e+00> : vector<2x96xf32>
    %562 = tpu.matmul %561, %546, %cst_172 {dimension_numbers = #tpu.dot_dimension_numbers<[1], [0], [0], [1], [0, 0, 1, 1], [], []>} : vector<2x32xf32>, vector<32x96xf32>, vector<2x96xf32> -> vector<2x96xf32>
    %563 = vector.broadcast %551 : vector<1x96xf32> to vector<2x96xf32>
    %564 = arith.addf %563, %562 : vector<2x96xf32>
    %565 = arith.index_cast %c0_i32_168 : i32 to index
    %c0_173 = arith.constant 0 : index
    %c0_174 = arith.constant 0 : index
    %566 = vector.load %arg26[%565, %c0_173, %c0_174] : memref<8x2x32xf32, #tpu.memory_space<vmem>>, vector<1x2x32xf32>
    %567 = vector.shape_cast %566 : vector<1x2x32xf32> to vector<2x32xf32>
    %cst_175 = arith.constant dense<0.000000e+00> : vector<2x96xf32>
    %568 = tpu.matmul %567, %547, %cst_175 {dimension_numbers = #tpu.dot_dimension_numbers<[1], [0], [0], [1], [0, 0, 1, 1], [], []>} : vector<2x32xf32>, vector<32x96xf32>, vector<2x96xf32> -> vector<2x96xf32>
    %569 = arith.addf %564, %568 : vector<2x96xf32>
    %cst_176 = arith.constant dense<0.000000e+00> : vector<2x96xf32>
    %570 = tpu.matmul %557, %553, %cst_176 {dimension_numbers = #tpu.dot_dimension_numbers<[1], [0], [0], [1], [0, 0, 1, 1], [], []>} : vector<2x32xf32>, vector<32x96xf32>, vector<2x96xf32> -> vector<2x96xf32>
    %571 = vector.broadcast %555 : vector<1x96xf32> to vector<2x96xf32>
    %572 = arith.addf %570, %571 : vector<2x96xf32>
    %573 = vector.extract_strided_slice %569 {offsets = [0, 0], sizes = [2, 64], strides = [1, 1]} : vector<2x96xf32> to vector<2x64xf32>
    %574 = vector.extract_strided_slice %572 {offsets = [0, 0], sizes = [2, 64], strides = [1, 1]} : vector<2x96xf32> to vector<2x64xf32>
    %575 = arith.addf %573, %574 : vector<2x64xf32>
    %576 = arith.negf %575 : vector<2x64xf32>
    %577 = math.exp %576 : vector<2x64xf32>
    %cst_177 = arith.constant 1.000000e+00 : f32
    %578 = vector.broadcast %cst_177 : f32 to vector<2x64xf32>
    %579 = arith.addf %578, %577 : vector<2x64xf32>
    %580 = arith.divf %578, %579 : vector<2x64xf32>
    %581 = vector.extract_strided_slice %580 {offsets = [0, 0], sizes = [2, 32], strides = [1, 1]} : vector<2x64xf32> to vector<2x32xf32>
    %582 = vector.extract_strided_slice %580 {offsets = [0, 32], sizes = [2, 32], strides = [1, 1]} : vector<2x64xf32> to vector<2x32xf32>
    %583 = vector.extract_strided_slice %569 {offsets = [0, 64], sizes = [2, 32], strides = [1, 1]} : vector<2x96xf32> to vector<2x32xf32>
    %584 = vector.extract_strided_slice %572 {offsets = [0, 64], sizes = [2, 32], strides = [1, 1]} : vector<2x96xf32> to vector<2x32xf32>
    %585 = arith.mulf %581, %584 : vector<2x32xf32>
    %586 = arith.addf %583, %585 : vector<2x32xf32>
    %587 = math.tanh %586 : vector<2x32xf32>
    %cst_178 = arith.constant 1.000000e+00 : f32
    %588 = vector.broadcast %cst_178 : f32 to vector<2x32xf32>
    %589 = arith.subf %588, %582 : vector<2x32xf32>
    %590 = arith.mulf %589, %587 : vector<2x32xf32>
    %591 = arith.mulf %582, %557 : vector<2x32xf32>
    %592 = arith.addf %590, %591 : vector<2x32xf32>
    %593 = arith.index_cast %558 : i32 to index
    %c0_179 = arith.constant 0 : index
    %c0_180 = arith.constant 0 : index
    %594 = vector.load %arg25[%593, %c0_179, %c0_180] : memref<8x2x32xf32, #tpu.memory_space<vmem>>, vector<1x2x32xf32>
    %595 = vector.shape_cast %594 : vector<1x2x32xf32> to vector<2x32xf32>
    %cst_181 = arith.constant dense<0.000000e+00> : vector<2x96xf32>
    %596 = tpu.matmul %595, %549, %cst_181 {dimension_numbers = #tpu.dot_dimension_numbers<[1], [0], [0], [1], [0, 0, 1, 1], [], []>} : vector<2x32xf32>, vector<32x96xf32>, vector<2x96xf32> -> vector<2x96xf32>
    %597 = vector.broadcast %552 : vector<1x96xf32> to vector<2x96xf32>
    %598 = arith.addf %597, %596 : vector<2x96xf32>
    %599 = arith.index_cast %558 : i32 to index
    %c0_182 = arith.constant 0 : index
    %c0_183 = arith.constant 0 : index
    %600 = vector.load %arg26[%599, %c0_182, %c0_183] : memref<8x2x32xf32, #tpu.memory_space<vmem>>, vector<1x2x32xf32>
    %601 = vector.shape_cast %600 : vector<1x2x32xf32> to vector<2x32xf32>
    %cst_184 = arith.constant dense<0.000000e+00> : vector<2x96xf32>
    %602 = tpu.matmul %601, %550, %cst_184 {dimension_numbers = #tpu.dot_dimension_numbers<[1], [0], [0], [1], [0, 0, 1, 1], [], []>} : vector<2x32xf32>, vector<32x96xf32>, vector<2x96xf32> -> vector<2x96xf32>
    %603 = arith.addf %598, %602 : vector<2x96xf32>
    %cst_185 = arith.constant dense<0.000000e+00> : vector<2x96xf32>
    %604 = tpu.matmul %557, %554, %cst_185 {dimension_numbers = #tpu.dot_dimension_numbers<[1], [0], [0], [1], [0, 0, 1, 1], [], []>} : vector<2x32xf32>, vector<32x96xf32>, vector<2x96xf32> -> vector<2x96xf32>
    %605 = vector.broadcast %556 : vector<1x96xf32> to vector<2x96xf32>
    %606 = arith.addf %604, %605 : vector<2x96xf32>
    %607 = vector.extract_strided_slice %603 {offsets = [0, 0], sizes = [2, 64], strides = [1, 1]} : vector<2x96xf32> to vector<2x64xf32>
    %608 = vector.extract_strided_slice %606 {offsets = [0, 0], sizes = [2, 64], strides = [1, 1]} : vector<2x96xf32> to vector<2x64xf32>
    %609 = arith.addf %607, %608 : vector<2x64xf32>
    %610 = arith.negf %609 : vector<2x64xf32>
    %611 = math.exp %610 : vector<2x64xf32>
    %cst_186 = arith.constant 1.000000e+00 : f32
    %612 = vector.broadcast %cst_186 : f32 to vector<2x64xf32>
    %613 = arith.addf %612, %611 : vector<2x64xf32>
    %614 = arith.divf %612, %613 : vector<2x64xf32>
    %615 = vector.extract_strided_slice %614 {offsets = [0, 0], sizes = [2, 32], strides = [1, 1]} : vector<2x64xf32> to vector<2x32xf32>
    %616 = vector.extract_strided_slice %614 {offsets = [0, 32], sizes = [2, 32], strides = [1, 1]} : vector<2x64xf32> to vector<2x32xf32>
    %617 = vector.extract_strided_slice %603 {offsets = [0, 64], sizes = [2, 32], strides = [1, 1]} : vector<2x96xf32> to vector<2x32xf32>
    %618 = vector.extract_strided_slice %606 {offsets = [0, 64], sizes = [2, 32], strides = [1, 1]} : vector<2x96xf32> to vector<2x32xf32>
    %619 = arith.mulf %615, %618 : vector<2x32xf32>
    %620 = arith.addf %617, %619 : vector<2x32xf32>
    %621 = math.tanh %620 : vector<2x32xf32>
    %cst_187 = arith.constant 1.000000e+00 : f32
    %622 = vector.broadcast %cst_187 : f32 to vector<2x32xf32>
    %623 = arith.subf %622, %616 : vector<2x32xf32>
    %624 = arith.mulf %623, %621 : vector<2x32xf32>
    %625 = arith.mulf %616, %557 : vector<2x32xf32>
    %626 = arith.addf %624, %625 : vector<2x32xf32>
    %627 = arith.index_cast %c0_i32_168 : i32 to index
    %c0_188 = arith.constant 0 : index
    %c0_189 = arith.constant 0 : index
    %628 = vector.load %arg27[%627, %c0_188, %c0_189] : memref<8x2x32xf32, #tpu.memory_space<vmem>>, vector<1x2x32xf32>
    %629 = vector.shape_cast %628 : vector<1x2x32xf32> to vector<2x32xf32>
    %630 = vector.shape_cast %592 : vector<2x32xf32> to vector<1x2x32xf32>
    tpu.vector_store %arg27[%627, %c0_188, %c0_189], %630 {strides = array<i32>} : memref<8x2x32xf32, #tpu.memory_space<vmem>>, vector<1x2x32xf32>,
    %631 = arith.index_cast %558 : i32 to index
    %c0_190 = arith.constant 0 : index
    %c0_191 = arith.constant 0 : index
    %632 = vector.load %arg28[%631, %c0_190, %c0_191] : memref<8x2x32xf32, #tpu.memory_space<vmem>>, vector<1x2x32xf32>
    %633 = vector.shape_cast %632 : vector<1x2x32xf32> to vector<2x32xf32>
    %634 = vector.shape_cast %626 : vector<2x32xf32> to vector<1x2x32xf32>
    tpu.vector_store %arg28[%631, %c0_190, %c0_191], %634 {strides = array<i32>} : memref<8x2x32xf32, #tpu.memory_space<vmem>>, vector<1x2x32xf32>,
    %c1_i32_192 = arith.constant 1 : i32
    %c7_i32_193 = arith.constant 7 : i32
    %635 = arith.subi %c7_i32_193, %c1_i32_192 : i32
    %636 = arith.index_cast %c1_i32_192 : i32 to index
    %c0_194 = arith.constant 0 : index
    %c0_195 = arith.constant 0 : index
    %637 = vector.load %arg25[%636, %c0_194, %c0_195] : memref<8x2x32xf32, #tpu.memory_space<vmem>>, vector<1x2x32xf32>
    %638 = vector.shape_cast %637 : vector<1x2x32xf32> to vector<2x32xf32>
    %cst_196 = arith.constant dense<0.000000e+00> : vector<2x96xf32>
    %639 = tpu.matmul %638, %546, %cst_196 {dimension_numbers = #tpu.dot_dimension_numbers<[1], [0], [0], [1], [0, 0, 1, 1], [], []>} : vector<2x32xf32>, vector<32x96xf32>, vector<2x96xf32> -> vector<2x96xf32>
    %640 = vector.broadcast %551 : vector<1x96xf32> to vector<2x96xf32>
    %641 = arith.addf %640, %639 : vector<2x96xf32>
    %642 = arith.index_cast %c1_i32_192 : i32 to index
    %c0_197 = arith.constant 0 : index
    %c0_198 = arith.constant 0 : index
    %643 = vector.load %arg26[%642, %c0_197, %c0_198] : memref<8x2x32xf32, #tpu.memory_space<vmem>>, vector<1x2x32xf32>
    %644 = vector.shape_cast %643 : vector<1x2x32xf32> to vector<2x32xf32>
    %cst_199 = arith.constant dense<0.000000e+00> : vector<2x96xf32>
    %645 = tpu.matmul %644, %547, %cst_199 {dimension_numbers = #tpu.dot_dimension_numbers<[1], [0], [0], [1], [0, 0, 1, 1], [], []>} : vector<2x32xf32>, vector<32x96xf32>, vector<2x96xf32> -> vector<2x96xf32>
    %646 = arith.addf %641, %645 : vector<2x96xf32>
    %cst_200 = arith.constant dense<0.000000e+00> : vector<2x96xf32>
    %647 = tpu.matmul %592, %553, %cst_200 {dimension_numbers = #tpu.dot_dimension_numbers<[1], [0], [0], [1], [0, 0, 1, 1], [], []>} : vector<2x32xf32>, vector<32x96xf32>, vector<2x96xf32> -> vector<2x96xf32>
    %648 = vector.broadcast %555 : vector<1x96xf32> to vector<2x96xf32>
    %649 = arith.addf %647, %648 : vector<2x96xf32>
    %650 = vector.extract_strided_slice %646 {offsets = [0, 0], sizes = [2, 64], strides = [1, 1]} : vector<2x96xf32> to vector<2x64xf32>
    %651 = vector.extract_strided_slice %649 {offsets = [0, 0], sizes = [2, 64], strides = [1, 1]} : vector<2x96xf32> to vector<2x64xf32>
    %652 = arith.addf %650, %651 : vector<2x64xf32>
    %653 = arith.negf %652 : vector<2x64xf32>
    %654 = math.exp %653 : vector<2x64xf32>
    %cst_201 = arith.constant 1.000000e+00 : f32
    %655 = vector.broadcast %cst_201 : f32 to vector<2x64xf32>
    %656 = arith.addf %655, %654 : vector<2x64xf32>
    %657 = arith.divf %655, %656 : vector<2x64xf32>
    %658 = vector.extract_strided_slice %657 {offsets = [0, 0], sizes = [2, 32], strides = [1, 1]} : vector<2x64xf32> to vector<2x32xf32>
    %659 = vector.extract_strided_slice %657 {offsets = [0, 32], sizes = [2, 32], strides = [1, 1]} : vector<2x64xf32> to vector<2x32xf32>
    %660 = vector.extract_strided_slice %646 {offsets = [0, 64], sizes = [2, 32], strides = [1, 1]} : vector<2x96xf32> to vector<2x32xf32>
    %661 = vector.extract_strided_slice %649 {offsets = [0, 64], sizes = [2, 32], strides = [1, 1]} : vector<2x96xf32> to vector<2x32xf32>
    %662 = arith.mulf %658, %661 : vector<2x32xf32>
    %663 = arith.addf %660, %662 : vector<2x32xf32>
    %664 = math.tanh %663 : vector<2x32xf32>
    %cst_202 = arith.constant 1.000000e+00 : f32
    %665 = vector.broadcast %cst_202 : f32 to vector<2x32xf32>
    %666 = arith.subf %665, %659 : vector<2x32xf32>
    %667 = arith.mulf %666, %664 : vector<2x32xf32>
    %668 = arith.mulf %659, %592 : vector<2x32xf32>
    %669 = arith.addf %667, %668 : vector<2x32xf32>
    %670 = arith.index_cast %635 : i32 to index
    %c0_203 = arith.constant 0 : index
    %c0_204 = arith.constant 0 : index
    %671 = vector.load %arg25[%670, %c0_203, %c0_204] : memref<8x2x32xf32, #tpu.memory_space<vmem>>, vector<1x2x32xf32>
    %672 = vector.shape_cast %671 : vector<1x2x32xf32> to vector<2x32xf32>
    %cst_205 = arith.constant dense<0.000000e+00> : vector<2x96xf32>
    %673 = tpu.matmul %672, %549, %cst_205 {dimension_numbers = #tpu.dot_dimension_numbers<[1], [0], [0], [1], [0, 0, 1, 1], [], []>} : vector<2x32xf32>, vector<32x96xf32>, vector<2x96xf32> -> vector<2x96xf32>
    %674 = vector.broadcast %552 : vector<1x96xf32> to vector<2x96xf32>
    %675 = arith.addf %674, %673 : vector<2x96xf32>
    %676 = arith.index_cast %635 : i32 to index
    %c0_206 = arith.constant 0 : index
    %c0_207 = arith.constant 0 : index
    %677 = vector.load %arg26[%676, %c0_206, %c0_207] : memref<8x2x32xf32, #tpu.memory_space<vmem>>, vector<1x2x32xf32>
    %678 = vector.shape_cast %677 : vector<1x2x32xf32> to vector<2x32xf32>
    %cst_208 = arith.constant dense<0.000000e+00> : vector<2x96xf32>
    %679 = tpu.matmul %678, %550, %cst_208 {dimension_numbers = #tpu.dot_dimension_numbers<[1], [0], [0], [1], [0, 0, 1, 1], [], []>} : vector<2x32xf32>, vector<32x96xf32>, vector<2x96xf32> -> vector<2x96xf32>
    %680 = arith.addf %675, %679 : vector<2x96xf32>
    %cst_209 = arith.constant dense<0.000000e+00> : vector<2x96xf32>
    %681 = tpu.matmul %626, %554, %cst_209 {dimension_numbers = #tpu.dot_dimension_numbers<[1], [0], [0], [1], [0, 0, 1, 1], [], []>} : vector<2x32xf32>, vector<32x96xf32>, vector<2x96xf32> -> vector<2x96xf32>
    %682 = vector.broadcast %556 : vector<1x96xf32> to vector<2x96xf32>
    %683 = arith.addf %681, %682 : vector<2x96xf32>
    %684 = vector.extract_strided_slice %680 {offsets = [0, 0], sizes = [2, 64], strides = [1, 1]} : vector<2x96xf32> to vector<2x64xf32>
    %685 = vector.extract_strided_slice %683 {offsets = [0, 0], sizes = [2, 64], strides = [1, 1]} : vector<2x96xf32> to vector<2x64xf32>
    %686 = arith.addf %684, %685 : vector<2x64xf32>
    %687 = arith.negf %686 : vector<2x64xf32>
    %688 = math.exp %687 : vector<2x64xf32>
    %cst_210 = arith.constant 1.000000e+00 : f32
    %689 = vector.broadcast %cst_210 : f32 to vector<2x64xf32>
    %690 = arith.addf %689, %688 : vector<2x64xf32>
    %691 = arith.divf %689, %690 : vector<2x64xf32>
    %692 = vector.extract_strided_slice %691 {offsets = [0, 0], sizes = [2, 32], strides = [1, 1]} : vector<2x64xf32> to vector<2x32xf32>
    %693 = vector.extract_strided_slice %691 {offsets = [0, 32], sizes = [2, 32], strides = [1, 1]} : vector<2x64xf32> to vector<2x32xf32>
    %694 = vector.extract_strided_slice %680 {offsets = [0, 64], sizes = [2, 32], strides = [1, 1]} : vector<2x96xf32> to vector<2x32xf32>
    %695 = vector.extract_strided_slice %683 {offsets = [0, 64], sizes = [2, 32], strides = [1, 1]} : vector<2x96xf32> to vector<2x32xf32>
    %696 = arith.mulf %692, %695 : vector<2x32xf32>
    %697 = arith.addf %694, %696 : vector<2x32xf32>
    %698 = math.tanh %697 : vector<2x32xf32>
    %cst_211 = arith.constant 1.000000e+00 : f32
    %699 = vector.broadcast %cst_211 : f32 to vector<2x32xf32>
    %700 = arith.subf %699, %693 : vector<2x32xf32>
    %701 = arith.mulf %700, %698 : vector<2x32xf32>
    %702 = arith.mulf %693, %626 : vector<2x32xf32>
    %703 = arith.addf %701, %702 : vector<2x32xf32>
    %704 = arith.index_cast %c1_i32_192 : i32 to index
    %c0_212 = arith.constant 0 : index
    %c0_213 = arith.constant 0 : index
    %705 = vector.load %arg27[%704, %c0_212, %c0_213] : memref<8x2x32xf32, #tpu.memory_space<vmem>>, vector<1x2x32xf32>
    %706 = vector.shape_cast %705 : vector<1x2x32xf32> to vector<2x32xf32>
    %707 = vector.shape_cast %669 : vector<2x32xf32> to vector<1x2x32xf32>
    tpu.vector_store %arg27[%704, %c0_212, %c0_213], %707 {strides = array<i32>} : memref<8x2x32xf32, #tpu.memory_space<vmem>>, vector<1x2x32xf32>,
    %708 = arith.index_cast %635 : i32 to index
    %c0_214 = arith.constant 0 : index
    %c0_215 = arith.constant 0 : index
    %709 = vector.load %arg28[%708, %c0_214, %c0_215] : memref<8x2x32xf32, #tpu.memory_space<vmem>>, vector<1x2x32xf32>
    %710 = vector.shape_cast %709 : vector<1x2x32xf32> to vector<2x32xf32>
    %711 = vector.shape_cast %703 : vector<2x32xf32> to vector<1x2x32xf32>
    tpu.vector_store %arg28[%708, %c0_214, %c0_215], %711 {strides = array<i32>} : memref<8x2x32xf32, #tpu.memory_space<vmem>>, vector<1x2x32xf32>,
    %c2_i32_216 = arith.constant 2 : i32
    %c7_i32_217 = arith.constant 7 : i32
    %712 = arith.subi %c7_i32_217, %c2_i32_216 : i32
    %713 = arith.index_cast %c2_i32_216 : i32 to index
    %c0_218 = arith.constant 0 : index
    %c0_219 = arith.constant 0 : index
    %714 = vector.load %arg25[%713, %c0_218, %c0_219] : memref<8x2x32xf32, #tpu.memory_space<vmem>>, vector<1x2x32xf32>
    %715 = vector.shape_cast %714 : vector<1x2x32xf32> to vector<2x32xf32>
    %cst_220 = arith.constant dense<0.000000e+00> : vector<2x96xf32>
    %716 = tpu.matmul %715, %546, %cst_220 {dimension_numbers = #tpu.dot_dimension_numbers<[1], [0], [0], [1], [0, 0, 1, 1], [], []>} : vector<2x32xf32>, vector<32x96xf32>, vector<2x96xf32> -> vector<2x96xf32>
    %717 = vector.broadcast %551 : vector<1x96xf32> to vector<2x96xf32>
    %718 = arith.addf %717, %716 : vector<2x96xf32>
    %719 = arith.index_cast %c2_i32_216 : i32 to index
    %c0_221 = arith.constant 0 : index
    %c0_222 = arith.constant 0 : index
    %720 = vector.load %arg26[%719, %c0_221, %c0_222] : memref<8x2x32xf32, #tpu.memory_space<vmem>>, vector<1x2x32xf32>
    %721 = vector.shape_cast %720 : vector<1x2x32xf32> to vector<2x32xf32>
    %cst_223 = arith.constant dense<0.000000e+00> : vector<2x96xf32>
    %722 = tpu.matmul %721, %547, %cst_223 {dimension_numbers = #tpu.dot_dimension_numbers<[1], [0], [0], [1], [0, 0, 1, 1], [], []>} : vector<2x32xf32>, vector<32x96xf32>, vector<2x96xf32> -> vector<2x96xf32>
    %723 = arith.addf %718, %722 : vector<2x96xf32>
    %cst_224 = arith.constant dense<0.000000e+00> : vector<2x96xf32>
    %724 = tpu.matmul %669, %553, %cst_224 {dimension_numbers = #tpu.dot_dimension_numbers<[1], [0], [0], [1], [0, 0, 1, 1], [], []>} : vector<2x32xf32>, vector<32x96xf32>, vector<2x96xf32> -> vector<2x96xf32>
    %725 = vector.broadcast %555 : vector<1x96xf32> to vector<2x96xf32>
    %726 = arith.addf %724, %725 : vector<2x96xf32>
    %727 = vector.extract_strided_slice %723 {offsets = [0, 0], sizes = [2, 64], strides = [1, 1]} : vector<2x96xf32> to vector<2x64xf32>
    %728 = vector.extract_strided_slice %726 {offsets = [0, 0], sizes = [2, 64], strides = [1, 1]} : vector<2x96xf32> to vector<2x64xf32>
    %729 = arith.addf %727, %728 : vector<2x64xf32>
    %730 = arith.negf %729 : vector<2x64xf32>
    %731 = math.exp %730 : vector<2x64xf32>
    %cst_225 = arith.constant 1.000000e+00 : f32
    %732 = vector.broadcast %cst_225 : f32 to vector<2x64xf32>
    %733 = arith.addf %732, %731 : vector<2x64xf32>
    %734 = arith.divf %732, %733 : vector<2x64xf32>
    %735 = vector.extract_strided_slice %734 {offsets = [0, 0], sizes = [2, 32], strides = [1, 1]} : vector<2x64xf32> to vector<2x32xf32>
    %736 = vector.extract_strided_slice %734 {offsets = [0, 32], sizes = [2, 32], strides = [1, 1]} : vector<2x64xf32> to vector<2x32xf32>
    %737 = vector.extract_strided_slice %723 {offsets = [0, 64], sizes = [2, 32], strides = [1, 1]} : vector<2x96xf32> to vector<2x32xf32>
    %738 = vector.extract_strided_slice %726 {offsets = [0, 64], sizes = [2, 32], strides = [1, 1]} : vector<2x96xf32> to vector<2x32xf32>
    %739 = arith.mulf %735, %738 : vector<2x32xf32>
    %740 = arith.addf %737, %739 : vector<2x32xf32>
    %741 = math.tanh %740 : vector<2x32xf32>
    %cst_226 = arith.constant 1.000000e+00 : f32
    %742 = vector.broadcast %cst_226 : f32 to vector<2x32xf32>
    %743 = arith.subf %742, %736 : vector<2x32xf32>
    %744 = arith.mulf %743, %741 : vector<2x32xf32>
    %745 = arith.mulf %736, %669 : vector<2x32xf32>
    %746 = arith.addf %744, %745 : vector<2x32xf32>
    %747 = arith.index_cast %712 : i32 to index
    %c0_227 = arith.constant 0 : index
    %c0_228 = arith.constant 0 : index
    %748 = vector.load %arg25[%747, %c0_227, %c0_228] : memref<8x2x32xf32, #tpu.memory_space<vmem>>, vector<1x2x32xf32>
    %749 = vector.shape_cast %748 : vector<1x2x32xf32> to vector<2x32xf32>
    %cst_229 = arith.constant dense<0.000000e+00> : vector<2x96xf32>
    %750 = tpu.matmul %749, %549, %cst_229 {dimension_numbers = #tpu.dot_dimension_numbers<[1], [0], [0], [1], [0, 0, 1, 1], [], []>} : vector<2x32xf32>, vector<32x96xf32>, vector<2x96xf32> -> vector<2x96xf32>
    %751 = vector.broadcast %552 : vector<1x96xf32> to vector<2x96xf32>
    %752 = arith.addf %751, %750 : vector<2x96xf32>
    %753 = arith.index_cast %712 : i32 to index
    %c0_230 = arith.constant 0 : index
    %c0_231 = arith.constant 0 : index
    %754 = vector.load %arg26[%753, %c0_230, %c0_231] : memref<8x2x32xf32, #tpu.memory_space<vmem>>, vector<1x2x32xf32>
    %755 = vector.shape_cast %754 : vector<1x2x32xf32> to vector<2x32xf32>
    %cst_232 = arith.constant dense<0.000000e+00> : vector<2x96xf32>
    %756 = tpu.matmul %755, %550, %cst_232 {dimension_numbers = #tpu.dot_dimension_numbers<[1], [0], [0], [1], [0, 0, 1, 1], [], []>} : vector<2x32xf32>, vector<32x96xf32>, vector<2x96xf32> -> vector<2x96xf32>
    %757 = arith.addf %752, %756 : vector<2x96xf32>
    %cst_233 = arith.constant dense<0.000000e+00> : vector<2x96xf32>
    %758 = tpu.matmul %703, %554, %cst_233 {dimension_numbers = #tpu.dot_dimension_numbers<[1], [0], [0], [1], [0, 0, 1, 1], [], []>} : vector<2x32xf32>, vector<32x96xf32>, vector<2x96xf32> -> vector<2x96xf32>
    %759 = vector.broadcast %556 : vector<1x96xf32> to vector<2x96xf32>
    %760 = arith.addf %758, %759 : vector<2x96xf32>
    %761 = vector.extract_strided_slice %757 {offsets = [0, 0], sizes = [2, 64], strides = [1, 1]} : vector<2x96xf32> to vector<2x64xf32>
    %762 = vector.extract_strided_slice %760 {offsets = [0, 0], sizes = [2, 64], strides = [1, 1]} : vector<2x96xf32> to vector<2x64xf32>
    %763 = arith.addf %761, %762 : vector<2x64xf32>
    %764 = arith.negf %763 : vector<2x64xf32>
    %765 = math.exp %764 : vector<2x64xf32>
    %cst_234 = arith.constant 1.000000e+00 : f32
    %766 = vector.broadcast %cst_234 : f32 to vector<2x64xf32>
    %767 = arith.addf %766, %765 : vector<2x64xf32>
    %768 = arith.divf %766, %767 : vector<2x64xf32>
    %769 = vector.extract_strided_slice %768 {offsets = [0, 0], sizes = [2, 32], strides = [1, 1]} : vector<2x64xf32> to vector<2x32xf32>
    %770 = vector.extract_strided_slice %768 {offsets = [0, 32], sizes = [2, 32], strides = [1, 1]} : vector<2x64xf32> to vector<2x32xf32>
    %771 = vector.extract_strided_slice %757 {offsets = [0, 64], sizes = [2, 32], strides = [1, 1]} : vector<2x96xf32> to vector<2x32xf32>
    %772 = vector.extract_strided_slice %760 {offsets = [0, 64], sizes = [2, 32], strides = [1, 1]} : vector<2x96xf32> to vector<2x32xf32>
    %773 = arith.mulf %769, %772 : vector<2x32xf32>
    %774 = arith.addf %771, %773 : vector<2x32xf32>
    %775 = math.tanh %774 : vector<2x32xf32>
    %cst_235 = arith.constant 1.000000e+00 : f32
    %776 = vector.broadcast %cst_235 : f32 to vector<2x32xf32>
    %777 = arith.subf %776, %770 : vector<2x32xf32>
    %778 = arith.mulf %777, %775 : vector<2x32xf32>
    %779 = arith.mulf %770, %703 : vector<2x32xf32>
    %780 = arith.addf %778, %779 : vector<2x32xf32>
    %781 = arith.index_cast %c2_i32_216 : i32 to index
    %c0_236 = arith.constant 0 : index
    %c0_237 = arith.constant 0 : index
    %782 = vector.load %arg27[%781, %c0_236, %c0_237] : memref<8x2x32xf32, #tpu.memory_space<vmem>>, vector<1x2x32xf32>
    %783 = vector.shape_cast %782 : vector<1x2x32xf32> to vector<2x32xf32>
    %784 = vector.shape_cast %746 : vector<2x32xf32> to vector<1x2x32xf32>
    tpu.vector_store %arg27[%781, %c0_236, %c0_237], %784 {strides = array<i32>} : memref<8x2x32xf32, #tpu.memory_space<vmem>>, vector<1x2x32xf32>,
    %785 = arith.index_cast %712 : i32 to index
    %c0_238 = arith.constant 0 : index
    %c0_239 = arith.constant 0 : index
    %786 = vector.load %arg28[%785, %c0_238, %c0_239] : memref<8x2x32xf32, #tpu.memory_space<vmem>>, vector<1x2x32xf32>
    %787 = vector.shape_cast %786 : vector<1x2x32xf32> to vector<2x32xf32>
    %788 = vector.shape_cast %780 : vector<2x32xf32> to vector<1x2x32xf32>
    tpu.vector_store %arg28[%785, %c0_238, %c0_239], %788 {strides = array<i32>} : memref<8x2x32xf32, #tpu.memory_space<vmem>>, vector<1x2x32xf32>,
    %c3_i32_240 = arith.constant 3 : i32
    %c7_i32_241 = arith.constant 7 : i32
    %789 = arith.subi %c7_i32_241, %c3_i32_240 : i32
    %790 = arith.index_cast %c3_i32_240 : i32 to index
    %c0_242 = arith.constant 0 : index
    %c0_243 = arith.constant 0 : index
    %791 = vector.load %arg25[%790, %c0_242, %c0_243] : memref<8x2x32xf32, #tpu.memory_space<vmem>>, vector<1x2x32xf32>
    %792 = vector.shape_cast %791 : vector<1x2x32xf32> to vector<2x32xf32>
    %cst_244 = arith.constant dense<0.000000e+00> : vector<2x96xf32>
    %793 = tpu.matmul %792, %546, %cst_244 {dimension_numbers = #tpu.dot_dimension_numbers<[1], [0], [0], [1], [0, 0, 1, 1], [], []>} : vector<2x32xf32>, vector<32x96xf32>, vector<2x96xf32> -> vector<2x96xf32>
    %794 = vector.broadcast %551 : vector<1x96xf32> to vector<2x96xf32>
    %795 = arith.addf %794, %793 : vector<2x96xf32>
    %796 = arith.index_cast %c3_i32_240 : i32 to index
    %c0_245 = arith.constant 0 : index
    %c0_246 = arith.constant 0 : index
    %797 = vector.load %arg26[%796, %c0_245, %c0_246] : memref<8x2x32xf32, #tpu.memory_space<vmem>>, vector<1x2x32xf32>
    %798 = vector.shape_cast %797 : vector<1x2x32xf32> to vector<2x32xf32>
    %cst_247 = arith.constant dense<0.000000e+00> : vector<2x96xf32>
    %799 = tpu.matmul %798, %547, %cst_247 {dimension_numbers = #tpu.dot_dimension_numbers<[1], [0], [0], [1], [0, 0, 1, 1], [], []>} : vector<2x32xf32>, vector<32x96xf32>, vector<2x96xf32> -> vector<2x96xf32>
    %800 = arith.addf %795, %799 : vector<2x96xf32>
    %cst_248 = arith.constant dense<0.000000e+00> : vector<2x96xf32>
    %801 = tpu.matmul %746, %553, %cst_248 {dimension_numbers = #tpu.dot_dimension_numbers<[1], [0], [0], [1], [0, 0, 1, 1], [], []>} : vector<2x32xf32>, vector<32x96xf32>, vector<2x96xf32> -> vector<2x96xf32>
    %802 = vector.broadcast %555 : vector<1x96xf32> to vector<2x96xf32>
    %803 = arith.addf %801, %802 : vector<2x96xf32>
    %804 = vector.extract_strided_slice %800 {offsets = [0, 0], sizes = [2, 64], strides = [1, 1]} : vector<2x96xf32> to vector<2x64xf32>
    %805 = vector.extract_strided_slice %803 {offsets = [0, 0], sizes = [2, 64], strides = [1, 1]} : vector<2x96xf32> to vector<2x64xf32>
    %806 = arith.addf %804, %805 : vector<2x64xf32>
    %807 = arith.negf %806 : vector<2x64xf32>
    %808 = math.exp %807 : vector<2x64xf32>
    %cst_249 = arith.constant 1.000000e+00 : f32
    %809 = vector.broadcast %cst_249 : f32 to vector<2x64xf32>
    %810 = arith.addf %809, %808 : vector<2x64xf32>
    %811 = arith.divf %809, %810 : vector<2x64xf32>
    %812 = vector.extract_strided_slice %811 {offsets = [0, 0], sizes = [2, 32], strides = [1, 1]} : vector<2x64xf32> to vector<2x32xf32>
    %813 = vector.extract_strided_slice %811 {offsets = [0, 32], sizes = [2, 32], strides = [1, 1]} : vector<2x64xf32> to vector<2x32xf32>
    %814 = vector.extract_strided_slice %800 {offsets = [0, 64], sizes = [2, 32], strides = [1, 1]} : vector<2x96xf32> to vector<2x32xf32>
    %815 = vector.extract_strided_slice %803 {offsets = [0, 64], sizes = [2, 32], strides = [1, 1]} : vector<2x96xf32> to vector<2x32xf32>
    %816 = arith.mulf %812, %815 : vector<2x32xf32>
    %817 = arith.addf %814, %816 : vector<2x32xf32>
    %818 = math.tanh %817 : vector<2x32xf32>
    %cst_250 = arith.constant 1.000000e+00 : f32
    %819 = vector.broadcast %cst_250 : f32 to vector<2x32xf32>
    %820 = arith.subf %819, %813 : vector<2x32xf32>
    %821 = arith.mulf %820, %818 : vector<2x32xf32>
    %822 = arith.mulf %813, %746 : vector<2x32xf32>
    %823 = arith.addf %821, %822 : vector<2x32xf32>
    %824 = arith.index_cast %789 : i32 to index
    %c0_251 = arith.constant 0 : index
    %c0_252 = arith.constant 0 : index
    %825 = vector.load %arg25[%824, %c0_251, %c0_252] : memref<8x2x32xf32, #tpu.memory_space<vmem>>, vector<1x2x32xf32>
    %826 = vector.shape_cast %825 : vector<1x2x32xf32> to vector<2x32xf32>
    %cst_253 = arith.constant dense<0.000000e+00> : vector<2x96xf32>
    %827 = tpu.matmul %826, %549, %cst_253 {dimension_numbers = #tpu.dot_dimension_numbers<[1], [0], [0], [1], [0, 0, 1, 1], [], []>} : vector<2x32xf32>, vector<32x96xf32>, vector<2x96xf32> -> vector<2x96xf32>
    %828 = vector.broadcast %552 : vector<1x96xf32> to vector<2x96xf32>
    %829 = arith.addf %828, %827 : vector<2x96xf32>
    %830 = arith.index_cast %789 : i32 to index
    %c0_254 = arith.constant 0 : index
    %c0_255 = arith.constant 0 : index
    %831 = vector.load %arg26[%830, %c0_254, %c0_255] : memref<8x2x32xf32, #tpu.memory_space<vmem>>, vector<1x2x32xf32>
    %832 = vector.shape_cast %831 : vector<1x2x32xf32> to vector<2x32xf32>
    %cst_256 = arith.constant dense<0.000000e+00> : vector<2x96xf32>
    %833 = tpu.matmul %832, %550, %cst_256 {dimension_numbers = #tpu.dot_dimension_numbers<[1], [0], [0], [1], [0, 0, 1, 1], [], []>} : vector<2x32xf32>, vector<32x96xf32>, vector<2x96xf32> -> vector<2x96xf32>
    %834 = arith.addf %829, %833 : vector<2x96xf32>
    %cst_257 = arith.constant dense<0.000000e+00> : vector<2x96xf32>
    %835 = tpu.matmul %780, %554, %cst_257 {dimension_numbers = #tpu.dot_dimension_numbers<[1], [0], [0], [1], [0, 0, 1, 1], [], []>} : vector<2x32xf32>, vector<32x96xf32>, vector<2x96xf32> -> vector<2x96xf32>
    %836 = vector.broadcast %556 : vector<1x96xf32> to vector<2x96xf32>
    %837 = arith.addf %835, %836 : vector<2x96xf32>
    %838 = vector.extract_strided_slice %834 {offsets = [0, 0], sizes = [2, 64], strides = [1, 1]} : vector<2x96xf32> to vector<2x64xf32>
    %839 = vector.extract_strided_slice %837 {offsets = [0, 0], sizes = [2, 64], strides = [1, 1]} : vector<2x96xf32> to vector<2x64xf32>
    %840 = arith.addf %838, %839 : vector<2x64xf32>
    %841 = arith.negf %840 : vector<2x64xf32>
    %842 = math.exp %841 : vector<2x64xf32>
    %cst_258 = arith.constant 1.000000e+00 : f32
    %843 = vector.broadcast %cst_258 : f32 to vector<2x64xf32>
    %844 = arith.addf %843, %842 : vector<2x64xf32>
    %845 = arith.divf %843, %844 : vector<2x64xf32>
    %846 = vector.extract_strided_slice %845 {offsets = [0, 0], sizes = [2, 32], strides = [1, 1]} : vector<2x64xf32> to vector<2x32xf32>
    %847 = vector.extract_strided_slice %845 {offsets = [0, 32], sizes = [2, 32], strides = [1, 1]} : vector<2x64xf32> to vector<2x32xf32>
    %848 = vector.extract_strided_slice %834 {offsets = [0, 64], sizes = [2, 32], strides = [1, 1]} : vector<2x96xf32> to vector<2x32xf32>
    %849 = vector.extract_strided_slice %837 {offsets = [0, 64], sizes = [2, 32], strides = [1, 1]} : vector<2x96xf32> to vector<2x32xf32>
    %850 = arith.mulf %846, %849 : vector<2x32xf32>
    %851 = arith.addf %848, %850 : vector<2x32xf32>
    %852 = math.tanh %851 : vector<2x32xf32>
    %cst_259 = arith.constant 1.000000e+00 : f32
    %853 = vector.broadcast %cst_259 : f32 to vector<2x32xf32>
    %854 = arith.subf %853, %847 : vector<2x32xf32>
    %855 = arith.mulf %854, %852 : vector<2x32xf32>
    %856 = arith.mulf %847, %780 : vector<2x32xf32>
    %857 = arith.addf %855, %856 : vector<2x32xf32>
    %858 = arith.index_cast %c3_i32_240 : i32 to index
    %c0_260 = arith.constant 0 : index
    %c0_261 = arith.constant 0 : index
    %859 = vector.load %arg27[%858, %c0_260, %c0_261] : memref<8x2x32xf32, #tpu.memory_space<vmem>>, vector<1x2x32xf32>
    %860 = vector.shape_cast %859 : vector<1x2x32xf32> to vector<2x32xf32>
    %861 = vector.shape_cast %823 : vector<2x32xf32> to vector<1x2x32xf32>
    tpu.vector_store %arg27[%858, %c0_260, %c0_261], %861 {strides = array<i32>} : memref<8x2x32xf32, #tpu.memory_space<vmem>>, vector<1x2x32xf32>,
    %862 = arith.index_cast %789 : i32 to index
    %c0_262 = arith.constant 0 : index
    %c0_263 = arith.constant 0 : index
    %863 = vector.load %arg28[%862, %c0_262, %c0_263] : memref<8x2x32xf32, #tpu.memory_space<vmem>>, vector<1x2x32xf32>
    %864 = vector.shape_cast %863 : vector<1x2x32xf32> to vector<2x32xf32>
    %865 = vector.shape_cast %857 : vector<2x32xf32> to vector<1x2x32xf32>
    tpu.vector_store %arg28[%862, %c0_262, %c0_263], %865 {strides = array<i32>} : memref<8x2x32xf32, #tpu.memory_space<vmem>>, vector<1x2x32xf32>,
    %c4_i32_264 = arith.constant 4 : i32
    %c7_i32_265 = arith.constant 7 : i32
    %866 = arith.subi %c7_i32_265, %c4_i32_264 : i32
    %867 = arith.index_cast %c4_i32_264 : i32 to index
    %c0_266 = arith.constant 0 : index
    %c0_267 = arith.constant 0 : index
    %868 = vector.load %arg25[%867, %c0_266, %c0_267] : memref<8x2x32xf32, #tpu.memory_space<vmem>>, vector<1x2x32xf32>
    %869 = vector.shape_cast %868 : vector<1x2x32xf32> to vector<2x32xf32>
    %cst_268 = arith.constant dense<0.000000e+00> : vector<2x96xf32>
    %870 = tpu.matmul %869, %546, %cst_268 {dimension_numbers = #tpu.dot_dimension_numbers<[1], [0], [0], [1], [0, 0, 1, 1], [], []>} : vector<2x32xf32>, vector<32x96xf32>, vector<2x96xf32> -> vector<2x96xf32>
    %871 = vector.broadcast %551 : vector<1x96xf32> to vector<2x96xf32>
    %872 = arith.addf %871, %870 : vector<2x96xf32>
    %873 = arith.index_cast %c4_i32_264 : i32 to index
    %c0_269 = arith.constant 0 : index
    %c0_270 = arith.constant 0 : index
    %874 = vector.load %arg26[%873, %c0_269, %c0_270] : memref<8x2x32xf32, #tpu.memory_space<vmem>>, vector<1x2x32xf32>
    %875 = vector.shape_cast %874 : vector<1x2x32xf32> to vector<2x32xf32>
    %cst_271 = arith.constant dense<0.000000e+00> : vector<2x96xf32>
    %876 = tpu.matmul %875, %547, %cst_271 {dimension_numbers = #tpu.dot_dimension_numbers<[1], [0], [0], [1], [0, 0, 1, 1], [], []>} : vector<2x32xf32>, vector<32x96xf32>, vector<2x96xf32> -> vector<2x96xf32>
    %877 = arith.addf %872, %876 : vector<2x96xf32>
    %cst_272 = arith.constant dense<0.000000e+00> : vector<2x96xf32>
    %878 = tpu.matmul %823, %553, %cst_272 {dimension_numbers = #tpu.dot_dimension_numbers<[1], [0], [0], [1], [0, 0, 1, 1], [], []>} : vector<2x32xf32>, vector<32x96xf32>, vector<2x96xf32> -> vector<2x96xf32>
    %879 = vector.broadcast %555 : vector<1x96xf32> to vector<2x96xf32>
    %880 = arith.addf %878, %879 : vector<2x96xf32>
    %881 = vector.extract_strided_slice %877 {offsets = [0, 0], sizes = [2, 64], strides = [1, 1]} : vector<2x96xf32> to vector<2x64xf32>
    %882 = vector.extract_strided_slice %880 {offsets = [0, 0], sizes = [2, 64], strides = [1, 1]} : vector<2x96xf32> to vector<2x64xf32>
    %883 = arith.addf %881, %882 : vector<2x64xf32>
    %884 = arith.negf %883 : vector<2x64xf32>
    %885 = math.exp %884 : vector<2x64xf32>
    %cst_273 = arith.constant 1.000000e+00 : f32
    %886 = vector.broadcast %cst_273 : f32 to vector<2x64xf32>
    %887 = arith.addf %886, %885 : vector<2x64xf32>
    %888 = arith.divf %886, %887 : vector<2x64xf32>
    %889 = vector.extract_strided_slice %888 {offsets = [0, 0], sizes = [2, 32], strides = [1, 1]} : vector<2x64xf32> to vector<2x32xf32>
    %890 = vector.extract_strided_slice %888 {offsets = [0, 32], sizes = [2, 32], strides = [1, 1]} : vector<2x64xf32> to vector<2x32xf32>
    %891 = vector.extract_strided_slice %877 {offsets = [0, 64], sizes = [2, 32], strides = [1, 1]} : vector<2x96xf32> to vector<2x32xf32>
    %892 = vector.extract_strided_slice %880 {offsets = [0, 64], sizes = [2, 32], strides = [1, 1]} : vector<2x96xf32> to vector<2x32xf32>
    %893 = arith.mulf %889, %892 : vector<2x32xf32>
    %894 = arith.addf %891, %893 : vector<2x32xf32>
    %895 = math.tanh %894 : vector<2x32xf32>
    %cst_274 = arith.constant 1.000000e+00 : f32
    %896 = vector.broadcast %cst_274 : f32 to vector<2x32xf32>
    %897 = arith.subf %896, %890 : vector<2x32xf32>
    %898 = arith.mulf %897, %895 : vector<2x32xf32>
    %899 = arith.mulf %890, %823 : vector<2x32xf32>
    %900 = arith.addf %898, %899 : vector<2x32xf32>
    %901 = arith.index_cast %866 : i32 to index
    %c0_275 = arith.constant 0 : index
    %c0_276 = arith.constant 0 : index
    %902 = vector.load %arg25[%901, %c0_275, %c0_276] : memref<8x2x32xf32, #tpu.memory_space<vmem>>, vector<1x2x32xf32>
    %903 = vector.shape_cast %902 : vector<1x2x32xf32> to vector<2x32xf32>
    %cst_277 = arith.constant dense<0.000000e+00> : vector<2x96xf32>
    %904 = tpu.matmul %903, %549, %cst_277 {dimension_numbers = #tpu.dot_dimension_numbers<[1], [0], [0], [1], [0, 0, 1, 1], [], []>} : vector<2x32xf32>, vector<32x96xf32>, vector<2x96xf32> -> vector<2x96xf32>
    %905 = vector.broadcast %552 : vector<1x96xf32> to vector<2x96xf32>
    %906 = arith.addf %905, %904 : vector<2x96xf32>
    %907 = arith.index_cast %866 : i32 to index
    %c0_278 = arith.constant 0 : index
    %c0_279 = arith.constant 0 : index
    %908 = vector.load %arg26[%907, %c0_278, %c0_279] : memref<8x2x32xf32, #tpu.memory_space<vmem>>, vector<1x2x32xf32>
    %909 = vector.shape_cast %908 : vector<1x2x32xf32> to vector<2x32xf32>
    %cst_280 = arith.constant dense<0.000000e+00> : vector<2x96xf32>
    %910 = tpu.matmul %909, %550, %cst_280 {dimension_numbers = #tpu.dot_dimension_numbers<[1], [0], [0], [1], [0, 0, 1, 1], [], []>} : vector<2x32xf32>, vector<32x96xf32>, vector<2x96xf32> -> vector<2x96xf32>
    %911 = arith.addf %906, %910 : vector<2x96xf32>
    %cst_281 = arith.constant dense<0.000000e+00> : vector<2x96xf32>
    %912 = tpu.matmul %857, %554, %cst_281 {dimension_numbers = #tpu.dot_dimension_numbers<[1], [0], [0], [1], [0, 0, 1, 1], [], []>} : vector<2x32xf32>, vector<32x96xf32>, vector<2x96xf32> -> vector<2x96xf32>
    %913 = vector.broadcast %556 : vector<1x96xf32> to vector<2x96xf32>
    %914 = arith.addf %912, %913 : vector<2x96xf32>
    %915 = vector.extract_strided_slice %911 {offsets = [0, 0], sizes = [2, 64], strides = [1, 1]} : vector<2x96xf32> to vector<2x64xf32>
    %916 = vector.extract_strided_slice %914 {offsets = [0, 0], sizes = [2, 64], strides = [1, 1]} : vector<2x96xf32> to vector<2x64xf32>
    %917 = arith.addf %915, %916 : vector<2x64xf32>
    %918 = arith.negf %917 : vector<2x64xf32>
    %919 = math.exp %918 : vector<2x64xf32>
    %cst_282 = arith.constant 1.000000e+00 : f32
    %920 = vector.broadcast %cst_282 : f32 to vector<2x64xf32>
    %921 = arith.addf %920, %919 : vector<2x64xf32>
    %922 = arith.divf %920, %921 : vector<2x64xf32>
    %923 = vector.extract_strided_slice %922 {offsets = [0, 0], sizes = [2, 32], strides = [1, 1]} : vector<2x64xf32> to vector<2x32xf32>
    %924 = vector.extract_strided_slice %922 {offsets = [0, 32], sizes = [2, 32], strides = [1, 1]} : vector<2x64xf32> to vector<2x32xf32>
    %925 = vector.extract_strided_slice %911 {offsets = [0, 64], sizes = [2, 32], strides = [1, 1]} : vector<2x96xf32> to vector<2x32xf32>
    %926 = vector.extract_strided_slice %914 {offsets = [0, 64], sizes = [2, 32], strides = [1, 1]} : vector<2x96xf32> to vector<2x32xf32>
    %927 = arith.mulf %923, %926 : vector<2x32xf32>
    %928 = arith.addf %925, %927 : vector<2x32xf32>
    %929 = math.tanh %928 : vector<2x32xf32>
    %cst_283 = arith.constant 1.000000e+00 : f32
    %930 = vector.broadcast %cst_283 : f32 to vector<2x32xf32>
    %931 = arith.subf %930, %924 : vector<2x32xf32>
    %932 = arith.mulf %931, %929 : vector<2x32xf32>
    %933 = arith.mulf %924, %857 : vector<2x32xf32>
    %934 = arith.addf %932, %933 : vector<2x32xf32>
    %935 = arith.index_cast %c4_i32_264 : i32 to index
    %c0_284 = arith.constant 0 : index
    %c0_285 = arith.constant 0 : index
    %936 = vector.load %arg27[%935, %c0_284, %c0_285] : memref<8x2x32xf32, #tpu.memory_space<vmem>>, vector<1x2x32xf32>
    %937 = vector.shape_cast %936 : vector<1x2x32xf32> to vector<2x32xf32>
    %938 = vector.shape_cast %900 : vector<2x32xf32> to vector<1x2x32xf32>
    tpu.vector_store %arg27[%935, %c0_284, %c0_285], %938 {strides = array<i32>} : memref<8x2x32xf32, #tpu.memory_space<vmem>>, vector<1x2x32xf32>,
    %939 = arith.index_cast %866 : i32 to index
    %c0_286 = arith.constant 0 : index
    %c0_287 = arith.constant 0 : index
    %940 = vector.load %arg28[%939, %c0_286, %c0_287] : memref<8x2x32xf32, #tpu.memory_space<vmem>>, vector<1x2x32xf32>
    %941 = vector.shape_cast %940 : vector<1x2x32xf32> to vector<2x32xf32>
    %942 = vector.shape_cast %934 : vector<2x32xf32> to vector<1x2x32xf32>
    tpu.vector_store %arg28[%939, %c0_286, %c0_287], %942 {strides = array<i32>} : memref<8x2x32xf32, #tpu.memory_space<vmem>>, vector<1x2x32xf32>,
    %c5_i32_288 = arith.constant 5 : i32
    %c7_i32_289 = arith.constant 7 : i32
    %943 = arith.subi %c7_i32_289, %c5_i32_288 : i32
    %944 = arith.index_cast %c5_i32_288 : i32 to index
    %c0_290 = arith.constant 0 : index
    %c0_291 = arith.constant 0 : index
    %945 = vector.load %arg25[%944, %c0_290, %c0_291] : memref<8x2x32xf32, #tpu.memory_space<vmem>>, vector<1x2x32xf32>
    %946 = vector.shape_cast %945 : vector<1x2x32xf32> to vector<2x32xf32>
    %cst_292 = arith.constant dense<0.000000e+00> : vector<2x96xf32>
    %947 = tpu.matmul %946, %546, %cst_292 {dimension_numbers = #tpu.dot_dimension_numbers<[1], [0], [0], [1], [0, 0, 1, 1], [], []>} : vector<2x32xf32>, vector<32x96xf32>, vector<2x96xf32> -> vector<2x96xf32>
    %948 = vector.broadcast %551 : vector<1x96xf32> to vector<2x96xf32>
    %949 = arith.addf %948, %947 : vector<2x96xf32>
    %950 = arith.index_cast %c5_i32_288 : i32 to index
    %c0_293 = arith.constant 0 : index
    %c0_294 = arith.constant 0 : index
    %951 = vector.load %arg26[%950, %c0_293, %c0_294] : memref<8x2x32xf32, #tpu.memory_space<vmem>>, vector<1x2x32xf32>
    %952 = vector.shape_cast %951 : vector<1x2x32xf32> to vector<2x32xf32>
    %cst_295 = arith.constant dense<0.000000e+00> : vector<2x96xf32>
    %953 = tpu.matmul %952, %547, %cst_295 {dimension_numbers = #tpu.dot_dimension_numbers<[1], [0], [0], [1], [0, 0, 1, 1], [], []>} : vector<2x32xf32>, vector<32x96xf32>, vector<2x96xf32> -> vector<2x96xf32>
    %954 = arith.addf %949, %953 : vector<2x96xf32>
    %cst_296 = arith.constant dense<0.000000e+00> : vector<2x96xf32>
    %955 = tpu.matmul %900, %553, %cst_296 {dimension_numbers = #tpu.dot_dimension_numbers<[1], [0], [0], [1], [0, 0, 1, 1], [], []>} : vector<2x32xf32>, vector<32x96xf32>, vector<2x96xf32> -> vector<2x96xf32>
    %956 = vector.broadcast %555 : vector<1x96xf32> to vector<2x96xf32>
    %957 = arith.addf %955, %956 : vector<2x96xf32>
    %958 = vector.extract_strided_slice %954 {offsets = [0, 0], sizes = [2, 64], strides = [1, 1]} : vector<2x96xf32> to vector<2x64xf32>
    %959 = vector.extract_strided_slice %957 {offsets = [0, 0], sizes = [2, 64], strides = [1, 1]} : vector<2x96xf32> to vector<2x64xf32>
    %960 = arith.addf %958, %959 : vector<2x64xf32>
    %961 = arith.negf %960 : vector<2x64xf32>
    %962 = math.exp %961 : vector<2x64xf32>
    %cst_297 = arith.constant 1.000000e+00 : f32
    %963 = vector.broadcast %cst_297 : f32 to vector<2x64xf32>
    %964 = arith.addf %963, %962 : vector<2x64xf32>
    %965 = arith.divf %963, %964 : vector<2x64xf32>
    %966 = vector.extract_strided_slice %965 {offsets = [0, 0], sizes = [2, 32], strides = [1, 1]} : vector<2x64xf32> to vector<2x32xf32>
    %967 = vector.extract_strided_slice %965 {offsets = [0, 32], sizes = [2, 32], strides = [1, 1]} : vector<2x64xf32> to vector<2x32xf32>
    %968 = vector.extract_strided_slice %954 {offsets = [0, 64], sizes = [2, 32], strides = [1, 1]} : vector<2x96xf32> to vector<2x32xf32>
    %969 = vector.extract_strided_slice %957 {offsets = [0, 64], sizes = [2, 32], strides = [1, 1]} : vector<2x96xf32> to vector<2x32xf32>
    %970 = arith.mulf %966, %969 : vector<2x32xf32>
    %971 = arith.addf %968, %970 : vector<2x32xf32>
    %972 = math.tanh %971 : vector<2x32xf32>
    %cst_298 = arith.constant 1.000000e+00 : f32
    %973 = vector.broadcast %cst_298 : f32 to vector<2x32xf32>
    %974 = arith.subf %973, %967 : vector<2x32xf32>
    %975 = arith.mulf %974, %972 : vector<2x32xf32>
    %976 = arith.mulf %967, %900 : vector<2x32xf32>
    %977 = arith.addf %975, %976 : vector<2x32xf32>
    %978 = arith.index_cast %943 : i32 to index
    %c0_299 = arith.constant 0 : index
    %c0_300 = arith.constant 0 : index
    %979 = vector.load %arg25[%978, %c0_299, %c0_300] : memref<8x2x32xf32, #tpu.memory_space<vmem>>, vector<1x2x32xf32>
    %980 = vector.shape_cast %979 : vector<1x2x32xf32> to vector<2x32xf32>
    %cst_301 = arith.constant dense<0.000000e+00> : vector<2x96xf32>
    %981 = tpu.matmul %980, %549, %cst_301 {dimension_numbers = #tpu.dot_dimension_numbers<[1], [0], [0], [1], [0, 0, 1, 1], [], []>} : vector<2x32xf32>, vector<32x96xf32>, vector<2x96xf32> -> vector<2x96xf32>
    %982 = vector.broadcast %552 : vector<1x96xf32> to vector<2x96xf32>
    %983 = arith.addf %982, %981 : vector<2x96xf32>
    %984 = arith.index_cast %943 : i32 to index
    %c0_302 = arith.constant 0 : index
    %c0_303 = arith.constant 0 : index
    %985 = vector.load %arg26[%984, %c0_302, %c0_303] : memref<8x2x32xf32, #tpu.memory_space<vmem>>, vector<1x2x32xf32>
    %986 = vector.shape_cast %985 : vector<1x2x32xf32> to vector<2x32xf32>
    %cst_304 = arith.constant dense<0.000000e+00> : vector<2x96xf32>
    %987 = tpu.matmul %986, %550, %cst_304 {dimension_numbers = #tpu.dot_dimension_numbers<[1], [0], [0], [1], [0, 0, 1, 1], [], []>} : vector<2x32xf32>, vector<32x96xf32>, vector<2x96xf32> -> vector<2x96xf32>
    %988 = arith.addf %983, %987 : vector<2x96xf32>
    %cst_305 = arith.constant dense<0.000000e+00> : vector<2x96xf32>
    %989 = tpu.matmul %934, %554, %cst_305 {dimension_numbers = #tpu.dot_dimension_numbers<[1], [0], [0], [1], [0, 0, 1, 1], [], []>} : vector<2x32xf32>, vector<32x96xf32>, vector<2x96xf32> -> vector<2x96xf32>
    %990 = vector.broadcast %556 : vector<1x96xf32> to vector<2x96xf32>
    %991 = arith.addf %989, %990 : vector<2x96xf32>
    %992 = vector.extract_strided_slice %988 {offsets = [0, 0], sizes = [2, 64], strides = [1, 1]} : vector<2x96xf32> to vector<2x64xf32>
    %993 = vector.extract_strided_slice %991 {offsets = [0, 0], sizes = [2, 64], strides = [1, 1]} : vector<2x96xf32> to vector<2x64xf32>
    %994 = arith.addf %992, %993 : vector<2x64xf32>
    %995 = arith.negf %994 : vector<2x64xf32>
    %996 = math.exp %995 : vector<2x64xf32>
    %cst_306 = arith.constant 1.000000e+00 : f32
    %997 = vector.broadcast %cst_306 : f32 to vector<2x64xf32>
    %998 = arith.addf %997, %996 : vector<2x64xf32>
    %999 = arith.divf %997, %998 : vector<2x64xf32>
    %1000 = vector.extract_strided_slice %999 {offsets = [0, 0], sizes = [2, 32], strides = [1, 1]} : vector<2x64xf32> to vector<2x32xf32>
    %1001 = vector.extract_strided_slice %999 {offsets = [0, 32], sizes = [2, 32], strides = [1, 1]} : vector<2x64xf32> to vector<2x32xf32>
    %1002 = vector.extract_strided_slice %988 {offsets = [0, 64], sizes = [2, 32], strides = [1, 1]} : vector<2x96xf32> to vector<2x32xf32>
    %1003 = vector.extract_strided_slice %991 {offsets = [0, 64], sizes = [2, 32], strides = [1, 1]} : vector<2x96xf32> to vector<2x32xf32>
    %1004 = arith.mulf %1000, %1003 : vector<2x32xf32>
    %1005 = arith.addf %1002, %1004 : vector<2x32xf32>
    %1006 = math.tanh %1005 : vector<2x32xf32>
    %cst_307 = arith.constant 1.000000e+00 : f32
    %1007 = vector.broadcast %cst_307 : f32 to vector<2x32xf32>
    %1008 = arith.subf %1007, %1001 : vector<2x32xf32>
    %1009 = arith.mulf %1008, %1006 : vector<2x32xf32>
    %1010 = arith.mulf %1001, %934 : vector<2x32xf32>
    %1011 = arith.addf %1009, %1010 : vector<2x32xf32>
    %1012 = arith.index_cast %c5_i32_288 : i32 to index
    %c0_308 = arith.constant 0 : index
    %c0_309 = arith.constant 0 : index
    %1013 = vector.load %arg27[%1012, %c0_308, %c0_309] : memref<8x2x32xf32, #tpu.memory_space<vmem>>, vector<1x2x32xf32>
    %1014 = vector.shape_cast %1013 : vector<1x2x32xf32> to vector<2x32xf32>
    %1015 = vector.shape_cast %977 : vector<2x32xf32> to vector<1x2x32xf32>
    tpu.vector_store %arg27[%1012, %c0_308, %c0_309], %1015 {strides = array<i32>} : memref<8x2x32xf32, #tpu.memory_space<vmem>>, vector<1x2x32xf32>,
    %1016 = arith.index_cast %943 : i32 to index
    %c0_310 = arith.constant 0 : index
    %c0_311 = arith.constant 0 : index
    %1017 = vector.load %arg28[%1016, %c0_310, %c0_311] : memref<8x2x32xf32, #tpu.memory_space<vmem>>, vector<1x2x32xf32>
    %1018 = vector.shape_cast %1017 : vector<1x2x32xf32> to vector<2x32xf32>
    %1019 = vector.shape_cast %1011 : vector<2x32xf32> to vector<1x2x32xf32>
    tpu.vector_store %arg28[%1016, %c0_310, %c0_311], %1019 {strides = array<i32>} : memref<8x2x32xf32, #tpu.memory_space<vmem>>, vector<1x2x32xf32>,
    %c6_i32_312 = arith.constant 6 : i32
    %c7_i32_313 = arith.constant 7 : i32
    %1020 = arith.subi %c7_i32_313, %c6_i32_312 : i32
    %1021 = arith.index_cast %c6_i32_312 : i32 to index
    %c0_314 = arith.constant 0 : index
    %c0_315 = arith.constant 0 : index
    %1022 = vector.load %arg25[%1021, %c0_314, %c0_315] : memref<8x2x32xf32, #tpu.memory_space<vmem>>, vector<1x2x32xf32>
    %1023 = vector.shape_cast %1022 : vector<1x2x32xf32> to vector<2x32xf32>
    %cst_316 = arith.constant dense<0.000000e+00> : vector<2x96xf32>
    %1024 = tpu.matmul %1023, %546, %cst_316 {dimension_numbers = #tpu.dot_dimension_numbers<[1], [0], [0], [1], [0, 0, 1, 1], [], []>} : vector<2x32xf32>, vector<32x96xf32>, vector<2x96xf32> -> vector<2x96xf32>
    %1025 = vector.broadcast %551 : vector<1x96xf32> to vector<2x96xf32>
    %1026 = arith.addf %1025, %1024 : vector<2x96xf32>
    %1027 = arith.index_cast %c6_i32_312 : i32 to index
    %c0_317 = arith.constant 0 : index
    %c0_318 = arith.constant 0 : index
    %1028 = vector.load %arg26[%1027, %c0_317, %c0_318] : memref<8x2x32xf32, #tpu.memory_space<vmem>>, vector<1x2x32xf32>
    %1029 = vector.shape_cast %1028 : vector<1x2x32xf32> to vector<2x32xf32>
    %cst_319 = arith.constant dense<0.000000e+00> : vector<2x96xf32>
    %1030 = tpu.matmul %1029, %547, %cst_319 {dimension_numbers = #tpu.dot_dimension_numbers<[1], [0], [0], [1], [0, 0, 1, 1], [], []>} : vector<2x32xf32>, vector<32x96xf32>, vector<2x96xf32> -> vector<2x96xf32>
    %1031 = arith.addf %1026, %1030 : vector<2x96xf32>
    %cst_320 = arith.constant dense<0.000000e+00> : vector<2x96xf32>
    %1032 = tpu.matmul %977, %553, %cst_320 {dimension_numbers = #tpu.dot_dimension_numbers<[1], [0], [0], [1], [0, 0, 1, 1], [], []>} : vector<2x32xf32>, vector<32x96xf32>, vector<2x96xf32> -> vector<2x96xf32>
    %1033 = vector.broadcast %555 : vector<1x96xf32> to vector<2x96xf32>
    %1034 = arith.addf %1032, %1033 : vector<2x96xf32>
    %1035 = vector.extract_strided_slice %1031 {offsets = [0, 0], sizes = [2, 64], strides = [1, 1]} : vector<2x96xf32> to vector<2x64xf32>
    %1036 = vector.extract_strided_slice %1034 {offsets = [0, 0], sizes = [2, 64], strides = [1, 1]} : vector<2x96xf32> to vector<2x64xf32>
    %1037 = arith.addf %1035, %1036 : vector<2x64xf32>
    %1038 = arith.negf %1037 : vector<2x64xf32>
    %1039 = math.exp %1038 : vector<2x64xf32>
    %cst_321 = arith.constant 1.000000e+00 : f32
    %1040 = vector.broadcast %cst_321 : f32 to vector<2x64xf32>
    %1041 = arith.addf %1040, %1039 : vector<2x64xf32>
    %1042 = arith.divf %1040, %1041 : vector<2x64xf32>
    %1043 = vector.extract_strided_slice %1042 {offsets = [0, 0], sizes = [2, 32], strides = [1, 1]} : vector<2x64xf32> to vector<2x32xf32>
    %1044 = vector.extract_strided_slice %1042 {offsets = [0, 32], sizes = [2, 32], strides = [1, 1]} : vector<2x64xf32> to vector<2x32xf32>
    %1045 = vector.extract_strided_slice %1031 {offsets = [0, 64], sizes = [2, 32], strides = [1, 1]} : vector<2x96xf32> to vector<2x32xf32>
    %1046 = vector.extract_strided_slice %1034 {offsets = [0, 64], sizes = [2, 32], strides = [1, 1]} : vector<2x96xf32> to vector<2x32xf32>
    %1047 = arith.mulf %1043, %1046 : vector<2x32xf32>
    %1048 = arith.addf %1045, %1047 : vector<2x32xf32>
    %1049 = math.tanh %1048 : vector<2x32xf32>
    %cst_322 = arith.constant 1.000000e+00 : f32
    %1050 = vector.broadcast %cst_322 : f32 to vector<2x32xf32>
    %1051 = arith.subf %1050, %1044 : vector<2x32xf32>
    %1052 = arith.mulf %1051, %1049 : vector<2x32xf32>
    %1053 = arith.mulf %1044, %977 : vector<2x32xf32>
    %1054 = arith.addf %1052, %1053 : vector<2x32xf32>
    %1055 = arith.index_cast %1020 : i32 to index
    %c0_323 = arith.constant 0 : index
    %c0_324 = arith.constant 0 : index
    %1056 = vector.load %arg25[%1055, %c0_323, %c0_324] : memref<8x2x32xf32, #tpu.memory_space<vmem>>, vector<1x2x32xf32>
    %1057 = vector.shape_cast %1056 : vector<1x2x32xf32> to vector<2x32xf32>
    %cst_325 = arith.constant dense<0.000000e+00> : vector<2x96xf32>
    %1058 = tpu.matmul %1057, %549, %cst_325 {dimension_numbers = #tpu.dot_dimension_numbers<[1], [0], [0], [1], [0, 0, 1, 1], [], []>} : vector<2x32xf32>, vector<32x96xf32>, vector<2x96xf32> -> vector<2x96xf32>
    %1059 = vector.broadcast %552 : vector<1x96xf32> to vector<2x96xf32>
    %1060 = arith.addf %1059, %1058 : vector<2x96xf32>
    %1061 = arith.index_cast %1020 : i32 to index
    %c0_326 = arith.constant 0 : index
    %c0_327 = arith.constant 0 : index
    %1062 = vector.load %arg26[%1061, %c0_326, %c0_327] : memref<8x2x32xf32, #tpu.memory_space<vmem>>, vector<1x2x32xf32>
    %1063 = vector.shape_cast %1062 : vector<1x2x32xf32> to vector<2x32xf32>
    %cst_328 = arith.constant dense<0.000000e+00> : vector<2x96xf32>
    %1064 = tpu.matmul %1063, %550, %cst_328 {dimension_numbers = #tpu.dot_dimension_numbers<[1], [0], [0], [1], [0, 0, 1, 1], [], []>} : vector<2x32xf32>, vector<32x96xf32>, vector<2x96xf32> -> vector<2x96xf32>
    %1065 = arith.addf %1060, %1064 : vector<2x96xf32>
    %cst_329 = arith.constant dense<0.000000e+00> : vector<2x96xf32>
    %1066 = tpu.matmul %1011, %554, %cst_329 {dimension_numbers = #tpu.dot_dimension_numbers<[1], [0], [0], [1], [0, 0, 1, 1], [], []>} : vector<2x32xf32>, vector<32x96xf32>, vector<2x96xf32> -> vector<2x96xf32>
    %1067 = vector.broadcast %556 : vector<1x96xf32> to vector<2x96xf32>
    %1068 = arith.addf %1066, %1067 : vector<2x96xf32>
    %1069 = vector.extract_strided_slice %1065 {offsets = [0, 0], sizes = [2, 64], strides = [1, 1]} : vector<2x96xf32> to vector<2x64xf32>
    %1070 = vector.extract_strided_slice %1068 {offsets = [0, 0], sizes = [2, 64], strides = [1, 1]} : vector<2x96xf32> to vector<2x64xf32>
    %1071 = arith.addf %1069, %1070 : vector<2x64xf32>
    %1072 = arith.negf %1071 : vector<2x64xf32>
    %1073 = math.exp %1072 : vector<2x64xf32>
    %cst_330 = arith.constant 1.000000e+00 : f32
    %1074 = vector.broadcast %cst_330 : f32 to vector<2x64xf32>
    %1075 = arith.addf %1074, %1073 : vector<2x64xf32>
    %1076 = arith.divf %1074, %1075 : vector<2x64xf32>
    %1077 = vector.extract_strided_slice %1076 {offsets = [0, 0], sizes = [2, 32], strides = [1, 1]} : vector<2x64xf32> to vector<2x32xf32>
    %1078 = vector.extract_strided_slice %1076 {offsets = [0, 32], sizes = [2, 32], strides = [1, 1]} : vector<2x64xf32> to vector<2x32xf32>
    %1079 = vector.extract_strided_slice %1065 {offsets = [0, 64], sizes = [2, 32], strides = [1, 1]} : vector<2x96xf32> to vector<2x32xf32>
    %1080 = vector.extract_strided_slice %1068 {offsets = [0, 64], sizes = [2, 32], strides = [1, 1]} : vector<2x96xf32> to vector<2x32xf32>
    %1081 = arith.mulf %1077, %1080 : vector<2x32xf32>
    %1082 = arith.addf %1079, %1081 : vector<2x32xf32>
    %1083 = math.tanh %1082 : vector<2x32xf32>
    %cst_331 = arith.constant 1.000000e+00 : f32
    %1084 = vector.broadcast %cst_331 : f32 to vector<2x32xf32>
    %1085 = arith.subf %1084, %1078 : vector<2x32xf32>
    %1086 = arith.mulf %1085, %1083 : vector<2x32xf32>
    %1087 = arith.mulf %1078, %1011 : vector<2x32xf32>
    %1088 = arith.addf %1086, %1087 : vector<2x32xf32>
    %1089 = arith.index_cast %c6_i32_312 : i32 to index
    %c0_332 = arith.constant 0 : index
    %c0_333 = arith.constant 0 : index
    %1090 = vector.load %arg27[%1089, %c0_332, %c0_333] : memref<8x2x32xf32, #tpu.memory_space<vmem>>, vector<1x2x32xf32>
    %1091 = vector.shape_cast %1090 : vector<1x2x32xf32> to vector<2x32xf32>
    %1092 = vector.shape_cast %1054 : vector<2x32xf32> to vector<1x2x32xf32>
    tpu.vector_store %arg27[%1089, %c0_332, %c0_333], %1092 {strides = array<i32>} : memref<8x2x32xf32, #tpu.memory_space<vmem>>, vector<1x2x32xf32>,
    %1093 = arith.index_cast %1020 : i32 to index
    %c0_334 = arith.constant 0 : index
    %c0_335 = arith.constant 0 : index
    %1094 = vector.load %arg28[%1093, %c0_334, %c0_335] : memref<8x2x32xf32, #tpu.memory_space<vmem>>, vector<1x2x32xf32>
    %1095 = vector.shape_cast %1094 : vector<1x2x32xf32> to vector<2x32xf32>
    %1096 = vector.shape_cast %1088 : vector<2x32xf32> to vector<1x2x32xf32>
    tpu.vector_store %arg28[%1093, %c0_334, %c0_335], %1096 {strides = array<i32>} : memref<8x2x32xf32, #tpu.memory_space<vmem>>, vector<1x2x32xf32>,
    %c7_i32_336 = arith.constant 7 : i32
    %c7_i32_337 = arith.constant 7 : i32
    %1097 = arith.subi %c7_i32_337, %c7_i32_336 : i32
    %1098 = arith.index_cast %c7_i32_336 : i32 to index
    %c0_338 = arith.constant 0 : index
    %c0_339 = arith.constant 0 : index
    %1099 = vector.load %arg25[%1098, %c0_338, %c0_339] : memref<8x2x32xf32, #tpu.memory_space<vmem>>, vector<1x2x32xf32>
    %1100 = vector.shape_cast %1099 : vector<1x2x32xf32> to vector<2x32xf32>
    %cst_340 = arith.constant dense<0.000000e+00> : vector<2x96xf32>
    %1101 = tpu.matmul %1100, %546, %cst_340 {dimension_numbers = #tpu.dot_dimension_numbers<[1], [0], [0], [1], [0, 0, 1, 1], [], []>} : vector<2x32xf32>, vector<32x96xf32>, vector<2x96xf32> -> vector<2x96xf32>
    %1102 = vector.broadcast %551 : vector<1x96xf32> to vector<2x96xf32>
    %1103 = arith.addf %1102, %1101 : vector<2x96xf32>
    %1104 = arith.index_cast %c7_i32_336 : i32 to index
    %c0_341 = arith.constant 0 : index
    %c0_342 = arith.constant 0 : index
    %1105 = vector.load %arg26[%1104, %c0_341, %c0_342] : memref<8x2x32xf32, #tpu.memory_space<vmem>>, vector<1x2x32xf32>
    %1106 = vector.shape_cast %1105 : vector<1x2x32xf32> to vector<2x32xf32>
    %cst_343 = arith.constant dense<0.000000e+00> : vector<2x96xf32>
    %1107 = tpu.matmul %1106, %547, %cst_343 {dimension_numbers = #tpu.dot_dimension_numbers<[1], [0], [0], [1], [0, 0, 1, 1], [], []>} : vector<2x32xf32>, vector<32x96xf32>, vector<2x96xf32> -> vector<2x96xf32>
    %1108 = arith.addf %1103, %1107 : vector<2x96xf32>
    %cst_344 = arith.constant dense<0.000000e+00> : vector<2x96xf32>
    %1109 = tpu.matmul %1054, %553, %cst_344 {dimension_numbers = #tpu.dot_dimension_numbers<[1], [0], [0], [1], [0, 0, 1, 1], [], []>} : vector<2x32xf32>, vector<32x96xf32>, vector<2x96xf32> -> vector<2x96xf32>
    %1110 = vector.broadcast %555 : vector<1x96xf32> to vector<2x96xf32>
    %1111 = arith.addf %1109, %1110 : vector<2x96xf32>
    %1112 = vector.extract_strided_slice %1108 {offsets = [0, 0], sizes = [2, 64], strides = [1, 1]} : vector<2x96xf32> to vector<2x64xf32>
    %1113 = vector.extract_strided_slice %1111 {offsets = [0, 0], sizes = [2, 64], strides = [1, 1]} : vector<2x96xf32> to vector<2x64xf32>
    %1114 = arith.addf %1112, %1113 : vector<2x64xf32>
    %1115 = arith.negf %1114 : vector<2x64xf32>
    %1116 = math.exp %1115 : vector<2x64xf32>
    %cst_345 = arith.constant 1.000000e+00 : f32
    %1117 = vector.broadcast %cst_345 : f32 to vector<2x64xf32>
    %1118 = arith.addf %1117, %1116 : vector<2x64xf32>
    %1119 = arith.divf %1117, %1118 : vector<2x64xf32>
    %1120 = vector.extract_strided_slice %1119 {offsets = [0, 0], sizes = [2, 32], strides = [1, 1]} : vector<2x64xf32> to vector<2x32xf32>
    %1121 = vector.extract_strided_slice %1119 {offsets = [0, 32], sizes = [2, 32], strides = [1, 1]} : vector<2x64xf32> to vector<2x32xf32>
    %1122 = vector.extract_strided_slice %1108 {offsets = [0, 64], sizes = [2, 32], strides = [1, 1]} : vector<2x96xf32> to vector<2x32xf32>
    %1123 = vector.extract_strided_slice %1111 {offsets = [0, 64], sizes = [2, 32], strides = [1, 1]} : vector<2x96xf32> to vector<2x32xf32>
    %1124 = arith.mulf %1120, %1123 : vector<2x32xf32>
    %1125 = arith.addf %1122, %1124 : vector<2x32xf32>
    %1126 = math.tanh %1125 : vector<2x32xf32>
    %cst_346 = arith.constant 1.000000e+00 : f32
    %1127 = vector.broadcast %cst_346 : f32 to vector<2x32xf32>
    %1128 = arith.subf %1127, %1121 : vector<2x32xf32>
    %1129 = arith.mulf %1128, %1126 : vector<2x32xf32>
    %1130 = arith.mulf %1121, %1054 : vector<2x32xf32>
    %1131 = arith.addf %1129, %1130 : vector<2x32xf32>
    %1132 = arith.index_cast %1097 : i32 to index
    %c0_347 = arith.constant 0 : index
    %c0_348 = arith.constant 0 : index
    %1133 = vector.load %arg25[%1132, %c0_347, %c0_348] : memref<8x2x32xf32, #tpu.memory_space<vmem>>, vector<1x2x32xf32>
    %1134 = vector.shape_cast %1133 : vector<1x2x32xf32> to vector<2x32xf32>
    %cst_349 = arith.constant dense<0.000000e+00> : vector<2x96xf32>
    %1135 = tpu.matmul %1134, %549, %cst_349 {dimension_numbers = #tpu.dot_dimension_numbers<[1], [0], [0], [1], [0, 0, 1, 1], [], []>} : vector<2x32xf32>, vector<32x96xf32>, vector<2x96xf32> -> vector<2x96xf32>
    %1136 = vector.broadcast %552 : vector<1x96xf32> to vector<2x96xf32>
    %1137 = arith.addf %1136, %1135 : vector<2x96xf32>
    %1138 = arith.index_cast %1097 : i32 to index
    %c0_350 = arith.constant 0 : index
    %c0_351 = arith.constant 0 : index
    %1139 = vector.load %arg26[%1138, %c0_350, %c0_351] : memref<8x2x32xf32, #tpu.memory_space<vmem>>, vector<1x2x32xf32>
    %1140 = vector.shape_cast %1139 : vector<1x2x32xf32> to vector<2x32xf32>
    %cst_352 = arith.constant dense<0.000000e+00> : vector<2x96xf32>
    %1141 = tpu.matmul %1140, %550, %cst_352 {dimension_numbers = #tpu.dot_dimension_numbers<[1], [0], [0], [1], [0, 0, 1, 1], [], []>} : vector<2x32xf32>, vector<32x96xf32>, vector<2x96xf32> -> vector<2x96xf32>
    %1142 = arith.addf %1137, %1141 : vector<2x96xf32>
    %cst_353 = arith.constant dense<0.000000e+00> : vector<2x96xf32>
    %1143 = tpu.matmul %1088, %554, %cst_353 {dimension_numbers = #tpu.dot_dimension_numbers<[1], [0], [0], [1], [0, 0, 1, 1], [], []>} : vector<2x32xf32>, vector<32x96xf32>, vector<2x96xf32> -> vector<2x96xf32>
    %1144 = vector.broadcast %556 : vector<1x96xf32> to vector<2x96xf32>
    %1145 = arith.addf %1143, %1144 : vector<2x96xf32>
    %1146 = vector.extract_strided_slice %1142 {offsets = [0, 0], sizes = [2, 64], strides = [1, 1]} : vector<2x96xf32> to vector<2x64xf32>
    %1147 = vector.extract_strided_slice %1145 {offsets = [0, 0], sizes = [2, 64], strides = [1, 1]} : vector<2x96xf32> to vector<2x64xf32>
    %1148 = arith.addf %1146, %1147 : vector<2x64xf32>
    %1149 = arith.negf %1148 : vector<2x64xf32>
    %1150 = math.exp %1149 : vector<2x64xf32>
    %cst_354 = arith.constant 1.000000e+00 : f32
    %1151 = vector.broadcast %cst_354 : f32 to vector<2x64xf32>
    %1152 = arith.addf %1151, %1150 : vector<2x64xf32>
    %1153 = arith.divf %1151, %1152 : vector<2x64xf32>
    %1154 = vector.extract_strided_slice %1153 {offsets = [0, 0], sizes = [2, 32], strides = [1, 1]} : vector<2x64xf32> to vector<2x32xf32>
    %1155 = vector.extract_strided_slice %1153 {offsets = [0, 32], sizes = [2, 32], strides = [1, 1]} : vector<2x64xf32> to vector<2x32xf32>
    %1156 = vector.extract_strided_slice %1142 {offsets = [0, 64], sizes = [2, 32], strides = [1, 1]} : vector<2x96xf32> to vector<2x32xf32>
    %1157 = vector.extract_strided_slice %1145 {offsets = [0, 64], sizes = [2, 32], strides = [1, 1]} : vector<2x96xf32> to vector<2x32xf32>
    %1158 = arith.mulf %1154, %1157 : vector<2x32xf32>
    %1159 = arith.addf %1156, %1158 : vector<2x32xf32>
    %1160 = math.tanh %1159 : vector<2x32xf32>
    %cst_355 = arith.constant 1.000000e+00 : f32
    %1161 = vector.broadcast %cst_355 : f32 to vector<2x32xf32>
    %1162 = arith.subf %1161, %1155 : vector<2x32xf32>
    %1163 = arith.mulf %1162, %1160 : vector<2x32xf32>
    %1164 = arith.mulf %1155, %1088 : vector<2x32xf32>
    %1165 = arith.addf %1163, %1164 : vector<2x32xf32>
    %1166 = arith.index_cast %c7_i32_336 : i32 to index
    %c0_356 = arith.constant 0 : index
    %c0_357 = arith.constant 0 : index
    %1167 = vector.load %arg27[%1166, %c0_356, %c0_357] : memref<8x2x32xf32, #tpu.memory_space<vmem>>, vector<1x2x32xf32>
    %1168 = vector.shape_cast %1167 : vector<1x2x32xf32> to vector<2x32xf32>
    %1169 = vector.shape_cast %1131 : vector<2x32xf32> to vector<1x2x32xf32>
    tpu.vector_store %arg27[%1166, %c0_356, %c0_357], %1169 {strides = array<i32>} : memref<8x2x32xf32, #tpu.memory_space<vmem>>, vector<1x2x32xf32>,
    %1170 = arith.index_cast %1097 : i32 to index
    %c0_358 = arith.constant 0 : index
    %c0_359 = arith.constant 0 : index
    %1171 = vector.load %arg28[%1170, %c0_358, %c0_359] : memref<8x2x32xf32, #tpu.memory_space<vmem>>, vector<1x2x32xf32>
    %1172 = vector.shape_cast %1171 : vector<1x2x32xf32> to vector<2x32xf32>
    %1173 = vector.shape_cast %1165 : vector<2x32xf32> to vector<1x2x32xf32>
    tpu.vector_store %arg28[%1170, %c0_358, %c0_359], %1173 {strides = array<i32>} : memref<8x2x32xf32, #tpu.memory_space<vmem>>, vector<1x2x32xf32>,
    %c8_i32_360 = arith.constant 8 : i32
    %c0_361 = arith.constant 0 : index
    %c0_362 = arith.constant 0 : index
    %1174 = vector.load %arg18[%c0_361, %c0_362] : memref<64x64xf32, #tpu.memory_space<vmem>>, vector<64x64xf32>
    %1175 = vector.extract_strided_slice %1174 {offsets = [0, 0], sizes = [32, 64], strides = [1, 1]} : vector<64x64xf32> to vector<32x64xf32>
    %1176 = vector.extract_strided_slice %1174 {offsets = [32, 0], sizes = [32, 64], strides = [1, 1]} : vector<64x64xf32> to vector<32x64xf32>
    %c0_363 = arith.constant 0 : index
    %c0_364 = arith.constant 0 : index
    %1177 = vector.load %arg19[%c0_363, %c0_364] : memref<1x64xf32, #tpu.memory_space<vmem>>, vector<1x64xf32>
    %c0_365 = arith.constant 0 : index
    %c0_366 = arith.constant 0 : index
    %1178 = vector.load %arg20[%c0_365, %c0_366] : memref<1x64xf32, #tpu.memory_space<vmem>>, vector<1x64xf32>
    %c0_367 = arith.constant 0 : index
    %c0_368 = arith.constant 0 : index
    %1179 = vector.load %arg21[%c0_367, %c0_368] : memref<1x64xf32, #tpu.memory_space<vmem>>, vector<1x64xf32>
    %c0_369 = arith.constant 0 : index
    %c0_370 = arith.constant 0 : index
    %1180 = vector.load %arg22[%c0_369, %c0_370] : memref<64x7xf32, #tpu.memory_space<vmem>>, vector<64x7xf32>
    %c0_371 = arith.constant 0 : index
    %c0_372 = arith.constant 0 : index
    %1181 = vector.load %arg23[%c0_371, %c0_372] : memref<1x7xf32, #tpu.memory_space<vmem>>, vector<1x7xf32>
    %c0_i32_373 = arith.constant 0 : i32
    %1182 = arith.index_cast %c0_i32_373 : i32 to index
    %c0_374 = arith.constant 0 : index
    %c0_375 = arith.constant 0 : index
    %1183 = vector.load %arg27[%1182, %c0_374, %c0_375] : memref<8x2x32xf32, #tpu.memory_space<vmem>>, vector<1x2x32xf32>
    %1184 = vector.shape_cast %1183 : vector<1x2x32xf32> to vector<2x32xf32>
    %cst_376 = arith.constant dense<0.000000e+00> : vector<2x64xf32>
    %1185 = tpu.matmul %1184, %1175, %cst_376 {dimension_numbers = #tpu.dot_dimension_numbers<[1], [0], [0], [1], [0, 0, 1, 1], [], []>} : vector<2x32xf32>, vector<32x64xf32>, vector<2x64xf32> -> vector<2x64xf32>
    %1186 = arith.index_cast %c0_i32_373 : i32 to index
    %c0_377 = arith.constant 0 : index
    %c0_378 = arith.constant 0 : index
    %1187 = vector.load %arg28[%1186, %c0_377, %c0_378] : memref<8x2x32xf32, #tpu.memory_space<vmem>>, vector<1x2x32xf32>
    %1188 = vector.shape_cast %1187 : vector<1x2x32xf32> to vector<2x32xf32>
    %cst_379 = arith.constant dense<0.000000e+00> : vector<2x64xf32>
    %1189 = tpu.matmul %1188, %1176, %cst_379 {dimension_numbers = #tpu.dot_dimension_numbers<[1], [0], [0], [1], [0, 0, 1, 1], [], []>} : vector<2x32xf32>, vector<32x64xf32>, vector<2x64xf32> -> vector<2x64xf32>
    %1190 = arith.addf %1185, %1189 : vector<2x64xf32>
    %1191 = vector.broadcast %1177 : vector<1x64xf32> to vector<2x64xf32>
    %1192 = arith.addf %1190, %1191 : vector<2x64xf32>
    %1193 = vector.broadcast %1178 : vector<1x64xf32> to vector<2x64xf32>
    %1194 = arith.mulf %1192, %1193 : vector<2x64xf32>
    %1195 = vector.broadcast %1179 : vector<1x64xf32> to vector<2x64xf32>
    %1196 = arith.addf %1194, %1195 : vector<2x64xf32>
    %cst_380 = arith.constant 0.000000e+00 : f32
    %1197 = vector.broadcast %cst_380 : f32 to vector<2x64xf32>
    %1198 = arith.cmpf ogt, %1196, %1197 : vector<2x64xf32>
    %cst_381 = arith.constant 0.00999999977 : f32
    %1199 = vector.broadcast %cst_381 : f32 to vector<2x64xf32>
    %1200 = arith.mulf %1199, %1196 : vector<2x64xf32>
    %1201 = arith.select %1198, %1196, %1200 : vector<2x64xi1>, vector<2x64xf32>
    %cst_382 = arith.constant dense<0.000000e+00> : vector<2x7xf32>
    %1202 = tpu.matmul %1201, %1180, %cst_382 {dimension_numbers = #tpu.dot_dimension_numbers<[1], [0], [0], [1], [0, 0, 1, 1], [], []>} : vector<2x64xf32>, vector<64x7xf32>, vector<2x7xf32> -> vector<2x7xf32>
    %1203 = vector.broadcast %1181 : vector<1x7xf32> to vector<2x7xf32>
    %1204 = arith.addf %1202, %1203 : vector<2x7xf32>
    %1205 = arith.index_cast %c0_i32_373 : i32 to index
    %c0_383 = arith.constant 0 : index
    %c0_384 = arith.constant 0 : index
    %1206 = vector.load %arg24[%1205, %c0_383, %c0_384] : memref<8x2x7xf32, #tpu.memory_space<vmem>>, vector<1x2x7xf32>
    %1207 = vector.shape_cast %1206 : vector<1x2x7xf32> to vector<2x7xf32>
    %1208 = vector.shape_cast %1204 : vector<2x7xf32> to vector<1x2x7xf32>
    tpu.vector_store %arg24[%1205, %c0_383, %c0_384], %1208 {strides = array<i32>} : memref<8x2x7xf32, #tpu.memory_space<vmem>>, vector<1x2x7xf32>,
    %c1_i32_385 = arith.constant 1 : i32
    %1209 = arith.index_cast %c1_i32_385 : i32 to index
    %c0_386 = arith.constant 0 : index
    %c0_387 = arith.constant 0 : index
    %1210 = vector.load %arg27[%1209, %c0_386, %c0_387] : memref<8x2x32xf32, #tpu.memory_space<vmem>>, vector<1x2x32xf32>
    %1211 = vector.shape_cast %1210 : vector<1x2x32xf32> to vector<2x32xf32>
    %cst_388 = arith.constant dense<0.000000e+00> : vector<2x64xf32>
    %1212 = tpu.matmul %1211, %1175, %cst_388 {dimension_numbers = #tpu.dot_dimension_numbers<[1], [0], [0], [1], [0, 0, 1, 1], [], []>} : vector<2x32xf32>, vector<32x64xf32>, vector<2x64xf32> -> vector<2x64xf32>
    %1213 = arith.index_cast %c1_i32_385 : i32 to index
    %c0_389 = arith.constant 0 : index
    %c0_390 = arith.constant 0 : index
    %1214 = vector.load %arg28[%1213, %c0_389, %c0_390] : memref<8x2x32xf32, #tpu.memory_space<vmem>>, vector<1x2x32xf32>
    %1215 = vector.shape_cast %1214 : vector<1x2x32xf32> to vector<2x32xf32>
    %cst_391 = arith.constant dense<0.000000e+00> : vector<2x64xf32>
    %1216 = tpu.matmul %1215, %1176, %cst_391 {dimension_numbers = #tpu.dot_dimension_numbers<[1], [0], [0], [1], [0, 0, 1, 1], [], []>} : vector<2x32xf32>, vector<32x64xf32>, vector<2x64xf32> -> vector<2x64xf32>
    %1217 = arith.addf %1212, %1216 : vector<2x64xf32>
    %1218 = vector.broadcast %1177 : vector<1x64xf32> to vector<2x64xf32>
    %1219 = arith.addf %1217, %1218 : vector<2x64xf32>
    %1220 = vector.broadcast %1178 : vector<1x64xf32> to vector<2x64xf32>
    %1221 = arith.mulf %1219, %1220 : vector<2x64xf32>
    %1222 = vector.broadcast %1179 : vector<1x64xf32> to vector<2x64xf32>
    %1223 = arith.addf %1221, %1222 : vector<2x64xf32>
    %cst_392 = arith.constant 0.000000e+00 : f32
    %1224 = vector.broadcast %cst_392 : f32 to vector<2x64xf32>
    %1225 = arith.cmpf ogt, %1223, %1224 : vector<2x64xf32>
    %cst_393 = arith.constant 0.00999999977 : f32
    %1226 = vector.broadcast %cst_393 : f32 to vector<2x64xf32>
    %1227 = arith.mulf %1226, %1223 : vector<2x64xf32>
    %1228 = arith.select %1225, %1223, %1227 : vector<2x64xi1>, vector<2x64xf32>
    %cst_394 = arith.constant dense<0.000000e+00> : vector<2x7xf32>
    %1229 = tpu.matmul %1228, %1180, %cst_394 {dimension_numbers = #tpu.dot_dimension_numbers<[1], [0], [0], [1], [0, 0, 1, 1], [], []>} : vector<2x64xf32>, vector<64x7xf32>, vector<2x7xf32> -> vector<2x7xf32>
    %1230 = vector.broadcast %1181 : vector<1x7xf32> to vector<2x7xf32>
    %1231 = arith.addf %1229, %1230 : vector<2x7xf32>
    %1232 = arith.index_cast %c1_i32_385 : i32 to index
    %c0_395 = arith.constant 0 : index
    %c0_396 = arith.constant 0 : index
    %1233 = vector.load %arg24[%1232, %c0_395, %c0_396] : memref<8x2x7xf32, #tpu.memory_space<vmem>>, vector<1x2x7xf32>
    %1234 = vector.shape_cast %1233 : vector<1x2x7xf32> to vector<2x7xf32>
    %1235 = vector.shape_cast %1231 : vector<2x7xf32> to vector<1x2x7xf32>
    tpu.vector_store %arg24[%1232, %c0_395, %c0_396], %1235 {strides = array<i32>} : memref<8x2x7xf32, #tpu.memory_space<vmem>>, vector<1x2x7xf32>,
    %c2_i32_397 = arith.constant 2 : i32
    %1236 = arith.index_cast %c2_i32_397 : i32 to index
    %c0_398 = arith.constant 0 : index
    %c0_399 = arith.constant 0 : index
    %1237 = vector.load %arg27[%1236, %c0_398, %c0_399] : memref<8x2x32xf32, #tpu.memory_space<vmem>>, vector<1x2x32xf32>
    %1238 = vector.shape_cast %1237 : vector<1x2x32xf32> to vector<2x32xf32>
    %cst_400 = arith.constant dense<0.000000e+00> : vector<2x64xf32>
    %1239 = tpu.matmul %1238, %1175, %cst_400 {dimension_numbers = #tpu.dot_dimension_numbers<[1], [0], [0], [1], [0, 0, 1, 1], [], []>} : vector<2x32xf32>, vector<32x64xf32>, vector<2x64xf32> -> vector<2x64xf32>
    %1240 = arith.index_cast %c2_i32_397 : i32 to index
    %c0_401 = arith.constant 0 : index
    %c0_402 = arith.constant 0 : index
    %1241 = vector.load %arg28[%1240, %c0_401, %c0_402] : memref<8x2x32xf32, #tpu.memory_space<vmem>>, vector<1x2x32xf32>
    %1242 = vector.shape_cast %1241 : vector<1x2x32xf32> to vector<2x32xf32>
    %cst_403 = arith.constant dense<0.000000e+00> : vector<2x64xf32>
    %1243 = tpu.matmul %1242, %1176, %cst_403 {dimension_numbers = #tpu.dot_dimension_numbers<[1], [0], [0], [1], [0, 0, 1, 1], [], []>} : vector<2x32xf32>, vector<32x64xf32>, vector<2x64xf32> -> vector<2x64xf32>
    %1244 = arith.addf %1239, %1243 : vector<2x64xf32>
    %1245 = vector.broadcast %1177 : vector<1x64xf32> to vector<2x64xf32>
    %1246 = arith.addf %1244, %1245 : vector<2x64xf32>
    %1247 = vector.broadcast %1178 : vector<1x64xf32> to vector<2x64xf32>
    %1248 = arith.mulf %1246, %1247 : vector<2x64xf32>
    %1249 = vector.broadcast %1179 : vector<1x64xf32> to vector<2x64xf32>
    %1250 = arith.addf %1248, %1249 : vector<2x64xf32>
    %cst_404 = arith.constant 0.000000e+00 : f32
    %1251 = vector.broadcast %cst_404 : f32 to vector<2x64xf32>
    %1252 = arith.cmpf ogt, %1250, %1251 : vector<2x64xf32>
    %cst_405 = arith.constant 0.00999999977 : f32
    %1253 = vector.broadcast %cst_405 : f32 to vector<2x64xf32>
    %1254 = arith.mulf %1253, %1250 : vector<2x64xf32>
    %1255 = arith.select %1252, %1250, %1254 : vector<2x64xi1>, vector<2x64xf32>
    %cst_406 = arith.constant dense<0.000000e+00> : vector<2x7xf32>
    %1256 = tpu.matmul %1255, %1180, %cst_406 {dimension_numbers = #tpu.dot_dimension_numbers<[1], [0], [0], [1], [0, 0, 1, 1], [], []>} : vector<2x64xf32>, vector<64x7xf32>, vector<2x7xf32> -> vector<2x7xf32>
    %1257 = vector.broadcast %1181 : vector<1x7xf32> to vector<2x7xf32>
    %1258 = arith.addf %1256, %1257 : vector<2x7xf32>
    %1259 = arith.index_cast %c2_i32_397 : i32 to index
    %c0_407 = arith.constant 0 : index
    %c0_408 = arith.constant 0 : index
    %1260 = vector.load %arg24[%1259, %c0_407, %c0_408] : memref<8x2x7xf32, #tpu.memory_space<vmem>>, vector<1x2x7xf32>
    %1261 = vector.shape_cast %1260 : vector<1x2x7xf32> to vector<2x7xf32>
    %1262 = vector.shape_cast %1258 : vector<2x7xf32> to vector<1x2x7xf32>
    tpu.vector_store %arg24[%1259, %c0_407, %c0_408], %1262 {strides = array<i32>} : memref<8x2x7xf32, #tpu.memory_space<vmem>>, vector<1x2x7xf32>,
    %c3_i32_409 = arith.constant 3 : i32
    %1263 = arith.index_cast %c3_i32_409 : i32 to index
    %c0_410 = arith.constant 0 : index
    %c0_411 = arith.constant 0 : index
    %1264 = vector.load %arg27[%1263, %c0_410, %c0_411] : memref<8x2x32xf32, #tpu.memory_space<vmem>>, vector<1x2x32xf32>
    %1265 = vector.shape_cast %1264 : vector<1x2x32xf32> to vector<2x32xf32>
    %cst_412 = arith.constant dense<0.000000e+00> : vector<2x64xf32>
    %1266 = tpu.matmul %1265, %1175, %cst_412 {dimension_numbers = #tpu.dot_dimension_numbers<[1], [0], [0], [1], [0, 0, 1, 1], [], []>} : vector<2x32xf32>, vector<32x64xf32>, vector<2x64xf32> -> vector<2x64xf32>
    %1267 = arith.index_cast %c3_i32_409 : i32 to index
    %c0_413 = arith.constant 0 : index
    %c0_414 = arith.constant 0 : index
    %1268 = vector.load %arg28[%1267, %c0_413, %c0_414] : memref<8x2x32xf32, #tpu.memory_space<vmem>>, vector<1x2x32xf32>
    %1269 = vector.shape_cast %1268 : vector<1x2x32xf32> to vector<2x32xf32>
    %cst_415 = arith.constant dense<0.000000e+00> : vector<2x64xf32>
    %1270 = tpu.matmul %1269, %1176, %cst_415 {dimension_numbers = #tpu.dot_dimension_numbers<[1], [0], [0], [1], [0, 0, 1, 1], [], []>} : vector<2x32xf32>, vector<32x64xf32>, vector<2x64xf32> -> vector<2x64xf32>
    %1271 = arith.addf %1266, %1270 : vector<2x64xf32>
    %1272 = vector.broadcast %1177 : vector<1x64xf32> to vector<2x64xf32>
    %1273 = arith.addf %1271, %1272 : vector<2x64xf32>
    %1274 = vector.broadcast %1178 : vector<1x64xf32> to vector<2x64xf32>
    %1275 = arith.mulf %1273, %1274 : vector<2x64xf32>
    %1276 = vector.broadcast %1179 : vector<1x64xf32> to vector<2x64xf32>
    %1277 = arith.addf %1275, %1276 : vector<2x64xf32>
    %cst_416 = arith.constant 0.000000e+00 : f32
    %1278 = vector.broadcast %cst_416 : f32 to vector<2x64xf32>
    %1279 = arith.cmpf ogt, %1277, %1278 : vector<2x64xf32>
    %cst_417 = arith.constant 0.00999999977 : f32
    %1280 = vector.broadcast %cst_417 : f32 to vector<2x64xf32>
    %1281 = arith.mulf %1280, %1277 : vector<2x64xf32>
    %1282 = arith.select %1279, %1277, %1281 : vector<2x64xi1>, vector<2x64xf32>
    %cst_418 = arith.constant dense<0.000000e+00> : vector<2x7xf32>
    %1283 = tpu.matmul %1282, %1180, %cst_418 {dimension_numbers = #tpu.dot_dimension_numbers<[1], [0], [0], [1], [0, 0, 1, 1], [], []>} : vector<2x64xf32>, vector<64x7xf32>, vector<2x7xf32> -> vector<2x7xf32>
    %1284 = vector.broadcast %1181 : vector<1x7xf32> to vector<2x7xf32>
    %1285 = arith.addf %1283, %1284 : vector<2x7xf32>
    %1286 = arith.index_cast %c3_i32_409 : i32 to index
    %c0_419 = arith.constant 0 : index
    %c0_420 = arith.constant 0 : index
    %1287 = vector.load %arg24[%1286, %c0_419, %c0_420] : memref<8x2x7xf32, #tpu.memory_space<vmem>>, vector<1x2x7xf32>
    %1288 = vector.shape_cast %1287 : vector<1x2x7xf32> to vector<2x7xf32>
    %1289 = vector.shape_cast %1285 : vector<2x7xf32> to vector<1x2x7xf32>
    tpu.vector_store %arg24[%1286, %c0_419, %c0_420], %1289 {strides = array<i32>} : memref<8x2x7xf32, #tpu.memory_space<vmem>>, vector<1x2x7xf32>,
    %c4_i32_421 = arith.constant 4 : i32
    %1290 = arith.index_cast %c4_i32_421 : i32 to index
    %c0_422 = arith.constant 0 : index
    %c0_423 = arith.constant 0 : index
    %1291 = vector.load %arg27[%1290, %c0_422, %c0_423] : memref<8x2x32xf32, #tpu.memory_space<vmem>>, vector<1x2x32xf32>
    %1292 = vector.shape_cast %1291 : vector<1x2x32xf32> to vector<2x32xf32>
    %cst_424 = arith.constant dense<0.000000e+00> : vector<2x64xf32>
    %1293 = tpu.matmul %1292, %1175, %cst_424 {dimension_numbers = #tpu.dot_dimension_numbers<[1], [0], [0], [1], [0, 0, 1, 1], [], []>} : vector<2x32xf32>, vector<32x64xf32>, vector<2x64xf32> -> vector<2x64xf32>
    %1294 = arith.index_cast %c4_i32_421 : i32 to index
    %c0_425 = arith.constant 0 : index
    %c0_426 = arith.constant 0 : index
    %1295 = vector.load %arg28[%1294, %c0_425, %c0_426] : memref<8x2x32xf32, #tpu.memory_space<vmem>>, vector<1x2x32xf32>
    %1296 = vector.shape_cast %1295 : vector<1x2x32xf32> to vector<2x32xf32>
    %cst_427 = arith.constant dense<0.000000e+00> : vector<2x64xf32>
    %1297 = tpu.matmul %1296, %1176, %cst_427 {dimension_numbers = #tpu.dot_dimension_numbers<[1], [0], [0], [1], [0, 0, 1, 1], [], []>} : vector<2x32xf32>, vector<32x64xf32>, vector<2x64xf32> -> vector<2x64xf32>
    %1298 = arith.addf %1293, %1297 : vector<2x64xf32>
    %1299 = vector.broadcast %1177 : vector<1x64xf32> to vector<2x64xf32>
    %1300 = arith.addf %1298, %1299 : vector<2x64xf32>
    %1301 = vector.broadcast %1178 : vector<1x64xf32> to vector<2x64xf32>
    %1302 = arith.mulf %1300, %1301 : vector<2x64xf32>
    %1303 = vector.broadcast %1179 : vector<1x64xf32> to vector<2x64xf32>
    %1304 = arith.addf %1302, %1303 : vector<2x64xf32>
    %cst_428 = arith.constant 0.000000e+00 : f32
    %1305 = vector.broadcast %cst_428 : f32 to vector<2x64xf32>
    %1306 = arith.cmpf ogt, %1304, %1305 : vector<2x64xf32>
    %cst_429 = arith.constant 0.00999999977 : f32
    %1307 = vector.broadcast %cst_429 : f32 to vector<2x64xf32>
    %1308 = arith.mulf %1307, %1304 : vector<2x64xf32>
    %1309 = arith.select %1306, %1304, %1308 : vector<2x64xi1>, vector<2x64xf32>
    %cst_430 = arith.constant dense<0.000000e+00> : vector<2x7xf32>
    %1310 = tpu.matmul %1309, %1180, %cst_430 {dimension_numbers = #tpu.dot_dimension_numbers<[1], [0], [0], [1], [0, 0, 1, 1], [], []>} : vector<2x64xf32>, vector<64x7xf32>, vector<2x7xf32> -> vector<2x7xf32>
    %1311 = vector.broadcast %1181 : vector<1x7xf32> to vector<2x7xf32>
    %1312 = arith.addf %1310, %1311 : vector<2x7xf32>
    %1313 = arith.index_cast %c4_i32_421 : i32 to index
    %c0_431 = arith.constant 0 : index
    %c0_432 = arith.constant 0 : index
    %1314 = vector.load %arg24[%1313, %c0_431, %c0_432] : memref<8x2x7xf32, #tpu.memory_space<vmem>>, vector<1x2x7xf32>
    %1315 = vector.shape_cast %1314 : vector<1x2x7xf32> to vector<2x7xf32>
    %1316 = vector.shape_cast %1312 : vector<2x7xf32> to vector<1x2x7xf32>
    tpu.vector_store %arg24[%1313, %c0_431, %c0_432], %1316 {strides = array<i32>} : memref<8x2x7xf32, #tpu.memory_space<vmem>>, vector<1x2x7xf32>,
    %c5_i32_433 = arith.constant 5 : i32
    %1317 = arith.index_cast %c5_i32_433 : i32 to index
    %c0_434 = arith.constant 0 : index
    %c0_435 = arith.constant 0 : index
    %1318 = vector.load %arg27[%1317, %c0_434, %c0_435] : memref<8x2x32xf32, #tpu.memory_space<vmem>>, vector<1x2x32xf32>
    %1319 = vector.shape_cast %1318 : vector<1x2x32xf32> to vector<2x32xf32>
    %cst_436 = arith.constant dense<0.000000e+00> : vector<2x64xf32>
    %1320 = tpu.matmul %1319, %1175, %cst_436 {dimension_numbers = #tpu.dot_dimension_numbers<[1], [0], [0], [1], [0, 0, 1, 1], [], []>} : vector<2x32xf32>, vector<32x64xf32>, vector<2x64xf32> -> vector<2x64xf32>
    %1321 = arith.index_cast %c5_i32_433 : i32 to index
    %c0_437 = arith.constant 0 : index
    %c0_438 = arith.constant 0 : index
    %1322 = vector.load %arg28[%1321, %c0_437, %c0_438] : memref<8x2x32xf32, #tpu.memory_space<vmem>>, vector<1x2x32xf32>
    %1323 = vector.shape_cast %1322 : vector<1x2x32xf32> to vector<2x32xf32>
    %cst_439 = arith.constant dense<0.000000e+00> : vector<2x64xf32>
    %1324 = tpu.matmul %1323, %1176, %cst_439 {dimension_numbers = #tpu.dot_dimension_numbers<[1], [0], [0], [1], [0, 0, 1, 1], [], []>} : vector<2x32xf32>, vector<32x64xf32>, vector<2x64xf32> -> vector<2x64xf32>
    %1325 = arith.addf %1320, %1324 : vector<2x64xf32>
    %1326 = vector.broadcast %1177 : vector<1x64xf32> to vector<2x64xf32>
    %1327 = arith.addf %1325, %1326 : vector<2x64xf32>
    %1328 = vector.broadcast %1178 : vector<1x64xf32> to vector<2x64xf32>
    %1329 = arith.mulf %1327, %1328 : vector<2x64xf32>
    %1330 = vector.broadcast %1179 : vector<1x64xf32> to vector<2x64xf32>
    %1331 = arith.addf %1329, %1330 : vector<2x64xf32>
    %cst_440 = arith.constant 0.000000e+00 : f32
    %1332 = vector.broadcast %cst_440 : f32 to vector<2x64xf32>
    %1333 = arith.cmpf ogt, %1331, %1332 : vector<2x64xf32>
    %cst_441 = arith.constant 0.00999999977 : f32
    %1334 = vector.broadcast %cst_441 : f32 to vector<2x64xf32>
    %1335 = arith.mulf %1334, %1331 : vector<2x64xf32>
    %1336 = arith.select %1333, %1331, %1335 : vector<2x64xi1>, vector<2x64xf32>
    %cst_442 = arith.constant dense<0.000000e+00> : vector<2x7xf32>
    %1337 = tpu.matmul %1336, %1180, %cst_442 {dimension_numbers = #tpu.dot_dimension_numbers<[1], [0], [0], [1], [0, 0, 1, 1], [], []>} : vector<2x64xf32>, vector<64x7xf32>, vector<2x7xf32> -> vector<2x7xf32>
    %1338 = vector.broadcast %1181 : vector<1x7xf32> to vector<2x7xf32>
    %1339 = arith.addf %1337, %1338 : vector<2x7xf32>
    %1340 = arith.index_cast %c5_i32_433 : i32 to index
    %c0_443 = arith.constant 0 : index
    %c0_444 = arith.constant 0 : index
    %1341 = vector.load %arg24[%1340, %c0_443, %c0_444] : memref<8x2x7xf32, #tpu.memory_space<vmem>>, vector<1x2x7xf32>
    %1342 = vector.shape_cast %1341 : vector<1x2x7xf32> to vector<2x7xf32>
    %1343 = vector.shape_cast %1339 : vector<2x7xf32> to vector<1x2x7xf32>
    tpu.vector_store %arg24[%1340, %c0_443, %c0_444], %1343 {strides = array<i32>} : memref<8x2x7xf32, #tpu.memory_space<vmem>>, vector<1x2x7xf32>,
    %c6_i32_445 = arith.constant 6 : i32
    %1344 = arith.index_cast %c6_i32_445 : i32 to index
    %c0_446 = arith.constant 0 : index
    %c0_447 = arith.constant 0 : index
    %1345 = vector.load %arg27[%1344, %c0_446, %c0_447] : memref<8x2x32xf32, #tpu.memory_space<vmem>>, vector<1x2x32xf32>
    %1346 = vector.shape_cast %1345 : vector<1x2x32xf32> to vector<2x32xf32>
    %cst_448 = arith.constant dense<0.000000e+00> : vector<2x64xf32>
    %1347 = tpu.matmul %1346, %1175, %cst_448 {dimension_numbers = #tpu.dot_dimension_numbers<[1], [0], [0], [1], [0, 0, 1, 1], [], []>} : vector<2x32xf32>, vector<32x64xf32>, vector<2x64xf32> -> vector<2x64xf32>
    %1348 = arith.index_cast %c6_i32_445 : i32 to index
    %c0_449 = arith.constant 0 : index
    %c0_450 = arith.constant 0 : index
    %1349 = vector.load %arg28[%1348, %c0_449, %c0_450] : memref<8x2x32xf32, #tpu.memory_space<vmem>>, vector<1x2x32xf32>
    %1350 = vector.shape_cast %1349 : vector<1x2x32xf32> to vector<2x32xf32>
    %cst_451 = arith.constant dense<0.000000e+00> : vector<2x64xf32>
    %1351 = tpu.matmul %1350, %1176, %cst_451 {dimension_numbers = #tpu.dot_dimension_numbers<[1], [0], [0], [1], [0, 0, 1, 1], [], []>} : vector<2x32xf32>, vector<32x64xf32>, vector<2x64xf32> -> vector<2x64xf32>
    %1352 = arith.addf %1347, %1351 : vector<2x64xf32>
    %1353 = vector.broadcast %1177 : vector<1x64xf32> to vector<2x64xf32>
    %1354 = arith.addf %1352, %1353 : vector<2x64xf32>
    %1355 = vector.broadcast %1178 : vector<1x64xf32> to vector<2x64xf32>
    %1356 = arith.mulf %1354, %1355 : vector<2x64xf32>
    %1357 = vector.broadcast %1179 : vector<1x64xf32> to vector<2x64xf32>
    %1358 = arith.addf %1356, %1357 : vector<2x64xf32>
    %cst_452 = arith.constant 0.000000e+00 : f32
    %1359 = vector.broadcast %cst_452 : f32 to vector<2x64xf32>
    %1360 = arith.cmpf ogt, %1358, %1359 : vector<2x64xf32>
    %cst_453 = arith.constant 0.00999999977 : f32
    %1361 = vector.broadcast %cst_453 : f32 to vector<2x64xf32>
    %1362 = arith.mulf %1361, %1358 : vector<2x64xf32>
    %1363 = arith.select %1360, %1358, %1362 : vector<2x64xi1>, vector<2x64xf32>
    %cst_454 = arith.constant dense<0.000000e+00> : vector<2x7xf32>
    %1364 = tpu.matmul %1363, %1180, %cst_454 {dimension_numbers = #tpu.dot_dimension_numbers<[1], [0], [0], [1], [0, 0, 1, 1], [], []>} : vector<2x64xf32>, vector<64x7xf32>, vector<2x7xf32> -> vector<2x7xf32>
    %1365 = vector.broadcast %1181 : vector<1x7xf32> to vector<2x7xf32>
    %1366 = arith.addf %1364, %1365 : vector<2x7xf32>
    %1367 = arith.index_cast %c6_i32_445 : i32 to index
    %c0_455 = arith.constant 0 : index
    %c0_456 = arith.constant 0 : index
    %1368 = vector.load %arg24[%1367, %c0_455, %c0_456] : memref<8x2x7xf32, #tpu.memory_space<vmem>>, vector<1x2x7xf32>
    %1369 = vector.shape_cast %1368 : vector<1x2x7xf32> to vector<2x7xf32>
    %1370 = vector.shape_cast %1366 : vector<2x7xf32> to vector<1x2x7xf32>
    tpu.vector_store %arg24[%1367, %c0_455, %c0_456], %1370 {strides = array<i32>} : memref<8x2x7xf32, #tpu.memory_space<vmem>>, vector<1x2x7xf32>,
    %c7_i32_457 = arith.constant 7 : i32
    %1371 = arith.index_cast %c7_i32_457 : i32 to index
    %c0_458 = arith.constant 0 : index
    %c0_459 = arith.constant 0 : index
    %1372 = vector.load %arg27[%1371, %c0_458, %c0_459] : memref<8x2x32xf32, #tpu.memory_space<vmem>>, vector<1x2x32xf32>
    %1373 = vector.shape_cast %1372 : vector<1x2x32xf32> to vector<2x32xf32>
    %cst_460 = arith.constant dense<0.000000e+00> : vector<2x64xf32>
    %1374 = tpu.matmul %1373, %1175, %cst_460 {dimension_numbers = #tpu.dot_dimension_numbers<[1], [0], [0], [1], [0, 0, 1, 1], [], []>} : vector<2x32xf32>, vector<32x64xf32>, vector<2x64xf32> -> vector<2x64xf32>
    %1375 = arith.index_cast %c7_i32_457 : i32 to index
    %c0_461 = arith.constant 0 : index
    %c0_462 = arith.constant 0 : index
    %1376 = vector.load %arg28[%1375, %c0_461, %c0_462] : memref<8x2x32xf32, #tpu.memory_space<vmem>>, vector<1x2x32xf32>
    %1377 = vector.shape_cast %1376 : vector<1x2x32xf32> to vector<2x32xf32>
    %cst_463 = arith.constant dense<0.000000e+00> : vector<2x64xf32>
    %1378 = tpu.matmul %1377, %1176, %cst_463 {dimension_numbers = #tpu.dot_dimension_numbers<[1], [0], [0], [1], [0, 0, 1, 1], [], []>} : vector<2x32xf32>, vector<32x64xf32>, vector<2x64xf32> -> vector<2x64xf32>
    %1379 = arith.addf %1374, %1378 : vector<2x64xf32>
    %1380 = vector.broadcast %1177 : vector<1x64xf32> to vector<2x64xf32>
    %1381 = arith.addf %1379, %1380 : vector<2x64xf32>
    %1382 = vector.broadcast %1178 : vector<1x64xf32> to vector<2x64xf32>
    %1383 = arith.mulf %1381, %1382 : vector<2x64xf32>
    %1384 = vector.broadcast %1179 : vector<1x64xf32> to vector<2x64xf32>
    %1385 = arith.addf %1383, %1384 : vector<2x64xf32>
    %cst_464 = arith.constant 0.000000e+00 : f32
    %1386 = vector.broadcast %cst_464 : f32 to vector<2x64xf32>
    %1387 = arith.cmpf ogt, %1385, %1386 : vector<2x64xf32>
    %cst_465 = arith.constant 0.00999999977 : f32
    %1388 = vector.broadcast %cst_465 : f32 to vector<2x64xf32>
    %1389 = arith.mulf %1388, %1385 : vector<2x64xf32>
    %1390 = arith.select %1387, %1385, %1389 : vector<2x64xi1>, vector<2x64xf32>
    %cst_466 = arith.constant dense<0.000000e+00> : vector<2x7xf32>
    %1391 = tpu.matmul %1390, %1180, %cst_466 {dimension_numbers = #tpu.dot_dimension_numbers<[1], [0], [0], [1], [0, 0, 1, 1], [], []>} : vector<2x64xf32>, vector<64x7xf32>, vector<2x7xf32> -> vector<2x7xf32>
    %1392 = vector.broadcast %1181 : vector<1x7xf32> to vector<2x7xf32>
    %1393 = arith.addf %1391, %1392 : vector<2x7xf32>
    %1394 = arith.index_cast %c7_i32_457 : i32 to index
    %c0_467 = arith.constant 0 : index
    %c0_468 = arith.constant 0 : index
    %1395 = vector.load %arg24[%1394, %c0_467, %c0_468] : memref<8x2x7xf32, #tpu.memory_space<vmem>>, vector<1x2x7xf32>
    %1396 = vector.shape_cast %1395 : vector<1x2x7xf32> to vector<2x7xf32>
    %1397 = vector.shape_cast %1393 : vector<2x7xf32> to vector<1x2x7xf32>
    tpu.vector_store %arg24[%1394, %c0_467, %c0_468], %1397 {strides = array<i32>} : memref<8x2x7xf32, #tpu.memory_space<vmem>>, vector<1x2x7xf32>,
    %c8_i32_469 = arith.constant 8 : i32
    return
  }
  func.func @transform_0(%arg0: i32) -> (i32, i32, i32) {
    %c0_i32 = arith.constant 0 : i32
    %c0_i32_0 = arith.constant 0 : i32
    %c0_i32_1 = arith.constant 0 : i32
    %c0_i32_2 = arith.constant 0 : i32
    return %c0_i32, %c0_i32_0, %c0_i32_1 : i32, i32, i32
  }
  func.func @transform_1(%arg0: i32) -> (i32, i32) {
    %c0_i32 = arith.constant 0 : i32
    %c0_i32_0 = arith.constant 0 : i32
    %c0_i32_1 = arith.constant 0 : i32
    return %c0_i32, %c0_i32_0 : i32, i32
  }
  func.func @transform_2(%arg0: i32) -> (i32, i32) {
    %c0_i32 = arith.constant 0 : i32
    %c0_i32_0 = arith.constant 0 : i32
    %c0_i32_1 = arith.constant 0 : i32
    return %c0_i32, %c0_i32_0 : i32, i32
  }
  func.func @transform_3(%arg0: i32) -> (i32, i32) {
    %c0_i32 = arith.constant 0 : i32
    %c0_i32_0 = arith.constant 0 : i32
    %c0_i32_1 = arith.constant 0 : i32
    return %c0_i32, %c0_i32_0 : i32, i32
  }
  func.func @transform_4(%arg0: i32) -> (i32, i32) {
    %c0_i32 = arith.constant 0 : i32
    %c0_i32_0 = arith.constant 0 : i32
    %c0_i32_1 = arith.constant 0 : i32
    return %c0_i32, %c0_i32_0 : i32, i32
  }
  func.func @transform_5(%arg0: i32) -> (i32, i32) {
    %c0_i32 = arith.constant 0 : i32
    %c0_i32_0 = arith.constant 0 : i32
    %c0_i32_1 = arith.constant 0 : i32
    return %c0_i32, %c0_i32_0 : i32, i32
  }
  func.func @transform_6(%arg0: i32) -> (i32, i32) {
    %c0_i32 = arith.constant 0 : i32
    %c0_i32_0 = arith.constant 0 : i32
    %c0_i32_1 = arith.constant 0 : i32
    return %c0_i32, %c0_i32_0 : i32, i32
  }
  func.func @transform_7(%arg0: i32) -> (i32, i32) {
    %c0_i32 = arith.constant 0 : i32
    %c0_i32_0 = arith.constant 0 : i32
    %c0_i32_1 = arith.constant 0 : i32
    return %c0_i32, %c0_i32_0 : i32, i32
  }
  func.func @transform_8(%arg0: i32) -> (i32, i32) {
    %c0_i32 = arith.constant 0 : i32
    %c0_i32_0 = arith.constant 0 : i32
    %c0_i32_1 = arith.constant 0 : i32
    return %c0_i32, %c0_i32_0 : i32, i32
  }
  func.func @transform_9(%arg0: i32) -> (i32, i32) {
    %c0_i32 = arith.constant 0 : i32
    %c0_i32_0 = arith.constant 0 : i32
    %c0_i32_1 = arith.constant 0 : i32
    return %c0_i32, %c0_i32_0 : i32, i32
  }
  func.func @transform_10(%arg0: i32) -> (i32, i32) {
    %c0_i32 = arith.constant 0 : i32
    %c0_i32_0 = arith.constant 0 : i32
    %c0_i32_1 = arith.constant 0 : i32
    return %c0_i32, %c0_i32_0 : i32, i32
  }
  func.func @transform_11(%arg0: i32) -> (i32, i32) {
    %c0_i32 = arith.constant 0 : i32
    %c0_i32_0 = arith.constant 0 : i32
    %c0_i32_1 = arith.constant 0 : i32
    return %c0_i32, %c0_i32_0 : i32, i32
  }
  func.func @transform_12(%arg0: i32) -> (i32, i32) {
    %c0_i32 = arith.constant 0 : i32
    %c0_i32_0 = arith.constant 0 : i32
    %c0_i32_1 = arith.constant 0 : i32
    return %c0_i32, %c0_i32_0 : i32, i32
  }
  func.func @transform_13(%arg0: i32) -> (i32, i32) {
    %c0_i32 = arith.constant 0 : i32
    %c0_i32_0 = arith.constant 0 : i32
    %c0_i32_1 = arith.constant 0 : i32
    return %c0_i32, %c0_i32_0 : i32, i32
  }
  func.func @transform_14(%arg0: i32) -> (i32, i32) {
    %c0_i32 = arith.constant 0 : i32
    %c0_i32_0 = arith.constant 0 : i32
    %c0_i32_1 = arith.constant 0 : i32
    return %c0_i32, %c0_i32_0 : i32, i32
  }
  func.func @transform_15(%arg0: i32) -> (i32, i32) {
    %c0_i32 = arith.constant 0 : i32
    %c0_i32_0 = arith.constant 0 : i32
    %c0_i32_1 = arith.constant 0 : i32
    return %c0_i32, %c0_i32_0 : i32, i32
  }
  func.func @transform_16(%arg0: i32) -> (i32, i32) {
    %c0_i32 = arith.constant 0 : i32
    %c0_i32_0 = arith.constant 0 : i32
    %c0_i32_1 = arith.constant 0 : i32
    return %c0_i32, %c0_i32_0 : i32, i32
  }
  func.func @transform_17(%arg0: i32) -> (i32, i32) {
    %c0_i32 = arith.constant 0 : i32
    %c0_i32_0 = arith.constant 0 : i32
    %c0_i32_1 = arith.constant 0 : i32
    return %c0_i32, %c0_i32_0 : i32, i32
  }
  func.func @transform_18(%arg0: i32) -> (i32, i32) {
    %c0_i32 = arith.constant 0 : i32
    %c0_i32_0 = arith.constant 0 : i32
    %c0_i32_1 = arith.constant 0 : i32
    return %c0_i32, %c0_i32_0 : i32, i32
  }
  func.func @transform_19(%arg0: i32) -> (i32, i32) {
    %c0_i32 = arith.constant 0 : i32
    %c0_i32_0 = arith.constant 0 : i32
    %c0_i32_1 = arith.constant 0 : i32
    return %c0_i32, %c0_i32_0 : i32, i32
  }
  func.func @transform_20(%arg0: i32) -> (i32, i32) {
    %c0_i32 = arith.constant 0 : i32
    %c0_i32_0 = arith.constant 0 : i32
    %c0_i32_1 = arith.constant 0 : i32
    return %c0_i32, %c0_i32_0 : i32, i32
  }
  func.func @transform_21(%arg0: i32) -> (i32, i32) {
    %c0_i32 = arith.constant 0 : i32
    %c0_i32_0 = arith.constant 0 : i32
    %c0_i32_1 = arith.constant 0 : i32
    return %c0_i32, %c0_i32_0 : i32, i32
  }
  func.func @transform_22(%arg0: i32) -> (i32, i32) {
    %c0_i32 = arith.constant 0 : i32
    %c0_i32_0 = arith.constant 0 : i32
    %c0_i32_1 = arith.constant 0 : i32
    return %c0_i32, %c0_i32_0 : i32, i32
  }
  func.func @transform_23(%arg0: i32) -> (i32, i32, i32) {
    %c0_i32 = arith.constant 0 : i32
    %c0_i32_0 = arith.constant 0 : i32
    %c0_i32_1 = arith.constant 0 : i32
    %c0_i32_2 = arith.constant 0 : i32
    return %c0_i32, %c0_i32_0, %c0_i32_1 : i32, i32, i32
  }
}

</mosaic_0001>

<bundles_post_ra>
// kernel: speech_to_lip_forward.1
= control target key start
LH: loop header
LB: loop body
LE: loop exit
PB: predicated region body
PF: predicated region fallthrough
CT: control target
= control target key end

     0   :  { %s15006_s0 = inlined_call_operand.hbm [shape: f32[8,2,80], index: 0, kind: input, shape index: {}]   ;;  %s15007_s1 = inlined_call_operand.hbm [shape: f32[80,96], index: 1, kind: input, shape index: {}]   ;;  %s15008_s2 = inlined_call_operand.hbm [shape: f32[1,96], index: 2, kind: input, shape index: {}]   ;;  %s15009_s3 = inlined_call_operand.hbm [shape: f32[32,96], index: 3, kind: input, shape index: {}]   ;;  %s15010_s4 = inlined_call_operand.hbm [shape: f32[1,96], index: 4, kind: input, shape index: {}]   ;;  %s15011_s5 = inlined_call_operand.hbm [shape: f32[80,96], index: 5, kind: input, shape index: {}]   ;;  %s15012_s6 = inlined_call_operand.hbm [shape: f32[1,96], index: 6, kind: input, shape index: {}]   ;;  %s15013_s7 = inlined_call_operand.hbm [shape: f32[32,96], index: 7, kind: input, shape index: {}]   ;;  %s15014_s8 = inlined_call_operand.hbm [shape: f32[1,96], index: 8, kind: input, shape index: {}]   ;;  %s15015_s9 = inlined_call_operand.hbm [shape: f32[64,96], index: 9, kind: input, shape index: {}]   ;;  %s15016_s10 = inlined_call_operand.hbm [shape: f32[1,96], index: 10, kind: input, shape index: {}]   ;;  %s15017_s11 = inlined_call_operand.hbm [shape: f32[32,96], index: 11, kind: input, shape index: {}]   ;;  %s15018_s12 = inlined_call_operand.hbm [shape: f32[1,96], index: 12, kind: input, shape index: {}]   ;;  %s15019_s13 = inlined_call_operand.hbm [shape: f32[64,96], index: 13, kind: input, shape index: {}]   ;;  %s15020_s14 = inlined_call_operand.hbm [shape: f32[1,96], index: 14, kind: input, shape index: {}]   ;;  %s15021_s15 = inlined_call_operand.hbm [shape: f32[32,96], index: 15, kind: input, shape index: {}]   ;;  %s15022_s16 = inlined_call_operand.hbm [shape: f32[1,96], index: 16, kind: input, shape index: {}]   ;;  %s15023_s17 = inlined_call_operand.hbm [shape: f32[64,64], index: 17, kind: input, shape index: {}]   ;;  %s15024_s18 = inlined_call_operand.hbm [shape: f32[1,64], index: 18, kind: input, shape index: {}]   ;;  %s15025_s19 = inlined_call_operand.hbm [shape: f32[1,64], index: 19, kind: input, shape index: {}]   ;;  %s15026_s20 = inlined_call_operand.hbm [shape: f32[1,64], index: 20, kind: input, shape index: {}]   ;;  %s15027_s21 = inlined_call_operand.hbm [shape: f32[64,7], index: 21, kind: input, shape index: {}]   ;;  %s15028_s22 = inlined_call_operand.hbm [shape: f32[1,7], index: 22, kind: input, shape index: {}]   ;;  %s15029_s23 = inlined_call_operand.hbm [shape: f32[8,2,7], index: 23, kind: output, shape index: {}]  }
   0x1   :  { %15041 = sst [smem:[#allocation56_spill]] %s15006_s0 }
   0x2   :  { %15042 = sst [smem:[#allocation57_spill]] %s15007_s1 }
   0x3   :  { %15043 = sst [smem:[#allocation58_spill]] %s15008_s2 }
   0x4   :  { %15044 = sst [smem:[#allocation59_spill]] %s15009_s3 }
   0x5   :  { %15045 = sst [smem:[#allocation60_spill]] %s15010_s4 }
   0x6   :  { %15046 = sst [smem:[#allocation61_spill]] %s15011_s5 }
   0x7   :  { %15047 = sst [smem:[#allocation62_spill]] %s15012_s6 }
   0x8   :  { %15048 = sst [smem:[#allocation63_spill]] %s15013_s7 }
   0x9   :  { %15049 = sst [smem:[#allocation64_spill]] %s15026_s20 }
   0xa   :  { %15050 = sst [smem:[#allocation65_spill]] %s15028_s22 }
   0xb   :  { %15051 = sst [smem:[#allocation66_spill]] %s15029_s23 }
   0xc   :  { %28 = vsyncpa [#allocation7], 0 }
   0xd   :  { %29 = vsyncpa [#allocation10], 0 }
   0xe   :  { %30 = vsyncpa [#allocation13], 0 }
   0xf   :  { %31 = vsyncpa [#allocation16], 0 }
  0x10   :  { %32 = vsyncpa [#allocation19], 0 }
  0x11   :  { %33 = vsyncpa [#allocation22], 0 }
  0x12   :  { %34 = vsyncpa [#allocation25], 0 }
  0x13   :  { %35 = vsyncpa [#allocation28], 0 }
  0x14   :  { %36 = vsyncpa [#allocation31], 0 }
  0x15   :  { %37 = vsyncpa [#allocation34], 0 }
  0x16   :  { %38 = vsyncpa [#allocation37], 0 }
  0x17   :  { %39 = vsyncpa [#allocation40], 0 }
  0x18   :  { %40 = vsyncpa [#allocation8], 0  ;;  %s13147_s4 = smov [#allocation9]   ;;  %s15052_s5 = sld [smem:[#allocation57_spill]] }
  0x19   :  { %s58_s30 = sshll.u32 %s13147_s4, 4  ;;  %s59_s30 = int_to_ptr.vmem [resolvable:$true] %s58_s30 }
  0x1e   :  { %s12593_s1 = scalar_lea.hbm %s15052_s5, 1280 }
  0x1f   :  { %p12594_p0 = scmp.ne.s32.totalorder %s15052_s5, %s12593_s1  ;;  %p12597_p1 = scmp.lt.u32.totalorder %s12593_s1, %s15052_s5 }
  0x21   :  { %p12599_p2 = pnand %p12597_p1, %p12594_p0 }
  0x23   :  { %12602 = shalt.err (!%p12599_p2)
}
  0x24   :  { %s12603_s7 = scalar_lea.vmem %s59_s30, 1280  ;;  %p12608_p4 = scmp.lt.s32.totalorder %s59_s30, %s59_s30 }
  0x25   :  { %p12604_p3 = scmp.ne.s32.totalorder %s59_s30, %s12603_s7  ;;  %p12609_p5 = scmp.lt.s32.totalorder %s12603_s7, %s12603_s7 }
  0x27   :  { %p12610_p6 = por %p12609_p5, %p12608_p4 }
  0x29   :  { %p12611_p7 = pnand %p12610_p6, %p12604_p3 }
  0x2b   :  { %12614 = shalt.err (!%p12611_p7)
}
  0x2c   :  { %s13148_s28 = smov 128   ;;  %s13149_s29 = smov 8  }
  0x2d   :  { %64 = dma.hbm_to_vmem [thread:$0]  %s15052_s5, 1280, %s59_s30, [#allocation10], %s13148_s28, %s13148_s28, %s13149_s29  }
  0x2e   :  { %s13150_s4 = smov [#allocation12]   ;;  %s13151_s25 = smov [#allocation15]  }
  0x2f   :  { %s80_s24 = sshll.u32 %s13150_s4, 4  ;;  %s102_s1 = sshll.u32 %s13151_s25, 4  ;;  %s81_s24 = int_to_ptr.vmem [resolvable:$true] %s80_s24  ;;  %s103_s1 = int_to_ptr.vmem [resolvable:$true] %s102_s1 }
  0x30   :  { %s15053_s6 = sld [smem:[#allocation59_spill]] }
  0x36   :  { %s12615_s27 = scalar_lea.hbm %s15053_s6, 512 }
  0x37   :  { %p12616_p8 = scmp.ne.s32.totalorder %s15053_s6, %s12615_s27  ;;  %p12619_p9 = scmp.lt.u32.totalorder %s12615_s27, %s15053_s6 }
  0x39   :  { %p12621_p10 = pnand %p12619_p9, %p12616_p8 }
  0x3b   :  { %12624 = shalt.err (!%p12621_p10)
}
  0x3c   :  { %s12625_s30 = scalar_lea.vmem %s81_s24, 512  ;;  %p12630_p12 = scmp.lt.s32.totalorder %s81_s24, %s81_s24 }
  0x3d   :  { %p12626_p11 = scmp.ne.s32.totalorder %s81_s24, %s12625_s30  ;;  %p12631_p13 = scmp.lt.s32.totalorder %s12625_s30, %s12625_s30 }
  0x3f   :  { %p12632_p0 = por %p12631_p13, %p12630_p12 }
  0x41   :  { %p12633_p1 = pnand %p12632_p0, %p12626_p11 }
  0x43   :  { %12636 = shalt.err (!%p12633_p1)
}
  0x44   :  { %86 = dma.hbm_to_vmem [thread:$0]  %s15053_s6, 512, %s81_s24, [#allocation13], %s13148_s28, %s13148_s28, %s13149_s29  }
  0x45   :  { %s15054_s22 = sld [smem:[#allocation61_spill]] }
  0x4b   :  { %s12637_s0 = scalar_lea.hbm %s15054_s22, 1280 }
  0x4c   :  { %p12638_p2 = scmp.ne.s32.totalorder %s15054_s22, %s12637_s0  ;;  %p12641_p3 = scmp.lt.u32.totalorder %s12637_s0, %s15054_s22 }
  0x4e   :  { %p12643_p4 = pnand %p12641_p3, %p12638_p2 }
  0x50   :  { %12646 = shalt.err (!%p12643_p4)
}
  0x51   :  { %s12647_s27 = scalar_lea.vmem %s103_s1, 1280  ;;  %p12652_p6 = scmp.lt.s32.totalorder %s103_s1, %s103_s1 }
  0x52   :  { %p12648_p5 = scmp.ne.s32.totalorder %s103_s1, %s12647_s27  ;;  %p12653_p7 = scmp.lt.s32.totalorder %s12647_s27, %s12647_s27 }
  0x54   :  { %p12654_p8 = por %p12653_p7, %p12652_p6 }
  0x56   :  { %p12655_p9 = pnand %p12654_p8, %p12648_p5 }
  0x58   :  { %12658 = shalt.err (!%p12655_p9)
}
  0x59   :  { %108 = dma.hbm_to_vmem [thread:$0]  %s15054_s22, 1280, %s103_s1, [#allocation16], %s13148_s28, %s13148_s28, %s13149_s29  }
  0x5a   :  { %s13152_s7 = smov [#allocation18]   ;;  %s13153_s5 = smov [#allocation21]  }
  0x5b   :  { %s124_s30 = sshll.u32 %s13152_s7, 4  ;;  %s146_s3 = sshll.u32 %s13153_s5, 4  ;;  %s125_s30 = int_to_ptr.vmem [resolvable:$true] %s124_s30  ;;  %s147_s3 = int_to_ptr.vmem [resolvable:$true] %s146_s3 }
  0x5c   :  { %s15055_s0 = sld [smem:[#allocation63_spill]] }
  0x62   :  { %s12659_s4 = scalar_lea.hbm %s15055_s0, 512 }
  0x63   :  { %p12660_p10 = scmp.ne.s32.totalorder %s15055_s0, %s12659_s4  ;;  %p12663_p11 = scmp.lt.u32.totalorder %s12659_s4, %s15055_s0 }
  0x65   :  { %p12665_p12 = pnand %p12663_p11, %p12660_p10 }
  0x67   :  { %12668 = shalt.err (!%p12665_p12)
}
  0x68   :  { %s12669_s1 = scalar_lea.vmem %s125_s30, 512  ;;  %p12674_p0 = scmp.lt.s32.totalorder %s125_s30, %s125_s30 }
  0x69   :  { %p12670_p13 = scmp.ne.s32.totalorder %s125_s30, %s12669_s1  ;;  %p12675_p1 = scmp.lt.s32.totalorder %s12669_s1, %s12669_s1 }
  0x6b   :  { %p12676_p2 = por %p12675_p1, %p12674_p0 }
  0x6d   :  { %p12677_p3 = pnand %p12676_p2, %p12670_p13 }
  0x6f   :  { %12680 = shalt.err (!%p12677_p3)
}
  0x70   :  { %130 = dma.hbm_to_vmem [thread:$0]  %s15055_s0, 512, %s125_s30, [#allocation19], %s13148_s28, %s13148_s28, %s13149_s29  }
  0x71   :  { %s12681_s5 = scalar_lea.hbm %s15015_s9, 1024 }
  0x72   :  { %p12682_p4 = scmp.ne.s32.totalorder %s15015_s9, %s12681_s5  ;;  %p12685_p5 = scmp.lt.u32.totalorder %s12681_s5, %s15015_s9 }
  0x74   :  { %p12687_p6 = pnand %p12685_p5, %p12682_p4 }
  0x76   :  { %12690 = shalt.err (!%p12687_p6)
}
  0x77   :  { %s12691_s26 = scalar_lea.vmem %s147_s3, 1024  ;;  %p12696_p8 = scmp.lt.s32.totalorder %s147_s3, %s147_s3 }
  0x78   :  { %p12692_p7 = scmp.ne.s32.totalorder %s147_s3, %s12691_s26  ;;  %p12697_p9 = scmp.lt.s32.totalorder %s12691_s26, %s12691_s26 }
  0x7a   :  { %p12698_p10 = por %p12697_p9, %p12696_p8 }
  0x7c   :  { %p12699_p11 = pnand %p12698_p10, %p12692_p7 }
  0x7e   :  { %12702 = shalt.err (!%p12699_p11)
}
  0x7f   :  { %152 = dma.hbm_to_vmem [thread:$0]  %s15015_s9, 1024, %s147_s3, [#allocation22], %s13148_s28, %s13148_s28, %s13149_s29  }
  0x80   :  { %s13154_s2 = smov [#allocation24]   ;;  %s13155_s1 = smov [#allocation27]  }
  0x81   :  { %s168_s27 = sshll.u32 %s13154_s2, 4  ;;  %s190_s22 = sshll.u32 %s13155_s1, 4  ;;  %s169_s27 = int_to_ptr.vmem [resolvable:$true] %s168_s27  ;;  %s191_s22 = int_to_ptr.vmem [resolvable:$true] %s190_s22 }
  0x82   :  { %s12703_s7 = scalar_lea.hbm %s15017_s11, 512 }
  0x83   :  { %p12704_p12 = scmp.ne.s32.totalorder %s15017_s11, %s12703_s7  ;;  %p12707_p13 = scmp.lt.u32.totalorder %s12703_s7, %s15017_s11 }
  0x85   :  { %p12709_p0 = pnand %p12707_p13, %p12704_p12 }
  0x87   :  { %12712 = shalt.err (!%p12709_p0)
}
  0x88   :  { %s12713_s9 = scalar_lea.vmem %s169_s27, 512  ;;  %p12718_p2 = scmp.lt.s32.totalorder %s169_s27, %s169_s27 }
  0x89   :  { %p12714_p1 = scmp.ne.s32.totalorder %s169_s27, %s12713_s9  ;;  %p12719_p3 = scmp.lt.s32.totalorder %s12713_s9, %s12713_s9 }
  0x8b   :  { %p12720_p4 = por %p12719_p3, %p12718_p2 }
  0x8d   :  { %p12721_p5 = pnand %p12720_p4, %p12714_p1 }
  0x8f   :  { %12724 = shalt.err (!%p12721_p5)
}
  0x90   :  { %174 = dma.hbm_to_vmem [thread:$0]  %s15017_s11, 512, %s169_s27, [#allocation25], %s13148_s28, %s13148_s28, %s13149_s29  }
  0x91   :  { %s12725_s0 = scalar_lea.hbm %s15019_s13, 1024 }
  0x92   :  { %p12726_p6 = scmp.ne.s32.totalorder %s15019_s13, %s12725_s0  ;;  %p12729_p7 = scmp.lt.u32.totalorder %s12725_s0, %s15019_s13 }
  0x94   :  { %p12731_p8 = pnand %p12729_p7, %p12726_p6 }
  0x96   :  { %12734 = shalt.err (!%p12731_p8)
}
  0x97   :  { %s12735_s7 = scalar_lea.vmem %s191_s22, 1024  ;;  %p12740_p10 = scmp.lt.s32.totalorder %s191_s22, %s191_s22 }
  0x98   :  { %p12736_p9 = scmp.ne.s32.totalorder %s191_s22, %s12735_s7  ;;  %p12741_p11 = scmp.lt.s32.totalorder %s12735_s7, %s12735_s7 }
  0x9a   :  { %p12742_p12 = por %p12741_p11, %p12740_p10 }
  0x9c   :  { %p12743_p13 = pnand %p12742_p12, %p12736_p9 }
  0x9e   :  { %12746 = shalt.err (!%p12743_p13)
}
  0x9f   :  { %196 = dma.hbm_to_vmem [thread:$0]  %s15019_s13, 1024, %s191_s22, [#allocation28], %s13148_s28, %s13148_s28, %s13149_s29  }
  0xa0   :  { %s13156_s5 = smov [#allocation30]   ;;  %s13157_s20 = smov [#allocation33]  }
  0xa1   :  { %s212_s23 = sshll.u32 %s13156_s5, 4  ;;  %s234_s4 = sshll.u32 %s13157_s20, 4  ;;  %s213_s23 = int_to_ptr.vmem [resolvable:$true] %s212_s23  ;;  %s235_s4 = int_to_ptr.vmem [resolvable:$true] %s234_s4 }
  0xa2   :  { %s12747_s25 = scalar_lea.hbm %s15021_s15, 512 }
  0xa3   :  { %p12748_p0 = scmp.ne.s32.totalorder %s15021_s15, %s12747_s25  ;;  %p12751_p1 = scmp.lt.u32.totalorder %s12747_s25, %s15021_s15 }
  0xa5   :  { %p12753_p2 = pnand %p12751_p1, %p12748_p0 }
  0xa7   :  { %12756 = shalt.err (!%p12753_p2)
}
  0xa8   :  { %s12757_s13 = scalar_lea.vmem %s213_s23, 512  ;;  %p12762_p4 = scmp.lt.s32.totalorder %s213_s23, %s213_s23 }
  0xa9   :  { %p12758_p3 = scmp.ne.s32.totalorder %s213_s23, %s12757_s13  ;;  %p12763_p5 = scmp.lt.s32.totalorder %s12757_s13, %s12757_s13 }
  0xab   :  { %p12764_p6 = por %p12763_p5, %p12762_p4 }
  0xad   :  { %p12765_p7 = pnand %p12764_p6, %p12758_p3 }
  0xaf   :  { %12768 = shalt.err (!%p12765_p7)
}
  0xb0   :  { %218 = dma.hbm_to_vmem [thread:$0]  %s15021_s15, 512, %s213_s23, [#allocation31], %s13148_s28, %s13148_s28, %s13149_s29  }
  0xb1   :  { %s12769_s7 = scalar_lea.hbm %s15023_s17, 1024 }
  0xb2   :  { %p12770_p8 = scmp.ne.s32.totalorder %s15023_s17, %s12769_s7  ;;  %p12773_p9 = scmp.lt.u32.totalorder %s12769_s7, %s15023_s17 }
  0xb4   :  { %p12775_p10 = pnand %p12773_p9, %p12770_p8 }
  0xb6   :  { %12778 = shalt.err (!%p12775_p10)
}
  0xb7   :  { %s12779_s9 = scalar_lea.vmem %s235_s4, 1024  ;;  %p12784_p12 = scmp.lt.s32.totalorder %s235_s4, %s235_s4 }
  0xb8   :  { %p12780_p11 = scmp.ne.s32.totalorder %s235_s4, %s12779_s9  ;;  %p12785_p13 = scmp.lt.s32.totalorder %s12779_s9, %s12779_s9 }
  0xba   :  { %p12786_p0 = por %p12785_p13, %p12784_p12 }
  0xbc   :  { %p12787_p1 = pnand %p12786_p0, %p12780_p11 }
  0xbe   :  { %12790 = shalt.err (!%p12787_p1)
}
  0xbf   :  { %240 = dma.hbm_to_vmem [thread:$0]  %s15023_s17, 1024, %s235_s4, [#allocation34], %s13148_s28, %s13148_s28, %s13149_s29  }
  0xc0   :  { %s13158_s3 = smov [#allocation36]   ;;  %s13159_s26 = smov [#allocation39]  }
  0xc1   :  { %s257_s25 = sshll.u32 %s13158_s3, 4  ;;  %s276_s30 = sshll.u32 %s13159_s26, 4  ;;  %s258_s25 = int_to_ptr.vmem [resolvable:$true] %s257_s25  ;;  %s277_s30 = int_to_ptr.vmem [resolvable:$true] %s276_s30 }
  0xc2   :  { %s12791_s13 = scalar_lea.hbm %s15025_s19, 16 }
  0xc3   :  { %p12792_p2 = scmp.ne.s32.totalorder %s15025_s19, %s12791_s13  ;;  %p12795_p3 = scmp.lt.u32.totalorder %s12791_s13, %s15025_s19 }
  0xc5   :  { %p12797_p4 = pnand %p12795_p3, %p12792_p2 }
  0xc7   :  { %12800 = shalt.err (!%p12797_p4)
}
  0xc8   :  { %s12801_s17 = scalar_lea.vmem %s258_s25, 16  ;;  %s12805_s4 = scalar_lea.vmem %s258_s25, 32 }
  0xc9   :  { %p12802_p5 = scmp.ne.s32.totalorder %s258_s25, %s12801_s17  ;;  %p12806_p6 = scmp.lt.s32.totalorder %s258_s25, %s258_s25 }
  0xca   :  { %p12807_p7 = scmp.lt.s32.totalorder %s12805_s4, %s12801_s17 }
  0xcc   :  { %p12808_p8 = por %p12807_p7, %p12806_p6 }
  0xce   :  { %p12809_p9 = pnand %p12808_p8, %p12802_p5 }
  0xd0   :  { %12812 = shalt.err (!%p12809_p9)
}
  0xd1   :  { %260 = dma.hbm_to_vmem [thread:$0]  %s15025_s19, 16, %s258_s25, [#allocation37]  }
  0xd2   :  { %s12813_s20 = scalar_lea.hbm %s15027_s21, 1024 }
  0xd3   :  { %p12814_p10 = scmp.ne.s32.totalorder %s15027_s21, %s12813_s20  ;;  %p12817_p11 = scmp.lt.u32.totalorder %s12813_s20, %s15027_s21 }
  0xd5   :  { %p12819_p12 = pnand %p12817_p11, %p12814_p10 }
  0xd7   :  { %12822 = shalt.err (!%p12819_p12)
}
  0xd8   :  { %s12823_s26 = scalar_lea.vmem %s277_s30, 1024  ;;  %p12828_p0 = scmp.lt.s32.totalorder %s277_s30, %s277_s30 }
  0xd9   :  { %p12824_p13 = scmp.ne.s32.totalorder %s277_s30, %s12823_s26  ;;  %p12829_p1 = scmp.lt.s32.totalorder %s12823_s26, %s12823_s26 }
  0xdb   :  { %p12830_p2 = por %p12829_p1, %p12828_p0 }
  0xdd   :  { %p12831_p3 = pnand %p12830_p2, %p12824_p13 }
  0xdf   :  { %12834 = shalt.err (!%p12831_p3)
}
  0xe0   :  { %282 = dma.hbm_to_vmem [thread:$0]  %s15027_s21, 1024, %s277_s30, [#allocation40], %s13148_s28, %s13148_s28, %s13149_s29  }
  0xe1   :  { %s13160_s0 = smov [#allocation6]   ;;  %s15056_s1 = sld [smem:[#allocation56_spill]] }
  0xe2   :  { %s46_s2 = sshll.u32 %s13160_s0, 4  ;;  %s47_s2 = int_to_ptr.vmem [resolvable:$true] %s46_s2 }
  0xe7   :  { %s12835_s24 = scalar_lea.hbm %s15056_s1, 256 }
  0xe8   :  { %p12836_p4 = scmp.ne.s32.totalorder %s15056_s1, %s12835_s24  ;;  %p12839_p5 = scmp.lt.u32.totalorder %s12835_s24, %s15056_s1 }
  0xea   :  { %p12841_p6 = pnand %p12839_p5, %p12836_p4 }
  0xec   :  { %12844 = shalt.err (!%p12841_p6)
}
  0xed   :  { %s12845_s11 = scalar_lea.vmem %s47_s2, 256  ;;  %p12850_p8 = scmp.lt.s32.totalorder %s47_s2, %s47_s2 }
  0xee   :  { %p12846_p7 = scmp.ne.s32.totalorder %s47_s2, %s12845_s11  ;;  %p12851_p9 = scmp.lt.s32.totalorder %s12845_s11, %s12845_s11 }
  0xf0   :  { %p12852_p10 = por %p12851_p9, %p12850_p8 }
  0xf2   :  { %p12853_p11 = pnand %p12852_p10, %p12846_p7 }
  0xf4   :  { %12856 = shalt.err (!%p12853_p11)
}
  0xf5   :  { %s13161_s21 = smov 32   ;;  %s13162_s28 = smov 2  }
  0xf6   :  { %52 = dma.hbm_to_vmem [thread:$0]  %s15056_s1, 256, %s47_s2, [#allocation7], %s13161_s21, %s13161_s21, %s13162_s28  }
  0xf7   :  { %s13163_s27 = smov [#allocation11]   ;;  %s13164_s20 = smov [#allocation14]  }
  0xf8   :  { %s71_s5 = sshll.u32 %s13163_s27, 4  ;;  %s93_s9 = sshll.u32 %s13164_s20, 4  ;;  %s72_s5 = int_to_ptr.vmem [resolvable:$true] %s71_s5  ;;  %s94_s9 = int_to_ptr.vmem [resolvable:$true] %s93_s9 }
  0xf9   :  { %s15057_s3 = sld [smem:[#allocation58_spill]] }
  0xff   :  { %s12857_s26 = scalar_lea.hbm %s15057_s3, 16 }
 0x100   :  { %p12858_p12 = scmp.ne.s32.totalorder %s15057_s3, %s12857_s26  ;;  %p12861_p13 = scmp.lt.u32.totalorder %s12857_s26, %s15057_s3 }
 0x102   :  { %p12863_p0 = pnand %p12861_p13, %p12858_p12 }
 0x104   :  { %12866 = shalt.err (!%p12863_p0)
}
 0x105   :  { %s12867_s2 = scalar_lea.vmem %s72_s5, 16  ;;  %s12871_s22 = scalar_lea.vmem %s72_s5, 32 }
 0x106   :  { %p12868_p1 = scmp.ne.s32.totalorder %s72_s5, %s12867_s2  ;;  %p12872_p2 = scmp.lt.s32.totalorder %s72_s5, %s72_s5 }
 0x107   :  { %p12873_p3 = scmp.lt.s32.totalorder %s12871_s22, %s12867_s2 }
 0x109   :  { %p12874_p4 = por %p12873_p3, %p12872_p2 }
 0x10b   :  { %p12875_p5 = pnand %p12874_p4, %p12868_p1 }
 0x10d   :  { %12878 = shalt.err (!%p12875_p5)
}
 0x10e   :  { %74 = dma.hbm_to_vmem [thread:$0]  %s15057_s3, 16, %s72_s5, [#allocation10]  }
 0x10f   :  { %s15058_s4 = sld [smem:[#allocation60_spill]] }
 0x115   :  { %s12879_s7 = scalar_lea.hbm %s15058_s4, 16 }
 0x116   :  { %p12880_p6 = scmp.ne.s32.totalorder %s15058_s4, %s12879_s7  ;;  %p12883_p7 = scmp.lt.u32.totalorder %s12879_s7, %s15058_s4 }
 0x118   :  { %p12885_p8 = pnand %p12883_p7, %p12880_p6 }
 0x11a   :  { %12888 = shalt.err (!%p12885_p8)
}
 0x11b   :  { %s12889_s20 = scalar_lea.vmem %s94_s9, 16  ;;  %s12893_s15 = scalar_lea.vmem %s94_s9, 32 }
 0x11c   :  { %p12890_p9 = scmp.ne.s32.totalorder %s94_s9, %s12889_s20  ;;  %p12894_p10 = scmp.lt.s32.totalorder %s94_s9, %s94_s9 }
 0x11d   :  { %p12895_p11 = scmp.lt.s32.totalorder %s12893_s15, %s12889_s20 }
 0x11f   :  { %p12896_p12 = por %p12895_p11, %p12894_p10 }
 0x121   :  { %p12897_p13 = pnand %p12896_p12, %p12890_p9 }
 0x123   :  { %12900 = shalt.err (!%p12897_p13)
}
 0x124   :  { %96 = dma.hbm_to_vmem [thread:$0]  %s15058_s4, 16, %s94_s9, [#allocation13]  }
 0x125   :  { %s13165_s3 = smov [#allocation17]   ;;  %s13166_s19 = smov [#allocation20]  }
 0x126   :  { %s115_s26 = sshll.u32 %s13165_s3, 4  ;;  %s137_s25 = sshll.u32 %s13166_s19, 4  ;;  %s116_s26 = int_to_ptr.vmem [resolvable:$true] %s115_s26  ;;  %s138_s25 = int_to_ptr.vmem [resolvable:$true] %s137_s25 }
 0x127   :  { %s15059_s2 = sld [smem:[#allocation62_spill]] }
 0x12d   :  { %s12901_s22 = scalar_lea.hbm %s15059_s2, 16 }
 0x12e   :  { %p12902_p0 = scmp.ne.s32.totalorder %s15059_s2, %s12901_s22  ;;  %p12905_p1 = scmp.lt.u32.totalorder %s12901_s22, %s15059_s2 }
 0x130   :  { %p12907_p2 = pnand %p12905_p1, %p12902_p0 }
 0x132   :  { %12910 = shalt.err (!%p12907_p2)
}
 0x133   :  { %s12911_s9 = scalar_lea.vmem %s116_s26, 16  ;;  %s12915_s4 = scalar_lea.vmem %s116_s26, 32 }
 0x134   :  { %p12912_p3 = scmp.ne.s32.totalorder %s116_s26, %s12911_s9  ;;  %p12916_p4 = scmp.lt.s32.totalorder %s116_s26, %s116_s26 }
 0x135   :  { %p12917_p5 = scmp.lt.s32.totalorder %s12915_s4, %s12911_s9 }
 0x137   :  { %p12918_p6 = por %p12917_p5, %p12916_p4 }
 0x139   :  { %p12919_p7 = pnand %p12918_p6, %p12912_p3 }
 0x13b   :  { %12922 = shalt.err (!%p12919_p7)
}
 0x13c   :  { %118 = dma.hbm_to_vmem [thread:$0]  %s15059_s2, 16, %s116_s26, [#allocation16]  }
 0x13d   :  { %s12923_s27 = scalar_lea.hbm %s15014_s8, 16 }
 0x13e   :  { %p12924_p8 = scmp.ne.s32.totalorder %s15014_s8, %s12923_s27  ;;  %p12927_p9 = scmp.lt.u32.totalorder %s12923_s27, %s15014_s8 }
 0x140   :  { %p12929_p10 = pnand %p12927_p9, %p12924_p8 }
 0x142   :  { %12932 = shalt.err (!%p12929_p10)
}
 0x143   :  { %s12933_s3 = scalar_lea.vmem %s138_s25, 16  ;;  %s12937_s19 = scalar_lea.vmem %s138_s25, 32 }
 0x144   :  { %p12934_p11 = scmp.ne.s32.totalorder %s138_s25, %s12933_s3  ;;  %p12938_p12 = scmp.lt.s32.totalorder %s138_s25, %s138_s25 }
 0x145   :  { %p12939_p13 = scmp.lt.s32.totalorder %s12937_s19, %s12933_s3 }
 0x147   :  { %p12940_p0 = por %p12939_p13, %p12938_p12 }
 0x149   :  { %p12941_p1 = pnand %p12940_p0, %p12934_p11 }
 0x14b   :  { %12944 = shalt.err (!%p12941_p1)
}
 0x14c   :  { %140 = dma.hbm_to_vmem [thread:$0]  %s15014_s8, 16, %s138_s25, [#allocation19]  }
 0x14d   :  { %s13167_s13 = smov [#allocation23]   ;;  %s13168_s22 = smov [#allocation26]  }
 0x14e   :  { %s159_s2 = sshll.u32 %s13167_s13, 4  ;;  %s181_s1 = sshll.u32 %s13168_s22, 4  ;;  %s160_s2 = int_to_ptr.vmem [resolvable:$true] %s159_s2  ;;  %s182_s1 = int_to_ptr.vmem [resolvable:$true] %s181_s1 }
 0x14f   :  { %s12945_s17 = scalar_lea.hbm %s15016_s10, 16 }
 0x150   :  { %p12946_p2 = scmp.ne.s32.totalorder %s15016_s10, %s12945_s17  ;;  %p12949_p3 = scmp.lt.u32.totalorder %s12945_s17, %s15016_s10 }
 0x152   :  { %p12951_p4 = pnand %p12949_p3, %p12946_p2 }
 0x154   :  { %12954 = shalt.err (!%p12951_p4)
}
 0x155   :  { %s12955_s8 = scalar_lea.vmem %s160_s2, 16  ;;  %s12959_s25 = scalar_lea.vmem %s160_s2, 32 }
 0x156   :  { %p12956_p5 = scmp.ne.s32.totalorder %s160_s2, %s12955_s8  ;;  %p12960_p6 = scmp.lt.s32.totalorder %s160_s2, %s160_s2 }
 0x157   :  { %p12961_p7 = scmp.lt.s32.totalorder %s12959_s25, %s12955_s8 }
 0x159   :  { %p12962_p8 = por %p12961_p7, %p12960_p6 }
 0x15b   :  { %p12963_p9 = pnand %p12962_p8, %p12956_p5 }
 0x15d   :  { %12966 = shalt.err (!%p12963_p9)
}
 0x15e   :  { %162 = dma.hbm_to_vmem [thread:$0]  %s15016_s10, 16, %s160_s2, [#allocation22]  }
 0x15f   :  { %s12967_s15 = scalar_lea.hbm %s15018_s12, 16 }
 0x160   :  { %p12968_p10 = scmp.ne.s32.totalorder %s15018_s12, %s12967_s15  ;;  %p12971_p11 = scmp.lt.u32.totalorder %s12967_s15, %s15018_s12 }
 0x162   :  { %p12973_p12 = pnand %p12971_p11, %p12968_p10 }
 0x164   :  { %12976 = shalt.err (!%p12973_p12)
}
 0x165   :  { %s12977_s26 = scalar_lea.vmem %s182_s1, 16  ;;  %s12981_s0 = scalar_lea.vmem %s182_s1, 32 }
 0x166   :  { %p12978_p13 = scmp.ne.s32.totalorder %s182_s1, %s12977_s26  ;;  %p12982_p0 = scmp.lt.s32.totalorder %s182_s1, %s182_s1 }
 0x167   :  { %p12983_p1 = scmp.lt.s32.totalorder %s12981_s0, %s12977_s26 }
 0x169   :  { %p12984_p2 = por %p12983_p1, %p12982_p0 }
 0x16b   :  { %p12985_p3 = pnand %p12984_p2, %p12978_p13 }
 0x16d   :  { %12988 = shalt.err (!%p12985_p3)
}
 0x16e   :  { %184 = dma.hbm_to_vmem [thread:$0]  %s15018_s12, 16, %s182_s1, [#allocation25]  }
 0x16f   :  { %s13169_s2 = smov [#allocation29]   ;;  %s13170_s24 = smov [#allocation32]  }
 0x170   :  { %s203_s22 = sshll.u32 %s13169_s2, 4  ;;  %s225_s6 = sshll.u32 %s13170_s24, 4  ;;  %s204_s22 = int_to_ptr.vmem [resolvable:$true] %s203_s22  ;;  %s226_s6 = int_to_ptr.vmem [resolvable:$true] %s225_s6 }
 0x171   :  { %s12989_s4 = scalar_lea.hbm %s15020_s14, 16 }
 0x172   :  { %p12990_p4 = scmp.ne.s32.totalorder %s15020_s14, %s12989_s4  ;;  %p12993_p5 = scmp.lt.u32.totalorder %s12989_s4, %s15020_s14 }
 0x174   :  { %p12995_p6 = pnand %p12993_p5, %p12990_p4 }
 0x176   :  { %12998 = shalt.err (!%p12995_p6)
}
 0x177   :  { %s12999_s12 = scalar_lea.vmem %s204_s22, 16  ;;  %s13003_s1 = scalar_lea.vmem %s204_s22, 32 }
 0x178   :  { %p13000_p7 = scmp.ne.s32.totalorder %s204_s22, %s12999_s12  ;;  %p13004_p8 = scmp.lt.s32.totalorder %s204_s22, %s204_s22 }
 0x179   :  { %p13005_p9 = scmp.lt.s32.totalorder %s13003_s1, %s12999_s12 }
 0x17b   :  { %p13006_p10 = por %p13005_p9, %p13004_p8 }
 0x17d   :  { %p13007_p11 = pnand %p13006_p10, %p13000_p7 }
 0x17f   :  { %13010 = shalt.err (!%p13007_p11)
}
 0x180   :  { %206 = dma.hbm_to_vmem [thread:$0]  %s15020_s14, 16, %s204_s22, [#allocation28]  }
 0x181   :  { %s13011_s15 = scalar_lea.hbm %s15022_s16, 16 }
 0x182   :  { %p13012_p12 = scmp.ne.s32.totalorder %s15022_s16, %s13011_s15  ;;  %p13015_p13 = scmp.lt.u32.totalorder %s13011_s15, %s15022_s16 }
 0x184   :  { %p13017_p0 = pnand %p13015_p13, %p13012_p12 }
 0x186   :  { %13020 = shalt.err (!%p13017_p0)
}
 0x187   :  { %s13021_s26 = scalar_lea.vmem %s226_s6, 16  ;;  %s13025_s0 = scalar_lea.vmem %s226_s6, 32 }
 0x188   :  { %p13022_p1 = scmp.ne.s32.totalorder %s226_s6, %s13021_s26  ;;  %p13026_p2 = scmp.lt.s32.totalorder %s226_s6, %s226_s6 }
 0x189   :  { %p13027_p3 = scmp.lt.s32.totalorder %s13025_s0, %s13021_s26 }
 0x18b   :  { %p13028_p4 = por %p13027_p3, %p13026_p2 }
 0x18d   :  { %p13029_p5 = pnand %p13028_p4, %p13022_p1 }
 0x18f   :  { %13032 = shalt.err (!%p13029_p5)
}
 0x190   :  { %228 = dma.hbm_to_vmem [thread:$0]  %s15022_s16, 16, %s226_s6, [#allocation31]  }
 0x191   :  { %s13171_s13 = smov [#allocation35]   ;;  %s13172_s22 = smov [#allocation38]  }
 0x192   :  { %s247_s2 = sshll.u32 %s13171_s13, 4  ;;  %s267_s24 = sshll.u32 %s13172_s22, 4  ;;  %s248_s2 = int_to_ptr.vmem [resolvable:$true] %s247_s2  ;;  %s268_s24 = int_to_ptr.vmem [resolvable:$true] %s267_s24 }
 0x193   :  { %s13033_s4 = scalar_lea.hbm %s15024_s18, 16 }
 0x194   :  { %p13034_p6 = scmp.ne.s32.totalorder %s15024_s18, %s13033_s4  ;;  %p13037_p7 = scmp.lt.u32.totalorder %s13033_s4, %s15024_s18 }
 0x196   :  { %p13039_p8 = pnand %p13037_p7, %p13034_p6 }
 0x198   :  { %13042 = shalt.err (!%p13039_p8)
}
 0x199   :  { %s13043_s16 = scalar_lea.vmem %s248_s2, 16  ;;  %s13047_s6 = scalar_lea.vmem %s248_s2, 32 }
 0x19a   :  { %p13044_p9 = scmp.ne.s32.totalorder %s248_s2, %s13043_s16  ;;  %p13048_p10 = scmp.lt.s32.totalorder %s248_s2, %s248_s2 }
 0x19b   :  { %p13049_p11 = scmp.lt.s32.totalorder %s13047_s6, %s13043_s16 }
 0x19d   :  { %p13050_p12 = por %p13049_p11, %p13048_p10 }
 0x19f   :  { %p13051_p13 = pnand %p13050_p12, %p13044_p9 }
 0x1a1   :  { %13054 = shalt.err (!%p13051_p13)
}
 0x1a2   :  { %250 = dma.hbm_to_vmem [thread:$0]  %s15024_s18, 16, %s248_s2, [#allocation34]  }
 0x1a3   :  { %s15060_s27 = sld [smem:[#allocation64_spill]] }
 0x1a9   :  { %s13055_s20 = scalar_lea.hbm %s15060_s27, 16 }
 0x1aa   :  { %p13056_p0 = scmp.ne.s32.totalorder %s15060_s27, %s13055_s20  ;;  %p13059_p1 = scmp.lt.u32.totalorder %s13055_s20, %s15060_s27 }
 0x1ac   :  { %p13061_p2 = pnand %p13059_p1, %p13056_p0 }
 0x1ae   :  { %13064 = shalt.err (!%p13061_p2)
}
 0x1af   :  { %s13065_s19 = scalar_lea.vmem %s268_s24, 16  ;;  %s13069_s26 = scalar_lea.vmem %s268_s24, 32 }
 0x1b0   :  { %p13066_p3 = scmp.ne.s32.totalorder %s268_s24, %s13065_s19  ;;  %p13070_p4 = scmp.lt.s32.totalorder %s268_s24, %s268_s24 }
 0x1b1   :  { %p13071_p5 = scmp.lt.s32.totalorder %s13069_s26, %s13065_s19 }
 0x1b3   :  { %p13072_p6 = por %p13071_p5, %p13070_p4 }
 0x1b5   :  { %p13073_p7 = pnand %p13072_p6, %p13066_p3 }
 0x1b7   :  { %13076 = shalt.err (!%p13073_p7)
}
 0x1b8   :  { %270 = dma.hbm_to_vmem [thread:$0]  %s15060_s27, 16, %s268_s24, [#allocation37]  }
 0x1b9   :  { %s13173_s14 = smov [#allocation41]   ;;  %s15061_s22 = sld [smem:[#allocation65_spill]] }
 0x1ba   :  { %s289_s10 = sshll.u32 %s13173_s14, 4  ;;  %s290_s10 = int_to_ptr.vmem [resolvable:$true] %s289_s10 }
 0x1bf   :  { %s13077_s17 = scalar_lea.hbm %s15061_s22, 16 }
 0x1c0   :  { %p13078_p8 = scmp.ne.s32.totalorder %s15061_s22, %s13077_s17  ;;  %p13081_p9 = scmp.lt.u32.totalorder %s13077_s17, %s15061_s22 }
 0x1c2   :  { %p13083_p10 = pnand %p13081_p9, %p13078_p8 }
 0x1c4   :  { %13086 = shalt.err (!%p13083_p10)
}
 0x1c5   :  { %s13087_s8 = scalar_lea.vmem %s290_s10, 16  ;;  %s13091_s24 = scalar_lea.vmem %s290_s10, 32 }
 0x1c6   :  { %p13088_p11 = scmp.ne.s32.totalorder %s290_s10, %s13087_s8  ;;  %p13092_p12 = scmp.lt.s32.totalorder %s290_s10, %s290_s10 }
 0x1c7   :  { %p13093_p13 = scmp.lt.s32.totalorder %s13091_s24, %s13087_s8 }
 0x1c9   :  { %p13094_p0 = por %p13093_p13, %p13092_p12 }
 0x1cb   :  { %p13095_p1 = pnand %p13094_p0, %p13088_p11 }
 0x1cd   :  { %13098 = shalt.err (!%p13095_p1)
}
 0x1ce   :  { %292 = dma.hbm_to_vmem [thread:$0]  %s15061_s22, 16, %s290_s10, [#allocation40]  }
 0x1cf   :  { %13121 = dma.done.wait [#allocation7], 256  }
 0x1d0   :  { %13122 = vsyncadd [#allocation7], 4294967040 }
 0x1d1   :  { %13123 = dma.done.wait [#allocation10], 1296  }
 0x1d2   :  { %13124 = vsyncadd [#allocation10], 4294966000 }
 0x1d3   :  { %13125 = dma.done.wait [#allocation13], 528  }
 0x1d4   :  { %13126 = vsyncadd [#allocation13], 4294966768 }
 0x1d5   :  { %13127 = dma.done.wait [#allocation16], 1296  }
 0x1d6   :  { %13128 = vsyncadd [#allocation16], 4294966000 }
 0x1d7   :  { %13129 = dma.done.wait [#allocation19], 528  }
 0x1d8   :  { %13130 = vsyncadd [#allocation19], 4294966768 }
 0x1d9   :  { %13131 = dma.done.wait [#allocation22], 1040  }
 0x1da   :  { %13132 = vsyncadd [#allocation22], 4294966256 }
 0x1db   :  { %13133 = dma.done.wait [#allocation25], 528  }
 0x1dc   :  { %13134 = vsyncadd [#allocation25], 4294966768 }
 0x1dd   :  { %13135 = dma.done.wait [#allocation28], 1040  }
 0x1de   :  { %13136 = vsyncadd [#allocation28], 4294966256 }
 0x1df   :  { %13137 = dma.done.wait [#allocation31], 528  }
 0x1e0   :  { %13138 = vsyncadd [#allocation31], 4294966768 }
 0x1e1   :  { %13139 = dma.done.wait [#allocation34], 1040  }
 0x1e2   :  { %13140 = vsyncadd [#allocation34], 4294966256 }
 0x1e3   :  { %13141 = dma.done.wait [#allocation37], 32  }
 0x1e4   :  { %13142 = vsyncadd [#allocation37], 4294967264 }
 0x1e5   :  { %13143 = dma.done.wait [#allocation40], 1040  }
 0x1e6   :  { %13144 = vsyncadd [#allocation40], 4294966256  ;;  %v13174_v0 = vmov 0.0|0.0   ;;  %vm13175_vm0 = vmmov 0   ;;  %v13176_v1 = vmov 0.0   ;;  %v362_v2 = vld [vmem:[#allocation9] sm:$0xff] }
 0x1e7   :  { %11496 = vmatprep.subr.bf16.mxu0 %v13174_v0  ;;  %11511 = vmatprep.subr.bf16.mxu1 %v13174_v0  ;;  %v363_v3 = vld [vmem:[#allocation9 + $0x8] sm:$0xff]  ;;  %v384_v4 = vld [vmem:[#allocation12] sm:$0xff]  ;;  %v385_v6 = vld [vmem:[#allocation12 + $0x8] sm:$0xff]  ;;  %vm395_vm1 = vcmask 654336   ;;  %s13177_s6 = smov 64   ;;  %s13178_s12 = smov 96  }
 0x1e8   :  { %10127 = vmatprep.mubr.msk.f32.mxu1 %vm13175_vm0, %v13176_v1  ;;  %10116 = vmatprep.mubr.msk.f32.mxu0 %vm13175_vm0, %v13176_v1  ;;  %v13615_v5 = vpack.c.bf16 %v363_v3, %v362_v2  ;;  %v364_v7 = vld [vmem:[#allocation9 + $0x10] sm:$0xff]  ;;  %v365_v8 = vld [vmem:[#allocation9 + $0x18] sm:$0xff]  ;;  %v13617_v9 = vpack.c.bf16 %v385_v6, %v384_v4  ;;  %v386_v10 = vld [vmem:[#allocation12 + $0x10] sm:$0xff]  ;;  %vm770_vm2 = vcmask 254976   ;;  %vm482_vm3 = vcmask 261120   ;;  %s13179_s1 = smov [#allocation42]  }
 0x1e9   :  { %v387_v11 = vld [vmem:[#allocation12 + $0x18] sm:$0xff]  ;;  %v13620_v12 = vpack.c.bf16 %v365_v8, %v364_v7  ;;  %v366_v14 = vld [vmem:[#allocation9 + $0x20] sm:$0xff]  ;;  %v372_v16 = vld [vmem:[#allocation15] sm:$0xff]  ;;  %vm7597_vm5 = vcmask 523264   ;;  %vm7671_vm13 = vcmask 50176   ;;  %s9281_s29 = sshll.u32 %s13179_s1, 4  ;;  %s9282_s29 = int_to_ptr.vmem [resolvable:$true] %s9281_s29 }
 0x1ea   :  { %11498 = vmatpush3.bf16.msra.mxu0 %v13615_v5  ;;  %11513 = vmatpush3.bf16.msra.mxu1 %v13617_v9  ;;  %v13624_v13 = vpack.c.bf16 %v387_v11, %v386_v10  ;;  %v367_v15 = vld [vmem:[#allocation9 + $0x28] sm:$0xff]  ;;  %v373_v17 = vld [vmem:[#allocation15 + $0x8] sm:$0xff]  ;;  %v368_v20 = vld [vmem:[#allocation9 + $0x30] sm:$0xff]  ;;  %s13099_s30 = scalar_lea.vmem %s9282_s29, 256  ;;  %p13104_p3 = scmp.lt.s32.totalorder %s9282_s29, %s9282_s29 }
 0x1eb   :  { %11499 = vmatprep.subr.bf16.mxu0 %v13174_v0  ;;  %11514 = vmatprep.subr.bf16.mxu1 %v13174_v0  ;;  %v13628_v18 = vpack.c.bf16 %v367_v15, %v366_v14  ;;  %v13632_v19 = vpack.c.bf16 %v373_v17, %v372_v16  ;;  %v369_v21 = vld [vmem:[#allocation9 + $0x38] sm:$0xff]  ;;  %v374_v22 = vld [vmem:[#allocation15 + $0x10] sm:$0xff]  ;;  %v375_v23 = vld [vmem:[#allocation15 + $0x18] sm:$0xff]  ;;  %p13100_p2 = scmp.ne.s32.totalorder %s9282_s29, %s13099_s30  ;;  %p13105_p4 = scmp.lt.s32.totalorder %s13099_s30, %s13099_s30 }
 0x1ec   :  { %v13637_v24 = vpack.c.bf16 %v369_v21, %v368_v20  ;;  %v13641_v25 = vpack.c.bf16 %v375_v23, %v374_v22  ;;  %v370_v26 = vld [vmem:[#allocation9 + $0x40] sm:$0xff]  ;;  %v371_v27 = vld [vmem:[#allocation9 + $0x48] sm:$0xff]  ;;  %v376_v28 = vld [vmem:[#allocation15 + $0x20] sm:$0xff] }
 0x1ed   :  { %v377_v29 = vld [vmem:[#allocation15 + $0x28] sm:$0xff]  ;;  %v13647_v30 = vpack.c.bf16 %v371_v27, %v370_v26  ;;  %v378_v32 = vld [vmem:[#allocation15 + $0x30] sm:$0xff]  ;;  %v379_v33 = vld [vmem:[#allocation15 + $0x38] sm:$0xff]  ;;  %p13106_p5 = por %p13105_p4, %p13104_p3 }
 0x1ee   :  { %11501 = vmatpush3.bf16.msra.mxu0 %v13620_v12  ;;  %11516 = vmatpush3.bf16.msra.mxu1 %v13624_v13  ;;  %v13651_v31 = vpack.c.bf16 %v377_v29, %v376_v28  ;;  %v394_v34 = vld [vmem:[#allocation6] sm:$0x3]  ;;  %v13656_v35 = vpack.c.bf16 %v379_v33, %v378_v32  ;;  %v380_v36 = vld [vmem:[#allocation15 + $0x40] sm:$0xff]  ;;  %v381_v37 = vld [vmem:[#allocation15 + $0x48] sm:$0xff] }
 0x1ef   :  { %11502 = vmatprep.subr.bf16.mxu0 %v13174_v0  ;;  %11517 = vmatprep.subr.bf16.mxu1 %v13174_v0  ;;  %v13665_v38 = vpack.c.bf16 %v381_v37, %v380_v36  ;;  %v388_v39 = vld [vmem:[#allocation18] sm:$0xff]  ;;  %v389_v40 = vld [vmem:[#allocation18 + $0x8] sm:$0xff]  ;;  %v583_v41 = vld [vmem:[#allocation6 + $0xe] sm:$0x3]  ;;  %p13107_p6 = pnand %p13106_p5, %p13100_p2 }
 0x1f0   :  { %v13671_v42 = vpack.c.bf16 %v389_v40, %v388_v39  ;;  %v390_v43 = vld [vmem:[#allocation18 + $0x10] sm:$0xff]  ;;  %v391_v44 = vld [vmem:[#allocation18 + $0x18] sm:$0xff]  ;;  %v13697_v52 = vld [vmem:[#allocation20] ss:$0 sm:$0xff] }
 0x1f1   :  { %10128 = vmatmul.mubr.f32.vlgmr.msra.gmra.mrb[0].mxu1 %v13176_v1  ;;  %v13678_v45 = vpack.c.bf16 %v391_v44, %v390_v43  ;;  %v13700_v56 = vld [vmem:[#allocation14] ss:$0 sm:$0xff]  ;;  %v13705_v58 = vld [vmem:[#allocation17] ss:$0 sm:$0xff]  ;;  %v13707_v59 = vld [vmem:[#allocation11] ss:$0 sm:$0xff] }
 0x1f2   :  { %11504 = vmatpush3.bf16.msra.mxu0 %v13628_v18  ;;  %11519 = vmatpush3.bf16.msra.mxu1 %v13632_v19  ;;  %v779_v26 = vld [vmem:[#allocation6 + $0x2] sm:$0x3] }
 0x1f3   :  { %11505 = vmatprep.subr.bf16.mxu0 %v13174_v0  ;;  %11520 = vmatprep.subr.bf16.mxu1 %v13174_v0 }
 0x1f4   :  { %10150 = vmatprep.mubr.msk.f32.mxu1 %vm13175_vm0, %v13176_v1 }
 0x1f6   :  { %11507 = vmatpush3.bf16.msra.mxu0 %v13637_v24  ;;  %11522 = vmatpush3.bf16.msra.mxu1 %v13641_v25 }
 0x1f7   :  { %11508 = vmatprep.subr.bf16.mxu0 %v13174_v0  ;;  %11523 = vmatprep.subr.bf16.mxu1 %v13174_v0 }
 0x1fa   :  { %11510 = vmatpush3.bf16.msra.mxu0 %v13647_v30  ;;  %11525 = vmatpush3.bf16.msra.mxu1 %v13651_v31 }
 0x1fb   :  { %11538 = vmatprep.subr.bf16.mxu0 %v13174_v0  ;;  %11526 = vmatprep.subr.bf16.mxu1 %v13174_v0 }
 0x1fd   :  { %10117 = vmatmul.mubr.msk.f32.vlgmr.msra.gmra.mrb[0].mxu0 %vm395_vm1, %v394_v34 }
 0x1fe   :  { %11540 = vmatpush3.bf16.msra.mxu0 %v13615_v5  ;;  %10184 = vmatprep.mubr.msk.f32.mxu0 %vm13175_vm0, %v13176_v1 }
 0x1ff   :  { %11528 = vmatpush3.bf16.msra.mxu1 %v13656_v35  ;;  %11541 = vmatprep.subr.bf16.mxu0 %v13174_v0 }
 0x200   :  { %11529 = vmatprep.subr.bf16.mxu1 %v13174_v0 }
 0x202   :  { %11543 = vmatpush3.bf16.msra.mxu0 %v13620_v12 }
 0x203   :  { %11531 = vmatpush3.bf16.msra.mxu1 %v13665_v38  ;;  %11544 = vmatprep.subr.bf16.mxu0 %v13174_v0 }
 0x204   :  { %11532 = vmatprep.subr.bf16.mxu1 %v13174_v0 }
 0x206   :  { %10151 = vmatmul.mubr.msk.f32.vlgmr.msra.gmra.mrb[2].mxu1 %vm395_vm1, %v583_v41  ;;  %11546 = vmatpush3.bf16.msra.mxu0 %v13628_v18 }
 0x207   :  { %11534 = vmatpush3.bf16.msra.mxu1 %v13671_v42  ;;  %10161 = vmatprep.mubr.msk.f32.mxu1 %vm13175_vm0, %v13176_v1 }
 0x208   :  { %11535 = vmatprep.subr.bf16.mxu1 %v13174_v0  ;;  %11547 = vmatprep.subr.bf16.mxu0 %v13174_v0 }
 0x20a   :  { %11549 = vmatpush3.bf16.msra.mxu0 %v13637_v24 }
 0x20b   :  { %11537 = vmatpush3.bf16.msra.mxu1 %v13678_v45  ;;  %11550 = vmatprep.subr.bf16.mxu0 %v13174_v0 }
 0x20c   :  { %11553 = vmatprep.subr.bf16.mxu1 %v13174_v0 }
 0x20e   :  { %10162 = vmatmul.mubr.f32.vlgmr.msra.gmra.mrb[4].mxu1 %v13176_v1  ;;  %11552 = vmatpush3.bf16.msra.mxu0 %v13647_v30 }
 0x20f   :  { %11574 = vmatprep.subr.bf16.mxu0 %v13174_v0  ;;  %11555 = vmatpush3.bf16.msra.mxu1 %v13617_v9 }
 0x210   :  { %11556 = vmatprep.subr.bf16.mxu1 %v13174_v0  ;;  %10195 = vmatprep.mubr.msk.f32.mxu1 %vm13175_vm0, %v13176_v1 }
 0x211   :  { %10185 = vmatmul.mubr.msk.f32.vlgmr.msra.gmra.mrb[2].mxu0 %vm395_vm1, %v779_v26 }
 0x212   :  { %11576 = vmatpush3.bf16.msra.mxu0 %v13671_v42  ;;  %10229 = vmatprep.mubr.msk.f32.mxu0 %vm13175_vm0, %v13176_v1 }
 0x213   :  { %11558 = vmatpush3.bf16.msra.mxu1 %v13624_v13  ;;  %11577 = vmatprep.subr.bf16.mxu0 %v13174_v0 }
 0x214   :  { %11559 = vmatprep.subr.bf16.mxu1 %v13174_v0 }
 0x216   :  { %11579 = vmatpush3.bf16.msra.mxu0 %v13678_v45 }
 0x217   :  { %11580 = vmatprep.subr.bf16.mxu0 %v13174_v0 }
 0x2c4   :  { %v552_v46 = vpop.f32.mrb[0].mxu1 }
 0x2c5   :  { %v10129_v47 = vpop.f32.mrb[1].mxu1  ;;  %v553_v57 = vadd.f32 %v13700_v56, %v552_v46 }
 0x2d0   :  { %v465_v48 = vpop.f32.mrb[0].mxu0 }
 0x2d1   :  { %v10118_v49 = vpop.f32.mrb[1].mxu0  ;;  %v475_v61 = vadd.f32 %v13707_v59, %v465_v48 }
 0x2d2   :  { %v953_v49 = vld [vmem:[#allocation6 + $0xc] sm:$0x3] }
 0x2d3   :  { %v556_v63 = vadd.f32 %v553_v57, %v475_v61 }
 0x2d5   :  { %v9307_v3 = vmul.f32 -1.442695, %v556_v63 }
 0x2d9   :  { %v653_v50 = vpop.f32.mrb[2].mxu1 }
 0x2da   :  { %v10152_v51 = vpop.f32.mrb[3].mxu1  ;;  %v663_v60 = vadd.f32 %v13705_v58, %v653_v50 }
 0x2e1   :  { %v736_v53 = vpop.f32.mrb[4].mxu1 }
 0x2e2   :  { %v737_v54 = vadd.f32 %v13697_v52, %v736_v53  ;;  %v10163_v55 = vpop.f32.mrb[5].mxu1 }
 0x2e4   :  { %748 = vrot.lane.b32.xlu0 %v737_v54, %s13177_s6  ;;  %v740_v62 = vadd.f32 %v737_v54, %v663_v60  ;;  %v849_v44 = vpop.f32.mrb[2].mxu0 }
 0x2e5   :  { %v10186_v46 = vpop.f32.mrb[3].mxu0 }
 0x2e6   :  { %v9311_v2 = vmul.f32 -1.442695, %v740_v62 }
 0x2e8   :  { %564 = vrot.lane.b32.xlu0 %v553_v57, %s13177_s6  ;;  %12393 = vpow2.f32 %v9311_v2  ;;  %v853_v2 = vadd.f32 %v13707_v59, %v849_v44 }
 0x2e9   :  { %12395 = vpow2.f32 %v9307_v3 }
 0x2f2   :  { %v12394_v4 = vpop.eup %12393 }
 0x2f3   :  { %v744_v6 = vadd.f32 1.0, %v12394_v4  ;;  %v12396_v7 = vpop.eup %12395 }
 0x2f4   :  { %v560_v8 = vadd.f32 1.0, %v12396_v7 }
 0x2f5   :  { %12397 = vrcp.f32 %v744_v6 }
 0x2f6   :  { %12399 = vrcp.f32 %v560_v8 }
 0x2ff   :  { %v12398_v10 = vpop.eup %12397 }
 0x300   :  { %v12400_v15 = vpop.eup %12399  ;;  %v758_v29 = vsub.f32 1.0, %v12398_v10  ;;  %v764_v33 = vmul.f32 0.0, %v12398_v10 }
 0x301   :  { %v574_v37 = vsub.f32 1.0, %v12400_v15  ;;  %v580_v40 = vmul.f32 0.0, %v12400_v15 }
 0x356   :  { %v749_v11 = vpop.permute.xlu0 %748 }
 0x357   :  { %v751_v14 = vmul.f32 %v12398_v10, %v749_v11 }
 0x359   :  { %753 = vrot.lane.b32.xlu1 %v751_v14, %s13177_s6 }
 0x35a   :  { %v565_v16 = vpop.permute.xlu0 %564 }
 0x35b   :  { %v567_v17 = vmul.f32 %v12400_v15, %v565_v16 }
 0x35d   :  { %569 = vrot.lane.b32.xlu1 %v567_v17, %s13177_s6 }
 0x3cb   :  { %v754_v20 = vpop.permute.xlu1 %753 }
 0x3cc   :  { %v756_v21 = vadd.f32 %v754_v20, %v663_v60 }
 0x3ce   :  { %12401 = vtanh.f32 %v756_v21 }
 0x3cf   :  { %v570_v22 = vpop.permute.xlu1 %569 }
 0x3d0   :  { %v572_v23 = vadd.f32 %v570_v22, %v475_v61 }
 0x3d2   :  { %12403 = vtanh.f32 %v572_v23 }
 0x3d8   :  { %v12402_v27 = vpop.eup %12401 }
 0x3d9   :  { %760 = vrot.lane.b32.xlu0 %v12402_v27, %s13178_s12 }
 0x3dc   :  { %v12404_v28 = vpop.eup %12403 }
 0x3dd   :  { %576 = vrot.lane.b32.xlu1 %v12404_v28, %s13178_s12  ;;  %v1139_v28 = vld [vmem:[#allocation6 + $0x4] sm:$0x3] }
 0x44b   :  { %v761_v32 = vpop.permute.xlu0 %760 }
 0x44c   :  { %v763_v34 = vmul.f32 %v761_v32, %v758_v29 }
 0x44e   :  { %v13722_v36 = vadd.f32 %v764_v33, %v763_v34 }
 0x44f   :  { %v577_v39 = vpop.permute.xlu1 %576 }
 0x450   :  { %v579_v41 = vmul.f32 %v577_v39, %v574_v37  ;;  %773 = vrot.lane.b32.xlu0 %v13722_v36, %s13178_s12 }
 0x452   :  { %v13726_v43 = vadd.f32 %v580_v40, %v579_v41 }
 0x454   :  { %767 = vrot.lane.b32.xlu1 %v13726_v43, %s13178_s12 }
 0x4c2   :  { %v774_v47 = vpop.permute.xlu0 %773 }
 0x4c3   :  { %777 = vst.msk [vmem:[#allocation3 + $0xe] sm:$0x3] %vm770_vm2, %v774_v47  ;;  %10230 = vmatmul.mubr.msk.f32.vlgmr.msra.gmra.mrb[4].mxu0 %vm482_vm3, %v774_v47 }
 0x4c4   :  { %11582 = vmatpush3.bf16.msra.mxu0 %v13615_v5  ;;  %10252 = vmatprep.mubr.msk.f32.mxu0 %vm13175_vm0, %v13176_v1 }
 0x4c5   :  { %11583 = vmatprep.subr.bf16.mxu0 %v13174_v0 }
 0x4c6   :  { %v768_v48 = vpop.permute.xlu1 %767 }
 0x4c7   :  { %771 = vst.msk [vmem:[#allocation2] sm:$0x3] %vm770_vm2, %v768_v48  ;;  %10196 = vmatmul.mubr.msk.f32.vlgmr.msra.gmra.mrb[6].mxu1 %vm482_vm3, %v768_v48 }
 0x4c8   :  { %11561 = vmatpush3.bf16.msra.mxu1 %v13632_v19  ;;  %10218 = vmatprep.mubr.msk.f32.mxu1 %vm13175_vm0, %v13176_v1 }
 0x4c9   :  { %11562 = vmatprep.subr.bf16.mxu1 %v13174_v0  ;;  %11585 = vmatpush3.bf16.msra.mxu0 %v13620_v12 }
 0x4ca   :  { %11586 = vmatprep.subr.bf16.mxu0 %v13174_v0 }
 0x4cc   :  { %11564 = vmatpush3.bf16.msra.mxu1 %v13641_v25 }
 0x4cd   :  { %11565 = vmatprep.subr.bf16.mxu1 %v13174_v0  ;;  %11588 = vmatpush3.bf16.msra.mxu0 %v13628_v18 }
 0x4ce   :  { %11589 = vmatprep.subr.bf16.mxu0 %v13174_v0 }
 0x4d0   :  { %11567 = vmatpush3.bf16.msra.mxu1 %v13651_v31 }
 0x4d1   :  { %11568 = vmatprep.subr.bf16.mxu1 %v13174_v0  ;;  %11591 = vmatpush3.bf16.msra.mxu0 %v13637_v24 }
 0x4d2   :  { %11592 = vmatprep.subr.bf16.mxu0 %v13174_v0 }
 0x4d4   :  { %11570 = vmatpush3.bf16.msra.mxu1 %v13656_v35 }
 0x4d5   :  { %11571 = vmatprep.subr.bf16.mxu1 %v13174_v0  ;;  %11594 = vmatpush3.bf16.msra.mxu0 %v13647_v30 }
 0x4d6   :  { %11616 = vmatprep.subr.bf16.mxu0 %v13174_v0 }
 0x4d8   :  { %11573 = vmatpush3.bf16.msra.mxu1 %v13665_v38  ;;  %10253 = vmatmul.mubr.msk.f32.vlgmr.msra.gmra.mrb[6].mxu0 %vm395_vm1, %v1139_v28 }
 0x4d9   :  { %11595 = vmatprep.subr.bf16.mxu1 %v13174_v0  ;;  %11618 = vmatpush3.bf16.msra.mxu0 %v13671_v42 }
 0x4da   :  { %10297 = vmatprep.mubr.msk.f32.mxu0 %vm13175_vm0, %v13176_v1  ;;  %11619 = vmatprep.subr.bf16.mxu0 %v13174_v0 }
 0x4db   :  { %10219 = vmatmul.mubr.msk.f32.vlgmr.msra.gmra.mrb[8].mxu1 %vm395_vm1, %v953_v49 }
 0x4dc   :  { %11597 = vmatpush3.bf16.msra.mxu1 %v13617_v9  ;;  %10263 = vmatprep.mubr.msk.f32.mxu1 %vm13175_vm0, %v13176_v1 }
 0x4dd   :  { %11598 = vmatprep.subr.bf16.mxu1 %v13174_v0  ;;  %11621 = vmatpush3.bf16.msra.mxu0 %v13678_v45 }
 0x4de   :  { %11622 = vmatprep.subr.bf16.mxu0 %v13174_v0 }
 0x4e0   :  { %11600 = vmatpush3.bf16.msra.mxu1 %v13624_v13 }
 0x4e1   :  { %11601 = vmatprep.subr.bf16.mxu1 %v13174_v0 }
 0x596   :  { %v1096_v50 = vpop.f32.mrb[4].mxu0 }
 0x597   :  { %v1097_v51 = vadd.f32 %v13697_v52, %v1096_v50  ;;  %v10231_v53 = vpop.f32.mrb[5].mxu0 }
 0x599   :  { %1108 = vrot.lane.b32.xlu0 %v1097_v51, %s13177_s6 }
 0x59a   :  { %v922_v54 = vpop.f32.mrb[6].mxu1 }
 0x59b   :  { %v923_v55 = vadd.f32 %v13700_v56, %v922_v54  ;;  %v10197_v57 = vpop.f32.mrb[7].mxu1 }
 0x59d   :  { %934 = vrot.lane.b32.xlu1 %v923_v55, %s13177_s6  ;;  %v926_v3 = vadd.f32 %v923_v55, %v853_v2 }
 0x59f   :  { %v9314_v6 = vmul.f32 -1.442695, %v926_v3 }
 0x5ab   :  { %v1209_v49 = vpop.f32.mrb[6].mxu0 }
 0x5ac   :  { %v10254_v50 = vpop.f32.mrb[7].mxu0 }
 0x5ae   :  { %v1023_v60 = vpop.f32.mrb[8].mxu1 }
 0x5af   :  { %v10220_v61 = vpop.f32.mrb[9].mxu1  ;;  %v1027_v62 = vadd.f32 %v13705_v58, %v1023_v60 }
 0x5b1   :  { %v1100_v63 = vadd.f32 %v1097_v51, %v1027_v62 }
 0x5b3   :  { %v9317_v4 = vmul.f32 -1.442695, %v1100_v63 }
 0x5b5   :  { %12405 = vpow2.f32 %v9317_v4  ;;  %v1213_v4 = vadd.f32 %v13707_v59, %v1209_v49 }
 0x5b6   :  { %12407 = vpow2.f32 %v9314_v6 }
 0x5bf   :  { %v12406_v7 = vpop.eup %12405 }
 0x5c0   :  { %v1104_v8 = vadd.f32 1.0, %v12406_v7  ;;  %v12408_v10 = vpop.eup %12407 }
 0x5c1   :  { %v930_v11 = vadd.f32 1.0, %v12408_v10 }
 0x5c2   :  { %12409 = vrcp.f32 %v1104_v8 }
 0x5c3   :  { %12411 = vrcp.f32 %v930_v11 }
 0x5cc   :  { %v12410_v14 = vpop.eup %12409 }
 0x5cd   :  { %v12412_v17 = vpop.eup %12411  ;;  %v1118_v33 = vsub.f32 1.0, %v12410_v14  ;;  %v1124_v37 = vmul.f32 %v12410_v14, %v13722_v36 }
 0x5ce   :  { %v944_v41 = vsub.f32 1.0, %v12412_v17  ;;  %v950_v46 = vmul.f32 %v12412_v17, %v13726_v43  ;;  %v1313_v43 = vld [vmem:[#allocation6 + $0xa] sm:$0x3] }
 0x60b   :  { %v1109_v15 = vpop.permute.xlu0 %1108 }
 0x60c   :  { %v1111_v16 = vmul.f32 %v12410_v14, %v1109_v15 }
 0x60e   :  { %1113 = vrot.lane.b32.xlu0 %v1111_v16, %s13177_s6 }
 0x60f   :  { %v935_v20 = vpop.permute.xlu1 %934 }
 0x610   :  { %v937_v21 = vmul.f32 %v12412_v17, %v935_v20 }
 0x612   :  { %939 = vrot.lane.b32.xlu1 %v937_v21, %s13177_s6 }
 0x680   :  { %v1114_v22 = vpop.permute.xlu0 %1113 }
 0x681   :  { %v1116_v23 = vadd.f32 %v1114_v22, %v1027_v62 }
 0x683   :  { %12413 = vtanh.f32 %v1116_v23 }
 0x684   :  { %v940_v26 = vpop.permute.xlu1 %939 }
 0x685   :  { %v942_v27 = vadd.f32 %v940_v26, %v853_v2 }
 0x687   :  { %12415 = vtanh.f32 %v942_v27 }
 0x68d   :  { %v12414_v29 = vpop.eup %12413 }
 0x68e   :  { %1120 = vrot.lane.b32.xlu0 %v12414_v29, %s13178_s12 }
 0x691   :  { %v12416_v32 = vpop.eup %12415 }
 0x692   :  { %946 = vrot.lane.b32.xlu1 %v12416_v32, %s13178_s12  ;;  %v1499_v32 = vld [vmem:[#allocation6 + $0x6] sm:$0x3] }
 0x700   :  { %v1121_v34 = vpop.permute.xlu0 %1120 }
 0x701   :  { %v1123_v39 = vmul.f32 %v1121_v34, %v1118_v33 }
 0x703   :  { %v13783_v40 = vadd.f32 %v1124_v37, %v1123_v39 }
 0x704   :  { %v947_v44 = vpop.permute.xlu1 %946 }
 0x705   :  { %v949_v47 = vmul.f32 %v947_v44, %v944_v41  ;;  %1133 = vrot.lane.b32.xlu0 %v13783_v40, %s13178_s12 }
 0x707   :  { %v13788_v48 = vadd.f32 %v950_v46, %v949_v47 }
 0x709   :  { %1127 = vrot.lane.b32.xlu1 %v13788_v48, %s13178_s12 }
 0x777   :  { %v1134_v51 = vpop.permute.xlu0 %1133 }
 0x778   :  { %1137 = vst.msk [vmem:[#allocation3 + $0xc] sm:$0x3] %vm770_vm2, %v1134_v51  ;;  %10298 = vmatmul.mubr.msk.f32.vlgmr.msra.gmra.mrb[8].mxu0 %vm482_vm3, %v1134_v51 }
 0x779   :  { %11624 = vmatpush3.bf16.msra.mxu0 %v13615_v5  ;;  %10320 = vmatprep.mubr.msk.f32.mxu0 %vm13175_vm0, %v13176_v1 }
 0x77a   :  { %11625 = vmatprep.subr.bf16.mxu0 %v13174_v0 }
 0x77b   :  { %v1128_v36 = vpop.permute.xlu1 %1127 }
 0x77c   :  { %1131 = vst.msk [vmem:[#allocation2 + $0x2] sm:$0x3] %vm770_vm2, %v1128_v36  ;;  %10264 = vmatmul.mubr.msk.f32.vlgmr.msra.gmra.mrb[10].mxu1 %vm482_vm3, %v1128_v36 }
 0x77d   :  { %11603 = vmatpush3.bf16.msra.mxu1 %v13632_v19  ;;  %10286 = vmatprep.mubr.msk.f32.mxu1 %vm13175_vm0, %v13176_v1 }
 0x77e   :  { %11604 = vmatprep.subr.bf16.mxu1 %v13174_v0  ;;  %11627 = vmatpush3.bf16.msra.mxu0 %v13620_v12 }
 0x77f   :  { %11628 = vmatprep.subr.bf16.mxu0 %v13174_v0 }
 0x781   :  { %11606 = vmatpush3.bf16.msra.mxu1 %v13641_v25 }
 0x782   :  { %11607 = vmatprep.subr.bf16.mxu1 %v13174_v0  ;;  %11630 = vmatpush3.bf16.msra.mxu0 %v13628_v18 }
 0x783   :  { %11631 = vmatprep.subr.bf16.mxu0 %v13174_v0 }
 0x785   :  { %11609 = vmatpush3.bf16.msra.mxu1 %v13651_v31 }
 0x786   :  { %11610 = vmatprep.subr.bf16.mxu1 %v13174_v0  ;;  %11633 = vmatpush3.bf16.msra.mxu0 %v13637_v24 }
 0x787   :  { %11634 = vmatprep.subr.bf16.mxu0 %v13174_v0 }
 0x789   :  { %11612 = vmatpush3.bf16.msra.mxu1 %v13656_v35 }
 0x78a   :  { %11613 = vmatprep.subr.bf16.mxu1 %v13174_v0  ;;  %11636 = vmatpush3.bf16.msra.mxu0 %v13647_v30 }
 0x78b   :  { %11658 = vmatprep.subr.bf16.mxu0 %v13174_v0 }
 0x78d   :  { %11615 = vmatpush3.bf16.msra.mxu1 %v13665_v38  ;;  %10321 = vmatmul.mubr.msk.f32.vlgmr.msra.gmra.mrb[10].mxu0 %vm395_vm1, %v1499_v32 }
 0x78e   :  { %11637 = vmatprep.subr.bf16.mxu1 %v13174_v0  ;;  %11660 = vmatpush3.bf16.msra.mxu0 %v13671_v42 }
 0x78f   :  { %10365 = vmatprep.mubr.msk.f32.mxu0 %vm13175_vm0, %v13176_v1  ;;  %11661 = vmatprep.subr.bf16.mxu0 %v13174_v0 }
 0x790   :  { %10287 = vmatmul.mubr.msk.f32.vlgmr.msra.gmra.mrb[12].mxu1 %vm395_vm1, %v1313_v43 }
 0x791   :  { %11639 = vmatpush3.bf16.msra.mxu1 %v13617_v9  ;;  %10331 = vmatprep.mubr.msk.f32.mxu1 %vm13175_vm0, %v13176_v1 }
 0x792   :  { %11640 = vmatprep.subr.bf16.mxu1 %v13174_v0  ;;  %11663 = vmatpush3.bf16.msra.mxu0 %v13678_v45 }
 0x793   :  { %11664 = vmatprep.subr.bf16.mxu0 %v13174_v0 }
 0x795   :  { %11642 = vmatpush3.bf16.msra.mxu1 %v13624_v13 }
 0x796   :  { %11643 = vmatprep.subr.bf16.mxu1 %v13174_v0 }
 0x84b   :  { %v1456_v53 = vpop.f32.mrb[8].mxu0 }
 0x84c   :  { %v1457_v54 = vadd.f32 %v13697_v52, %v1456_v53  ;;  %v10299_v55 = vpop.f32.mrb[9].mxu0 }
 0x84e   :  { %1468 = vrot.lane.b32.xlu0 %v1457_v54, %s13177_s6 }
 0x84f   :  { %v1282_v57 = vpop.f32.mrb[10].mxu1 }
 0x850   :  { %v1283_v60 = vadd.f32 %v13700_v56, %v1282_v57  ;;  %v10265_v61 = vpop.f32.mrb[11].mxu1 }
 0x852   :  { %1294 = vrot.lane.b32.xlu1 %v1283_v60, %s13177_s6  ;;  %v1286_v6 = vadd.f32 %v1283_v60, %v1213_v4 }
 0x854   :  { %v9320_v8 = vmul.f32 -1.442695, %v1286_v6 }
 0x860   :  { %v1569_v43 = vpop.f32.mrb[10].mxu0 }
 0x861   :  { %v10322_v53 = vpop.f32.mrb[11].mxu0 }
 0x863   :  { %v1383_v62 = vpop.f32.mrb[12].mxu1 }
 0x864   :  { %v10288_v63 = vpop.f32.mrb[13].mxu1  ;;  %v1387_v2 = vadd.f32 %v13705_v58, %v1383_v62 }
 0x866   :  { %v1460_v3 = vadd.f32 %v1457_v54, %v1387_v2 }
 0x868   :  { %v9323_v7 = vmul.f32 -1.442695, %v1460_v3 }
 0x86a   :  { %12417 = vpow2.f32 %v9323_v7  ;;  %v1573_v7 = vadd.f32 %v13707_v59, %v1569_v43 }
 0x86b   :  { %12419 = vpow2.f32 %v9320_v8 }
 0x874   :  { %v12418_v10 = vpop.eup %12417 }
 0x875   :  { %v1464_v11 = vadd.f32 1.0, %v12418_v10  ;;  %v12420_v14 = vpop.eup %12419 }
 0x876   :  { %v1290_v15 = vadd.f32 1.0, %v12420_v14 }
 0x877   :  { %12421 = vrcp.f32 %v1464_v11 }
 0x878   :  { %12423 = vrcp.f32 %v1290_v15 }
 0x881   :  { %v12422_v16 = vpop.eup %12421 }
 0x882   :  { %v12424_v21 = vpop.eup %12423  ;;  %v1478_v37 = vsub.f32 1.0, %v12422_v16  ;;  %v1484_v41 = vmul.f32 %v12422_v16, %v13783_v40 }
 0x883   :  { %v1304_v47 = vsub.f32 1.0, %v12424_v21  ;;  %v1310_v50 = vmul.f32 %v12424_v21, %v13788_v48  ;;  %v1673_v48 = vld [vmem:[#allocation6 + $0x8] sm:$0x3] }
 0x8c0   :  { %v1469_v17 = vpop.permute.xlu0 %1468 }
 0x8c1   :  { %v1471_v20 = vmul.f32 %v12422_v16, %v1469_v17 }
 0x8c3   :  { %1473 = vrot.lane.b32.xlu0 %v1471_v20, %s13177_s6 }
 0x8c4   :  { %v1295_v22 = vpop.permute.xlu1 %1294 }
 0x8c5   :  { %v1297_v23 = vmul.f32 %v12424_v21, %v1295_v22 }
 0x8c7   :  { %1299 = vrot.lane.b32.xlu1 %v1297_v23, %s13177_s6 }
 0x935   :  { %v1474_v26 = vpop.permute.xlu0 %1473 }
 0x936   :  { %v1476_v27 = vadd.f32 %v1474_v26, %v1387_v2 }
 0x938   :  { %12425 = vtanh.f32 %v1476_v27 }
 0x939   :  { %v1300_v28 = vpop.permute.xlu1 %1299 }
 0x93a   :  { %v1302_v29 = vadd.f32 %v1300_v28, %v1213_v4 }
 0x93c   :  { %12427 = vtanh.f32 %v1302_v29 }
 0x942   :  { %v12426_v33 = vpop.eup %12425 }
 0x943   :  { %1480 = vrot.lane.b32.xlu0 %v12426_v33, %s13178_s12 }
 0x946   :  { %v12428_v34 = vpop.eup %12427 }
 0x947   :  { %1306 = vrot.lane.b32.xlu1 %v12428_v34, %s13178_s12  ;;  %v1858_v34 = vld [vmem:[#allocation6 + $0x8] sm:$0x3] }
 0x9b5   :  { %v1481_v39 = vpop.permute.xlu0 %1480 }
 0x9b6   :  { %v1483_v44 = vmul.f32 %v1481_v39, %v1478_v37 }
 0x9b8   :  { %v13845_v46 = vadd.f32 %v1484_v41, %v1483_v44 }
 0x9b9   :  { %v1307_v49 = vpop.permute.xlu1 %1306 }
 0x9ba   :  { %v1309_v51 = vmul.f32 %v1307_v49, %v1304_v47  ;;  %1493 = vrot.lane.b32.xlu0 %v13845_v46, %s13178_s12 }
 0x9bc   :  { %v13850_v36 = vadd.f32 %v1310_v50, %v1309_v51 }
 0x9be   :  { %1487 = vrot.lane.b32.xlu1 %v13850_v36, %s13178_s12 }
 0xa2c   :  { %v1494_v54 = vpop.permute.xlu0 %1493 }
 0xa2d   :  { %1497 = vst.msk [vmem:[#allocation3 + $0xa] sm:$0x3] %vm770_vm2, %v1494_v54  ;;  %10366 = vmatmul.mubr.msk.f32.vlgmr.msra.gmra.mrb[12].mxu0 %vm482_vm3, %v1494_v54 }
 0xa2e   :  { %11666 = vmatpush3.bf16.msra.mxu0 %v13615_v5  ;;  %10388 = vmatprep.mubr.msk.f32.mxu0 %vm13175_vm0, %v13176_v1 }
 0xa2f   :  { %11667 = vmatprep.subr.bf16.mxu0 %v13174_v0 }
 0xa30   :  { %v1488_v40 = vpop.permute.xlu1 %1487 }
 0xa31   :  { %1491 = vst.msk [vmem:[#allocation2 + $0x4] sm:$0x3] %vm770_vm2, %v1488_v40  ;;  %10332 = vmatmul.mubr.msk.f32.vlgmr.msra.gmra.mrb[14].mxu1 %vm482_vm3, %v1488_v40 }
 0xa32   :  { %11645 = vmatpush3.bf16.msra.mxu1 %v13632_v19  ;;  %10354 = vmatprep.mubr.msk.f32.mxu1 %vm13175_vm0, %v13176_v1 }
 0xa33   :  { %11646 = vmatprep.subr.bf16.mxu1 %v13174_v0  ;;  %11669 = vmatpush3.bf16.msra.mxu0 %v13620_v12 }
 0xa34   :  { %11670 = vmatprep.subr.bf16.mxu0 %v13174_v0 }
 0xa36   :  { %11648 = vmatpush3.bf16.msra.mxu1 %v13641_v25 }
 0xa37   :  { %11649 = vmatprep.subr.bf16.mxu1 %v13174_v0  ;;  %11672 = vmatpush3.bf16.msra.mxu0 %v13628_v18 }
 0xa38   :  { %11673 = vmatprep.subr.bf16.mxu0 %v13174_v0 }
 0xa3a   :  { %11651 = vmatpush3.bf16.msra.mxu1 %v13651_v31 }
 0xa3b   :  { %11652 = vmatprep.subr.bf16.mxu1 %v13174_v0  ;;  %11675 = vmatpush3.bf16.msra.mxu0 %v13637_v24 }
 0xa3c   :  { %11676 = vmatprep.subr.bf16.mxu0 %v13174_v0 }
 0xa3e   :  { %11654 = vmatpush3.bf16.msra.mxu1 %v13656_v35 }
 0xa3f   :  { %11655 = vmatprep.subr.bf16.mxu1 %v13174_v0  ;;  %11678 = vmatpush3.bf16.msra.mxu0 %v13647_v30 }
 0xa40   :  { %11700 = vmatprep.subr.bf16.mxu0 %v13174_v0 }
 0xa42   :  { %11657 = vmatpush3.bf16.msra.mxu1 %v13665_v38  ;;  %10389 = vmatmul.mubr.msk.f32.vlgmr.msra.gmra.mrb[14].mxu0 %vm395_vm1, %v1858_v34 }
 0xa43   :  { %11679 = vmatprep.subr.bf16.mxu1 %v13174_v0  ;;  %11702 = vmatpush3.bf16.msra.mxu0 %v13671_v42 }
 0xa44   :  { %10433 = vmatprep.mubr.msk.f32.mxu0 %vm13175_vm0, %v13176_v1  ;;  %11703 = vmatprep.subr.bf16.mxu0 %v13174_v0 }
 0xa45   :  { %10355 = vmatmul.mubr.msk.f32.vlgmr.msra.gmra.mrb[16].mxu1 %vm395_vm1, %v1673_v48 }
 0xa46   :  { %11681 = vmatpush3.bf16.msra.mxu1 %v13617_v9  ;;  %10399 = vmatprep.mubr.msk.f32.mxu1 %vm13175_vm0, %v13176_v1 }
 0xa47   :  { %11682 = vmatprep.subr.bf16.mxu1 %v13174_v0  ;;  %11705 = vmatpush3.bf16.msra.mxu0 %v13678_v45 }
 0xa48   :  { %11706 = vmatprep.subr.bf16.mxu0 %v13174_v0 }
 0xa4a   :  { %11684 = vmatpush3.bf16.msra.mxu1 %v13624_v13 }
 0xa4b   :  { %11685 = vmatprep.subr.bf16.mxu1 %v13174_v0 }
 0xb00   :  { %v1816_v55 = vpop.f32.mrb[12].mxu0 }
 0xb01   :  { %v1817_v57 = vadd.f32 %v13697_v52, %v1816_v55  ;;  %v10367_v60 = vpop.f32.mrb[13].mxu0 }
 0xb03   :  { %1828 = vrot.lane.b32.xlu0 %v1817_v57, %s13177_s6 }
 0xb04   :  { %v1642_v61 = vpop.f32.mrb[14].mxu1 }
 0xb05   :  { %v1643_v62 = vadd.f32 %v13700_v56, %v1642_v61  ;;  %v10333_v63 = vpop.f32.mrb[15].mxu1 }
 0xb07   :  { %1654 = vrot.lane.b32.xlu1 %v1643_v62, %s13177_s6  ;;  %v1646_v8 = vadd.f32 %v1643_v62, %v1573_v7 }
 0xb09   :  { %v9326_v11 = vmul.f32 -1.442695, %v1646_v8 }
 0xb15   :  { %v1928_v48 = vpop.f32.mrb[14].mxu0 }
 0xb16   :  { %v10390_v55 = vpop.f32.mrb[15].mxu0 }
 0xb18   :  { %v1743_v2 = vpop.f32.mrb[16].mxu1 }
 0xb19   :  { %v10356_v3 = vpop.f32.mrb[17].mxu1  ;;  %v1747_v4 = vadd.f32 %v13705_v58, %v1743_v2 }
 0xb1b   :  { %v1820_v6 = vadd.f32 %v1817_v57, %v1747_v4 }
 0xb1d   :  { %v9329_v10 = vmul.f32 -1.442695, %v1820_v6 }
 0xb1f   :  { %12429 = vpow2.f32 %v9329_v10  ;;  %v1932_v10 = vadd.f32 %v13707_v59, %v1928_v48 }
 0xb20   :  { %12431 = vpow2.f32 %v9326_v11 }
 0xb29   :  { %v12430_v14 = vpop.eup %12429 }
 0xb2a   :  { %v1824_v15 = vadd.f32 1.0, %v12430_v14  ;;  %v12432_v16 = vpop.eup %12431 }
 0xb2b   :  { %v1650_v17 = vadd.f32 1.0, %v12432_v16 }
 0xb2c   :  { %12433 = vrcp.f32 %v1824_v15 }
 0xb2d   :  { %12435 = vrcp.f32 %v1650_v17 }
 0xb36   :  { %v12434_v20 = vpop.eup %12433 }
 0xb37   :  { %v12436_v23 = vpop.eup %12435  ;;  %v1838_v41 = vsub.f32 1.0, %v12434_v20  ;;  %v1844_v47 = vmul.f32 %v12434_v20, %v13845_v46 }
 0xb38   :  { %v1664_v51 = vsub.f32 1.0, %v12436_v23  ;;  %v1670_v53 = vmul.f32 %v12436_v23, %v13850_v36  ;;  %v2031_v36 = vld [vmem:[#allocation6 + $0x6] sm:$0x3] }
 0xb75   :  { %v1829_v21 = vpop.permute.xlu0 %1828 }
 0xb76   :  { %v1831_v22 = vmul.f32 %v12434_v20, %v1829_v21 }
 0xb78   :  { %1833 = vrot.lane.b32.xlu0 %v1831_v22, %s13177_s6 }
 0xb79   :  { %v1655_v26 = vpop.permute.xlu1 %1654 }
 0xb7a   :  { %v1657_v27 = vmul.f32 %v12436_v23, %v1655_v26 }
 0xb7c   :  { %1659 = vrot.lane.b32.xlu1 %v1657_v27, %s13177_s6 }
 0xbea   :  { %v1834_v28 = vpop.permute.xlu0 %1833 }
 0xbeb   :  { %v1836_v29 = vadd.f32 %v1834_v28, %v1747_v4 }
 0xbed   :  { %12437 = vtanh.f32 %v1836_v29 }
 0xbee   :  { %v1660_v32 = vpop.permute.xlu1 %1659 }
 0xbef   :  { %v1662_v33 = vadd.f32 %v1660_v32, %v1573_v7 }
 0xbf1   :  { %12439 = vtanh.f32 %v1662_v33 }
 0xbf7   :  { %v12438_v37 = vpop.eup %12437 }
 0xbf8   :  { %1840 = vrot.lane.b32.xlu0 %v12438_v37, %s13178_s12 }
 0xbfb   :  { %v12440_v39 = vpop.eup %12439 }
 0xbfc   :  { %1666 = vrot.lane.b32.xlu1 %v12440_v39, %s13178_s12  ;;  %v2216_v39 = vld [vmem:[#allocation6 + $0xa] sm:$0x3] }
 0xc6a   :  { %v1841_v44 = vpop.permute.xlu0 %1840 }
 0xc6b   :  { %v1843_v49 = vmul.f32 %v1841_v44, %v1838_v41 }
 0xc6d   :  { %v13907_v50 = vadd.f32 %v1844_v47, %v1843_v49 }
 0xc6e   :  { %v1667_v43 = vpop.permute.xlu1 %1666 }
 0xc6f   :  { %v1669_v54 = vmul.f32 %v1667_v43, %v1664_v51  ;;  %1853 = vrot.lane.b32.xlu0 %v13907_v50, %s13178_s12 }
 0xc71   :  { %v13912_v40 = vadd.f32 %v1670_v53, %v1669_v54 }
 0xc73   :  { %1847 = vrot.lane.b32.xlu1 %v13912_v40, %s13178_s12 }
 0xce1   :  { %v1854_v57 = vpop.permute.xlu0 %1853 }
 0xce2   :  { %1857 = vst.msk [vmem:[#allocation3 + $0x8] sm:$0x3] %vm770_vm2, %v1854_v57  ;;  %10434 = vmatmul.mubr.msk.f32.vlgmr.msra.gmra.mrb[16].mxu0 %vm482_vm3, %v1854_v57 }
 0xce3   :  { %11708 = vmatpush3.bf16.msra.mxu0 %v13615_v5  ;;  %10456 = vmatprep.mubr.msk.f32.mxu0 %vm13175_vm0, %v13176_v1 }
 0xce4   :  { %11709 = vmatprep.subr.bf16.mxu0 %v13174_v0 }
 0xce5   :  { %v1848_v46 = vpop.permute.xlu1 %1847 }
 0xce6   :  { %1851 = vst.msk [vmem:[#allocation2 + $0x6] sm:$0x3] %vm770_vm2, %v1848_v46  ;;  %10400 = vmatmul.mubr.msk.f32.vlgmr.msra.gmra.mrb[18].mxu1 %vm482_vm3, %v1848_v46 }
 0xce7   :  { %11687 = vmatpush3.bf16.msra.mxu1 %v13632_v19  ;;  %10422 = vmatprep.mubr.msk.f32.mxu1 %vm13175_vm0, %v13176_v1 }
 0xce8   :  { %11688 = vmatprep.subr.bf16.mxu1 %v13174_v0  ;;  %11711 = vmatpush3.bf16.msra.mxu0 %v13620_v12 }
 0xce9   :  { %11712 = vmatprep.subr.bf16.mxu0 %v13174_v0 }
 0xceb   :  { %11690 = vmatpush3.bf16.msra.mxu1 %v13641_v25 }
 0xcec   :  { %11691 = vmatprep.subr.bf16.mxu1 %v13174_v0  ;;  %11714 = vmatpush3.bf16.msra.mxu0 %v13628_v18 }
 0xced   :  { %11715 = vmatprep.subr.bf16.mxu0 %v13174_v0 }
 0xcef   :  { %11693 = vmatpush3.bf16.msra.mxu1 %v13651_v31 }
 0xcf0   :  { %11694 = vmatprep.subr.bf16.mxu1 %v13174_v0  ;;  %11717 = vmatpush3.bf16.msra.mxu0 %v13637_v24 }
 0xcf1   :  { %11718 = vmatprep.subr.bf16.mxu0 %v13174_v0 }
 0xcf3   :  { %11696 = vmatpush3.bf16.msra.mxu1 %v13656_v35 }
 0xcf4   :  { %11697 = vmatprep.subr.bf16.mxu1 %v13174_v0  ;;  %11720 = vmatpush3.bf16.msra.mxu0 %v13647_v30 }
 0xcf5   :  { %11742 = vmatprep.subr.bf16.mxu0 %v13174_v0 }
 0xcf7   :  { %11699 = vmatpush3.bf16.msra.mxu1 %v13665_v38  ;;  %10457 = vmatmul.mubr.msk.f32.vlgmr.msra.gmra.mrb[18].mxu0 %vm395_vm1, %v2216_v39 }
 0xcf8   :  { %11721 = vmatprep.subr.bf16.mxu1 %v13174_v0  ;;  %11744 = vmatpush3.bf16.msra.mxu0 %v13671_v42 }
 0xcf9   :  { %10501 = vmatprep.mubr.msk.f32.mxu0 %vm13175_vm0, %v13176_v1  ;;  %11745 = vmatprep.subr.bf16.mxu0 %v13174_v0 }
 0xcfa   :  { %10423 = vmatmul.mubr.msk.f32.vlgmr.msra.gmra.mrb[20].mxu1 %vm395_vm1, %v2031_v36 }
 0xcfb   :  { %11723 = vmatpush3.bf16.msra.mxu1 %v13617_v9  ;;  %10467 = vmatprep.mubr.msk.f32.mxu1 %vm13175_vm0, %v13176_v1 }
 0xcfc   :  { %11724 = vmatprep.subr.bf16.mxu1 %v13174_v0  ;;  %11747 = vmatpush3.bf16.msra.mxu0 %v13678_v45 }
 0xcfd   :  { %11748 = vmatprep.subr.bf16.mxu0 %v13174_v0 }
 0xcff   :  { %11726 = vmatpush3.bf16.msra.mxu1 %v13624_v13 }
 0xd00   :  { %11727 = vmatprep.subr.bf16.mxu1 %v13174_v0 }
 0xdb5   :  { %v2174_v60 = vpop.f32.mrb[16].mxu0 }
 0xdb6   :  { %v2175_v61 = vadd.f32 %v13697_v52, %v2174_v60  ;;  %v10435_v62 = vpop.f32.mrb[17].mxu0 }
 0xdb8   :  { %2186 = vrot.lane.b32.xlu0 %v2175_v61, %s13177_s6 }
 0xdb9   :  { %v2001_v63 = vpop.f32.mrb[18].mxu1 }
 0xdba   :  { %v2002_v2 = vadd.f32 %v13700_v56, %v2001_v63  ;;  %v10401_v3 = vpop.f32.mrb[19].mxu1 }
 0xdbc   :  { %2013 = vrot.lane.b32.xlu1 %v2002_v2, %s13177_s6  ;;  %v2005_v11 = vadd.f32 %v2002_v2, %v1932_v10 }
 0xdbe   :  { %v9332_v15 = vmul.f32 -1.442695, %v2005_v11 }
 0xdca   :  { %v2286_v36 = vpop.f32.mrb[18].mxu0 }
 0xdcb   :  { %v10458_v60 = vpop.f32.mrb[19].mxu0 }
 0xdcd   :  { %v2101_v4 = vpop.f32.mrb[20].mxu1 }
 0xdce   :  { %v10424_v6 = vpop.f32.mrb[21].mxu1  ;;  %v2105_v7 = vadd.f32 %v13705_v58, %v2101_v4 }
 0xdd0   :  { %v2178_v8 = vadd.f32 %v2175_v61, %v2105_v7 }
 0xdd2   :  { %v9335_v14 = vmul.f32 -1.442695, %v2178_v8 }
 0xdd4   :  { %12441 = vpow2.f32 %v9335_v14  ;;  %v2290_v14 = vadd.f32 %v13707_v59, %v2286_v36 }
 0xdd5   :  { %12443 = vpow2.f32 %v9332_v15 }
 0xdde   :  { %v12442_v16 = vpop.eup %12441 }
 0xddf   :  { %v2182_v17 = vadd.f32 1.0, %v12442_v16  ;;  %v12444_v20 = vpop.eup %12443 }
 0xde0   :  { %v2009_v21 = vadd.f32 1.0, %v12444_v20 }
 0xde1   :  { %12445 = vrcp.f32 %v2182_v17 }
 0xde2   :  { %12447 = vrcp.f32 %v2009_v21 }
 0xdeb   :  { %v12446_v22 = vpop.eup %12445 }
 0xdec   :  { %v12448_v27 = vpop.eup %12447  ;;  %v2196_v47 = vsub.f32 1.0, %v12446_v22  ;;  %v2202_v51 = vmul.f32 %v12446_v22, %v13907_v50 }
 0xded   :  { %v2023_v54 = vsub.f32 1.0, %v12448_v27  ;;  %v2029_v55 = vmul.f32 %v12448_v27, %v13912_v40  ;;  %v2389_v40 = vld [vmem:[#allocation6 + $0x4] sm:$0x3] }
 0xe2a   :  { %v2187_v23 = vpop.permute.xlu0 %2186 }
 0xe2b   :  { %v2189_v26 = vmul.f32 %v12446_v22, %v2187_v23 }
 0xe2d   :  { %2191 = vrot.lane.b32.xlu0 %v2189_v26, %s13177_s6 }
 0xe2e   :  { %v2014_v28 = vpop.permute.xlu1 %2013 }
 0xe2f   :  { %v2016_v29 = vmul.f32 %v12448_v27, %v2014_v28 }
 0xe31   :  { %2018 = vrot.lane.b32.xlu1 %v2016_v29, %s13177_s6 }
 0xe9f   :  { %v2192_v32 = vpop.permute.xlu0 %2191 }
 0xea0   :  { %v2194_v33 = vadd.f32 %v2192_v32, %v2105_v7 }
 0xea2   :  { %12449 = vtanh.f32 %v2194_v33 }
 0xea3   :  { %v2019_v34 = vpop.permute.xlu1 %2018 }
 0xea4   :  { %v2021_v37 = vadd.f32 %v2019_v34, %v1932_v10  ;;  %v2574_v34 = vld [vmem:[#allocation6 + $0xc] sm:$0x3] }
 0xea6   :  { %12451 = vtanh.f32 %v2021_v37 }
 0xeac   :  { %v12450_v41 = vpop.eup %12449 }
 0xead   :  { %2198 = vrot.lane.b32.xlu0 %v12450_v41, %s13178_s12 }
 0xeb0   :  { %v12452_v44 = vpop.eup %12451 }
 0xeb1   :  { %2025 = vrot.lane.b32.xlu1 %v12452_v44, %s13178_s12 }
 0xf1f   :  { %v2199_v49 = vpop.permute.xlu0 %2198 }
 0xf20   :  { %v2201_v43 = vmul.f32 %v2199_v49, %v2196_v47 }
 0xf22   :  { %v13969_v53 = vadd.f32 %v2202_v51, %v2201_v43 }
 0xf23   :  { %v2026_v48 = vpop.permute.xlu1 %2025 }
 0xf24   :  { %v2028_v57 = vmul.f32 %v2026_v48, %v2023_v54  ;;  %2211 = vrot.lane.b32.xlu0 %v13969_v53, %s13178_s12 }
 0xf26   :  { %v13974_v46 = vadd.f32 %v2029_v55, %v2028_v57 }
 0xf28   :  { %2205 = vrot.lane.b32.xlu1 %v13974_v46, %s13178_s12 }
 0xf96   :  { %v2212_v61 = vpop.permute.xlu0 %2211 }
 0xf97   :  { %2215 = vst.msk [vmem:[#allocation3 + $0x6] sm:$0x3] %vm770_vm2, %v2212_v61  ;;  %10502 = vmatmul.mubr.msk.f32.vlgmr.msra.gmra.mrb[20].mxu0 %vm482_vm3, %v2212_v61 }
 0xf98   :  { %11750 = vmatpush3.bf16.msra.mxu0 %v13615_v5  ;;  %10524 = vmatprep.mubr.msk.f32.mxu0 %vm13175_vm0, %v13176_v1 }
 0xf99   :  { %11751 = vmatprep.subr.bf16.mxu0 %v13174_v0 }
 0xf9a   :  { %v2206_v50 = vpop.permute.xlu1 %2205 }
 0xf9b   :  { %2209 = vst.msk [vmem:[#allocation2 + $0x8] sm:$0x3] %vm770_vm2, %v2206_v50  ;;  %10468 = vmatmul.mubr.msk.f32.vlgmr.msra.gmra.mrb[22].mxu1 %vm482_vm3, %v2206_v50  ;;  %v14079_v50 = vld [vmem:[#allocation14] ss:$0 sm:$0xff] }
 0xf9c   :  { %11729 = vmatpush3.bf16.msra.mxu1 %v13632_v19  ;;  %10490 = vmatprep.mubr.msk.f32.mxu1 %vm13175_vm0, %v13176_v1 }
 0xf9d   :  { %11730 = vmatprep.subr.bf16.mxu1 %v13174_v0  ;;  %11753 = vmatpush3.bf16.msra.mxu0 %v13620_v12 }
 0xf9e   :  { %11754 = vmatprep.subr.bf16.mxu0 %v13174_v0 }
 0xfa0   :  { %11732 = vmatpush3.bf16.msra.mxu1 %v13641_v25 }
 0xfa1   :  { %11733 = vmatprep.subr.bf16.mxu1 %v13174_v0  ;;  %11756 = vmatpush3.bf16.msra.mxu0 %v13628_v18 }
 0xfa2   :  { %11757 = vmatprep.subr.bf16.mxu0 %v13174_v0 }
 0xfa4   :  { %11735 = vmatpush3.bf16.msra.mxu1 %v13651_v31 }
 0xfa5   :  { %11736 = vmatprep.subr.bf16.mxu1 %v13174_v0  ;;  %11759 = vmatpush3.bf16.msra.mxu0 %v13637_v24 }
 0xfa6   :  { %11760 = vmatprep.subr.bf16.mxu0 %v13174_v0 }
 0xfa8   :  { %11738 = vmatpush3.bf16.msra.mxu1 %v13656_v35 }
 0xfa9   :  { %11739 = vmatprep.subr.bf16.mxu1 %v13174_v0  ;;  %11762 = vmatpush3.bf16.msra.mxu0 %v13647_v30 }
 0xfaa   :  { %11784 = vmatprep.subr.bf16.mxu0 %v13174_v0 }
 0xfac   :  { %11741 = vmatpush3.bf16.msra.mxu1 %v13665_v38  ;;  %10525 = vmatmul.mubr.msk.f32.vlgmr.msra.gmra.mrb[22].mxu0 %vm395_vm1, %v2574_v34 }
 0xfad   :  { %11763 = vmatprep.subr.bf16.mxu1 %v13174_v0  ;;  %11786 = vmatpush3.bf16.msra.mxu0 %v13671_v42 }
 0xfae   :  { %10569 = vmatprep.mubr.msk.f32.mxu0 %vm13175_vm0, %v13176_v1  ;;  %11787 = vmatprep.subr.bf16.mxu0 %v13174_v0 }
 0xfaf   :  { %10491 = vmatmul.mubr.msk.f32.vlgmr.msra.gmra.mrb[24].mxu1 %vm395_vm1, %v2389_v40 }
 0xfb0   :  { %11765 = vmatpush3.bf16.msra.mxu1 %v13617_v9  ;;  %10535 = vmatprep.mubr.msk.f32.mxu1 %vm13175_vm0, %v13176_v1 }
 0xfb1   :  { %11766 = vmatprep.subr.bf16.mxu1 %v13174_v0  ;;  %11789 = vmatpush3.bf16.msra.mxu0 %v13678_v45 }
 0xfb2   :  { %11790 = vmatprep.subr.bf16.mxu0 %v13174_v0 }
 0xfb4   :  { %11768 = vmatpush3.bf16.msra.mxu1 %v13624_v13 }
 0xfb5   :  { %11769 = vmatprep.subr.bf16.mxu1 %v13174_v0 }
0x106a   :  { %v2532_v62 = vpop.f32.mrb[20].mxu0 }
0x106b   :  { %v2533_v63 = vadd.f32 %v13697_v52, %v2532_v62  ;;  %v10503_v2 = vpop.f32.mrb[21].mxu0 }
0x106d   :  { %2544 = vrot.lane.b32.xlu0 %v2533_v63, %s13177_s6 }
0x106e   :  { %v2359_v3 = vpop.f32.mrb[22].mxu1 }
0x106f   :  { %v2360_v4 = vadd.f32 %v13700_v56, %v2359_v3  ;;  %v10469_v6 = vpop.f32.mrb[23].mxu1 }
0x1071   :  { %2371 = vrot.lane.b32.xlu1 %v2360_v4, %s13177_s6  ;;  %v2363_v15 = vadd.f32 %v2360_v4, %v2290_v14  ;;  %v14086_v4 = vld [vmem:[#allocation11] ss:$0 sm:$0xff] }
0x1073   :  { %v9338_v17 = vmul.f32 -1.442695, %v2363_v15 }
0x107f   :  { %v2644_v36 = vpop.f32.mrb[22].mxu0 }
0x1080   :  { %v10526_v60 = vpop.f32.mrb[23].mxu0  ;;  %v2648_v6 = vadd.f32 %v14086_v4, %v2644_v36  ;;  %v3292_v36 = vld [vmem:[#allocation21 + $0x18] sm:$0xff] }
0x1082   :  { %v2459_v7 = vpop.f32.mrb[24].mxu1 }
0x1083   :  { %v10492_v8 = vpop.f32.mrb[25].mxu1  ;;  %v2463_v10 = vadd.f32 %v13705_v58, %v2459_v7 }
0x1085   :  { %v2536_v11 = vadd.f32 %v2533_v63, %v2463_v10  ;;  %v14083_v63 = vld [vmem:[#allocation17] ss:$0 sm:$0xff] }
0x1087   :  { %v9341_v16 = vmul.f32 -1.442695, %v2536_v11 }
0x1089   :  { %12453 = vpow2.f32 %v9341_v16 }
0x108a   :  { %12455 = vpow2.f32 %v9338_v17 }
0x1093   :  { %v12454_v52 = vpop.eup %12453 }
0x1094   :  { %v2540_v20 = vadd.f32 1.0, %v12454_v52  ;;  %v12456_v21 = vpop.eup %12455 }
0x1095   :  { %v2367_v22 = vadd.f32 1.0, %v12456_v21 }
0x1096   :  { %12457 = vrcp.f32 %v2540_v20 }
0x1097   :  { %12459 = vrcp.f32 %v2367_v22 }
0x10a0   :  { %v12458_v56 = vpop.eup %12457 }
0x10a1   :  { %v12460_v58 = vpop.eup %12459  ;;  %v2554_v41 = vsub.f32 1.0, %v12458_v56  ;;  %v2560_v47 = vmul.f32 %v12458_v56, %v13969_v53 }
0x10a2   :  { %v2381_v43 = vsub.f32 1.0, %v12460_v58  ;;  %v2387_v48 = vmul.f32 %v12460_v58, %v13974_v46 }
0x10df   :  { %v2545_v23 = vpop.permute.xlu0 %2544 }
0x10e0   :  { %v2547_v26 = vmul.f32 %v12458_v56, %v2545_v23 }
0x10e2   :  { %2549 = vrot.lane.b32.xlu0 %v2547_v26, %s13177_s6 }
0x10e3   :  { %v2372_v27 = vpop.permute.xlu1 %2371 }
0x10e4   :  { %v2374_v28 = vmul.f32 %v12460_v58, %v2372_v27 }
0x10e6   :  { %2376 = vrot.lane.b32.xlu1 %v2374_v28, %s13177_s6  ;;  %v2932_v28 = vld [vmem:[#allocation6 + $0xe] sm:$0x3] }
0x1154   :  { %v2550_v59 = vpop.permute.xlu0 %2549 }
0x1155   :  { %v2552_v29 = vadd.f32 %v2550_v59, %v2463_v10 }
0x1157   :  { %12461 = vtanh.f32 %v2552_v29 }
0x1158   :  { %v2377_v32 = vpop.permute.xlu1 %2376 }
0x1159   :  { %v2379_v33 = vadd.f32 %v2377_v32, %v2290_v14 }
0x115b   :  { %12463 = vtanh.f32 %v2379_v33 }
0x1161   :  { %v12462_v37 = vpop.eup %12461 }
0x1162   :  { %2556 = vrot.lane.b32.xlu0 %v12462_v37, %s13178_s12 }
0x1165   :  { %v12464_v39 = vpop.eup %12463 }
0x1166   :  { %2383 = vrot.lane.b32.xlu1 %v12464_v39, %s13178_s12 }
0x11d4   :  { %v2557_v44 = vpop.permute.xlu0 %2556 }
0x11d5   :  { %v2559_v49 = vmul.f32 %v2557_v44, %v2554_v41 }
0x11d7   :  { %v14031_v51 = vadd.f32 %v2560_v47, %v2559_v49 }
0x11d8   :  { %v2384_v54 = vpop.permute.xlu1 %2383 }
0x11d9   :  { %v2386_v55 = vmul.f32 %v2384_v54, %v2381_v43  ;;  %2569 = vrot.lane.b32.xlu0 %v14031_v51, %s13178_s12  ;;  %v3289_v54 = vld [vmem:[#allocation21] sm:$0xff] }
0x11db   :  { %v14036_v57 = vadd.f32 %v2387_v48, %v2386_v55  ;;  %v3291_v55 = vld [vmem:[#allocation21 + $0x10] sm:$0xff] }
0x11dd   :  { %2563 = vrot.lane.b32.xlu1 %v14036_v57, %s13178_s12 }
0x124b   :  { %v2570_v61 = vpop.permute.xlu0 %2569 }
0x124c   :  { %2573 = vst.msk [vmem:[#allocation3 + $0x4] sm:$0x3] %vm770_vm2, %v2570_v61  ;;  %10570 = vmatmul.mubr.msk.f32.vlgmr.msra.gmra.mrb[24].mxu0 %vm482_vm3, %v2570_v61 }
0x124d   :  { %11792 = vmatpush3.bf16.msra.mxu0 %v13615_v5  ;;  %10592 = vmatprep.mubr.msk.f32.mxu0 %vm13175_vm0, %v13176_v1  ;;  %v2747_v5 = vld [vmem:[#allocation6 + $0x2] sm:$0x3] }
0x124e   :  { %11793 = vmatprep.subr.bf16.mxu0 %v13174_v0 }
0x124f   :  { %v2564_v53 = vpop.permute.xlu1 %2563 }
0x1250   :  { %2567 = vst.msk [vmem:[#allocation2 + $0xa] sm:$0x3] %vm770_vm2, %v2564_v53  ;;  %10536 = vmatmul.mubr.msk.f32.vlgmr.msra.gmra.mrb[26].mxu1 %vm482_vm3, %v2564_v53  ;;  %v3317_v53 = vld [vmem:[#allocation2] sm:$0x3] }
0x1251   :  { %11771 = vmatpush3.bf16.msra.mxu1 %v13632_v19  ;;  %10558 = vmatprep.mubr.msk.f32.mxu1 %vm13175_vm0, %v13176_v1 }
0x1252   :  { %11772 = vmatprep.subr.bf16.mxu1 %v13174_v0  ;;  %11795 = vmatpush3.bf16.msra.mxu0 %v13620_v12 }
0x1253   :  { %11796 = vmatprep.subr.bf16.mxu0 %v13174_v0 }
0x1255   :  { %11774 = vmatpush3.bf16.msra.mxu1 %v13641_v25 }
0x1256   :  { %11775 = vmatprep.subr.bf16.mxu1 %v13174_v0  ;;  %11798 = vmatpush3.bf16.msra.mxu0 %v13628_v18  ;;  %v14075_v18 = vld [vmem:[#allocation20] ss:$0 sm:$0xff] }
0x1257   :  { %11799 = vmatprep.subr.bf16.mxu0 %v13174_v0 }
0x1259   :  { %11777 = vmatpush3.bf16.msra.mxu1 %v13651_v31 }
0x125a   :  { %11778 = vmatprep.subr.bf16.mxu1 %v13174_v0  ;;  %11801 = vmatpush3.bf16.msra.mxu0 %v13637_v24 }
0x125b   :  { %11802 = vmatprep.subr.bf16.mxu0 %v13174_v0 }
0x125d   :  { %11780 = vmatpush3.bf16.msra.mxu1 %v13656_v35 }
0x125e   :  { %11781 = vmatprep.subr.bf16.mxu1 %v13174_v0  ;;  %11804 = vmatpush3.bf16.msra.mxu0 %v13647_v30 }
0x125f   :  { %11826 = vmatprep.subr.bf16.mxu0 %v13174_v0 }
0x1261   :  { %11783 = vmatpush3.bf16.msra.mxu1 %v13665_v38  ;;  %10593 = vmatmul.mubr.msk.f32.vlgmr.msra.gmra.mrb[26].mxu0 %vm395_vm1, %v2932_v28  ;;  %v3294_v28 = vld [vmem:[#allocation21 + $0x28] sm:$0xff] }
0x1262   :  { %11805 = vmatprep.subr.bf16.mxu1 %v13174_v0  ;;  %11828 = vmatpush3.bf16.msra.mxu0 %v13671_v42 }
0x1263   :  { %10637 = vmatprep.mubr.msk.f32.mxu0 %vm13175_vm0, %v13176_v1  ;;  %11829 = vmatprep.subr.bf16.mxu0 %v13174_v0 }
0x1264   :  { %10559 = vmatmul.mubr.msk.f32.vlgmr.msra.gmra.mrb[28].mxu1 %vm395_vm1, %v2747_v5 }
0x1265   :  { %11807 = vmatpush3.bf16.msra.mxu1 %v13617_v9  ;;  %10603 = vmatprep.mubr.msk.f32.mxu1 %vm13175_vm0, %v13176_v1 }
0x1266   :  { %11808 = vmatprep.subr.bf16.mxu1 %v13174_v0  ;;  %11831 = vmatpush3.bf16.msra.mxu0 %v13678_v45 }
0x1267   :  { %11832 = vmatprep.subr.bf16.mxu0 %v13174_v0 }
0x1269   :  { %11810 = vmatpush3.bf16.msra.mxu1 %v13624_v13 }
0x126a   :  { %11811 = vmatprep.subr.bf16.mxu1 %v13174_v0 }
0x131f   :  { %v2890_v12 = vpop.f32.mrb[24].mxu0 }
0x1320   :  { %v2891_v24 = vadd.f32 %v14075_v18, %v2890_v12  ;;  %v10571_v30 = vpop.f32.mrb[25].mxu0 }
0x1322   :  { %2902 = vrot.lane.b32.xlu0 %v2891_v24, %s13177_s6 }
0x1323   :  { %v2717_v46 = vpop.f32.mrb[26].mxu1 }
0x1324   :  { %v2718_v9 = vadd.f32 %v14079_v50, %v2717_v46  ;;  %v10537_v40 = vpop.f32.mrb[27].mxu1 }
0x1326   :  { %2729 = vrot.lane.b32.xlu1 %v2718_v9, %s13177_s6  ;;  %v2721_v7 = vadd.f32 %v2718_v9, %v2648_v6 }
0x1328   :  { %v9344_v10 = vmul.f32 -1.442695, %v2721_v7 }
0x1334   :  { %v3002_v49 = vpop.f32.mrb[26].mxu0 }
0x1335   :  { %v10594_v43 = vpop.f32.mrb[27].mxu0  ;;  %v3006_v40 = vadd.f32 %v14086_v4, %v3002_v49 }
0x1337   :  { %v2817_v62 = vpop.f32.mrb[28].mxu1 }
0x1338   :  { %v10560_v13 = vpop.f32.mrb[29].mxu1  ;;  %v2821_v2 = vadd.f32 %v14083_v63, %v2817_v62 }
0x133a   :  { %v2894_v3 = vadd.f32 %v2891_v24, %v2821_v2 }
0x133c   :  { %v9347_v8 = vmul.f32 -1.442695, %v2894_v3 }
0x133e   :  { %12465 = vpow2.f32 %v9347_v8 }
0x133f   :  { %12467 = vpow2.f32 %v9344_v10 }
0x1348   :  { %v12466_v11 = vpop.eup %12465 }
0x1349   :  { %v2898_v14 = vadd.f32 1.0, %v12466_v11  ;;  %v12468_v15 = vpop.eup %12467 }
0x134a   :  { %v2725_v16 = vadd.f32 1.0, %v12468_v15 }
0x134b   :  { %12469 = vrcp.f32 %v2898_v14 }
0x134c   :  { %12471 = vrcp.f32 %v2725_v16 }
0x1355   :  { %v12470_v17 = vpop.eup %12469 }
0x1356   :  { %v12472_v21 = vpop.eup %12471  ;;  %v2912_v32 = vsub.f32 1.0, %v12470_v17  ;;  %v2918_v34 = vmul.f32 %v12470_v17, %v14031_v51  ;;  %v3290_v51 = vld [vmem:[#allocation21 + $0x8] sm:$0xff] }
0x1357   :  { %v2739_v39 = vsub.f32 1.0, %v12472_v21  ;;  %v2745_v44 = vmul.f32 %v12472_v21, %v14036_v57  ;;  %v14110_v48 = vpack.c.bf16 %v3290_v51, %v3289_v54  ;;  %v14115_v57 = vpack.c.bf16 %v3292_v36, %v3291_v55 }
0x1394   :  { %v2903_v52 = vpop.permute.xlu0 %2902 }
0x1395   :  { %v2905_v20 = vmul.f32 %v12470_v17, %v2903_v52  ;;  %v3307_v52 = vld [vmem:[#allocation24] sm:$0xff] }
0x1397   :  { %2907 = vrot.lane.b32.xlu0 %v2905_v20, %s13177_s6  ;;  %v3308_v20 = vld [vmem:[#allocation24 + $0x8] sm:$0xff] }
0x1398   :  { %v2730_v22 = vpop.permute.xlu1 %2729 }
0x1399   :  { %v2732_v56 = vmul.f32 %v12472_v21, %v2730_v22  ;;  %v3309_v21 = vld [vmem:[#allocation24 + $0x10] sm:$0xff]  ;;  %v14150_v22 = vpack.c.bf16 %v3308_v20, %v3307_v52 }
0x139b   :  { %2734 = vrot.lane.b32.xlu1 %v2732_v56, %s13177_s6  ;;  %v3310_v56 = vld [vmem:[#allocation24 + $0x18] sm:$0xff] }
0x1409   :  { %v2908_v23 = vpop.permute.xlu0 %2907 }
0x140a   :  { %v2910_v26 = vadd.f32 %v2908_v23, %v2821_v2  ;;  %v14153_v23 = vpack.c.bf16 %v3310_v56, %v3309_v21 }
0x140c   :  { %12473 = vtanh.f32 %v2910_v26 }
0x140d   :  { %v2735_v58 = vpop.permute.xlu1 %2734 }
0x140e   :  { %v2737_v27 = vadd.f32 %v2735_v58, %v2648_v6 }
0x1410   :  { %12475 = vtanh.f32 %v2737_v27  ;;  %v3293_v27 = vld [vmem:[#allocation21 + $0x20] sm:$0xff] }
0x1416   :  { %v12474_v59 = vpop.eup %12473 }
0x1417   :  { %2914 = vrot.lane.b32.xlu0 %v12474_v59, %s13178_s12  ;;  %v14163_v59 = vpack.c.bf16 %v3294_v28, %v3293_v27 }
0x141a   :  { %v12476_v29 = vpop.eup %12475 }
0x141b   :  { %2741 = vrot.lane.b32.xlu1 %v12476_v29, %s13178_s12  ;;  %v3295_v29 = vld [vmem:[#allocation21 + $0x30] sm:$0xff] }
0x1489   :  { %v2915_v33 = vpop.permute.xlu0 %2914 }
0x148a   :  { %v2917_v42 = vmul.f32 %v2915_v33, %v2912_v32  ;;  %v3296_v32 = vld [vmem:[#allocation21 + $0x38] sm:$0xff] }
0x148b   :  { %v14167_v33 = vpack.c.bf16 %v3296_v32, %v3295_v29 }
0x148c   :  { %v14101_v37 = vadd.f32 %v2918_v34, %v2917_v42  ;;  %v3297_v34 = vld [vmem:[#allocation27] sm:$0xff]  ;;  %v3298_v42 = vld [vmem:[#allocation27 + $0x8] sm:$0xff] }
0x148d   :  { %v2742_v41 = vpop.permute.xlu1 %2741 }
0x148e   :  { %v2744_v47 = vmul.f32 %v2742_v41, %v2739_v39  ;;  %2927 = vrot.lane.b32.xlu0 %v14101_v37, %s13178_s12  ;;  %v14169_v39 = vpack.c.bf16 %v3298_v42, %v3297_v34 }
0x1490   :  { %v14106_v45 = vadd.f32 %v2745_v44, %v2744_v47  ;;  %v3299_v44 = vld [vmem:[#allocation27 + $0x10] sm:$0xff]  ;;  %v3300_v47 = vld [vmem:[#allocation27 + $0x18] sm:$0xff] }
0x1491   :  { %v14175_v43 = vpack.c.bf16 %v3300_v47, %v3299_v44 }
0x1492   :  { %2921 = vrot.lane.b32.xlu1 %v14106_v45, %s13178_s12 }
0x1500   :  { %v2928_v60 = vpop.permute.xlu0 %2927 }
0x1501   :  { %2931 = vst.msk [vmem:[#allocation3 + $0x2] sm:$0x3] %vm770_vm2, %v2928_v60  ;;  %10638 = vmatmul.mubr.msk.f32.vlgmr.msra.gmra.mrb[28].mxu0 %vm482_vm3, %v2928_v60 }
0x1502   :  { %11834 = vmatpush3.bf16.msra.mxu0 %v14110_v48  ;;  %10648 = vmatprep.mubr.msk.f32.mxu0 %vm13175_vm0, %v13176_v1 }
0x1503   :  { %11835 = vmatprep.subr.bf16.mxu0 %v13174_v0 }
0x1504   :  { %v2922_v61 = vpop.permute.xlu1 %2921 }
0x1505   :  { %2925 = vst.msk [vmem:[#allocation2 + $0xc] sm:$0x3] %vm770_vm2, %v2922_v61  ;;  %10604 = vmatmul.mubr.msk.f32.vlgmr.msra.gmra.mrb[30].mxu1 %vm482_vm3, %v2922_v61 }
0x1506   :  { %11813 = vmatpush3.bf16.msra.mxu1 %v13632_v19  ;;  %11837 = vmatpush3.bf16.msra.mxu0 %v14115_v57  ;;  %v3105_v19 = vld [vmem:[#allocation6] sm:$0x3] }
0x1507   :  { %11814 = vmatprep.subr.bf16.mxu1 %v13174_v0  ;;  %10626 = vmatprep.mubr.msk.f32.mxu1 %vm13175_vm0, %v13176_v1 }
0x1508   :  { %11838 = vmatprep.subr.bf16.mxu0 %v13174_v0 }
0x1509   :  { %10649 = vmatmul.mubr.msk.f32.vlgmr.msra.gmra.mrb[30].mxu0 %vm482_vm3, %v3317_v53 }
0x150a   :  { %11816 = vmatpush3.bf16.msra.mxu1 %v13641_v25  ;;  %10659 = vmatprep.mubr.msk.f32.mxu0 %vm13175_vm0, %v13176_v1 }
0x150b   :  { %11817 = vmatprep.subr.bf16.mxu1 %v13174_v0  ;;  %11840 = vmatpush3.bf16.msra.mxu0 %v14163_v59 }
0x150c   :  { %11841 = vmatprep.subr.bf16.mxu0 %v13174_v0 }
0x150e   :  { %11819 = vmatpush3.bf16.msra.mxu1 %v13651_v31 }
0x150f   :  { %11820 = vmatprep.subr.bf16.mxu1 %v13174_v0  ;;  %11843 = vmatpush3.bf16.msra.mxu0 %v14167_v33 }
0x1510   :  { %11862 = vmatprep.subr.bf16.mxu0 %v13174_v0 }
0x1512   :  { %11822 = vmatpush3.bf16.msra.mxu1 %v13656_v35 }
0x1513   :  { %11823 = vmatprep.subr.bf16.mxu1 %v13174_v0 }
0x1516   :  { %11825 = vmatpush3.bf16.msra.mxu1 %v13665_v38 }
0x1517   :  { %11844 = vmatprep.subr.bf16.mxu1 %v13174_v0 }
0x1519   :  { %10627 = vmatmul.mubr.msk.f32.vlgmr.msra.gmra.mrb[32].mxu1 %vm395_vm1, %v3105_v19 }
0x151a   :  { %10670 = vmatprep.mubr.msk.f32.mxu1 %vm13175_vm0, %v13176_v1  ;;  %11846 = vmatpush3.bf16.msra.mxu1 %v14150_v22 }
0x151b   :  { %11847 = vmatprep.subr.bf16.mxu1 %v13174_v0 }
0x151e   :  { %11849 = vmatpush3.bf16.msra.mxu1 %v14153_v23 }
0x151f   :  { %11850 = vmatprep.subr.bf16.mxu1 %v13174_v0 }
0x1521   :  { %10671 = vmatmul.mubr.f32.vlgmr.msra.gmra.mrb[34].mxu1 %v13176_v1 }
0x1522   :  { %10681 = vmatprep.mubr.msk.f32.mxu1 %vm13175_vm0, %v13176_v1  ;;  %11852 = vmatpush3.bf16.msra.mxu1 %v14169_v39 }
0x1523   :  { %11853 = vmatprep.subr.bf16.mxu1 %v13174_v0 }
0x1526   :  { %11855 = vmatpush3.bf16.msra.mxu1 %v14175_v43 }
0x1527   :  { %11856 = vmatprep.subr.bf16.mxu1 %v13174_v0 }
0x15d4   :  { %v3248_v25 = vpop.f32.mrb[28].mxu0 }
0x15d5   :  { %v3249_v5 = vadd.f32 %v14075_v18, %v3248_v25  ;;  %v10639_v31 = vpop.f32.mrb[29].mxu0  ;;  %v14183_v25 = vld [vmem:[#allocation26] ss:$0 sm:$0xff] }
0x15d7   :  { %3260 = vrot.lane.b32.xlu0 %v3249_v5, %s13177_s6 }
0x15d8   :  { %v3075_v12 = vpop.f32.mrb[30].mxu1 }
0x15d9   :  { %v3076_v35 = vadd.f32 %v14079_v50, %v3075_v12  ;;  %v10605_v24 = vpop.f32.mrb[31].mxu1 }
0x15db   :  { %3087 = vrot.lane.b32.xlu1 %v3076_v35, %s13177_s6  ;;  %v3079_v62 = vadd.f32 %v3076_v35, %v3006_v40  ;;  %v3312_v35 = vld [vmem:[#allocation30 + $0x8] sm:$0xff] }
0x15dd   :  { %v9350_v2 = vmul.f32 -1.442695, %v3079_v62 }
0x15ec   :  { %v3175_v38 = vpop.f32.mrb[32].mxu1 }
0x15ed   :  { %v10628_v30 = vpop.f32.mrb[33].mxu1  ;;  %v3179_v46 = vadd.f32 %v14083_v63, %v3175_v38 }
0x15ee   :  { %v3313_v30 = vld [vmem:[#allocation30 + $0x10] sm:$0xff] }
0x15ef   :  { %v3252_v9 = vadd.f32 %v3249_v5, %v3179_v46 }
0x15f1   :  { %v9353_v13 = vmul.f32 -1.442695, %v3252_v9  ;;  %v3301_v9 = vld [vmem:[#allocation27 + $0x20] sm:$0xff] }
0x15f3   :  { %12477 = vpow2.f32 %v9353_v13 }
0x15f4   :  { %12479 = vpow2.f32 %v9350_v2  ;;  %v3545_v5 = vpop.f32.mrb[34].mxu1 }
0x15f5   :  { %v10672_v31 = vpop.f32.mrb[35].mxu1 }
0x15fd   :  { %v12478_v18 = vpop.eup %12477 }
0x15fe   :  { %v3256_v3 = vadd.f32 1.0, %v12478_v18  ;;  %v12480_v6 = vpop.eup %12479  ;;  %v3303_v18 = vld [vmem:[#allocation27 + $0x30] sm:$0xff] }
0x15ff   :  { %v3083_v7 = vadd.f32 1.0, %v12480_v6 }
0x1600   :  { %12481 = vrcp.f32 %v3256_v3  ;;  %v3304_v3 = vld [vmem:[#allocation27 + $0x38] sm:$0xff] }
0x1601   :  { %12483 = vrcp.f32 %v3083_v7  ;;  %v14206_v7 = vpack.c.bf16 %v3304_v3, %v3303_v18 }
0x160a   :  { %v12482_v50 = vpop.eup %12481 }
0x160b   :  { %v12484_v63 = vpop.eup %12483  ;;  %v3270_v41 = vsub.f32 1.0, %v12482_v50  ;;  %v3276_v54 = vmul.f32 %v12482_v50, %v14101_v37  ;;  %v14186_v37 = vadd.f32 %v14183_v25, %v3545_v5 }
0x160c   :  { %v3097_v36 = vsub.f32 1.0, %v12484_v63  ;;  %v3103_v61 = vmul.f32 %v12484_v63, %v14106_v45  ;;  %v3311_v45 = vld [vmem:[#allocation30] sm:$0xff] }
0x160d   :  { %v14192_v38 = vpack.c.bf16 %v3312_v35, %v3311_v45 }
0x1649   :  { %v3261_v8 = vpop.permute.xlu0 %3260 }
0x164a   :  { %v3263_v10 = vmul.f32 %v12482_v50, %v3261_v8  ;;  %v3656_v50 = vld [vmem:[#allocation3 + $0xe] sm:$0x3]  ;;  %v3844_v8 = vld [vmem:[#allocation2 + $0x2] sm:$0x3] }
0x164c   :  { %3265 = vrot.lane.b32.xlu0 %v3263_v10, %s13177_s6  ;;  %v3919_v10 = vld [vmem:[#allocation3 + $0x2] sm:$0x3] }
0x164d   :  { %v3088_v11 = vpop.permute.xlu1 %3087 }
0x164e   :  { %v3090_v14 = vmul.f32 %v12484_v63, %v3088_v11  ;;  %v14242_v63 = vld [vmem:[#allocation23] ss:$0 sm:$0xff] }
0x1650   :  { %3092 = vrot.lane.b32.xlu1 %v3090_v14, %s13177_s6 }
0x16be   :  { %v3266_v4 = vpop.permute.xlu0 %3265 }
0x16bf   :  { %v3268_v15 = vadd.f32 %v3266_v4, %v3179_v46  ;;  %v3314_v46 = vld [vmem:[#allocation30 + $0x18] sm:$0xff] }
0x16c0   :  { %v14196_v13 = vpack.c.bf16 %v3314_v46, %v3313_v30 }
0x16c1   :  { %12485 = vtanh.f32 %v3268_v15 }
0x16c2   :  { %v3093_v16 = vpop.permute.xlu1 %3092 }
0x16c3   :  { %v3095_v17 = vadd.f32 %v3093_v16, %v3006_v40  ;;  %v3302_v40 = vld [vmem:[#allocation27 + $0x28] sm:$0xff] }
0x16c4   :  { %v14198_v2 = vpack.c.bf16 %v3302_v40, %v3301_v9 }
0x16c5   :  { %12487 = vtanh.f32 %v3095_v17  ;;  %v14246_v17 = vld [vmem:[#allocation32] ss:$0 sm:$0xff] }
0x16cb   :  { %v12486_v26 = vpop.eup %12485 }
0x16cc   :  { %3272 = vrot.lane.b32.xlu0 %v12486_v26, %s13178_s12 }
0x16cf   :  { %v12488_v58 = vpop.eup %12487 }
0x16d0   :  { %3099 = vrot.lane.b32.xlu1 %v12488_v58, %s13178_s12 }
0x173e   :  { %v3273_v49 = vpop.permute.xlu0 %3272 }
0x173f   :  { %v3275_v51 = vmul.f32 %v3273_v49, %v3270_v41  ;;  %v14253_v41 = vld [vmem:[#allocation29] ss:$0 sm:$0xff] }
0x1741   :  { %v3277_v55 = vadd.f32 %v3276_v54, %v3275_v51 }
0x1742   :  { %v3100_v60 = vpop.permute.xlu1 %3099 }
0x1743   :  { %v3102_v53 = vmul.f32 %v3100_v60, %v3097_v36  ;;  %3285 = vrot.lane.b32.xlu0 %v3277_v55, %s13178_s12 }
0x1745   :  { %v3104_v19 = vadd.f32 %v3103_v61, %v3102_v53 }
0x1747   :  { %3279 = vrot.lane.b32.xlu1 %v3104_v19, %s13178_s12 }
0x174b   :  { %3557 = vrot.lane.b32.xlu1 %v14186_v37, %s13177_s6 }
0x17b5   :  { %v3286_v12 = vpop.permute.xlu0 %3285 }
0x17b6   :  { %3288 = vst.msk [vmem:[#allocation3] sm:$0x3] %vm770_vm2, %v3286_v12 }
0x17b9   :  { %v3280_v24 = vpop.permute.xlu1 %3279 }
0x17ba   :  { %3283 = vst.msk [vmem:[#allocation2 + $0xe] sm:$0x3] %vm770_vm2, %v3280_v24 }
0x17bd   :  { %v3398_v62 = vld [vmem:[#allocation3] sm:$0x3]  ;;  %v3558_v32 = vpop.permute.xlu1 %3557 }
0x17be   :  { %10660 = vmatmul.mubr.msk.f32.vlgmr.msra.gmra.mrb[30].mxu0 %vm482_vm3, %v3398_v62 }
0x17bf   :  { %11864 = vmatpush3.bf16.msra.mxu0 %v14192_v38  ;;  %10703 = vmatprep.mubr.msk.f32.mxu0 %vm13175_vm0, %v13176_v1 }
0x17c0   :  { %11865 = vmatprep.subr.bf16.mxu0 %v13174_v0 }
0x17c1   :  { %v3575_v6 = vld [vmem:[#allocation2 + $0xe] sm:$0x3] }
0x17c2   :  { %10682 = vmatmul.mubr.msk.f32.vlgmr.msra.gmra.mrb[36].mxu1 %vm482_vm3, %v3575_v6  ;;  %v4092_v6 = vld [vmem:[#allocation2 + $0xc] sm:$0x3] }
0x17c3   :  { %11867 = vmatpush3.bf16.msra.mxu0 %v14196_v13  ;;  %11858 = vmatpush3.bf16.msra.mxu1 %v14198_v2 }
0x17c4   :  { %11868 = vmatprep.subr.bf16.mxu0 %v13174_v0  ;;  %11859 = vmatprep.subr.bf16.mxu1 %v13174_v0 }
0x17c5   :  { %10692 = vmatprep.mubr.msk.f32.mxu1 %vm13175_vm0, %v13176_v1 }
0x17c6   :  { %10704 = vmatmul.mubr.f32.vlgmr.msra.gmra.mrb[32].mxu0 %v13176_v1 }
0x17c7   :  { %11870 = vmatpush3.bf16.msra.mxu0 %v14110_v48  ;;  %11861 = vmatpush3.bf16.msra.mxu1 %v14206_v7 }
0x17c8   :  { %11871 = vmatprep.subr.bf16.mxu0 %v13174_v0  ;;  %10714 = vmatprep.mubr.msk.f32.mxu0 %vm13175_vm0, %v13176_v1 }
0x17c9   :  { %11880 = vmatprep.subr.bf16.mxu1 %v13174_v0 }
0x17ca   :  { %10693 = vmatmul.mubr.msk.f32.vlgmr.msra.gmra.mrb[36].mxu1 %vm482_vm3, %v3656_v50  ;;  %v4167_v50 = vld [vmem:[#allocation3 + $0xc] sm:$0x3] }
0x17cb   :  { %11873 = vmatpush3.bf16.msra.mxu0 %v14115_v57  ;;  %11882 = vmatpush3.bf16.msra.mxu1 %v14150_v22 }
0x17cc   :  { %11874 = vmatprep.subr.bf16.mxu0 %v13174_v0  ;;  %11883 = vmatprep.subr.bf16.mxu1 %v13174_v0 }
0x17cd   :  { %10736 = vmatprep.mubr.msk.f32.mxu1 %vm13175_vm0, %v13176_v1 }
0x17ce   :  { %10715 = vmatmul.mubr.msk.f32.vlgmr.msra.gmra.mrb[34].mxu0 %vm482_vm3, %v3844_v8 }
0x17cf   :  { %11876 = vmatpush3.bf16.msra.mxu0 %v14163_v59  ;;  %10725 = vmatprep.mubr.msk.f32.mxu0 %vm13175_vm0, %v13176_v1 }
0x17d0   :  { %11877 = vmatprep.subr.bf16.mxu0 %v13174_v0  ;;  %11885 = vmatpush3.bf16.msra.mxu1 %v14153_v23 }
0x17d1   :  { %11886 = vmatprep.subr.bf16.mxu1 %v13174_v0 }
0x17d3   :  { %11879 = vmatpush3.bf16.msra.mxu0 %v14167_v33 }
0x17d4   :  { %11898 = vmatprep.subr.bf16.mxu0 %v13174_v0 }
0x17d6   :  { %10726 = vmatmul.mubr.msk.f32.vlgmr.msra.gmra.mrb[34].mxu0 %vm482_vm3, %v3919_v10  ;;  %v4352_v10 = vld [vmem:[#allocation2 + $0x4] sm:$0x3] }
0x17d7   :  { %11900 = vmatpush3.bf16.msra.mxu0 %v14192_v38  ;;  %10769 = vmatprep.mubr.msk.f32.mxu0 %vm13175_vm0, %v13176_v1 }
0x17d8   :  { %11901 = vmatprep.subr.bf16.mxu0 %v13174_v0 }
0x17db   :  { %11903 = vmatpush3.bf16.msra.mxu0 %v14196_v13 }
0x17dc   :  { %11904 = vmatprep.subr.bf16.mxu0 %v13174_v0 }
0x1891   :  { %v3468_v11 = vpop.f32.mrb[30].mxu0 }
0x1892   :  { %v12312_v14 = vadd.f32 %v14242_v63, %v3468_v11  ;;  %v10661_v4 = vpop.f32.mrb[31].mxu0  ;;  %v4427_v11 = vld [vmem:[#allocation3 + $0x4] sm:$0x3] }
0x1894   :  { %v3549_v15 = vadd.f32 %v12312_v14, %v14186_v37 }
0x1896   :  { %v9358_v16 = vmul.f32 -1.442695, %v3549_v15 }
0x1898   :  { %12489 = vpow2.f32 %v9358_v16 }
0x1899   :  { %v3803_v52 = vpop.f32.mrb[32].mxu0 }
0x189a   :  { %v3804_v20 = vadd.f32 %v14246_v17, %v3803_v52  ;;  %v10705_v21 = vpop.f32.mrb[33].mxu0 }
0x189c   :  { %3815 = vrot.lane.b32.xlu0 %v3804_v20, %s13177_s6 }
0x189d   :  { %v3726_v56 = vpop.f32.mrb[36].mxu1 }
0x189e   :  { %v10694_v26 = vpop.f32.mrb[37].mxu1  ;;  %v12313_v44 = vadd.f32 %v14253_v41, %v3726_v56 }
0x18a0   :  { %v3807_v47 = vadd.f32 %v12313_v44, %v3804_v20 }
0x18a2   :  { %v12490_v58 = vpop.eup %12489  ;;  %v9363_v49 = vmul.f32 -1.442695, %v3807_v47 }
0x18a3   :  { %v3553_v27 = vadd.f32 1.0, %v12490_v58 }
0x18a5   :  { %12491 = vrcp.f32 %v3553_v27 }
0x18a6   :  { %12493 = vpow2.f32 %v9363_v49 }
0x18a9   :  { %v14250_v28 = vpop.f32.mrb[34].mxu0 }
0x18aa   :  { %v10727_v29 = vpop.f32.mrb[35].mxu0  ;;  %v12314_v20 = vadd.f32 %v14242_v63, %v14250_v28 }
0x18af   :  { %v12492_v34 = vpop.eup %12491 }
0x18b0   :  { %v3560_v42 = vmul.f32 %v12492_v34, %v3558_v32  ;;  %v12494_v54 = vpop.eup %12493  ;;  %v3567_v12 = vsub.f32 1.0, %v12492_v34  ;;  %v3573_v35 = vmul.f32 0.0, %v12492_v34 }
0x18b1   :  { %v3811_v51 = vadd.f32 1.0, %v12494_v54 }
0x18b2   :  { %3562 = vrot.lane.b32.xlu1 %v3560_v42, %s13177_s6 }
0x18b3   :  { %12495 = vrcp.f32 %v3811_v51 }
0x18bd   :  { %v12496_v55 = vpop.eup %12495 }
0x18be   :  { %v3825_v46 = vsub.f32 1.0, %v12496_v55  ;;  %v3831_v40 = vmul.f32 0.0, %v12496_v55 }
0x190e   :  { %v3816_v36 = vpop.permute.xlu0 %3815 }
0x190f   :  { %v3818_v60 = vmul.f32 %v12496_v55, %v3816_v36 }
0x1911   :  { %3820 = vrot.lane.b32.xlu0 %v3818_v60, %s13177_s6 }
0x1924   :  { %v3563_v61 = vpop.permute.xlu1 %3562 }
0x1925   :  { %v3565_v53 = vadd.f32 %v12312_v14, %v3563_v61 }
0x1927   :  { %12497 = vtanh.f32 %v3565_v53 }
0x1931   :  { %v12498_v19 = vpop.eup %12497 }
0x1932   :  { %3569 = vrot.lane.b32.xlu1 %v12498_v19, %s13178_s12 }
0x1983   :  { %v3821_v5 = vpop.permute.xlu0 %3820 }
0x1984   :  { %v3823_v37 = vadd.f32 %v12313_v44, %v3821_v5 }
0x1986   :  { %12499 = vtanh.f32 %v3823_v37 }
0x1990   :  { %v12500_v31 = vpop.eup %12499 }
0x1991   :  { %3827 = vrot.lane.b32.xlu0 %v12500_v31, %s13178_s12 }
0x19a4   :  { %v3570_v45 = vpop.permute.xlu1 %3569 }
0x19a5   :  { %v3572_v24 = vmul.f32 %v3570_v45, %v3567_v12 }
0x19a7   :  { %v14259_v30 = vadd.f32 %v3573_v35, %v3572_v24 }
0x19a9   :  { %3834 = vrot.lane.b32.xlu1 %v14259_v30, %s13178_s12 }
0x1a03   :  { %v3828_v9 = vpop.permute.xlu0 %3827 }
0x1a04   :  { %v3830_v62 = vmul.f32 %v3828_v9, %v3825_v46 }
0x1a06   :  { %v14263_v18 = vadd.f32 %v3831_v40, %v3830_v62 }
0x1a08   :  { %3839 = vrot.lane.b32.xlu0 %v14263_v18, %s13178_s12 }
0x1a1b   :  { %v3835_v3 = vpop.permute.xlu1 %3834 }
0x1a1c   :  { %3837 = vst.msk [vmem:[#allocation4] sm:$0x3] %vm770_vm2, %v3835_v3  ;;  %10737 = vmatmul.mubr.msk.f32.vlgmr.msra.gmra.mrb[38].mxu1 %vm482_vm3, %v3835_v3 }
0x1a1d   :  { %11888 = vmatpush3.bf16.msra.mxu1 %v14169_v39  ;;  %10747 = vmatprep.mubr.msk.f32.mxu1 %vm13175_vm0, %v13176_v1 }
0x1a1e   :  { %11889 = vmatprep.subr.bf16.mxu1 %v13174_v0 }
0x1a21   :  { %11891 = vmatpush3.bf16.msra.mxu1 %v14175_v43 }
0x1a22   :  { %11892 = vmatprep.subr.bf16.mxu1 %v13174_v0 }
0x1a24   :  { %10748 = vmatmul.mubr.msk.f32.vlgmr.msra.gmra.mrb[40].mxu1 %vm482_vm3, %v4092_v6 }
0x1a25   :  { %11894 = vmatpush3.bf16.msra.mxu1 %v14198_v2  ;;  %10758 = vmatprep.mubr.msk.f32.mxu1 %vm13175_vm0, %v13176_v1 }
0x1a26   :  { %11895 = vmatprep.subr.bf16.mxu1 %v13174_v0 }
0x1a29   :  { %11897 = vmatpush3.bf16.msra.mxu1 %v14206_v7 }
0x1a2a   :  { %11916 = vmatprep.subr.bf16.mxu1 %v13174_v0 }
0x1a2c   :  { %10759 = vmatmul.mubr.msk.f32.vlgmr.msra.gmra.mrb[40].mxu1 %vm482_vm3, %v4167_v50 }
0x1a2d   :  { %11918 = vmatpush3.bf16.msra.mxu1 %v14150_v22  ;;  %10802 = vmatprep.mubr.msk.f32.mxu1 %vm13175_vm0, %v13176_v1 }
0x1a2e   :  { %11919 = vmatprep.subr.bf16.mxu1 %v13174_v0 }
0x1a31   :  { %11921 = vmatpush3.bf16.msra.mxu1 %v14153_v23 }
0x1a32   :  { %11922 = vmatprep.subr.bf16.mxu1 %v13174_v0 }
0x1a7a   :  { %v3840_v8 = vpop.permute.xlu0 %3839 }
0x1a7b   :  { %3843 = vst.msk [vmem:[#allocation5 + $0xe] sm:$0x3] %vm770_vm2, %v3840_v8  ;;  %10770 = vmatmul.mubr.msk.f32.vlgmr.msra.gmra.mrb[36].mxu0 %vm482_vm3, %v3840_v8 }
0x1a7c   :  { %11906 = vmatpush3.bf16.msra.mxu0 %v14110_v48  ;;  %10780 = vmatprep.mubr.msk.f32.mxu0 %vm13175_vm0, %v13176_v1 }
0x1a7d   :  { %11907 = vmatprep.subr.bf16.mxu0 %v13174_v0 }
0x1a80   :  { %11909 = vmatpush3.bf16.msra.mxu0 %v14115_v57 }
0x1a81   :  { %11910 = vmatprep.subr.bf16.mxu0 %v13174_v0 }
0x1a83   :  { %10781 = vmatmul.mubr.msk.f32.vlgmr.msra.gmra.mrb[38].mxu0 %vm482_vm3, %v4352_v10 }
0x1a84   :  { %11912 = vmatpush3.bf16.msra.mxu0 %v14163_v59  ;;  %10791 = vmatprep.mubr.msk.f32.mxu0 %vm13175_vm0, %v13176_v1 }
0x1a85   :  { %11913 = vmatprep.subr.bf16.mxu0 %v13174_v0 }
0x1a88   :  { %11915 = vmatpush3.bf16.msra.mxu0 %v14167_v33 }
0x1a89   :  { %11934 = vmatprep.subr.bf16.mxu0 %v13174_v0 }
0x1a8b   :  { %10792 = vmatmul.mubr.msk.f32.vlgmr.msra.gmra.mrb[38].mxu0 %vm482_vm3, %v4427_v11 }
0x1a8c   :  { %11936 = vmatpush3.bf16.msra.mxu0 %v14192_v38  ;;  %10835 = vmatprep.mubr.msk.f32.mxu0 %vm13175_vm0, %v13176_v1 }
0x1a8d   :  { %11937 = vmatprep.subr.bf16.mxu0 %v13174_v0 }
0x1a90   :  { %11939 = vmatpush3.bf16.msra.mxu0 %v14196_v13 }
0x1a91   :  { %11940 = vmatprep.subr.bf16.mxu0 %v13174_v0 }
0x1aef   :  { %v4062_v14 = vpop.f32.mrb[38].mxu1 }
0x1af0   :  { %v4063_v4 = vadd.f32 %v14183_v25, %v4062_v14  ;;  %v10738_v15 = vpop.f32.mrb[39].mxu1  ;;  %v4860_v14 = vld [vmem:[#allocation2 + $0x6] sm:$0x3] }
0x1af2   :  { %4074 = vrot.lane.b32.xlu1 %v4063_v4, %s13177_s6  ;;  %v4066_v21 = vadd.f32 %v12314_v20, %v4063_v4  ;;  %v4935_v4 = vld [vmem:[#allocation3 + $0x6] sm:$0x3] }
0x1af4   :  { %v9367_v56 = vmul.f32 -1.442695, %v4066_v21 }
0x1af6   :  { %12501 = vpow2.f32 %v9367_v56 }
0x1aff   :  { %v4237_v16 = vpop.f32.mrb[40].mxu1 }
0x1b00   :  { %v10760_v52 = vpop.f32.mrb[41].mxu1  ;;  %v12502_v29 = vpop.eup %12501  ;;  %v12315_v28 = vadd.f32 %v14253_v41, %v4237_v16 }
0x1b01   :  { %v4070_v32 = vadd.f32 1.0, %v12502_v29 }
0x1b03   :  { %12503 = vrcp.f32 %v4070_v32 }
0x1b0d   :  { %v12504_v44 = vpop.eup %12503 }
0x1b0e   :  { %v4084_v35 = vsub.f32 1.0, %v12504_v44  ;;  %v4090_v46 = vmul.f32 %v12504_v44, %v14259_v30  ;;  %v4600_v30 = vld [vmem:[#allocation2 + $0xa] sm:$0x3] }
0x1b4e   :  { %v4310_v26 = vpop.f32.mrb[36].mxu0 }
0x1b4f   :  { %v4311_v58 = vadd.f32 %v14246_v17, %v4310_v26  ;;  %v10771_v27 = vpop.f32.mrb[37].mxu0 }
0x1b51   :  { %4322 = vrot.lane.b32.xlu0 %v4311_v58, %s13177_s6  ;;  %v4314_v54 = vadd.f32 %v12315_v28, %v4311_v58 }
0x1b53   :  { %v9371_v51 = vmul.f32 -1.442695, %v4314_v54 }
0x1b55   :  { %12505 = vpow2.f32 %v9371_v51 }
0x1b5e   :  { %v14317_v34 = vpop.f32.mrb[38].mxu0 }
0x1b5f   :  { %v10793_v42 = vpop.f32.mrb[39].mxu0  ;;  %v12506_v55 = vpop.eup %12505  ;;  %v12316_v56 = vadd.f32 %v14242_v63, %v14317_v34 }
0x1b60   :  { %v4318_v36 = vadd.f32 1.0, %v12506_v55 }
0x1b62   :  { %12507 = vrcp.f32 %v4318_v36 }
0x1b64   :  { %v4075_v47 = vpop.permute.xlu1 %4074 }
0x1b65   :  { %v4077_v49 = vmul.f32 %v12504_v44, %v4075_v47 }
0x1b67   :  { %4079 = vrot.lane.b32.xlu1 %v4077_v49, %s13177_s6 }
0x1b6c   :  { %v12508_v60 = vpop.eup %12507 }
0x1b6d   :  { %v4332_v62 = vsub.f32 1.0, %v12508_v60  ;;  %v4338_v6 = vmul.f32 %v12508_v60, %v14263_v18  ;;  %v4675_v18 = vld [vmem:[#allocation3 + $0xa] sm:$0x3] }
0x1bc3   :  { %v4323_v61 = vpop.permute.xlu0 %4322 }
0x1bc4   :  { %v4325_v53 = vmul.f32 %v12508_v60, %v4323_v61 }
0x1bc6   :  { %4327 = vrot.lane.b32.xlu0 %v4325_v53, %s13177_s6 }
0x1bd9   :  { %v4080_v19 = vpop.permute.xlu1 %4079 }
0x1bda   :  { %v4082_v5 = vadd.f32 %v12314_v20, %v4080_v19 }
0x1bdc   :  { %12509 = vtanh.f32 %v4082_v5 }
0x1be6   :  { %v12510_v37 = vpop.eup %12509 }
0x1be7   :  { %4086 = vrot.lane.b32.xlu1 %v12510_v37, %s13178_s12 }
0x1c38   :  { %v4328_v31 = vpop.permute.xlu0 %4327 }
0x1c39   :  { %v4330_v12 = vadd.f32 %v12315_v28, %v4328_v31 }
0x1c3b   :  { %12511 = vtanh.f32 %v4330_v12 }
0x1c45   :  { %v12512_v45 = vpop.eup %12511 }
0x1c46   :  { %4334 = vrot.lane.b32.xlu0 %v12512_v45, %s13178_s12 }
0x1c59   :  { %v4087_v24 = vpop.permute.xlu1 %4086 }
0x1c5a   :  { %v4089_v9 = vmul.f32 %v4087_v24, %v4084_v35 }
0x1c5c   :  { %v14325_v40 = vadd.f32 %v4090_v46, %v4089_v9 }
0x1c5e   :  { %4341 = vrot.lane.b32.xlu1 %v14325_v40, %s13178_s12 }
0x1cb8   :  { %v4335_v3 = vpop.permute.xlu0 %4334 }
0x1cb9   :  { %v4337_v50 = vmul.f32 %v4335_v3, %v4332_v62 }
0x1cbb   :  { %v14330_v8 = vadd.f32 %v4338_v6, %v4337_v50 }
0x1cbd   :  { %4347 = vrot.lane.b32.xlu0 %v14330_v8, %s13178_s12 }
0x1cd0   :  { %v4342_v10 = vpop.permute.xlu1 %4341 }
0x1cd1   :  { %4345 = vst.msk [vmem:[#allocation4 + $0x2] sm:$0x3] %vm770_vm2, %v4342_v10  ;;  %10803 = vmatmul.mubr.msk.f32.vlgmr.msra.gmra.mrb[42].mxu1 %vm482_vm3, %v4342_v10 }
0x1cd2   :  { %11924 = vmatpush3.bf16.msra.mxu1 %v14169_v39  ;;  %10813 = vmatprep.mubr.msk.f32.mxu1 %vm13175_vm0, %v13176_v1 }
0x1cd3   :  { %11925 = vmatprep.subr.bf16.mxu1 %v13174_v0 }
0x1cd6   :  { %11927 = vmatpush3.bf16.msra.mxu1 %v14175_v43 }
0x1cd7   :  { %11928 = vmatprep.subr.bf16.mxu1 %v13174_v0 }
0x1cd9   :  { %10814 = vmatmul.mubr.msk.f32.vlgmr.msra.gmra.mrb[44].mxu1 %vm482_vm3, %v4600_v30 }
0x1cda   :  { %11930 = vmatpush3.bf16.msra.mxu1 %v14198_v2  ;;  %10824 = vmatprep.mubr.msk.f32.mxu1 %vm13175_vm0, %v13176_v1 }
0x1cdb   :  { %11931 = vmatprep.subr.bf16.mxu1 %v13174_v0 }
0x1cde   :  { %11933 = vmatpush3.bf16.msra.mxu1 %v14206_v7 }
0x1cdf   :  { %11952 = vmatprep.subr.bf16.mxu1 %v13174_v0 }
0x1ce1   :  { %10825 = vmatmul.mubr.msk.f32.vlgmr.msra.gmra.mrb[44].mxu1 %vm482_vm3, %v4675_v18 }
0x1ce2   :  { %11954 = vmatpush3.bf16.msra.mxu1 %v14150_v22  ;;  %10868 = vmatprep.mubr.msk.f32.mxu1 %vm13175_vm0, %v13176_v1 }
0x1ce3   :  { %11955 = vmatprep.subr.bf16.mxu1 %v13174_v0 }
0x1ce6   :  { %11957 = vmatpush3.bf16.msra.mxu1 %v14153_v23 }
0x1ce7   :  { %11958 = vmatprep.subr.bf16.mxu1 %v13174_v0 }
0x1d2f   :  { %v4348_v11 = vpop.permute.xlu0 %4347 }
0x1d30   :  { %4351 = vst.msk [vmem:[#allocation5 + $0xc] sm:$0x3] %vm770_vm2, %v4348_v11  ;;  %10836 = vmatmul.mubr.msk.f32.vlgmr.msra.gmra.mrb[40].mxu0 %vm482_vm3, %v4348_v11 }
0x1d31   :  { %11942 = vmatpush3.bf16.msra.mxu0 %v14110_v48  ;;  %10846 = vmatprep.mubr.msk.f32.mxu0 %vm13175_vm0, %v13176_v1 }
0x1d32   :  { %11943 = vmatprep.subr.bf16.mxu0 %v13174_v0 }
0x1d35   :  { %11945 = vmatpush3.bf16.msra.mxu0 %v14115_v57 }
0x1d36   :  { %11946 = vmatprep.subr.bf16.mxu0 %v13174_v0 }
0x1d38   :  { %10847 = vmatmul.mubr.msk.f32.vlgmr.msra.gmra.mrb[42].mxu0 %vm482_vm3, %v4860_v14 }
0x1d39   :  { %11948 = vmatpush3.bf16.msra.mxu0 %v14163_v59  ;;  %10857 = vmatprep.mubr.msk.f32.mxu0 %vm13175_vm0, %v13176_v1 }
0x1d3a   :  { %11949 = vmatprep.subr.bf16.mxu0 %v13174_v0 }
0x1d3d   :  { %11951 = vmatpush3.bf16.msra.mxu0 %v14167_v33 }
0x1d3e   :  { %11970 = vmatprep.subr.bf16.mxu0 %v13174_v0 }
0x1d40   :  { %10858 = vmatmul.mubr.msk.f32.vlgmr.msra.gmra.mrb[42].mxu0 %vm482_vm3, %v4935_v4 }
0x1d41   :  { %11972 = vmatpush3.bf16.msra.mxu0 %v14192_v38  ;;  %10901 = vmatprep.mubr.msk.f32.mxu0 %vm13175_vm0, %v13176_v1 }
0x1d42   :  { %11973 = vmatprep.subr.bf16.mxu0 %v13174_v0 }
0x1d45   :  { %11975 = vmatpush3.bf16.msra.mxu0 %v14196_v13 }
0x1d46   :  { %11976 = vmatprep.subr.bf16.mxu0 %v13174_v0 }
0x1da4   :  { %v4570_v15 = vpop.f32.mrb[42].mxu1 }
0x1da5   :  { %v4571_v16 = vadd.f32 %v14183_v25, %v4570_v15  ;;  %v10804_v52 = vpop.f32.mrb[43].mxu1  ;;  %v5368_v15 = vld [vmem:[#allocation2 + $0x8] sm:$0x3] }
0x1da7   :  { %4582 = vrot.lane.b32.xlu1 %v4571_v16, %s13177_s6  ;;  %v4574_v26 = vadd.f32 %v12316_v56, %v4571_v16  ;;  %v5443_v16 = vld [vmem:[#allocation3 + $0x8] sm:$0x3] }
0x1da9   :  { %v9375_v58 = vmul.f32 -1.442695, %v4574_v26 }
0x1dab   :  { %12513 = vpow2.f32 %v9375_v58 }
0x1db4   :  { %v4745_v20 = vpop.f32.mrb[44].mxu1 }
0x1db5   :  { %v10826_v21 = vpop.f32.mrb[45].mxu1  ;;  %v12514_v42 = vpop.eup %12513  ;;  %v12317_v34 = vadd.f32 %v14253_v41, %v4745_v20 }
0x1db6   :  { %v4578_v44 = vadd.f32 1.0, %v12514_v42 }
0x1db8   :  { %12515 = vrcp.f32 %v4578_v44 }
0x1dc2   :  { %v12516_v28 = vpop.eup %12515 }
0x1dc3   :  { %v4592_v46 = vsub.f32 1.0, %v12516_v28  ;;  %v4598_v62 = vmul.f32 %v12516_v28, %v14325_v40  ;;  %v5108_v40 = vld [vmem:[#allocation2 + $0x8] sm:$0x3] }
0x1e03   :  { %v4818_v27 = vpop.f32.mrb[40].mxu0 }
0x1e04   :  { %v4819_v29 = vadd.f32 %v14246_v17, %v4818_v27  ;;  %v10837_v32 = vpop.f32.mrb[41].mxu0 }
0x1e06   :  { %4830 = vrot.lane.b32.xlu0 %v4819_v29, %s13177_s6  ;;  %v4822_v55 = vadd.f32 %v12317_v34, %v4819_v29 }
0x1e08   :  { %v9379_v36 = vmul.f32 -1.442695, %v4822_v55 }
0x1e0a   :  { %12517 = vpow2.f32 %v9379_v36 }
0x1e13   :  { %v14384_v47 = vpop.f32.mrb[42].mxu0 }
0x1e14   :  { %v10859_v49 = vpop.f32.mrb[43].mxu0  ;;  %v12518_v60 = vpop.eup %12517  ;;  %v12318_v58 = vadd.f32 %v14242_v63, %v14384_v47 }
0x1e15   :  { %v4826_v61 = vadd.f32 1.0, %v12518_v60 }
0x1e17   :  { %12519 = vrcp.f32 %v4826_v61 }
0x1e19   :  { %v4583_v54 = vpop.permute.xlu1 %4582 }
0x1e1a   :  { %v4585_v51 = vmul.f32 %v12516_v28, %v4583_v54 }
0x1e1c   :  { %4587 = vrot.lane.b32.xlu1 %v4585_v51, %s13177_s6 }
0x1e21   :  { %v12520_v53 = vpop.eup %12519 }
0x1e22   :  { %v4840_v50 = vsub.f32 1.0, %v12520_v53  ;;  %v4846_v30 = vmul.f32 %v12520_v53, %v14330_v8  ;;  %v5183_v8 = vld [vmem:[#allocation3 + $0x8] sm:$0x3] }
0x1e78   :  { %v4831_v19 = vpop.permute.xlu0 %4830 }
0x1e79   :  { %v4833_v5 = vmul.f32 %v12520_v53, %v4831_v19 }
0x1e7b   :  { %4835 = vrot.lane.b32.xlu0 %v4833_v5, %s13177_s6 }
0x1e8e   :  { %v4588_v37 = vpop.permute.xlu1 %4587 }
0x1e8f   :  { %v4590_v31 = vadd.f32 %v12316_v56, %v4588_v37 }
0x1e91   :  { %12521 = vtanh.f32 %v4590_v31 }
0x1e9b   :  { %v12522_v12 = vpop.eup %12521 }
0x1e9c   :  { %4594 = vrot.lane.b32.xlu1 %v12522_v12, %s13178_s12 }
0x1eed   :  { %v4836_v45 = vpop.permute.xlu0 %4835 }
0x1eee   :  { %v4838_v35 = vadd.f32 %v12317_v34, %v4836_v45 }
0x1ef0   :  { %12523 = vtanh.f32 %v4838_v35 }
0x1efa   :  { %v12524_v24 = vpop.eup %12523 }
0x1efb   :  { %4842 = vrot.lane.b32.xlu0 %v12524_v24, %s13178_s12 }
0x1f0e   :  { %v4595_v9 = vpop.permute.xlu1 %4594 }
0x1f0f   :  { %v4597_v3 = vmul.f32 %v4595_v9, %v4592_v46 }
0x1f11   :  { %v14392_v6 = vadd.f32 %v4598_v62, %v4597_v3 }
0x1f13   :  { %4849 = vrot.lane.b32.xlu1 %v14392_v6, %s13178_s12 }
0x1f6d   :  { %v4843_v10 = vpop.permute.xlu0 %4842 }
0x1f6e   :  { %v4845_v18 = vmul.f32 %v4843_v10, %v4840_v50 }
0x1f70   :  { %v14397_v11 = vadd.f32 %v4846_v30, %v4845_v18 }
0x1f72   :  { %4855 = vrot.lane.b32.xlu0 %v14397_v11, %s13178_s12 }
0x1f85   :  { %v4850_v14 = vpop.permute.xlu1 %4849 }
0x1f86   :  { %4853 = vst.msk [vmem:[#allocation4 + $0x4] sm:$0x3] %vm770_vm2, %v4850_v14  ;;  %10869 = vmatmul.mubr.msk.f32.vlgmr.msra.gmra.mrb[46].mxu1 %vm482_vm3, %v4850_v14 }
0x1f87   :  { %11960 = vmatpush3.bf16.msra.mxu1 %v14169_v39  ;;  %10879 = vmatprep.mubr.msk.f32.mxu1 %vm13175_vm0, %v13176_v1 }
0x1f88   :  { %11961 = vmatprep.subr.bf16.mxu1 %v13174_v0 }
0x1f8b   :  { %11963 = vmatpush3.bf16.msra.mxu1 %v14175_v43 }
0x1f8c   :  { %11964 = vmatprep.subr.bf16.mxu1 %v13174_v0 }
0x1f8e   :  { %10880 = vmatmul.mubr.msk.f32.vlgmr.msra.gmra.mrb[48].mxu1 %vm482_vm3, %v5108_v40 }
0x1f8f   :  { %11966 = vmatpush3.bf16.msra.mxu1 %v14198_v2  ;;  %10890 = vmatprep.mubr.msk.f32.mxu1 %vm13175_vm0, %v13176_v1 }
0x1f90   :  { %11967 = vmatprep.subr.bf16.mxu1 %v13174_v0 }
0x1f93   :  { %11969 = vmatpush3.bf16.msra.mxu1 %v14206_v7 }
0x1f94   :  { %11988 = vmatprep.subr.bf16.mxu1 %v13174_v0 }
0x1f96   :  { %10891 = vmatmul.mubr.msk.f32.vlgmr.msra.gmra.mrb[48].mxu1 %vm482_vm3, %v5183_v8 }
0x1f97   :  { %11990 = vmatpush3.bf16.msra.mxu1 %v14150_v22  ;;  %10934 = vmatprep.mubr.msk.f32.mxu1 %vm13175_vm0, %v13176_v1 }
0x1f98   :  { %11991 = vmatprep.subr.bf16.mxu1 %v13174_v0 }
0x1f9b   :  { %11993 = vmatpush3.bf16.msra.mxu1 %v14153_v23 }
0x1f9c   :  { %11994 = vmatprep.subr.bf16.mxu1 %v13174_v0 }
0x1fe4   :  { %v4856_v4 = vpop.permute.xlu0 %4855 }
0x1fe5   :  { %4859 = vst.msk [vmem:[#allocation5 + $0xa] sm:$0x3] %vm770_vm2, %v4856_v4  ;;  %10902 = vmatmul.mubr.msk.f32.vlgmr.msra.gmra.mrb[44].mxu0 %vm482_vm3, %v4856_v4 }
0x1fe6   :  { %11978 = vmatpush3.bf16.msra.mxu0 %v14110_v48  ;;  %10912 = vmatprep.mubr.msk.f32.mxu0 %vm13175_vm0, %v13176_v1 }
0x1fe7   :  { %11979 = vmatprep.subr.bf16.mxu0 %v13174_v0 }
0x1fea   :  { %11981 = vmatpush3.bf16.msra.mxu0 %v14115_v57 }
0x1feb   :  { %11982 = vmatprep.subr.bf16.mxu0 %v13174_v0 }
0x1fed   :  { %10913 = vmatmul.mubr.msk.f32.vlgmr.msra.gmra.mrb[46].mxu0 %vm482_vm3, %v5368_v15 }
0x1fee   :  { %11984 = vmatpush3.bf16.msra.mxu0 %v14163_v59  ;;  %10923 = vmatprep.mubr.msk.f32.mxu0 %vm13175_vm0, %v13176_v1 }
0x1fef   :  { %11985 = vmatprep.subr.bf16.mxu0 %v13174_v0 }
0x1ff2   :  { %11987 = vmatpush3.bf16.msra.mxu0 %v14167_v33 }
0x1ff3   :  { %12006 = vmatprep.subr.bf16.mxu0 %v13174_v0 }
0x1ff5   :  { %10924 = vmatmul.mubr.msk.f32.vlgmr.msra.gmra.mrb[46].mxu0 %vm482_vm3, %v5443_v16 }
0x1ff6   :  { %12008 = vmatpush3.bf16.msra.mxu0 %v14192_v38  ;;  %10967 = vmatprep.mubr.msk.f32.mxu0 %vm13175_vm0, %v13176_v1 }
0x1ff7   :  { %12009 = vmatprep.subr.bf16.mxu0 %v13174_v0 }
0x1ffa   :  { %12011 = vmatpush3.bf16.msra.mxu0 %v14196_v13 }
0x1ffb   :  { %12012 = vmatprep.subr.bf16.mxu0 %v13174_v0 }
0x2059   :  { %v5078_v52 = vpop.f32.mrb[46].mxu1 }
0x205a   :  { %v5079_v20 = vadd.f32 %v14183_v25, %v5078_v52  ;;  %v10870_v21 = vpop.f32.mrb[47].mxu1  ;;  %v5876_v52 = vld [vmem:[#allocation2 + $0xa] sm:$0x3] }
0x205c   :  { %5090 = vrot.lane.b32.xlu1 %v5079_v20, %s13177_s6  ;;  %v5082_v27 = vadd.f32 %v12318_v58, %v5079_v20  ;;  %v5951_v20 = vld [vmem:[#allocation3 + $0xa] sm:$0x3] }
0x205e   :  { %v9383_v29 = vmul.f32 -1.442695, %v5082_v27 }
0x2060   :  { %12525 = vpow2.f32 %v9383_v29 }
0x2069   :  { %v5253_v56 = vpop.f32.mrb[48].mxu1 }
0x206a   :  { %v10892_v26 = vpop.f32.mrb[49].mxu1  ;;  %v12526_v49 = vpop.eup %12525  ;;  %v12319_v47 = vadd.f32 %v14253_v41, %v5253_v56 }
0x206b   :  { %v5086_v28 = vadd.f32 1.0, %v12526_v49 }
0x206d   :  { %12527 = vrcp.f32 %v5086_v28 }
0x2077   :  { %v12528_v34 = vpop.eup %12527 }
0x2078   :  { %v5100_v62 = vsub.f32 1.0, %v12528_v34  ;;  %v5106_v50 = vmul.f32 %v12528_v34, %v14392_v6  ;;  %v5616_v6 = vld [vmem:[#allocation2 + $0x6] sm:$0x3] }
0x20b8   :  { %v5326_v32 = vpop.f32.mrb[44].mxu0 }
0x20b9   :  { %v5327_v42 = vadd.f32 %v14246_v17, %v5326_v32  ;;  %v10903_v44 = vpop.f32.mrb[45].mxu0 }
0x20bb   :  { %5338 = vrot.lane.b32.xlu0 %v5327_v42, %s13177_s6  ;;  %v5330_v60 = vadd.f32 %v12319_v47, %v5327_v42 }
0x20bd   :  { %v9387_v61 = vmul.f32 -1.442695, %v5330_v60 }
0x20bf   :  { %12529 = vpow2.f32 %v9387_v61 }
0x20c8   :  { %v14451_v54 = vpop.f32.mrb[46].mxu0 }
0x20c9   :  { %v10925_v51 = vpop.f32.mrb[47].mxu0  ;;  %v12530_v53 = vpop.eup %12529  ;;  %v12320_v29 = vadd.f32 %v14242_v63, %v14451_v54 }
0x20ca   :  { %v5334_v19 = vadd.f32 1.0, %v12530_v53 }
0x20cc   :  { %12531 = vrcp.f32 %v5334_v19 }
0x20ce   :  { %v5091_v55 = vpop.permute.xlu1 %5090 }
0x20cf   :  { %v5093_v36 = vmul.f32 %v12528_v34, %v5091_v55 }
0x20d1   :  { %5095 = vrot.lane.b32.xlu1 %v5093_v36, %s13177_s6 }
0x20d6   :  { %v12532_v5 = vpop.eup %12531 }
0x20d7   :  { %v5348_v18 = vsub.f32 1.0, %v12532_v5  ;;  %v5354_v40 = vmul.f32 %v12532_v5, %v14397_v11  ;;  %v5691_v11 = vld [vmem:[#allocation3 + $0x6] sm:$0x3] }
0x212d   :  { %v5339_v37 = vpop.permute.xlu0 %5338 }
0x212e   :  { %v5341_v31 = vmul.f32 %v12532_v5, %v5339_v37 }
0x2130   :  { %5343 = vrot.lane.b32.xlu0 %v5341_v31, %s13177_s6 }
0x2143   :  { %v5096_v12 = vpop.permute.xlu1 %5095 }
0x2144   :  { %v5098_v45 = vadd.f32 %v12318_v58, %v5096_v12 }
0x2146   :  { %12533 = vtanh.f32 %v5098_v45 }
0x2150   :  { %v12534_v35 = vpop.eup %12533 }
0x2151   :  { %5102 = vrot.lane.b32.xlu1 %v12534_v35, %s13178_s12 }
0x21a2   :  { %v5344_v24 = vpop.permute.xlu0 %5343 }
0x21a3   :  { %v5346_v46 = vadd.f32 %v12319_v47, %v5344_v24 }
0x21a5   :  { %12535 = vtanh.f32 %v5346_v46 }
0x21af   :  { %v12536_v9 = vpop.eup %12535 }
0x21b0   :  { %5350 = vrot.lane.b32.xlu0 %v12536_v9, %s13178_s12 }
0x21c3   :  { %v5103_v3 = vpop.permute.xlu1 %5102 }
0x21c4   :  { %v5105_v10 = vmul.f32 %v5103_v3, %v5100_v62 }
0x21c6   :  { %v14459_v30 = vadd.f32 %v5106_v50, %v5105_v10 }
0x21c8   :  { %5357 = vrot.lane.b32.xlu1 %v14459_v30, %s13178_s12 }
0x2222   :  { %v5351_v14 = vpop.permute.xlu0 %5350 }
0x2223   :  { %v5353_v8 = vmul.f32 %v5351_v14, %v5348_v18 }
0x2225   :  { %v14464_v4 = vadd.f32 %v5354_v40, %v5353_v8 }
0x2227   :  { %5363 = vrot.lane.b32.xlu0 %v14464_v4, %s13178_s12 }
0x223a   :  { %v5358_v15 = vpop.permute.xlu1 %5357 }
0x223b   :  { %5361 = vst.msk [vmem:[#allocation4 + $0x6] sm:$0x3] %vm770_vm2, %v5358_v15  ;;  %10935 = vmatmul.mubr.msk.f32.vlgmr.msra.gmra.mrb[50].mxu1 %vm482_vm3, %v5358_v15 }
0x223c   :  { %11996 = vmatpush3.bf16.msra.mxu1 %v14169_v39  ;;  %10945 = vmatprep.mubr.msk.f32.mxu1 %vm13175_vm0, %v13176_v1 }
0x223d   :  { %11997 = vmatprep.subr.bf16.mxu1 %v13174_v0 }
0x2240   :  { %11999 = vmatpush3.bf16.msra.mxu1 %v14175_v43 }
0x2241   :  { %12000 = vmatprep.subr.bf16.mxu1 %v13174_v0 }
0x2243   :  { %10946 = vmatmul.mubr.msk.f32.vlgmr.msra.gmra.mrb[52].mxu1 %vm482_vm3, %v5616_v6 }
0x2244   :  { %12002 = vmatpush3.bf16.msra.mxu1 %v14198_v2  ;;  %10956 = vmatprep.mubr.msk.f32.mxu1 %vm13175_vm0, %v13176_v1 }
0x2245   :  { %12003 = vmatprep.subr.bf16.mxu1 %v13174_v0 }
0x2248   :  { %12005 = vmatpush3.bf16.msra.mxu1 %v14206_v7 }
0x2249   :  { %12024 = vmatprep.subr.bf16.mxu1 %v13174_v0 }
0x224b   :  { %10957 = vmatmul.mubr.msk.f32.vlgmr.msra.gmra.mrb[52].mxu1 %vm482_vm3, %v5691_v11 }
0x224c   :  { %12026 = vmatpush3.bf16.msra.mxu1 %v14150_v22  ;;  %11000 = vmatprep.mubr.msk.f32.mxu1 %vm13175_vm0, %v13176_v1 }
0x224d   :  { %12027 = vmatprep.subr.bf16.mxu1 %v13174_v0 }
0x2250   :  { %12029 = vmatpush3.bf16.msra.mxu1 %v14153_v23 }
0x2251   :  { %12030 = vmatprep.subr.bf16.mxu1 %v13174_v0 }
0x2299   :  { %v5364_v16 = vpop.permute.xlu0 %5363 }
0x229a   :  { %5367 = vst.msk [vmem:[#allocation5 + $0x8] sm:$0x3] %vm770_vm2, %v5364_v16  ;;  %10968 = vmatmul.mubr.msk.f32.vlgmr.msra.gmra.mrb[48].mxu0 %vm482_vm3, %v5364_v16 }
0x229b   :  { %12014 = vmatpush3.bf16.msra.mxu0 %v14110_v48  ;;  %10978 = vmatprep.mubr.msk.f32.mxu0 %vm13175_vm0, %v13176_v1 }
0x229c   :  { %12015 = vmatprep.subr.bf16.mxu0 %v13174_v0 }
0x229f   :  { %12017 = vmatpush3.bf16.msra.mxu0 %v14115_v57 }
0x22a0   :  { %12018 = vmatprep.subr.bf16.mxu0 %v13174_v0 }
0x22a2   :  { %10979 = vmatmul.mubr.msk.f32.vlgmr.msra.gmra.mrb[50].mxu0 %vm482_vm3, %v5876_v52 }
0x22a3   :  { %12020 = vmatpush3.bf16.msra.mxu0 %v14163_v59  ;;  %10989 = vmatprep.mubr.msk.f32.mxu0 %vm13175_vm0, %v13176_v1 }
0x22a4   :  { %12021 = vmatprep.subr.bf16.mxu0 %v13174_v0 }
0x22a7   :  { %12023 = vmatpush3.bf16.msra.mxu0 %v14167_v33 }
0x22a8   :  { %12042 = vmatprep.subr.bf16.mxu0 %v13174_v0 }
0x22aa   :  { %10990 = vmatmul.mubr.msk.f32.vlgmr.msra.gmra.mrb[50].mxu0 %vm482_vm3, %v5951_v20  ;;  %v6384_v20 = vld [vmem:[#allocation2 + $0xc] sm:$0x3] }
0x22ab   :  { %12044 = vmatpush3.bf16.msra.mxu0 %v14192_v38  ;;  %11033 = vmatprep.mubr.msk.f32.mxu0 %vm13175_vm0, %v13176_v1 }
0x22ac   :  { %12045 = vmatprep.subr.bf16.mxu0 %v13174_v0 }
0x22af   :  { %12047 = vmatpush3.bf16.msra.mxu0 %v14196_v13 }
0x22b0   :  { %12048 = vmatprep.subr.bf16.mxu0 %v13174_v0 }
0x230e   :  { %v5586_v21 = vpop.f32.mrb[50].mxu1 }
0x230f   :  { %v5587_v56 = vadd.f32 %v14183_v25, %v5586_v21  ;;  %v10936_v26 = vpop.f32.mrb[51].mxu1  ;;  %v6459_v21 = vld [vmem:[#allocation3 + $0xc] sm:$0x3] }
0x2310   :  { %v14579_v26 = vld [vmem:[#allocation26] ss:$0 sm:$0xff] }
0x2311   :  { %5598 = vrot.lane.b32.xlu1 %v5587_v56, %s13177_s6  ;;  %v5590_v32 = vadd.f32 %v12320_v29, %v5587_v56 }
0x2313   :  { %v9391_v42 = vmul.f32 -1.442695, %v5590_v32 }
0x2315   :  { %12537 = vpow2.f32 %v9391_v42 }
0x231e   :  { %v5761_v58 = vpop.f32.mrb[52].mxu1 }
0x231f   :  { %v10958_v27 = vpop.f32.mrb[53].mxu1  ;;  %v12538_v51 = vpop.eup %12537  ;;  %v12321_v54 = vadd.f32 %v14253_v41, %v5761_v58 }
0x2320   :  { %v5594_v34 = vadd.f32 1.0, %v12538_v51 }
0x2322   :  { %12539 = vrcp.f32 %v5594_v34 }
0x232c   :  { %v12540_v36 = vpop.eup %12539 }
0x232d   :  { %v5608_v3 = vsub.f32 1.0, %v12540_v36  ;;  %v5614_v10 = vmul.f32 %v12540_v36, %v14459_v30  ;;  %v6124_v30 = vld [vmem:[#allocation2 + $0x4] sm:$0x3] }
0x236d   :  { %v5834_v44 = vpop.f32.mrb[48].mxu0 }
0x236e   :  { %v5835_v49 = vadd.f32 %v14246_v17, %v5834_v44  ;;  %v10969_v28 = vpop.f32.mrb[49].mxu0 }
0x2370   :  { %5846 = vrot.lane.b32.xlu0 %v5835_v49, %s13177_s6  ;;  %v5838_v61 = vadd.f32 %v12321_v54, %v5835_v49 }
0x2372   :  { %v9395_v53 = vmul.f32 -1.442695, %v5838_v61 }
0x2374   :  { %12541 = vpow2.f32 %v9395_v53 }
0x237d   :  { %v14518_v25 = vpop.f32.mrb[50].mxu0 }
0x237e   :  { %v10991_v55 = vpop.f32.mrb[51].mxu0  ;;  %v12542_v19 = vpop.eup %12541  ;;  %v12322_v42 = vadd.f32 %v14242_v63, %v14518_v25 }
0x237f   :  { %v5842_v5 = vadd.f32 1.0, %v12542_v19 }
0x2381   :  { %12543 = vrcp.f32 %v5842_v5 }
0x2383   :  { %v5599_v47 = vpop.permute.xlu1 %5598 }
0x2384   :  { %v5601_v60 = vmul.f32 %v12540_v36, %v5599_v47 }
0x2386   :  { %5603 = vrot.lane.b32.xlu1 %v5601_v60, %s13177_s6 }
0x238b   :  { %v12544_v37 = vpop.eup %12543 }
0x238c   :  { %v5856_v40 = vsub.f32 1.0, %v12544_v37  ;;  %v5862_v15 = vmul.f32 %v12544_v37, %v14464_v4  ;;  %v6199_v4 = vld [vmem:[#allocation3 + $0x4] sm:$0x3] }
0x23e2   :  { %v5847_v31 = vpop.permute.xlu0 %5846 }
0x23e3   :  { %v5849_v12 = vmul.f32 %v12544_v37, %v5847_v31 }
0x23e5   :  { %5851 = vrot.lane.b32.xlu0 %v5849_v12, %s13177_s6 }
0x23f8   :  { %v5604_v45 = vpop.permute.xlu1 %5603 }
0x23f9   :  { %v5606_v35 = vadd.f32 %v12320_v29, %v5604_v45 }
0x23fb   :  { %12545 = vtanh.f32 %v5606_v35 }
0x2405   :  { %v12546_v24 = vpop.eup %12545 }
0x2406   :  { %5610 = vrot.lane.b32.xlu1 %v12546_v24, %s13178_s12 }
0x2457   :  { %v5852_v46 = vpop.permute.xlu0 %5851 }
0x2458   :  { %v5854_v9 = vadd.f32 %v12321_v54, %v5852_v46 }
0x245a   :  { %12547 = vtanh.f32 %v5854_v9 }
0x2464   :  { %v12548_v62 = vpop.eup %12547 }
0x2465   :  { %5858 = vrot.lane.b32.xlu0 %v12548_v62, %s13178_s12 }
0x2478   :  { %v5611_v50 = vpop.permute.xlu1 %5610 }
0x2479   :  { %v5613_v18 = vmul.f32 %v5611_v50, %v5608_v3 }
0x247b   :  { %v14526_v14 = vadd.f32 %v5614_v10, %v5613_v18 }
0x247d   :  { %5865 = vrot.lane.b32.xlu1 %v14526_v14, %s13178_s12 }
0x24d7   :  { %v5859_v8 = vpop.permute.xlu0 %5858 }
0x24d8   :  { %v5861_v6 = vmul.f32 %v5859_v8, %v5856_v40 }
0x24da   :  { %v14531_v11 = vadd.f32 %v5862_v15, %v5861_v6 }
0x24dc   :  { %5871 = vrot.lane.b32.xlu0 %v14531_v11, %s13178_s12 }
0x24ef   :  { %v5866_v16 = vpop.permute.xlu1 %5865 }
0x24f0   :  { %5869 = vst.msk [vmem:[#allocation4 + $0x8] sm:$0x3] %vm770_vm2, %v5866_v16  ;;  %11001 = vmatmul.mubr.msk.f32.vlgmr.msra.gmra.mrb[54].mxu1 %vm482_vm3, %v5866_v16 }
0x24f1   :  { %12032 = vmatpush3.bf16.msra.mxu1 %v14169_v39  ;;  %11011 = vmatprep.mubr.msk.f32.mxu1 %vm13175_vm0, %v13176_v1 }
0x24f2   :  { %12033 = vmatprep.subr.bf16.mxu1 %v13174_v0 }
0x24f5   :  { %12035 = vmatpush3.bf16.msra.mxu1 %v14175_v43 }
0x24f6   :  { %12036 = vmatprep.subr.bf16.mxu1 %v13174_v0 }
0x24f8   :  { %11012 = vmatmul.mubr.msk.f32.vlgmr.msra.gmra.mrb[56].mxu1 %vm482_vm3, %v6124_v30 }
0x24f9   :  { %12038 = vmatpush3.bf16.msra.mxu1 %v14198_v2  ;;  %11022 = vmatprep.mubr.msk.f32.mxu1 %vm13175_vm0, %v13176_v1 }
0x24fa   :  { %12039 = vmatprep.subr.bf16.mxu1 %v13174_v0 }
0x24fd   :  { %12041 = vmatpush3.bf16.msra.mxu1 %v14206_v7 }
0x24fe   :  { %12060 = vmatprep.subr.bf16.mxu1 %v13174_v0 }
0x2500   :  { %11023 = vmatmul.mubr.msk.f32.vlgmr.msra.gmra.mrb[56].mxu1 %vm482_vm3, %v6199_v4 }
0x2501   :  { %12062 = vmatpush3.bf16.msra.mxu1 %v14150_v22  ;;  %11066 = vmatprep.mubr.msk.f32.mxu1 %vm13175_vm0, %v13176_v1 }
0x2502   :  { %12063 = vmatprep.subr.bf16.mxu1 %v13174_v0 }
0x2505   :  { %12065 = vmatpush3.bf16.msra.mxu1 %v14153_v23 }
0x2506   :  { %12066 = vmatprep.subr.bf16.mxu1 %v13174_v0 }
0x254e   :  { %v5872_v52 = vpop.permute.xlu0 %5871 }
0x254f   :  { %5875 = vst.msk [vmem:[#allocation5 + $0x6] sm:$0x3] %vm770_vm2, %v5872_v52  ;;  %11034 = vmatmul.mubr.msk.f32.vlgmr.msra.gmra.mrb[52].mxu0 %vm482_vm3, %v5872_v52 }
0x2550   :  { %12050 = vmatpush3.bf16.msra.mxu0 %v14110_v48  ;;  %11044 = vmatprep.mubr.msk.f32.mxu0 %vm13175_vm0, %v13176_v1 }
0x2551   :  { %12051 = vmatprep.subr.bf16.mxu0 %v13174_v0 }
0x2554   :  { %12053 = vmatpush3.bf16.msra.mxu0 %v14115_v57 }
0x2555   :  { %12054 = vmatprep.subr.bf16.mxu0 %v13174_v0 }
0x2557   :  { %11045 = vmatmul.mubr.msk.f32.vlgmr.msra.gmra.mrb[54].mxu0 %vm482_vm3, %v6384_v20  ;;  %v14650_v20 = vld [vmem:[#allocation23] ss:$0 sm:$0xff] }
0x2558   :  { %12056 = vmatpush3.bf16.msra.mxu0 %v14163_v59  ;;  %11055 = vmatprep.mubr.msk.f32.mxu0 %vm13175_vm0, %v13176_v1 }
0x2559   :  { %12057 = vmatprep.subr.bf16.mxu0 %v13174_v0 }
0x255c   :  { %12059 = vmatpush3.bf16.msra.mxu0 %v14167_v33 }
0x255d   :  { %12078 = vmatprep.subr.bf16.mxu0 %v13174_v0 }
0x255f   :  { %11056 = vmatmul.mubr.msk.f32.vlgmr.msra.gmra.mrb[54].mxu0 %vm482_vm3, %v6459_v21 }
0x2560   :  { %12080 = vmatpush3.bf16.msra.mxu0 %v14192_v38  ;;  %11099 = vmatprep.mubr.msk.f32.mxu0 %vm13175_vm0, %v13176_v1 }
0x2561   :  { %12081 = vmatprep.subr.bf16.mxu0 %v13174_v0 }
0x2564   :  { %12083 = vmatpush3.bf16.msra.mxu0 %v14196_v13 }
0x2565   :  { %12084 = vmatprep.subr.bf16.mxu0 %v13174_v0 }
0x25c3   :  { %v6094_v56 = vpop.f32.mrb[54].mxu1 }
0x25c4   :  { %v6095_v58 = vadd.f32 %v14579_v26, %v6094_v56  ;;  %v11002_v27 = vpop.f32.mrb[55].mxu1 }
0x25c6   :  { %6106 = vrot.lane.b32.xlu1 %v6095_v58, %s13177_s6  ;;  %v6098_v44 = vadd.f32 %v12322_v42, %v6095_v58 }
0x25c8   :  { %v9399_v49 = vmul.f32 -1.442695, %v6098_v44 }
0x25ca   :  { %12549 = vpow2.f32 %v9399_v49 }
0x25d3   :  { %v6269_v29 = vpop.f32.mrb[56].mxu1 }
0x25d4   :  { %v11024_v32 = vpop.f32.mrb[57].mxu1  ;;  %v12550_v55 = vpop.eup %12549  ;;  %v12323_v63 = vadd.f32 %v14253_v41, %v6269_v29 }
0x25d5   :  { %v6102_v36 = vadd.f32 1.0, %v12550_v55  ;;  %v14661_v55 = vld [vmem:[#allocation29] ss:$0 sm:$0xff] }
0x25d7   :  { %12551 = vrcp.f32 %v6102_v36 }
0x25e1   :  { %v12552_v54 = vpop.eup %12551 }
0x25e2   :  { %v6116_v62 = vsub.f32 1.0, %v12552_v54  ;;  %v6122_v50 = vmul.f32 %v12552_v54, %v14526_v14  ;;  %v6632_v14 = vld [vmem:[#allocation2 + $0x2] sm:$0x3] }
0x2622   :  { %v6342_v28 = vpop.f32.mrb[52].mxu0 }
0x2623   :  { %v6343_v51 = vadd.f32 %v14246_v17, %v6342_v28  ;;  %v11035_v34 = vpop.f32.mrb[53].mxu0 }
0x2625   :  { %6354 = vrot.lane.b32.xlu0 %v6343_v51, %s13177_s6  ;;  %v6346_v25 = vadd.f32 %v12323_v63, %v6343_v51 }
0x2627   :  { %v9403_v19 = vmul.f32 -1.442695, %v6346_v25 }
0x2629   :  { %12553 = vpow2.f32 %v9403_v19 }
0x2632   :  { %v14587_v47 = vpop.f32.mrb[54].mxu0 }
0x2633   :  { %v11057_v60 = vpop.f32.mrb[55].mxu0  ;;  %v12554_v17 = vpop.eup %12553 }
0x2634   :  { %v6350_v5 = vadd.f32 1.0, %v12554_v17 }
0x2636   :  { %12555 = vrcp.f32 %v6350_v5 }
0x2638   :  { %v6107_v61 = vpop.permute.xlu1 %6106 }
0x2639   :  { %v6109_v53 = vmul.f32 %v12552_v54, %v6107_v61 }
0x263b   :  { %6111 = vrot.lane.b32.xlu1 %v6109_v53, %s13177_s6 }
0x2640   :  { %v12556_v37 = vpop.eup %12555 }
0x2641   :  { %v6364_v40 = vsub.f32 1.0, %v12556_v37  ;;  %v6370_v15 = vmul.f32 %v12556_v37, %v14531_v11  ;;  %v6707_v11 = vld [vmem:[#allocation3 + $0x2] sm:$0x3] }
0x2697   :  { %v6355_v31 = vpop.permute.xlu0 %6354 }
0x2698   :  { %v6357_v12 = vmul.f32 %v12556_v37, %v6355_v31 }
0x269a   :  { %6359 = vrot.lane.b32.xlu0 %v6357_v12, %s13177_s6 }
0x26ad   :  { %v6112_v45 = vpop.permute.xlu1 %6111 }
0x26ae   :  { %v6114_v35 = vadd.f32 %v12322_v42, %v6112_v45 }
0x26b0   :  { %12557 = vtanh.f32 %v6114_v35 }
0x26ba   :  { %v12558_v24 = vpop.eup %12557 }
0x26bb   :  { %6118 = vrot.lane.b32.xlu1 %v12558_v24, %s13178_s12 }
0x270c   :  { %v6360_v46 = vpop.permute.xlu0 %6359 }
0x270d   :  { %v6362_v9 = vadd.f32 %v12323_v63, %v6360_v46 }
0x270f   :  { %12559 = vtanh.f32 %v6362_v9 }
0x2719   :  { %v12560_v41 = vpop.eup %12559 }
0x271a   :  { %6366 = vrot.lane.b32.xlu0 %v12560_v41, %s13178_s12 }
0x272d   :  { %v6119_v3 = vpop.permute.xlu1 %6118 }
0x272e   :  { %v6121_v10 = vmul.f32 %v6119_v3, %v6116_v62 }
0x2730   :  { %v14595_v18 = vadd.f32 %v6122_v50, %v6121_v10 }
0x2732   :  { %6373 = vrot.lane.b32.xlu1 %v14595_v18, %s13178_s12 }
0x278c   :  { %v6367_v8 = vpop.permute.xlu0 %6366 }
0x278d   :  { %v6369_v6 = vmul.f32 %v6367_v8, %v6364_v40  ;;  %v7400_v8 = vld [vmem:[#allocation33 + $0x8] sm:$0xff] }
0x278f   :  { %v14600_v16 = vadd.f32 %v6370_v15, %v6369_v6  ;;  %v7402_v6 = vld [vmem:[#allocation33 + $0x18] sm:$0xff] }
0x2791   :  { %6379 = vrot.lane.b32.xlu0 %v14600_v16, %s13178_s12 }
0x27a4   :  { %v6374_v30 = vpop.permute.xlu1 %6373 }
0x27a5   :  { %6377 = vst.msk [vmem:[#allocation4 + $0xa] sm:$0x3] %vm770_vm2, %v6374_v30  ;;  %11067 = vmatmul.mubr.msk.f32.vlgmr.msra.gmra.mrb[58].mxu1 %vm482_vm3, %v6374_v30  ;;  %v7403_v30 = vld [vmem:[#allocation33 + $0x20] sm:$0xff] }
0x27a6   :  { %12068 = vmatpush3.bf16.msra.mxu1 %v14169_v39  ;;  %11077 = vmatprep.mubr.msk.f32.mxu1 %vm13175_vm0, %v13176_v1 }
0x27a7   :  { %12069 = vmatprep.subr.bf16.mxu1 %v13174_v0 }
0x27aa   :  { %12071 = vmatpush3.bf16.msra.mxu1 %v14175_v43 }
0x27ab   :  { %12072 = vmatprep.subr.bf16.mxu1 %v13174_v0 }
0x27ad   :  { %11078 = vmatmul.mubr.msk.f32.vlgmr.msra.gmra.mrb[60].mxu1 %vm482_vm3, %v6632_v14 }
0x27ae   :  { %12074 = vmatpush3.bf16.msra.mxu1 %v14198_v2  ;;  %11088 = vmatprep.mubr.msk.f32.mxu1 %vm13175_vm0, %v13176_v1 }
0x27af   :  { %12075 = vmatprep.subr.bf16.mxu1 %v13174_v0 }
0x27b2   :  { %12077 = vmatpush3.bf16.msra.mxu1 %v14206_v7 }
0x27b3   :  { %12096 = vmatprep.subr.bf16.mxu1 %v13174_v0 }
0x27b5   :  { %11089 = vmatmul.mubr.msk.f32.vlgmr.msra.gmra.mrb[60].mxu1 %vm482_vm3, %v6707_v11  ;;  %v7405_v11 = vld [vmem:[#allocation33 + $0x30] sm:$0xff] }
0x27b6   :  { %12098 = vmatpush3.bf16.msra.mxu1 %v14150_v22  ;;  %11132 = vmatprep.mubr.msk.f32.mxu1 %vm13175_vm0, %v13176_v1  ;;  %v6892_v22 = vld [vmem:[#allocation2 + $0xe] sm:$0x3] }
0x27b7   :  { %12099 = vmatprep.subr.bf16.mxu1 %v13174_v0 }
0x27ba   :  { %12101 = vmatpush3.bf16.msra.mxu1 %v14153_v23 }
0x27bb   :  { %12102 = vmatprep.subr.bf16.mxu1 %v13174_v0 }
0x2803   :  { %v6380_v4 = vpop.permute.xlu0 %6379 }
0x2804   :  { %6383 = vst.msk [vmem:[#allocation5 + $0x4] sm:$0x3] %vm770_vm2, %v6380_v4  ;;  %11100 = vmatmul.mubr.msk.f32.vlgmr.msra.gmra.mrb[56].mxu0 %vm482_vm3, %v6380_v4  ;;  %v7406_v4 = vld [vmem:[#allocation33 + $0x38] sm:$0xff] }
0x2805   :  { %12086 = vmatpush3.bf16.msra.mxu0 %v14110_v48  ;;  %11110 = vmatprep.mubr.msk.f32.mxu0 %vm13175_vm0, %v13176_v1  ;;  %v6967_v48 = vld [vmem:[#allocation3 + $0xe] sm:$0x3] }
0x2806   :  { %12087 = vmatprep.subr.bf16.mxu0 %v13174_v0 }
0x2809   :  { %12089 = vmatpush3.bf16.msra.mxu0 %v14115_v57 }
0x280a   :  { %12090 = vmatprep.subr.bf16.mxu0 %v13174_v0 }
0x280c   :  { %11111 = vmatmul.mubr.msk.f32.vlgmr.msra.gmra.mrb[58].mxu0 %vm482_vm3, %v6892_v22  ;;  %v7419_v22 = vld [vmem:[#allocation4] sm:$0x3] }
0x280d   :  { %12092 = vmatpush3.bf16.msra.mxu0 %v14163_v59  ;;  %11121 = vmatprep.mubr.msk.f32.mxu0 %vm13175_vm0, %v13176_v1 }
0x280e   :  { %12093 = vmatprep.subr.bf16.mxu0 %v13174_v0 }
0x2811   :  { %12095 = vmatpush3.bf16.msra.mxu0 %v14167_v33 }
0x2812   :  { %12114 = vmatprep.subr.bf16.mxu0 %v13174_v0 }
0x2814   :  { %11122 = vmatmul.mubr.msk.f32.vlgmr.msra.gmra.mrb[58].mxu0 %vm482_vm3, %v6967_v48  ;;  %v14707_v48 = vpack.c.bf16 %v7406_v4, %v7405_v11 }
0x2815   :  { %12116 = vmatpush3.bf16.msra.mxu0 %v14192_v38  ;;  %11165 = vmatprep.mubr.msk.f32.mxu0 %vm13175_vm0, %v13176_v1  ;;  %v12324_v38 = vadd.f32 %v14650_v20, %v14587_v47 }
0x2816   :  { %12117 = vmatprep.subr.bf16.mxu0 %v13174_v0 }
0x2819   :  { %12119 = vmatpush3.bf16.msra.mxu0 %v14196_v13  ;;  %v14654_v13 = vld [vmem:[#allocation32] ss:$0 sm:$0xff] }
0x281a   :  { %12120 = vmatprep.subr.bf16.mxu0 %v13174_v0 }
0x2878   :  { %v6602_v57 = vpop.f32.mrb[58].mxu1 }
0x2879   :  { %v6603_v23 = vadd.f32 %v14579_v26, %v6602_v57  ;;  %v11068_v59 = vpop.f32.mrb[59].mxu1 }
0x287a   :  { %v7673_v59 = vld [vmem:[#allocation4 + $0x2] sm:$0x3] }
0x287b   :  { %6614 = vrot.lane.b32.xlu1 %v6603_v23, %s13177_s6  ;;  %v6606_v21 = vadd.f32 %v12324_v38, %v6603_v23 }
0x287d   :  { %v9407_v56 = vmul.f32 -1.442695, %v6606_v21  ;;  %v8131_v21 = vld [vmem:[#allocation4 + $0x6] sm:$0x3] }
0x287f   :  { %12561 = vpow2.f32 %v9407_v56  ;;  %v8361_v56 = vld [vmem:[#allocation5 + $0x8] sm:$0x3] }
0x2888   :  { %v6777_v33 = vpop.f32.mrb[60].mxu1 }
0x2889   :  { %v11090_v52 = vpop.f32.mrb[61].mxu1  ;;  %v12562_v32 = vpop.eup %12561  ;;  %v12325_v36 = vadd.f32 %v14661_v55, %v6777_v33  ;;  %v7903_v33 = vld [vmem:[#allocation5 + $0x4] sm:$0x3] }
0x288a   :  { %v6610_v42 = vadd.f32 1.0, %v12562_v32  ;;  %v7902_v52 = vld [vmem:[#allocation4 + $0x4] sm:$0x3]  ;;  %v8819_v32 = vld [vmem:[#allocation5 + $0xc] sm:$0x3] }
0x288c   :  { %12563 = vrcp.f32 %v6610_v42 }
0x2896   :  { %v12564_v28 = vpop.eup %12563 }
0x2897   :  { %v6624_v45 = vsub.f32 1.0, %v12564_v28  ;;  %v6630_v24 = vmul.f32 %v12564_v28, %v14595_v18  ;;  %v7140_v18 = vld [vmem:[#allocation2] sm:$0x3] }
0x28d7   :  { %v6850_v58 = vpop.f32.mrb[56].mxu0 }
0x28d8   :  { %v6851_v27 = vadd.f32 %v14654_v13, %v6850_v58  ;;  %v11101_v29 = vpop.f32.mrb[57].mxu0  ;;  %v8360_v58 = vld [vmem:[#allocation4 + $0x8] sm:$0x3] }
0x28d9   :  { %v8589_v29 = vld [vmem:[#allocation4 + $0xa] sm:$0x3] }
0x28da   :  { %6862 = vrot.lane.b32.xlu0 %v6851_v27, %s13177_s6  ;;  %v6854_v47 = vadd.f32 %v12325_v36, %v6851_v27  ;;  %v8590_v27 = vld [vmem:[#allocation5 + $0xa] sm:$0x3] }
0x28dc   :  { %v9411_v60 = vmul.f32 -1.442695, %v6854_v47 }
0x28de   :  { %12565 = vpow2.f32 %v9411_v60 }
0x28e7   :  { %v14658_v44 = vpop.f32.mrb[58].mxu0 }
0x28e8   :  { %v11123_v49 = vpop.f32.mrb[59].mxu0  ;;  %v12566_v54 = vpop.eup %12565 }
0x28e9   :  { %v6858_v61 = vadd.f32 1.0, %v12566_v54  ;;  %v9048_v49 = vld [vmem:[#allocation5 + $0xe] sm:$0x3] }
0x28eb   :  { %12567 = vrcp.f32 %v6858_v61 }
0x28ed   :  { %v6615_v51 = vpop.permute.xlu1 %6614 }
0x28ee   :  { %v6617_v34 = vmul.f32 %v12564_v28, %v6615_v51 }
0x28f0   :  { %6619 = vrot.lane.b32.xlu1 %v6617_v34, %s13177_s6 }
0x28f5   :  { %v12568_v53 = vpop.eup %12567 }
0x28f6   :  { %v6872_v41 = vsub.f32 1.0, %v12568_v53  ;;  %v6878_v3 = vmul.f32 %v12568_v53, %v14600_v16  ;;  %v7215_v16 = vld [vmem:[#allocation3] sm:$0x3] }
0x294c   :  { %v6863_v63 = vpop.permute.xlu0 %6862 }
0x294d   :  { %v6865_v25 = vmul.f32 %v12568_v53, %v6863_v63 }
0x294f   :  { %6867 = vrot.lane.b32.xlu0 %v6865_v25, %s13177_s6 }
0x2962   :  { %v6620_v19 = vpop.permute.xlu1 %6619 }
0x2963   :  { %v6622_v17 = vadd.f32 %v12324_v38, %v6620_v19  ;;  %v8132_v38 = vld [vmem:[#allocation5 + $0x6] sm:$0x3] }
0x2965   :  { %12569 = vtanh.f32 %v6622_v17 }
0x296f   :  { %v12570_v5 = vpop.eup %12569 }
0x2970   :  { %6626 = vrot.lane.b32.xlu1 %v12570_v5, %s13178_s12 }
0x29c1   :  { %v6868_v37 = vpop.permute.xlu0 %6867 }
0x29c2   :  { %v6870_v31 = vadd.f32 %v12325_v36, %v6868_v37 }
0x29c4   :  { %12571 = vtanh.f32 %v6870_v31 }
0x29ce   :  { %v12572_v12 = vpop.eup %12571 }
0x29cf   :  { %6874 = vrot.lane.b32.xlu0 %v12572_v12, %s13178_s12 }
0x29e2   :  { %v6627_v35 = vpop.permute.xlu1 %6626 }
0x29e3   :  { %v6629_v46 = vmul.f32 %v6627_v35, %v6624_v45 }
0x29e5   :  { %v14668_v9 = vadd.f32 %v6630_v24, %v6629_v46 }
0x29e7   :  { %6881 = vrot.lane.b32.xlu1 %v14668_v9, %s13178_s12 }
0x2a41   :  { %v6875_v62 = vpop.permute.xlu0 %6874 }
0x2a42   :  { %v6877_v50 = vmul.f32 %v6875_v62, %v6872_v41 }
0x2a44   :  { %v14673_v10 = vadd.f32 %v6878_v3, %v6877_v50 }
0x2a46   :  { %6887 = vrot.lane.b32.xlu0 %v14673_v10, %s13178_s12 }
0x2a59   :  { %v6882_v40 = vpop.permute.xlu1 %6881 }
0x2a5a   :  { %6885 = vst.msk [vmem:[#allocation4 + $0xc] sm:$0x3] %vm770_vm2, %v6882_v40  ;;  %11133 = vmatmul.mubr.msk.f32.vlgmr.msra.gmra.mrb[62].mxu1 %vm482_vm3, %v6882_v40 }
0x2a5b   :  { %12104 = vmatpush3.bf16.msra.mxu1 %v14169_v39  ;;  %11143 = vmatprep.mubr.msk.f32.mxu1 %vm13175_vm0, %v13176_v1  ;;  %v7399_v39 = vld [vmem:[#allocation33] sm:$0xff] }
0x2a5c   :  { %12105 = vmatprep.subr.bf16.mxu1 %v13174_v0  ;;  %v14691_v15 = vpack.c.bf16 %v7400_v8, %v7399_v39 }
0x2a5f   :  { %12107 = vmatpush3.bf16.msra.mxu1 %v14175_v43  ;;  %v7401_v43 = vld [vmem:[#allocation33 + $0x10] sm:$0xff] }
0x2a60   :  { %12108 = vmatprep.subr.bf16.mxu1 %v13174_v0 }
0x2a61   :  { %v8818_v42 = vld [vmem:[#allocation4 + $0xc] sm:$0x3] }
0x2a62   :  { %11144 = vmatmul.mubr.msk.f32.vlgmr.msra.gmra.mrb[64].mxu1 %vm482_vm3, %v7140_v18 }
0x2a63   :  { %12110 = vmatpush3.bf16.msra.mxu1 %v14198_v2  ;;  %11154 = vmatprep.mubr.msk.f32.mxu1 %vm13175_vm0, %v13176_v1  ;;  %v14696_v2 = vpack.c.bf16 %v7402_v6, %v7401_v43 }
0x2a64   :  { %12111 = vmatprep.subr.bf16.mxu1 %v13174_v0 }
0x2a67   :  { %12113 = vmatpush3.bf16.msra.mxu1 %v14206_v7  ;;  %v7404_v7 = vld [vmem:[#allocation33 + $0x28] sm:$0xff] }
0x2a68   :  { %12126 = vmatprep.subr.bf16.mxu1 %v13174_v0  ;;  %v14702_v14 = vpack.c.bf16 %v7404_v7, %v7403_v30  ;;  %v12326_v7 = vadd.f32 %v14650_v20, %v14658_v44 }
0x2a6a   :  { %11155 = vmatmul.mubr.msk.f32.vlgmr.msra.gmra.mrb[64].mxu1 %vm482_vm3, %v7215_v16 }
0x2a6b   :  { %12128 = vmatpush3.bf16.msra.mxu1 %v14691_v15  ;;  %11187 = vmatprep.mubr.msk.f32.mxu1 %vm13175_vm0, %v13176_v1 }
0x2a6c   :  { %12129 = vmatprep.subr.bf16.mxu1 %v13174_v0 }
0x2a6f   :  { %12131 = vmatpush3.bf16.msra.mxu1 %v14696_v2 }
0x2a70   :  { %12144 = vmatprep.subr.bf16.mxu1 %v13174_v0 }
0x2a72   :  { %11188 = vmatmul.mubr.msk.f32.vlgmr.msra.gmra.mrb[66].mxu1 %vm482_vm3, %v7419_v22 }
0x2a73   :  { %12146 = vmatpush3.bf16.msra.mxu1 %v14702_v14  ;;  %11217 = vmatprep.mubr.msk.f32.mxu1 %vm13175_vm0, %v13176_v1 }
0x2a74   :  { %12147 = vmatprep.subr.bf16.mxu1 %v13174_v0 }
0x2a77   :  { %12149 = vmatpush3.bf16.msra.mxu1 %v14707_v48 }
0x2a78   :  { %12150 = vmatprep.subr.bf16.mxu1 %v13174_v0 }
0x2ab8   :  { %v6888_v57 = vpop.permute.xlu0 %6887 }
0x2ab9   :  { %6891 = vst.msk [vmem:[#allocation5 + $0x2] sm:$0x3] %vm770_vm2, %v6888_v57  ;;  %11166 = vmatmul.mubr.msk.f32.vlgmr.msra.gmra.mrb[60].mxu0 %vm482_vm3, %v6888_v57 }
0x2aba   :  { %12122 = vmatpush3.bf16.msra.mxu0 %v14702_v14  ;;  %11176 = vmatprep.mubr.msk.f32.mxu0 %vm13175_vm0, %v13176_v1 }
0x2abb   :  { %12123 = vmatprep.subr.bf16.mxu0 %v13174_v0 }
0x2abe   :  { %12125 = vmatpush3.bf16.msra.mxu0 %v14707_v48 }
0x2abf   :  { %12132 = vmatprep.subr.bf16.mxu0 %v13174_v0 }
0x2ac0   :  { %v7674_v23 = vld [vmem:[#allocation5 + $0x2] sm:$0x3] }
0x2ac1   :  { %11218 = vmatmul.mubr.msk.f32.vlgmr.msra.gmra.mrb[68].mxu1 %vm482_vm3, %v7674_v23 }
0x2ac2   :  { %12152 = vmatpush3.bf16.msra.mxu1 %v14691_v15  ;;  %11228 = vmatprep.mubr.msk.f32.mxu1 %vm13175_vm0, %v13176_v1 }
0x2ac3   :  { %12153 = vmatprep.subr.bf16.mxu1 %v13174_v0 }
0x2ac6   :  { %12155 = vmatpush3.bf16.msra.mxu1 %v14696_v2 }
0x2ac7   :  { %12168 = vmatprep.subr.bf16.mxu1 %v13174_v0 }
0x2ac9   :  { %11229 = vmatmul.mubr.msk.f32.vlgmr.msra.gmra.mrb[70].mxu1 %vm482_vm3, %v7673_v59 }
0x2aca   :  { %12170 = vmatpush3.bf16.msra.mxu1 %v14702_v14  ;;  %11258 = vmatprep.mubr.msk.f32.mxu1 %vm13175_vm0, %v13176_v1 }
0x2acb   :  { %12171 = vmatprep.subr.bf16.mxu1 %v13174_v0 }
0x2ace   :  { %12173 = vmatpush3.bf16.msra.mxu1 %v14707_v48 }
0x2acf   :  { %12174 = vmatprep.subr.bf16.mxu1 %v13174_v0 }
0x2ad1   :  { %11259 = vmatmul.mubr.msk.f32.vlgmr.msra.gmra.mrb[72].mxu1 %vm482_vm3, %v7903_v33 }
0x2ad2   :  { %12176 = vmatpush3.bf16.msra.mxu1 %v14691_v15  ;;  %11269 = vmatprep.mubr.msk.f32.mxu1 %vm13175_vm0, %v13176_v1 }
0x2ad3   :  { %12177 = vmatprep.subr.bf16.mxu1 %v13174_v0 }
0x2ad6   :  { %12179 = vmatpush3.bf16.msra.mxu1 %v14696_v2 }
0x2ad7   :  { %12192 = vmatprep.subr.bf16.mxu1 %v13174_v0 }
0x2ad9   :  { %11270 = vmatmul.mubr.msk.f32.vlgmr.msra.gmra.mrb[74].mxu1 %vm482_vm3, %v7902_v52 }
0x2ada   :  { %12194 = vmatpush3.bf16.msra.mxu1 %v14702_v14  ;;  %11299 = vmatprep.mubr.msk.f32.mxu1 %vm13175_vm0, %v13176_v1 }
0x2adb   :  { %12195 = vmatprep.subr.bf16.mxu1 %v13174_v0 }
0x2ade   :  { %12197 = vmatpush3.bf16.msra.mxu1 %v14707_v48 }
0x2adf   :  { %12198 = vmatprep.subr.bf16.mxu1 %v13174_v0 }
0x2ae1   :  { %11300 = vmatmul.mubr.msk.f32.vlgmr.msra.gmra.mrb[76].mxu1 %vm482_vm3, %v8132_v38 }
0x2ae2   :  { %12200 = vmatpush3.bf16.msra.mxu1 %v14691_v15  ;;  %11310 = vmatprep.mubr.msk.f32.mxu1 %vm13175_vm0, %v13176_v1 }
0x2ae3   :  { %12201 = vmatprep.subr.bf16.mxu1 %v13174_v0 }
0x2ae6   :  { %12203 = vmatpush3.bf16.msra.mxu1 %v14696_v2 }
0x2ae7   :  { %12216 = vmatprep.subr.bf16.mxu1 %v13174_v0 }
0x2ae9   :  { %11311 = vmatmul.mubr.msk.f32.vlgmr.msra.gmra.mrb[78].mxu1 %vm482_vm3, %v8131_v21 }
0x2aea   :  { %12218 = vmatpush3.bf16.msra.mxu1 %v14702_v14  ;;  %11340 = vmatprep.mubr.msk.f32.mxu1 %vm13175_vm0, %v13176_v1 }
0x2aeb   :  { %12219 = vmatprep.subr.bf16.mxu1 %v13174_v0 }
0x2aee   :  { %12221 = vmatpush3.bf16.msra.mxu1 %v14707_v48 }
0x2aef   :  { %12222 = vmatprep.subr.bf16.mxu1 %v13174_v0 }
0x2af1   :  { %11341 = vmatmul.mubr.msk.f32.vlgmr.msra.gmra.mrb[80].mxu1 %vm482_vm3, %v8361_v56 }
0x2af2   :  { %12224 = vmatpush3.bf16.msra.mxu1 %v14691_v15  ;;  %11351 = vmatprep.mubr.msk.f32.mxu1 %vm13175_vm0, %v13176_v1 }
0x2af3   :  { %12225 = vmatprep.subr.bf16.mxu1 %v13174_v0 }
0x2af6   :  { %12227 = vmatpush3.bf16.msra.mxu1 %v14696_v2 }
0x2af7   :  { %12240 = vmatprep.subr.bf16.mxu1 %v13174_v0 }
0x2af9   :  { %11352 = vmatmul.mubr.msk.f32.vlgmr.msra.gmra.mrb[82].mxu1 %vm482_vm3, %v8360_v58 }
0x2afa   :  { %12242 = vmatpush3.bf16.msra.mxu1 %v14702_v14  ;;  %11381 = vmatprep.mubr.msk.f32.mxu1 %vm13175_vm0, %v13176_v1 }
0x2afb   :  { %12243 = vmatprep.subr.bf16.mxu1 %v13174_v0 }
0x2afe   :  { %12245 = vmatpush3.bf16.msra.mxu1 %v14707_v48 }
0x2aff   :  { %12246 = vmatprep.subr.bf16.mxu1 %v13174_v0 }
0x2b01   :  { %11382 = vmatmul.mubr.msk.f32.vlgmr.msra.gmra.mrb[84].mxu1 %vm482_vm3, %v8590_v27 }
0x2b02   :  { %12248 = vmatpush3.bf16.msra.mxu1 %v14691_v15  ;;  %11392 = vmatprep.mubr.msk.f32.mxu1 %vm13175_vm0, %v13176_v1 }
0x2b03   :  { %12249 = vmatprep.subr.bf16.mxu1 %v13174_v0 }
0x2b06   :  { %12251 = vmatpush3.bf16.msra.mxu1 %v14696_v2 }
0x2b07   :  { %12264 = vmatprep.subr.bf16.mxu1 %v13174_v0 }
0x2b09   :  { %11393 = vmatmul.mubr.msk.f32.vlgmr.msra.gmra.mrb[86].mxu1 %vm482_vm3, %v8589_v29 }
0x2b0a   :  { %12266 = vmatpush3.bf16.msra.mxu1 %v14702_v14  ;;  %11422 = vmatprep.mubr.msk.f32.mxu1 %vm13175_vm0, %v13176_v1 }
0x2b0b   :  { %12267 = vmatprep.subr.bf16.mxu1 %v13174_v0 }
0x2b0e   :  { %12269 = vmatpush3.bf16.msra.mxu1 %v14707_v48 }
0x2b0f   :  { %12270 = vmatprep.subr.bf16.mxu1 %v13174_v0 }
0x2b11   :  { %11423 = vmatmul.mubr.msk.f32.vlgmr.msra.gmra.mrb[88].mxu1 %vm482_vm3, %v8819_v32 }
0x2b12   :  { %12272 = vmatpush3.bf16.msra.mxu1 %v14691_v15  ;;  %11433 = vmatprep.mubr.msk.f32.mxu1 %vm13175_vm0, %v13176_v1 }
0x2b13   :  { %12273 = vmatprep.subr.bf16.mxu1 %v13174_v0 }
0x2b16   :  { %12275 = vmatpush3.bf16.msra.mxu1 %v14696_v2 }
0x2b17   :  { %12288 = vmatprep.subr.bf16.mxu1 %v13174_v0 }
0x2b19   :  { %11434 = vmatmul.mubr.msk.f32.vlgmr.msra.gmra.mrb[90].mxu1 %vm482_vm3, %v8818_v42 }
0x2b1a   :  { %12290 = vmatpush3.bf16.msra.mxu1 %v14702_v14  ;;  %11463 = vmatprep.mubr.msk.f32.mxu1 %vm13175_vm0, %v13176_v1 }
0x2b1b   :  { %12291 = vmatprep.subr.bf16.mxu1 %v13174_v0 }
0x2b1e   :  { %12293 = vmatpush3.bf16.msra.mxu1 %v14707_v48 }
0x2b1f   :  { %12294 = vmatprep.subr.bf16.mxu1 %v13174_v0 }
0x2b21   :  { %11464 = vmatmul.mubr.msk.f32.vlgmr.msra.gmra.mrb[92].mxu1 %vm482_vm3, %v9048_v49 }
0x2b22   :  { %12296 = vmatpush3.bf16.msra.mxu1 %v14691_v15  ;;  %11474 = vmatprep.mubr.msk.f32.mxu1 %vm13175_vm0, %v13176_v1 }
0x2b23   :  { %12297 = vmatprep.subr.bf16.mxu1 %v13174_v0 }
0x2b26   :  { %12299 = vmatpush3.bf16.msra.mxu1 %v14696_v2 }
0x2b2d   :  { %v7110_v28 = vpop.f32.mrb[62].mxu1 }
0x2b2e   :  { %v11134_v51 = vpop.f32.mrb[63].mxu1  ;;  %v7111_v63 = vadd.f32 %v14579_v26, %v7110_v28 }
0x2b30   :  { %v7114_v14 = vadd.f32 %v12326_v7, %v7111_v63 }
0x2b32   :  { %v9415_v48 = vmul.f32 -1.442695, %v7114_v14 }
0x2b3d   :  { %v7285_v34 = vpop.f32.mrb[64].mxu1 }
0x2b3e   :  { %v11156_v36 = vpop.f32.mrb[65].mxu1  ;;  %v12327_v43 = vadd.f32 %v14661_v55, %v7285_v34 }
0x2b45   :  { %v14812_v47 = vpop.f32.mrb[66].mxu1 }
0x2b46   :  { %v11189_v60 = vpop.f32.mrb[67].mxu1 }
0x2b8c   :  { %v7358_v54 = vpop.f32.mrb[60].mxu0 }
0x2b8d   :  { %v7359_v61 = vadd.f32 %v14654_v13, %v7358_v54  ;;  %v11167_v53 = vpop.f32.mrb[61].mxu0 }
0x2b8f   :  { %7370 = vrot.lane.b32.xlu0 %v7359_v61, %s13177_s6  ;;  %v7362_v30 = vadd.f32 %v12327_v43, %v7359_v61 }
0x2b91   :  { %v9419_v11 = vmul.f32 -1.442695, %v7362_v30 }
0x2b93   :  { %7122 = vrot.lane.b32.xlu0 %v7111_v63, %s13177_s6  ;;  %12573 = vpow2.f32 %v9419_v11  ;;  %v14869_v11 = vld [vmem:[#allocation36] ss:$0 sm:$0xff] }
0x2b94   :  { %v7744_v25 = vpop.f32.mrb[68].mxu1  ;;  %12575 = vpow2.f32 %v9415_v48 }
0x2b95   :  { %v11219_v19 = vpop.f32.mrb[69].mxu1 }
0x2b9c   :  { %v7817_v17 = vpop.f32.mrb[70].mxu1 }
0x2b9d   :  { %v14818_v5 = vadd.f32 %v7817_v17, %v7744_v25  ;;  %v11230_v37 = vpop.f32.mrb[71].mxu1  ;;  %v12574_v55 = vpop.eup %12573 }
0x2b9e   :  { %v7366_v33 = vadd.f32 1.0, %v12574_v55  ;;  %v12576_v52 = vpop.eup %12575 }
0x2b9f   :  { %v7118_v56 = vadd.f32 1.0, %v12576_v52 }
0x2ba0   :  { %12577 = vrcp.f32 %v7366_v33 }
0x2ba1   :  { %12579 = vrcp.f32 %v7118_v56 }
0x2ba4   :  { %v7973_v31 = vpop.f32.mrb[72].mxu1 }
0x2ba5   :  { %v11260_v12 = vpop.f32.mrb[73].mxu1 }
0x2baa   :  { %v12578_v20 = vpop.eup %12577 }
0x2bab   :  { %v12580_v27 = vpop.eup %12579  ;;  %v7380_v60 = vsub.f32 1.0, %v12578_v20  ;;  %v7386_v61 = vmul.f32 %v12578_v20, %v14673_v10 }
0x2bac   :  { %v8046_v45 = vpop.f32.mrb[74].mxu1  ;;  %v7132_v25 = vsub.f32 1.0, %v12580_v27  ;;  %v7138_v17 = vmul.f32 %v12580_v27, %v14668_v9 }
0x2bad   :  { %v14820_v35 = vadd.f32 %v8046_v45, %v7973_v31  ;;  %v11271_v24 = vpop.f32.mrb[75].mxu1  ;;  %v7410_v45 = vld [vmem:[#allocation39] sm:$0xff] }
0x2bae   :  { %v7411_v24 = vld [vmem:[#allocation39 + $0x8] sm:$0xff] }
0x2baf   :  { %v14845_v10 = vpack.c.bf16 %v7411_v24, %v7410_v45 }
0x2bb4   :  { %v8202_v13 = vpop.f32.mrb[76].mxu1 }
0x2bb5   :  { %v11301_v46 = vpop.f32.mrb[77].mxu1 }
0x2bbc   :  { %v8275_v41 = vpop.f32.mrb[78].mxu1 }
0x2bbd   :  { %v14822_v62 = vadd.f32 %v8275_v41, %v8202_v13  ;;  %v11312_v26 = vpop.f32.mrb[79].mxu1  ;;  %v7412_v41 = vld [vmem:[#allocation39 + $0x10] sm:$0xff] }
0x2bbe   :  { %v7413_v26 = vld [vmem:[#allocation39 + $0x18] sm:$0xff] }
0x2bc4   :  { %v8431_v3 = vpop.f32.mrb[80].mxu1 }
0x2bc5   :  { %v11342_v50 = vpop.f32.mrb[81].mxu1 }
0x2bc6   :  { %v7414_v50 = vld [vmem:[#allocation39 + $0x20] sm:$0xff] }
0x2bcc   :  { %v8504_v40 = vpop.f32.mrb[82].mxu1 }
0x2bcd   :  { %v14824_v18 = vadd.f32 %v8504_v40, %v8431_v3  ;;  %v11353_v39 = vpop.f32.mrb[83].mxu1  ;;  %v14853_v3 = vpack.c.bf16 %v7413_v26, %v7412_v41  ;;  %v7415_v40 = vld [vmem:[#allocation39 + $0x28] sm:$0xff] }
0x2bce   :  { %v14857_v39 = vpack.c.bf16 %v7415_v40, %v7414_v50 }
0x2bd4   :  { %v8660_v8 = vpop.f32.mrb[84].mxu1 }
0x2bd5   :  { %v11383_v15 = vpop.f32.mrb[85].mxu1 }
0x2bd6   :  { %v7417_v15 = vld [vmem:[#allocation39 + $0x38] sm:$0xff] }
0x2bdc   :  { %v8733_v6 = vpop.f32.mrb[86].mxu1 }
0x2bdd   :  { %v14827_v16 = vadd.f32 %v8733_v6, %v8660_v8  ;;  %v11394_v2 = vpop.f32.mrb[87].mxu1  ;;  %v7416_v8 = vld [vmem:[#allocation39 + $0x30] sm:$0xff] }
0x2be4   :  { %v8889_v4 = vpop.f32.mrb[88].mxu1 }
0x2be5   :  { %v11424_v22 = vpop.f32.mrb[89].mxu1 }
0x2bec   :  { %v8962_v57 = vpop.f32.mrb[90].mxu1 }
0x2bed   :  { %v14831_v23 = vadd.f32 %v8962_v57, %v8889_v4  ;;  %v11435_v59 = vpop.f32.mrb[91].mxu1 }
0x2bee   :  { %v14875_v59 = vld [vmem:[#allocation38] ss:$0 sm:$0xff] }
0x2bf4   :  { %v14833_v38 = vpop.f32.mrb[92].mxu1 }
0x2bf5   :  { %v11465_v21 = vpop.f32.mrb[93].mxu1 }
0x2c01   :  { %v7371_v44 = vpop.permute.xlu0 %7370 }
0x2c02   :  { %v7373_v58 = vmul.f32 %v12578_v20, %v7371_v44 }
0x2c04   :  { %7375 = vrot.lane.b32.xlu1 %v7373_v58, %s13177_s6 }
0x2c05   :  { %v7123_v29 = vpop.permute.xlu0 %7122 }
0x2c06   :  { %v7125_v32 = vmul.f32 %v12580_v27, %v7123_v29 }
0x2c08   :  { %7127 = vrot.lane.b32.xlu0 %v7125_v32, %s13177_s6 }
0x2c76   :  { %v7376_v42 = vpop.permute.xlu1 %7375 }
0x2c77   :  { %v7378_v49 = vadd.f32 %v12327_v43, %v7376_v42  ;;  %v14861_v43 = vpack.c.bf16 %v7417_v15, %v7416_v8 }
0x2c79   :  { %12581 = vtanh.f32 %v7378_v49 }
0x2c7a   :  { %v7128_v28 = vpop.permute.xlu0 %7127 }
0x2c7b   :  { %v7130_v51 = vadd.f32 %v12326_v7, %v7128_v28  ;;  %v14866_v7 = vld [vmem:[#allocation35] ss:$0 sm:$0xff] }
0x2c7c   :  { %v7821_v33 = vadd.f32 %v14866_v7, %v14818_v5  ;;  %v8050_v56 = vadd.f32 %v14866_v7, %v14820_v35  ;;  %v8279_v27 = vadd.f32 %v14866_v7, %v14822_v62  ;;  %v8508_v49 = vadd.f32 %v14866_v7, %v14824_v18 }
0x2c7d   :  { %12583 = vtanh.f32 %v7130_v51 }
0x2c7e   :  { %v8051_v44 = vmul.f32 %v14869_v11, %v8050_v56  ;;  %v8280_v32 = vmul.f32 %v14869_v11, %v8279_v27  ;;  %v8509_v51 = vmul.f32 %v14869_v11, %v8508_v49 }
0x2c80   :  { %v8052_v58 = vadd.f32 %v14875_v59, %v8051_v44  ;;  %v8281_v42 = vadd.f32 %v14875_v59, %v8280_v32 }
0x2c82   :  { %v8054_v35 = vmul.f32 0.01, %v8052_v58  ;;  %vm8053_vm7 = vcmp.gt.f32.partialorder %v8052_v58, 0.0  ;;  %v8283_v62 = vmul.f32 0.01, %v8281_v42  ;;  %vm8282_vm8 = vcmp.gt.f32.partialorder %v8281_v42, 0.0 }
0x2c83   :  { %v12582_v34 = vpop.eup %12581 }
0x2c84   :  { %7382 = vrot.lane.b32.xlu1 %v12582_v34, %s13178_s12  ;;  %v8055_v29 = vsel %vm8053_vm7, %v8052_v58, %v8054_v35  ;;  %v8284_v28 = vsel %vm8282_vm8, %v8281_v42, %v8283_v62  ;;  %v8510_v34 = vadd.f32 %v14875_v59, %v8509_v51 }
0x2c86   :  { %v8512_v18 = vmul.f32 0.01, %v8510_v34  ;;  %vm8511_vm9 = vcmp.gt.f32.partialorder %v8510_v34, 0.0 }
0x2c87   :  { %v12584_v36 = vpop.eup %12583 }
0x2c88   :  { %7134 = vrot.lane.b32.xlu0 %v12584_v36, %s13178_s12  ;;  %v8737_v36 = vadd.f32 %v14866_v7, %v14827_v16 }
0x2cf6   :  { %v7383_v54 = vpop.permute.xlu1 %7382 }
0x2cf7   :  { %v7385_v53 = vmul.f32 %v7383_v54, %v7380_v60  ;;  %v8513_v60 = vsel %vm8511_vm9, %v8510_v34, %v8512_v18  ;;  %v8738_v54 = vmul.f32 %v14869_v11, %v8737_v36 }
0x2cf9   :  { %v7387_v63 = vadd.f32 %v7386_v61, %v7385_v53  ;;  %v8739_v61 = vadd.f32 %v14875_v59, %v8738_v54  ;;  %v8966_v53 = vadd.f32 %v14866_v7, %v14831_v23 }
0x2cfa   :  { %v7135_v19 = vpop.permute.xlu0 %7134 }
0x2cfb   :  { %v7137_v37 = vmul.f32 %v7135_v19, %v7132_v25  ;;  %7395 = vrot.lane.b32.xlu1 %v7387_v63, %s13178_s12  ;;  %v8741_v16 = vmul.f32 0.01, %v8739_v61  ;;  %vm8740_vm10 = vcmp.gt.f32.partialorder %v8739_v61, 0.0  ;;  %v8967_v25 = vmul.f32 %v14869_v11, %v8966_v53 }
0x2cfd   :  { %v7139_v31 = vadd.f32 %v7138_v17, %v7137_v37  ;;  %v8742_v63 = vsel %vm8740_vm10, %v8739_v61, %v8741_v16  ;;  %v8968_v19 = vadd.f32 %v14875_v59, %v8967_v25 }
0x2cff   :  { %7389 = vrot.lane.b32.xlu1 %v7139_v31, %s13178_s12  ;;  %v8970_v23 = vmul.f32 0.01, %v8968_v19  ;;  %vm8969_vm11 = vcmp.gt.f32.partialorder %v8968_v19, 0.0 }
0x2d01   :  { %v8971_v37 = vsel %vm8969_vm11, %v8968_v19, %v8970_v23 }
0x2d6d   :  { %v7396_v12 = vpop.permute.xlu1 %7395 }
0x2d6e   :  { %7398 = vst.msk [vmem:[#allocation5] sm:$0x3] %vm770_vm2, %v7396_v12 }
0x2d71   :  { %v7390_v13 = vpop.permute.xlu1 %7389 }
0x2d72   :  { %7393 = vst.msk [vmem:[#allocation4 + $0xe] sm:$0x3] %vm770_vm2, %v7390_v13 }
0x2d75   :  { %v7420_v46 = vld [vmem:[#allocation5] sm:$0x3] }
0x2d76   :  { %11177 = vmatmul.mubr.msk.f32.vlgmr.msra.gmra.mrb[62].mxu0 %vm482_vm3, %v7420_v46 }
0x2d77   :  { %12134 = vmatpush3.bf16.msra.mxu0 %v14845_v10  ;;  %11206 = vmatprep.mubr.msk.f32.mxu0 %vm13175_vm0, %v13176_v1 }
0x2d78   :  { %12135 = vmatprep.subr.bf16.mxu0 %v13174_v0 }
0x2d79   :  { %v9047_v9 = vld [vmem:[#allocation4 + $0xe] sm:$0x3] }
0x2d7a   :  { %11475 = vmatmul.mubr.msk.f32.vlgmr.msra.gmra.mrb[94].mxu1 %vm482_vm3, %v9047_v9 }
0x2d7b   :  { %12137 = vmatpush3.bf16.msra.mxu0 %v14853_v3 }
0x2d7c   :  { %12138 = vmatprep.subr.bf16.mxu0 %v13174_v0 }
0x2d7f   :  { %12140 = vmatpush3.bf16.msra.mxu0 %v14857_v39 }
0x2d80   :  { %12141 = vmatprep.subr.bf16.mxu0 %v13174_v0 }
0x2d83   :  { %12143 = vmatpush3.bf16.msra.mxu0 %v14861_v43 }
0x2d84   :  { %12156 = vmatprep.subr.bf16.mxu0 %v13174_v0 }
0x2e49   :  { %v7490_v6 = vpop.f32.mrb[62].mxu0 }
0x2e4a   :  { %v7564_v2 = vadd.f32 %v14812_v47, %v7490_v6  ;;  %v11178_v30 = vpop.f32.mrb[63].mxu0 }
0x2e4c   :  { %v7573_v14 = vadd.f32 %v14866_v7, %v7564_v2 }
0x2e4d   :  { %v9191_v4 = vpop.f32.mrb[94].mxu1 }
0x2e4e   :  { %v7580_v22 = vmul.f32 %v14869_v11, %v7573_v14  ;;  %v14873_v48 = vadd.f32 %v9191_v4, %v14833_v38  ;;  %v11476_v57 = vpop.f32.mrb[95].mxu1  ;;  %v7822_v38 = vmul.f32 %v14869_v11, %v7821_v33 }
0x2e50   :  { %v7587_v55 = vadd.f32 %v14875_v59, %v7580_v22  ;;  %v7823_v21 = vadd.f32 %v14875_v59, %v7822_v38  ;;  %v9195_v17 = vadd.f32 %v14866_v7, %v14873_v48 }
0x2e52   :  { %vm7588_vm4 = vcmp.gt.f32.partialorder %v7587_v55, 0.0  ;;  %v7589_v47 = vmul.f32 0.01, %v7587_v55  ;;  %v7825_v5 = vmul.f32 0.01, %v7823_v21  ;;  %vm7824_vm6 = vcmp.gt.f32.partialorder %v7823_v21, 0.0 }
0x2e53   :  { %v9196_v31 = vmul.f32 %v14869_v11, %v9195_v17 }
0x2e54   :  { %v7590_v52 = vsel %vm7588_vm4, %v7587_v55, %v7589_v47  ;;  %v7826_v20 = vsel %vm7824_vm6, %v7823_v21, %v7825_v5 }
0x2e55   :  { %11207 = vmatmul.mubr.msk.f32.vlgmr.msra.gmra.mrb[64].mxu0 %vm7597_vm5, %v7590_v52  ;;  %v9197_v12 = vadd.f32 %v14875_v59, %v9196_v31 }
0x2e56   :  { %12158 = vmatpush3.bf16.msra.mxu0 %v14845_v10  ;;  %11247 = vmatprep.mubr.msk.f32.mxu0 %vm13175_vm0, %v13176_v1 }
0x2e57   :  { %12159 = vmatprep.subr.bf16.mxu0 %v13174_v0  ;;  %v9199_v45 = vmul.f32 0.01, %v9197_v12  ;;  %vm9198_vm12 = vcmp.gt.f32.partialorder %v9197_v12, 0.0 }
0x2e59   :  { %v9200_v24 = vsel %vm9198_vm12, %v9197_v12, %v9199_v45 }
0x2e5a   :  { %12161 = vmatpush3.bf16.msra.mxu0 %v14853_v3 }
0x2e5b   :  { %12162 = vmatprep.subr.bf16.mxu0 %v13174_v0 }
0x2e5e   :  { %12164 = vmatpush3.bf16.msra.mxu0 %v14857_v39 }
0x2e5f   :  { %12165 = vmatprep.subr.bf16.mxu0 %v13174_v0 }
0x2e62   :  { %12167 = vmatpush3.bf16.msra.mxu0 %v14861_v43 }
0x2e63   :  { %12180 = vmatprep.subr.bf16.mxu0 %v13174_v0 }
0x2e65   :  { %11248 = vmatmul.mubr.msk.f32.vlgmr.msra.gmra.mrb[66].mxu0 %vm7597_vm5, %v7826_v20 }
0x2e66   :  { %12182 = vmatpush3.bf16.msra.mxu0 %v14845_v10  ;;  %11288 = vmatprep.mubr.msk.f32.mxu0 %vm13175_vm0, %v13176_v1 }
0x2e67   :  { %12183 = vmatprep.subr.bf16.mxu0 %v13174_v0 }
0x2e6a   :  { %12185 = vmatpush3.bf16.msra.mxu0 %v14853_v3 }
0x2e6b   :  { %12186 = vmatprep.subr.bf16.mxu0 %v13174_v0 }
0x2e6e   :  { %12188 = vmatpush3.bf16.msra.mxu0 %v14857_v39 }
0x2e6f   :  { %12189 = vmatprep.subr.bf16.mxu0 %v13174_v0 }
0x2e72   :  { %12191 = vmatpush3.bf16.msra.mxu0 %v14861_v43 }
0x2e73   :  { %12204 = vmatprep.subr.bf16.mxu0 %v13174_v0 }
0x2e75   :  { %11289 = vmatmul.mubr.msk.f32.vlgmr.msra.gmra.mrb[68].mxu0 %vm7597_vm5, %v8055_v29 }
0x2e76   :  { %12206 = vmatpush3.bf16.msra.mxu0 %v14845_v10  ;;  %11329 = vmatprep.mubr.msk.f32.mxu0 %vm13175_vm0, %v13176_v1 }
0x2e77   :  { %12207 = vmatprep.subr.bf16.mxu0 %v13174_v0 }
0x2e7a   :  { %12209 = vmatpush3.bf16.msra.mxu0 %v14853_v3 }
0x2e7b   :  { %12210 = vmatprep.subr.bf16.mxu0 %v13174_v0 }
0x2e7e   :  { %12212 = vmatpush3.bf16.msra.mxu0 %v14857_v39 }
0x2e7f   :  { %12213 = vmatprep.subr.bf16.mxu0 %v13174_v0 }
0x2e82   :  { %12215 = vmatpush3.bf16.msra.mxu0 %v14861_v43 }
0x2e83   :  { %12228 = vmatprep.subr.bf16.mxu0 %v13174_v0 }
0x2e85   :  { %11330 = vmatmul.mubr.msk.f32.vlgmr.msra.gmra.mrb[70].mxu0 %vm7597_vm5, %v8284_v28 }
0x2e86   :  { %12230 = vmatpush3.bf16.msra.mxu0 %v14845_v10  ;;  %11370 = vmatprep.mubr.msk.f32.mxu0 %vm13175_vm0, %v13176_v1 }
0x2e87   :  { %12231 = vmatprep.subr.bf16.mxu0 %v13174_v0 }
0x2e8a   :  { %12233 = vmatpush3.bf16.msra.mxu0 %v14853_v3 }
0x2e8b   :  { %12234 = vmatprep.subr.bf16.mxu0 %v13174_v0 }
0x2e8e   :  { %12236 = vmatpush3.bf16.msra.mxu0 %v14857_v39 }
0x2e8f   :  { %12237 = vmatprep.subr.bf16.mxu0 %v13174_v0 }
0x2e92   :  { %12239 = vmatpush3.bf16.msra.mxu0 %v14861_v43 }
0x2e93   :  { %12252 = vmatprep.subr.bf16.mxu0 %v13174_v0 }
0x2e95   :  { %11371 = vmatmul.mubr.msk.f32.vlgmr.msra.gmra.mrb[72].mxu0 %vm7597_vm5, %v8513_v60 }
0x2e96   :  { %12254 = vmatpush3.bf16.msra.mxu0 %v14845_v10  ;;  %11411 = vmatprep.mubr.msk.f32.mxu0 %vm13175_vm0, %v13176_v1 }
0x2e97   :  { %12255 = vmatprep.subr.bf16.mxu0 %v13174_v0 }
0x2e9a   :  { %12257 = vmatpush3.bf16.msra.mxu0 %v14853_v3 }
0x2e9b   :  { %12258 = vmatprep.subr.bf16.mxu0 %v13174_v0 }
0x2e9e   :  { %12260 = vmatpush3.bf16.msra.mxu0 %v14857_v39 }
0x2e9f   :  { %12261 = vmatprep.subr.bf16.mxu0 %v13174_v0 }
0x2ea2   :  { %12263 = vmatpush3.bf16.msra.mxu0 %v14861_v43 }
0x2ea3   :  { %12276 = vmatprep.subr.bf16.mxu0 %v13174_v0 }
0x2ea5   :  { %11412 = vmatmul.mubr.msk.f32.vlgmr.msra.gmra.mrb[74].mxu0 %vm7597_vm5, %v8742_v63 }
0x2ea6   :  { %12278 = vmatpush3.bf16.msra.mxu0 %v14845_v10  ;;  %11452 = vmatprep.mubr.msk.f32.mxu0 %vm13175_vm0, %v13176_v1 }
0x2ea7   :  { %12279 = vmatprep.subr.bf16.mxu0 %v13174_v0 }
0x2eaa   :  { %12281 = vmatpush3.bf16.msra.mxu0 %v14853_v3 }
0x2eab   :  { %12282 = vmatprep.subr.bf16.mxu0 %v13174_v0 }
0x2eae   :  { %12284 = vmatpush3.bf16.msra.mxu0 %v14857_v39 }
0x2eaf   :  { %12285 = vmatprep.subr.bf16.mxu0 %v13174_v0 }
0x2eb2   :  { %12287 = vmatpush3.bf16.msra.mxu0 %v14861_v43 }
0x2eb3   :  { %12300 = vmatprep.subr.bf16.mxu0 %v13174_v0 }
0x2eb5   :  { %11453 = vmatmul.mubr.msk.f32.vlgmr.msra.gmra.mrb[76].mxu0 %vm7597_vm5, %v8971_v37 }
0x2eb6   :  { %12302 = vmatpush3.bf16.msra.mxu0 %v14845_v10  ;;  %11493 = vmatprep.mubr.msk.f32.mxu0 %vm13175_vm0, %v13176_v1  ;;  %v9425_v1 = vld [vmem:[#allocation41] ss:$0 sm:$0xff] }
0x2eb7   :  { %12303 = vmatprep.subr.bf16.mxu0 %v13174_v0 }
0x2eba   :  { %12305 = vmatpush3.bf16.msra.mxu0 %v14853_v3 }
0x2ebb   :  { %12306 = vmatprep.subr.bf16.mxu0 %v13174_v0 }
0x2ebe   :  { %12308 = vmatpush3.bf16.msra.mxu0 %v14857_v39 }
0x2ebf   :  { %12309 = vmatprep.subr.bf16.mxu0 %v13174_v0 }
0x2ec2   :  { %12311 = vmatpush3.bf16.msra.mxu0 %v14861_v43 }
0x2ec5   :  { %11494 = vmatmul.mubr.msk.f32.vlgmr.msra.gmra.mrb[78].mxu0 %vm7597_vm5, %v9200_v24 }
0x2f28   :  { %v7667_v13 = vpop.f32.mrb[64].mxu0 }
0x2f29   :  { %v7668_v10 = vadd.f32 %v9425_v1, %v7667_v13  ;;  %v11208_v46 = vpop.f32.mrb[65].mxu0 }
0x2f2b   :  { %7672 = vst.msk [vmem:[#allocation42] sm:$0x3] %vm7671_vm13, %v7668_v10 }
0x2f38   :  { %v7896_v9 = vpop.f32.mrb[66].mxu0 }
0x2f39   :  { %v7897_v41 = vadd.f32 %v9425_v1, %v7896_v9  ;;  %v11249_v26 = vpop.f32.mrb[67].mxu0 }
0x2f3b   :  { %7901 = vst.msk [vmem:[#allocation42 + $0x2] sm:$0x3] %vm7671_vm13, %v7897_v41 }
0x2f48   :  { %v8125_v0 = vpop.f32.mrb[68].mxu0 }
0x2f49   :  { %v8126_v3 = vadd.f32 %v9425_v1, %v8125_v0  ;;  %v11290_v50 = vpop.f32.mrb[69].mxu0 }
0x2f4b   :  { %8130 = vst.msk [vmem:[#allocation42 + $0x4] sm:$0x3] %vm7671_vm13, %v8126_v3 }
0x2f58   :  { %v8354_v40 = vpop.f32.mrb[70].mxu0 }
0x2f59   :  { %v8355_v39 = vadd.f32 %v9425_v1, %v8354_v40  ;;  %v11331_v8 = vpop.f32.mrb[71].mxu0 }
0x2f5b   :  { %8359 = vst.msk [vmem:[#allocation42 + $0x6] sm:$0x3] %vm7671_vm13, %v8355_v39 }
0x2f68   :  { %v8583_v15 = vpop.f32.mrb[72].mxu0 }
0x2f69   :  { %v8584_v43 = vadd.f32 %v9425_v1, %v8583_v15  ;;  %v11372_v6 = vpop.f32.mrb[73].mxu0 }
0x2f6b   :  { %8588 = vst.msk [vmem:[#allocation42 + $0x8] sm:$0x3] %vm7671_vm13, %v8584_v43 }
0x2f78   :  { %v8812_v2 = vpop.f32.mrb[74].mxu0 }
0x2f79   :  { %v8813_v30 = vadd.f32 %v9425_v1, %v8812_v2  ;;  %v11413_v7 = vpop.f32.mrb[75].mxu0 }
0x2f7b   :  { %8817 = vst.msk [vmem:[#allocation42 + $0xa] sm:$0x3] %vm7671_vm13, %v8813_v30 }
0x2f88   :  { %v9041_v14 = vpop.f32.mrb[76].mxu0 }
0x2f89   :  { %v9042_v11 = vadd.f32 %v9425_v1, %v9041_v14  ;;  %v11454_v4 = vpop.f32.mrb[77].mxu0 }
0x2f8b   :  { %9046 = vst.msk [vmem:[#allocation42 + $0xc] sm:$0x3] %vm7671_vm13, %v9042_v11 }
0x2f98   :  { %v9270_v22 = vpop.f32.mrb[78].mxu0 }
0x2f99   :  { %v9271_v48 = vadd.f32 %v9425_v1, %v9270_v22  ;;  %v11495_v57 = vpop.f32.mrb[79].mxu0 }
0x2f9b   :  { %9275 = vst.msk [vmem:[#allocation42 + $0xe] sm:$0x3] %vm7671_vm13, %v9271_v48 }
0x2f9c   :  { %13110 = shalt.err (!%p13107_p6)
}
0x2f9d   :  { %s15062_s15 = sld [smem:[#allocation66_spill]] }
0x2fa3   :  { %s13111_s5 = scalar_lea.hbm %s15062_s15, 256 }
0x2fa4   :  { %p13112_p7 = scmp.ne.s32.totalorder %s15062_s15, %s13111_s5  ;;  %p13115_p8 = scmp.lt.u32.totalorder %s13111_s5, %s15062_s15 }
0x2fa6   :  { %p13117_p9 = pnand %p13115_p8, %p13112_p7 }
0x2fa8   :  { %13120 = shalt.err (!%p13117_p9)
}
0x2fa9   :  { %9287 = dma.vmem_to_hbm [thread:$0]  %s9282_s29, 256, %s15062_s15, [#allocation8], %s13161_s21, %s13161_s21, %s13162_s28  }
0x2faa   :  { %13145 = dma.done.wait [#allocation8], 256  }
0x2fab   :  { %13146 = vsyncadd [#allocation8], 4294967040 }
0x2fac   :  { %9291 = vsyncpa [#allocation7], 1 }
0x2fad   :  { %9292 = vsyncpa [#allocation10], 1 }
0x2fae   :  { %9293 = vsyncpa [#allocation13], 1 }
0x2faf   :  { %9294 = vsyncpa [#allocation16], 1 }
0x2fb0   :  { %9295 = vsyncpa [#allocation19], 1 }
0x2fb1   :  { %9296 = vsyncpa [#allocation22], 1 }
0x2fb2   :  { %9297 = vsyncpa [#allocation25], 1 }
0x2fb3   :  { %9298 = vsyncpa [#allocation28], 1 }
0x2fb4   :  { %9299 = vsyncpa [#allocation31], 1 }
0x2fb5   :  { %9300 = vsyncpa [#allocation34], 1 }
0x2fb6   :  { %9301 = vsyncpa [#allocation37], 1 }
0x2fb7   :  { %9302 = vsyncpa [#allocation40], 1 }
0x2fb8   :  { %9303 = vsyncpa [#allocation8], 1 }

</bundles_post_ra>
